<compile_context>
chip_gen: v5e
topology: v5e:2x2
jax: 0.10.0
libtpu: 0.0.40
codegen_flags: <defaults>
</compile_context>

<pallas_src>
import math

import jax
import jax.numpy as jnp
from jax.experimental import pallas as pl
from jax.experimental.pallas import tpu as pltpu


def lambda_init_fn(depth):
    return 0.8 - 0.6 * math.exp(-0.3 * depth)


# ---------------------------------------------------------------------------
# Kernel 1: batched differential attention + top-1 cosine-sim selection
# ---------------------------------------------------------------------------
def make_semantic_attn_kernel(num_heads, head_dim, n_rep, bt,
                              rms_eps=1e-5, l2_eps=1e-12):
    H = num_heads
    hd = head_dim
    two_hd = 2 * head_dim

    def kernel(lam_ref, kq_ref, pos_ref, x_ref, keep_ref,
               wq_ref, wk_ref, wv_ref, wo_ref, gamma_ref, out_ref):
        bf16 = jnp.bfloat16
        lam = lam_ref[...]                 # (1, 1, 1) lambda_full (in-graph value)
        kq = kq_ref[...]                   # (bt, nq, E)  queries (f32, reused by cos-sim)
        pos = pos_ref[...]                 # (bt, N, E)   keys    (f32, reused by cos-sim)
        xv = x_ref[...]                    # (bt, N, E)   values / image tokens (f32)
        keep = keep_ref[...]               # (bt, nq, 1)  1.0 if landmark present else 0.0
        gamma = gamma_ref[...]             # (1, 1, 2hd)  RMSNorm gamma * (1 - lambda_init)
        n_tok = pos.shape[1]

        # ---- q/k/v projections: bf16 MXU, f32 accumulate (scaling folded into Wq) ----
        q = jnp.einsum('bqe,bef->bqf', kq.astype(bf16), wq_ref[...],
                       preferred_element_type=jnp.float32).astype(bf16)
        k = jnp.einsum('bne,bef->bnf', pos.astype(bf16), wk_ref[...],
                       preferred_element_type=jnp.float32).astype(bf16)
        v = jnp.einsum('bne,bef->bnf', xv.astype(bf16), wv_ref[...],
                       preferred_element_type=jnp.float32).astype(bf16)

        # ---- stack per-head slices along the leading (batch) axis -> (H*bt, ., hd) ----
        q1 = jnp.concatenate(
            [q[:, :, (2 * h) * hd:(2 * h + 1) * hd] for h in range(H)], axis=0)
        q2 = jnp.concatenate(
            [q[:, :, (2 * h + 1) * hd:(2 * h + 2) * hd] for h in range(H)], axis=0)
        k1 = jnp.concatenate(
            [k[:, :, ((2 * h) // n_rep) * hd:((2 * h) // n_rep + 1) * hd]
             for h in range(H)], axis=0)
        k2 = jnp.concatenate(
            [k[:, :, ((2 * h + 1) // n_rep) * hd:((2 * h + 1) // n_rep + 1) * hd]
             for h in range(H)], axis=0)
        vh = jnp.concatenate(
            [v[:, :, (h // n_rep) * two_hd:(h // n_rep + 1) * two_hd]
             for h in range(H)], axis=0)

        # ---- differential attention: softmax pair, lambda subtraction ----
        s1 = jnp.einsum('bqd,bkd->bqk', q1, k1, preferred_element_type=jnp.float32)
        s2 = jnp.einsum('bqd,bkd->bqk', q2, k2, preferred_element_type=jnp.float32)
        a1 = jax.nn.softmax(s1, axis=-1)
        a2 = jax.nn.softmax(s2, axis=-1)
        aw = a1 - lam * a2                                           # (H*bt, nq, N) f32
        oh = jnp.einsum('bqk,bkd->bqd', aw.astype(bf16), vh,
                        preferred_element_type=jnp.float32)          # (H*bt, nq, 2hd)

        # sublayer RMSNorm; gamma already carries the (1 - lambda_init) factor
        inv = jax.lax.rsqrt(jnp.mean(oh * oh, axis=-1, keepdims=True) + rms_eps)
        oh = oh * inv * gamma

        # un-stack heads back onto the lane axis and apply the output projection
        attn = jnp.concatenate([oh[h * bt:(h + 1) * bt] for h in range(H)], axis=-1)
        x_pooled = jnp.einsum('bqd,bde->bqe', attn.astype(bf16), wo_ref[...],
                              preferred_element_type=jnp.float32)    # (bt, nq, E)
        x_pooled = x_pooled * keep                                   # zero missing ldmks

        # ---- cosine-similarity top-1 token selection (kept fully in f32) ----
        kq_n = kq / jnp.maximum(jnp.sqrt(jnp.sum(kq * kq, axis=-1, keepdims=True)), l2_eps)
        pos_n = pos / jnp.maximum(jnp.sqrt(jnp.sum(pos * pos, axis=-1, keepdims=True)), l2_eps)
        sim = jnp.einsum('bqe,bke->bqk', kq_n, pos_n, preferred_element_type=jnp.float32)
        mx = jnp.max(sim, axis=-1, keepdims=True)
        iota = jax.lax.broadcasted_iota(jnp.int32, sim.shape, 2)
        first = jnp.min(jnp.where(sim == mx, iota, n_tok), axis=-1, keepdims=True)
        onehot = (iota == first).astype(jnp.float32)
        x_sel = jnp.einsum('bqk,bke->bqe', onehot, xv,
                           preferred_element_type=jnp.float32)       # exact gather as matmul
        x_sel = x_sel * keep

        # packed, lane-dense output: part p -> [pooled_p | selected_p], last dim = 2E
        out_ref[...] = jnp.concatenate([x_pooled, x_sel], axis=-1).astype(out_ref.dtype)

    return kernel


# ---------------------------------------------------------------------------
# Kernel 2: flatten_feature = Linear -> BN(eval, folded) -> Linear -> BN
# ---------------------------------------------------------------------------
def mlp_bn_kernel(f_ref, w1_ref, s1_ref, b1_ref, w2_ref, s2_ref, b2_ref, o_ref):
    h = jnp.dot(f_ref[...].astype(jnp.bfloat16), w1_ref[...],
                preferred_element_type=jnp.float32)
    h = h * s1_ref[...] + b1_ref[...]
    h = jnp.dot(h.astype(jnp.bfloat16), w2_ref[...],
                preferred_element_type=jnp.float32)
    o_ref[...] = (h * s2_ref[...] + b2_ref[...]).astype(o_ref.dtype)


# ---------------------------------------------------------------------------
# Config, params, wrapper
# ---------------------------------------------------------------------------
class HeadConfig:
    num_keypoints = 5
    n_multiply_per_query = 2
    emb_dim = 64
    depth = 2
    num_heads = 4
    model_parallel_size = 1
    decoder_kv_attention_heads = 2
    output_dim = 128


def init_params(key, cfg):
    E = cfg.emb_dim
    nq = cfg.num_keypoints * cfg.n_multiply_per_query
    nparts = 2 * nq
    H = cfg.num_heads // cfg.model_parallel_size
    Hkv = cfg.decoder_kv_attention_heads // cfg.model_parallel_size
    n_rep = H // Hkv
    hd = E // cfg.num_heads // 2
    Dout = cfg.output_dim

    ks = jax.random.split(key, 16)
    p = {}
    p["query_pos_emb"] = 0.02 * jax.random.normal(ks[0], (1, nq, E), jnp.float32)
    # linear weights stored pre-transposed: (in, out)
    p["wq"] = 0.05 * jax.random.normal(ks[1], (E, E), jnp.float32)
    p["wk"] = 0.05 * jax.random.normal(ks[2], (E, E // n_rep), jnp.float32)
    p["wv"] = 0.05 * jax.random.normal(ks[3], (E, E // n_rep), jnp.float32)
    p["wo"] = 0.05 * jax.random.normal(ks[4], (E, E), jnp.float32)
    p["lambda_q1"] = 0.1 * jax.random.normal(ks[5], (hd,), jnp.float32)
    p["lambda_k1"] = 0.1 * jax.random.normal(ks[6], (hd,), jnp.float32)
    p["lambda_q2"] = 0.1 * jax.random.normal(ks[7], (hd,), jnp.float32)
    p["lambda_k2"] = 0.1 * jax.random.normal(ks[8], (hd,), jnp.float32)
    p["subln_gamma"] = jnp.ones((1, 2 * hd), jnp.float32)
    p["learned_mask"] = jnp.zeros((1, nparts), jnp.float32)        # fill_(0) in torch
    p["w1"] = 0.02 * jax.random.normal(ks[9], (nparts * E, Dout), jnp.float32)
    p["w2"] = 0.02 * jax.random.normal(ks[10], (Dout, Dout), jnp.float32)
    p["bn1_gamma"] = 1.0 + 0.05 * jax.random.normal(ks[11], (Dout,), jnp.float32)
    p["bn1_beta"] = 0.05 * jax.random.normal(ks[12], (Dout,), jnp.float32)
    p["bn1_mean"] = jnp.zeros((Dout,), jnp.float32)
    p["bn1_var"] = jnp.ones((Dout,), jnp.float32)
    p["bn2_gamma"] = 1.0 + 0.05 * jax.random.normal(ks[13], (Dout,), jnp.float32)
    p["bn2_beta"] = 0.05 * jax.random.normal(ks[14], (Dout,), jnp.float32)
    p["bn2_mean"] = jnp.zeros((Dout,), jnp.float32)
    p["bn2_var"] = jnp.ones((Dout,), jnp.float32)
    return p


def semantic_attention_head_forward(params, cfg, x, pos_embs, keypoint_embs, ldmks,
                                    x_mask_ids_keep=None):
    del x_mask_ids_keep  # unused by the reference forward as well
    B = x.shape[0]
    E = cfg.emb_dim
    K = cfg.num_keypoints
    n_mult = cfg.n_multiply_per_query
    nq = K * n_mult
    H = cfg.num_heads // cfg.model_parallel_size
    Hkv = cfg.decoder_kv_attention_heads // cfg.model_parallel_size
    n_rep = H // Hkv
    hd = E // cfg.num_heads // 2
    Ekv = E // n_rep
    Dout = cfg.output_dim
    bf16 = jnp.bfloat16

    # drop CLS token if present
    if x.shape[1] - 1 == pos_embs.shape[1]:
        x = x[:, 1:]
    N = pos_embs.shape[1]

    # queries: keypoint_embs (B,E,K) -> (B, K*n_mult, E) + query_pos_emb
    kq = jnp.transpose(keypoint_embs, (0, 2, 1))[:, :, None, :]
    kq = jnp.tile(kq, (1, 1, n_mult, 1)).reshape(B, nq, E)
    kq = kq + params["query_pos_emb"]

    # missing-landmark keep mask, repeated per query multiple
    missing = jnp.all(ldmks == -1, axis=2)
    missing = jnp.repeat(missing[:, :, None], n_mult, axis=2).reshape(B, nq)
    keep = (1.0 - missing.astype(jnp.float32))[:, :, None]            # (B, nq, 1)

    # diff-attention lambda, computed in-graph (no host sync, not baked in)
    lambda_init = lambda_init_fn(cfg.depth)
    lam1 = jnp.exp(jnp.sum(params["lambda_q1"] * params["lambda_k1"]))
    lam2 = jnp.exp(jnp.sum(params["lambda_q2"] * params["lambda_k2"]))
    lambda_full = (lam1 - lam2 + lambda_init).astype(jnp.float32).reshape(1, 1, 1)

    # batch tile: amortize per-grid-step overhead; keep >= 2 grid steps (v7x megacore)
    bt = min(8, max(1, B // 2))
    g = -(-B // bt)
    B_pad = g * bt
    if B_pad != B:
        pad = ((0, B_pad - B), (0, 0), (0, 0))
        kq = jnp.pad(kq, pad)
        pos_embs = jnp.pad(pos_embs, pad)
        x = jnp.pad(x, pad)
        keep = jnp.pad(keep, pad)

    # weight-side constant folding: scaling into Wq, (1 - lambda_init) into gamma.
    # Weights are pre-broadcast to (bt, ., .) so every in-kernel matmul is a plain
    # batched 3-D einsum (bf16 operands, f32 accumulation); constant index_maps
    # keep them resident in VMEM across grid steps.
    scaling = float(hd) ** -0.5
    wq_b = jnp.broadcast_to((params["wq"] * scaling).astype(bf16)[None], (bt, E, E))
    wk_b = jnp.broadcast_to(params["wk"].astype(bf16)[None], (bt, E, Ekv))
    wv_b = jnp.broadcast_to(params["wv"].astype(bf16)[None], (bt, E, Ekv))
    wo_b = jnp.broadcast_to(params["wo"].astype(bf16)[None], (bt, E, E))
    gamma = (params["subln_gamma"] * (1.0 - lambda_init)).reshape(1, 1, 2 * hd)
    gamma = gamma.astype(jnp.float32)

    kernel = make_semantic_attn_kernel(H, hd, n_rep, bt)
    feats = pl.pallas_call(
        kernel,
        out_shape=jax.ShapeDtypeStruct((B_pad, nq, 2 * E), jnp.float32),
        grid=(g,),
        in_specs=[
            pl.BlockSpec((1, 1, 1), lambda b: (0, 0, 0)),          # lambda_full
            pl.BlockSpec((bt, nq, E), lambda b: (b, 0, 0)),        # queries
            pl.BlockSpec((bt, N, E), lambda b: (b, 0, 0)),         # pos_embs (keys)
            pl.BlockSpec((bt, N, E), lambda b: (b, 0, 0)),         # x (values)
            pl.BlockSpec((bt, nq, 1), lambda b: (b, 0, 0)),        # keep mask
            pl.BlockSpec((bt, E, E), lambda b: (0, 0, 0)),         # Wq^T * scaling
            pl.BlockSpec((bt, E, Ekv), lambda b: (0, 0, 0)),       # Wk^T
            pl.BlockSpec((bt, E, Ekv), lambda b: (0, 0, 0)),       # Wv^T
            pl.BlockSpec((bt, E, E), lambda b: (0, 0, 0)),         # Wo^T
            pl.BlockSpec((1, 1, 2 * hd), lambda b: (0, 0, 0)),     # RMSNorm gamma
        ],
        out_specs=pl.BlockSpec((bt, nq, 2 * E), lambda b: (b, 0, 0)),
        compiler_params=pltpu.CompilerParams(dimension_semantics=("parallel",)),
    )(lambda_full, kq, pos_embs, x, keep, wq_b, wk_b, wv_b, wo_b, gamma)

    # flatten_feature: Linear -> BN(eval, folded) -> Linear -> BN(eval, folded).
    # sigmoid(learned_mask) is folded into W1's rows (eval dataset-mask path) and
    # W1 rows are permuted to the packed [pooled_p | selected_p] feature layout so
    # kernel 1's output is consumed as a lane-dense (B, nq*2E) slab.
    sig = jax.nn.sigmoid(params["learned_mask"])[0]                 # (2*nq,)
    w1 = params["w1"].reshape(2, nq, E, Dout) * sig.reshape(2, nq)[:, :, None, None]
    w1_packed = jnp.transpose(w1, (1, 0, 2, 3)).reshape(2 * nq * E, Dout).astype(bf16)
    w2 = params["w2"].astype(bf16)

    eps = 2e-5
    inv1 = 1.0 / jnp.sqrt(params["bn1_var"] + eps)
    s1 = (params["bn1_gamma"] * inv1)[None, :]
    b1 = (params["bn1_beta"] - params["bn1_mean"] * params["bn1_gamma"] * inv1)[None, :]
    inv2 = 1.0 / jnp.sqrt(params["bn2_var"] + eps)
    s2 = (params["bn2_gamma"] * inv2)[None, :]
    b2 = (params["bn2_beta"] - params["bn2_mean"] * params["bn2_gamma"] * inv2)[None, :]

    flat = feats.reshape(B_pad, 2 * nq * E)                         # lane-dense (mult. of 128)
    bt2 = 8
    g2 = -(-B_pad // bt2)
    B_pad2 = g2 * bt2
    if B_pad2 != B_pad:
        flat = jnp.pad(flat, ((0, B_pad2 - B_pad), (0, 0)))

    out = pl.pallas_call(
        mlp_bn_kernel,
        out_shape=jax.ShapeDtypeStruct((B_pad2, Dout), jnp.float32),
        grid=(g2,),
        in_specs=[
            pl.BlockSpec((bt2, 2 * nq * E), lambda i: (i, 0)),
            pl.BlockSpec((2 * nq * E, Dout), lambda i: (0, 0)),
            pl.BlockSpec((1, Dout), lambda i: (0, 0)),
            pl.BlockSpec((1, Dout), lambda i: (0, 0)),
            pl.BlockSpec((Dout, Dout), lambda i: (0, 0)),
            pl.BlockSpec((1, Dout), lambda i: (0, 0)),
            pl.BlockSpec((1, Dout), lambda i: (0, 0)),
        ],
        out_specs=pl.BlockSpec((bt2, Dout), lambda i: (i, 0)),
        compiler_params=pltpu.CompilerParams(dimension_semantics=("parallel",)),
    )(flat, w1_packed, s1, b1, w2, s2, b2)
    return out[:B]


if __name__ == "__main__":
    cfg = HeadConfig()
    key = jax.random.PRNGKey(0)
    kparam, kx, kpos, kkp, kldm = jax.random.split(key, 5)

    B, N = 8, 64
    params = init_params(kparam, cfg)

    x = jax.random.normal(kx, (B, N + 1, cfg.emb_dim), jnp.float32)          # has CLS token
    pos_embs = jax.random.normal(kpos, (B, N, cfg.emb_dim), jnp.float32)
    keypoint_embs = jax.random.normal(kkp, (B, cfg.emb_dim, cfg.num_keypoints), jnp.float32)
    ldmks = jnp.abs(jax.random.normal(kldm, (B, cfg.num_keypoints, 2), jnp.float32))
    ldmks = ldmks.at[0, 2].set(-1.0)   # missing keypoint in batch 0
    ldmks = ldmks.at[1, 4].set(-1.0)   # missing keypoint in batch 1

    fwd = jax.jit(lambda p, a, b, c, d: semantic_attention_head_forward(p, cfg, a, b, c, d))
    out = fwd(params, x, pos_embs, keypoint_embs, ldmks)
    out = jax.block_until_ready(out)
    assert out.shape == (B, cfg.output_dim) and out.dtype == jnp.float32
    assert bool(jnp.all(jnp.isfinite(out)))
    print("KERNEL_OK")
</pallas_src>

<mosaic_0001>
module attributes {stable_mosaic.version = 11 : i64} {
  func.func @kernel(%arg0: i32, %arg1: memref<1x1x1xf32, #tpu.memory_space<vmem>>, %arg2: memref<4x10x64xf32, #tpu.memory_space<vmem>>, %arg3: memref<4x64x64xf32, #tpu.memory_space<vmem>>, %arg4: memref<4x64x64xf32, #tpu.memory_space<vmem>>, %arg5: memref<4x10x1xf32, #tpu.memory_space<vmem>>, %arg6: memref<4x64x64xbf16, #tpu.memory_space<vmem>>, %arg7: memref<4x64x32xbf16, #tpu.memory_space<vmem>>, %arg8: memref<4x64x32xbf16, #tpu.memory_space<vmem>>, %arg9: memref<4x64x64xbf16, #tpu.memory_space<vmem>>, %arg10: memref<1x1x16xf32, #tpu.memory_space<vmem>>, %arg11: memref<4x10x128xf32, #tpu.memory_space<vmem>>) attributes {dimension_semantics = [#tpu.dimension_semantics<parallel>], iteration_bounds = array<i64: 2>, scalar_prefetch = 0 : i64, scratch_operands = 0 : i64, tpu.core_type = #tpu.core_type<tc>, window_params = [{pipeline_mode = #tpu.pipeline_mode<synchronous>, transform_indices = @transform_0, window_bounds = array<i64: 1, 1, 1>}, {transform_indices = @transform_1, window_bounds = array<i64: 4, 10, 64>}, {transform_indices = @transform_2, window_bounds = array<i64: 4, 64, 64>}, {transform_indices = @transform_3, window_bounds = array<i64: 4, 64, 64>}, {transform_indices = @transform_4, window_bounds = array<i64: 4, 10, 1>}, {pipeline_mode = #tpu.pipeline_mode<synchronous>, transform_indices = @transform_5, window_bounds = array<i64: 4, 64, 64>}, {pipeline_mode = #tpu.pipeline_mode<synchronous>, transform_indices = @transform_6, window_bounds = array<i64: 4, 64, 32>}, {pipeline_mode = #tpu.pipeline_mode<synchronous>, transform_indices = @transform_7, window_bounds = array<i64: 4, 64, 32>}, {pipeline_mode = #tpu.pipeline_mode<synchronous>, transform_indices = @transform_8, window_bounds = array<i64: 4, 64, 64>}, {pipeline_mode = #tpu.pipeline_mode<synchronous>, transform_indices = @transform_9, window_bounds = array<i64: 1, 1, 16>}, {transform_indices = @transform_10, window_bounds = array<i64: 4, 10, 128>}]} {
    %c0 = arith.constant 0 : index
    %c0_0 = arith.constant 0 : index
    %c0_1 = arith.constant 0 : index
    %0 = vector.load %arg1[%c0, %c0_0, %c0_1] : memref<1x1x1xf32, #tpu.memory_space<vmem>>, vector<1x1x1xf32>
    %c0_2 = arith.constant 0 : index
    %c0_3 = arith.constant 0 : index
    %c0_4 = arith.constant 0 : index
    %1 = vector.load %arg2[%c0_2, %c0_3, %c0_4] : memref<4x10x64xf32, #tpu.memory_space<vmem>>, vector<4x10x64xf32>
    %c0_5 = arith.constant 0 : index
    %c0_6 = arith.constant 0 : index
    %c0_7 = arith.constant 0 : index
    %2 = vector.load %arg3[%c0_5, %c0_6, %c0_7] : memref<4x64x64xf32, #tpu.memory_space<vmem>>, vector<4x64x64xf32>
    %c0_8 = arith.constant 0 : index
    %c0_9 = arith.constant 0 : index
    %c0_10 = arith.constant 0 : index
    %3 = vector.load %arg4[%c0_8, %c0_9, %c0_10] : memref<4x64x64xf32, #tpu.memory_space<vmem>>, vector<4x64x64xf32>
    %c0_11 = arith.constant 0 : index
    %c0_12 = arith.constant 0 : index
    %c0_13 = arith.constant 0 : index
    %4 = vector.load %arg5[%c0_11, %c0_12, %c0_13] : memref<4x10x1xf32, #tpu.memory_space<vmem>>, vector<4x10x1xf32>
    %c0_14 = arith.constant 0 : index
    %c0_15 = arith.constant 0 : index
    %c0_16 = arith.constant 0 : index
    %5 = vector.load %arg10[%c0_14, %c0_15, %c0_16] : memref<1x1x16xf32, #tpu.memory_space<vmem>>, vector<1x1x16xf32>
    %6 = arith.truncf %1 : vector<4x10x64xf32> to vector<4x10x64xbf16>
    %c0_17 = arith.constant 0 : index
    %c0_18 = arith.constant 0 : index
    %c0_19 = arith.constant 0 : index
    %7 = vector.load %arg6[%c0_17, %c0_18, %c0_19] : memref<4x64x64xbf16, #tpu.memory_space<vmem>>, vector<4x64x64xbf16>
    "tpu.trace_start"() <{level = 10 : i32, message = "bqe,bef->bqf"}> : () -> ()
    %cst = arith.constant dense<0.000000e+00> : vector<4x10x64xf32>
    %8 = tpu.matmul %6, %7, %cst {dimension_numbers = #tpu.dot_dimension_numbers<[2], [1], [1], [2], [0, 0, 0, 1, 1, 2], [0], [0]>} : vector<4x10x64xbf16>, vector<4x64x64xbf16>, vector<4x10x64xf32> -> vector<4x10x64xf32>
    "tpu.trace_stop"() : () -> ()
    %9 = arith.truncf %8 : vector<4x10x64xf32> to vector<4x10x64xbf16>
    %10 = arith.truncf %2 : vector<4x64x64xf32> to vector<4x64x64xbf16>
    %c0_20 = arith.constant 0 : index
    %c0_21 = arith.constant 0 : index
    %c0_22 = arith.constant 0 : index
    %11 = vector.load %arg7[%c0_20, %c0_21, %c0_22] : memref<4x64x32xbf16, #tpu.memory_space<vmem>>, vector<4x64x32xbf16>
    "tpu.trace_start"() <{level = 10 : i32, message = "bne,bef->bnf"}> : () -> ()
    %cst_23 = arith.constant dense<0.000000e+00> : vector<4x64x32xf32>
    %12 = tpu.matmul %10, %11, %cst_23 {dimension_numbers = #tpu.dot_dimension_numbers<[2], [1], [1], [2], [0, 0, 0, 1, 1, 2], [0], [0]>} : vector<4x64x64xbf16>, vector<4x64x32xbf16>, vector<4x64x32xf32> -> vector<4x64x32xf32>
    "tpu.trace_stop"() : () -> ()
    %13 = arith.truncf %12 : vector<4x64x32xf32> to vector<4x64x32xbf16>
    %14 = arith.truncf %3 : vector<4x64x64xf32> to vector<4x64x64xbf16>
    %c0_24 = arith.constant 0 : index
    %c0_25 = arith.constant 0 : index
    %c0_26 = arith.constant 0 : index
    %15 = vector.load %arg8[%c0_24, %c0_25, %c0_26] : memref<4x64x32xbf16, #tpu.memory_space<vmem>>, vector<4x64x32xbf16>
    "tpu.trace_start"() <{level = 10 : i32, message = "bne,bef->bnf"}> : () -> ()
    %cst_27 = arith.constant dense<0.000000e+00> : vector<4x64x32xf32>
    %16 = tpu.matmul %14, %15, %cst_27 {dimension_numbers = #tpu.dot_dimension_numbers<[2], [1], [1], [2], [0, 0, 0, 1, 1, 2], [0], [0]>} : vector<4x64x64xbf16>, vector<4x64x32xbf16>, vector<4x64x32xf32> -> vector<4x64x32xf32>
    "tpu.trace_stop"() : () -> ()
    %17 = arith.truncf %16 : vector<4x64x32xf32> to vector<4x64x32xbf16>
    %18 = vector.extract_strided_slice %9 {offsets = [0, 0, 0], sizes = [4, 10, 8], strides = [1, 1, 1]} : vector<4x10x64xbf16> to vector<4x10x8xbf16>
    %19 = vector.extract_strided_slice %9 {offsets = [0, 0, 16], sizes = [4, 10, 8], strides = [1, 1, 1]} : vector<4x10x64xbf16> to vector<4x10x8xbf16>
    %20 = vector.extract_strided_slice %9 {offsets = [0, 0, 32], sizes = [4, 10, 8], strides = [1, 1, 1]} : vector<4x10x64xbf16> to vector<4x10x8xbf16>
    %21 = vector.extract_strided_slice %9 {offsets = [0, 0, 48], sizes = [4, 10, 8], strides = [1, 1, 1]} : vector<4x10x64xbf16> to vector<4x10x8xbf16>
    %22 = tpu.concatenate %18, %19, %20, %21 in 0 : vector<4x10x8xbf16>, vector<4x10x8xbf16>, vector<4x10x8xbf16>, vector<4x10x8xbf16> -> vector<16x10x8xbf16>
    %23 = vector.extract_strided_slice %9 {offsets = [0, 0, 8], sizes = [4, 10, 8], strides = [1, 1, 1]} : vector<4x10x64xbf16> to vector<4x10x8xbf16>
    %24 = vector.extract_strided_slice %9 {offsets = [0, 0, 24], sizes = [4, 10, 8], strides = [1, 1, 1]} : vector<4x10x64xbf16> to vector<4x10x8xbf16>
    %25 = vector.extract_strided_slice %9 {offsets = [0, 0, 40], sizes = [4, 10, 8], strides = [1, 1, 1]} : vector<4x10x64xbf16> to vector<4x10x8xbf16>
    %26 = vector.extract_strided_slice %9 {offsets = [0, 0, 56], sizes = [4, 10, 8], strides = [1, 1, 1]} : vector<4x10x64xbf16> to vector<4x10x8xbf16>
    %27 = tpu.concatenate %23, %24, %25, %26 in 0 : vector<4x10x8xbf16>, vector<4x10x8xbf16>, vector<4x10x8xbf16>, vector<4x10x8xbf16> -> vector<16x10x8xbf16>
    %28 = vector.extract_strided_slice %13 {offsets = [0, 0, 0], sizes = [4, 64, 8], strides = [1, 1, 1]} : vector<4x64x32xbf16> to vector<4x64x8xbf16>
    %29 = vector.extract_strided_slice %13 {offsets = [0, 0, 8], sizes = [4, 64, 8], strides = [1, 1, 1]} : vector<4x64x32xbf16> to vector<4x64x8xbf16>
    %30 = vector.extract_strided_slice %13 {offsets = [0, 0, 16], sizes = [4, 64, 8], strides = [1, 1, 1]} : vector<4x64x32xbf16> to vector<4x64x8xbf16>
    %31 = vector.extract_strided_slice %13 {offsets = [0, 0, 24], sizes = [4, 64, 8], strides = [1, 1, 1]} : vector<4x64x32xbf16> to vector<4x64x8xbf16>
    %32 = tpu.concatenate %28, %29, %30, %31 in 0 : vector<4x64x8xbf16>, vector<4x64x8xbf16>, vector<4x64x8xbf16>, vector<4x64x8xbf16> -> vector<16x64x8xbf16>
    %33 = vector.extract_strided_slice %13 {offsets = [0, 0, 0], sizes = [4, 64, 8], strides = [1, 1, 1]} : vector<4x64x32xbf16> to vector<4x64x8xbf16>
    %34 = vector.extract_strided_slice %13 {offsets = [0, 0, 8], sizes = [4, 64, 8], strides = [1, 1, 1]} : vector<4x64x32xbf16> to vector<4x64x8xbf16>
    %35 = vector.extract_strided_slice %13 {offsets = [0, 0, 16], sizes = [4, 64, 8], strides = [1, 1, 1]} : vector<4x64x32xbf16> to vector<4x64x8xbf16>
    %36 = vector.extract_strided_slice %13 {offsets = [0, 0, 24], sizes = [4, 64, 8], strides = [1, 1, 1]} : vector<4x64x32xbf16> to vector<4x64x8xbf16>
    %37 = tpu.concatenate %33, %34, %35, %36 in 0 : vector<4x64x8xbf16>, vector<4x64x8xbf16>, vector<4x64x8xbf16>, vector<4x64x8xbf16> -> vector<16x64x8xbf16>
    %38 = vector.extract_strided_slice %17 {offsets = [0, 0, 0], sizes = [4, 64, 16], strides = [1, 1, 1]} : vector<4x64x32xbf16> to vector<4x64x16xbf16>
    %39 = vector.extract_strided_slice %17 {offsets = [0, 0, 0], sizes = [4, 64, 16], strides = [1, 1, 1]} : vector<4x64x32xbf16> to vector<4x64x16xbf16>
    %40 = vector.extract_strided_slice %17 {offsets = [0, 0, 16], sizes = [4, 64, 16], strides = [1, 1, 1]} : vector<4x64x32xbf16> to vector<4x64x16xbf16>
    %41 = vector.extract_strided_slice %17 {offsets = [0, 0, 16], sizes = [4, 64, 16], strides = [1, 1, 1]} : vector<4x64x32xbf16> to vector<4x64x16xbf16>
    %42 = tpu.concatenate %38, %39, %40, %41 in 0 : vector<4x64x16xbf16>, vector<4x64x16xbf16>, vector<4x64x16xbf16>, vector<4x64x16xbf16> -> vector<16x64x16xbf16>
    "tpu.trace_start"() <{level = 10 : i32, message = "bqd,bkd->bqk"}> : () -> ()
    %cst_28 = arith.constant dense<0.000000e+00> : vector<16x10x64xf32>
    %43 = tpu.matmul %22, %32, %cst_28 {dimension_numbers = #tpu.dot_dimension_numbers<[2], [2], [1], [1], [0, 0, 0, 1, 1, 1], [0], [0]>} : vector<16x10x8xbf16>, vector<16x64x8xbf16>, vector<16x10x64xf32> -> vector<16x10x64xf32>
    %cst_29 = arith.constant dense<0.000000e+00> : vector<16x10x64xf32>
    %44 = tpu.matmul %27, %37, %cst_29 {dimension_numbers = #tpu.dot_dimension_numbers<[2], [2], [1], [1], [0, 0, 0, 1, 1, 1], [0], [0]>} : vector<16x10x8xbf16>, vector<16x64x8xbf16>, vector<16x10x64xf32> -> vector<16x10x64xf32>
    "tpu.trace_stop"() : () -> ()
    %cst_30 = arith.constant dense<0xFF800000> : vector<16x10xf32>
    %45 = vector.multi_reduction <maximumf>, %43, %cst_30 [2] : vector<16x10x64xf32> to vector<16x10xf32>
    %cst_31 = arith.constant 0xFF800000 : f32
    %46 = vector.broadcast %cst_31 : f32 to vector<16x10xf32>
    %47 = arith.maximumf %46, %45 : vector<16x10xf32>
    %48 = vector.shape_cast %47 : vector<16x10xf32> to vector<16x10x1xf32>
    %49 = vector.broadcast %48 : vector<16x10x1xf32> to vector<16x10x64xf32>
    %50 = arith.subf %43, %49 : vector<16x10x64xf32>
    %51 = math.exp %50 : vector<16x10x64xf32>
    %cst_32 = arith.constant dense<0.000000e+00> : vector<16x10xf32>
    %52 = vector.multi_reduction <add>, %51, %cst_32 [2] : vector<16x10x64xf32> to vector<16x10xf32>
    %53 = vector.shape_cast %52 : vector<16x10xf32> to vector<16x10x1xf32>
    %54 = vector.broadcast %53 : vector<16x10x1xf32> to vector<16x10x64xf32>
    %55 = arith.divf %51, %54 : vector<16x10x64xf32>
    %cst_33 = arith.constant dense<0xFF800000> : vector<16x10xf32>
    %56 = vector.multi_reduction <maximumf>, %44, %cst_33 [2] : vector<16x10x64xf32> to vector<16x10xf32>
    %cst_34 = arith.constant 0xFF800000 : f32
    %57 = vector.broadcast %cst_34 : f32 to vector<16x10xf32>
    %58 = arith.maximumf %57, %56 : vector<16x10xf32>
    %59 = vector.shape_cast %58 : vector<16x10xf32> to vector<16x10x1xf32>
    %60 = vector.broadcast %59 : vector<16x10x1xf32> to vector<16x10x64xf32>
    %61 = arith.subf %44, %60 : vector<16x10x64xf32>
    %62 = math.exp %61 : vector<16x10x64xf32>
    %cst_35 = arith.constant dense<0.000000e+00> : vector<16x10xf32>
    %63 = vector.multi_reduction <add>, %62, %cst_35 [2] : vector<16x10x64xf32> to vector<16x10xf32>
    %64 = vector.shape_cast %63 : vector<16x10xf32> to vector<16x10x1xf32>
    %65 = vector.broadcast %64 : vector<16x10x1xf32> to vector<16x10x64xf32>
    %66 = arith.divf %62, %65 : vector<16x10x64xf32>
    %67 = vector.broadcast %0 : vector<1x1x1xf32> to vector<16x10x64xf32>
    %68 = arith.mulf %67, %66 : vector<16x10x64xf32>
    %69 = arith.subf %55, %68 : vector<16x10x64xf32>
    %70 = arith.truncf %69 : vector<16x10x64xf32> to vector<16x10x64xbf16>
    "tpu.trace_start"() <{level = 10 : i32, message = "bqk,bkd->bqd"}> : () -> ()
    %cst_36 = arith.constant dense<0.000000e+00> : vector<16x10x16xf32>
    %71 = tpu.matmul %70, %42, %cst_36 {dimension_numbers = #tpu.dot_dimension_numbers<[2], [1], [1], [2], [0, 0, 0, 1, 1, 2], [0], [0]>} : vector<16x10x64xbf16>, vector<16x64x16xbf16>, vector<16x10x16xf32> -> vector<16x10x16xf32>
    "tpu.trace_stop"() : () -> ()
    %72 = arith.mulf %71, %71 : vector<16x10x16xf32>
    %cst_37 = arith.constant dense<0.000000e+00> : vector<16x10xf32>
    %73 = vector.multi_reduction <add>, %72, %cst_37 [2] : vector<16x10x16xf32> to vector<16x10xf32>
    %74 = vector.shape_cast %73 : vector<16x10xf32> to vector<16x10x1xf32>
    %cst_38 = arith.constant 1.600000e+01 : f32
    %75 = vector.broadcast %cst_38 : f32 to vector<16x10x1xf32>
    %76 = arith.divf %74, %75 : vector<16x10x1xf32>
    %cst_39 = arith.constant 9.99999974E-6 : f32
    %77 = vector.broadcast %cst_39 : f32 to vector<16x10x1xf32>
    %78 = arith.addf %76, %77 : vector<16x10x1xf32>
    %79 = math.rsqrt %78 : vector<16x10x1xf32>
    %80 = vector.broadcast %79 : vector<16x10x1xf32> to vector<16x10x16xf32>
    %81 = arith.mulf %71, %80 : vector<16x10x16xf32>
    %82 = vector.broadcast %5 : vector<1x1x16xf32> to vector<16x10x16xf32>
    %83 = arith.mulf %81, %82 : vector<16x10x16xf32>
    %84 = vector.extract_strided_slice %83 {offsets = [0, 0, 0], sizes = [4, 10, 16], strides = [1, 1, 1]} : vector<16x10x16xf32> to vector<4x10x16xf32>
    %85 = vector.extract_strided_slice %83 {offsets = [4, 0, 0], sizes = [4, 10, 16], strides = [1, 1, 1]} : vector<16x10x16xf32> to vector<4x10x16xf32>
    %86 = vector.extract_strided_slice %83 {offsets = [8, 0, 0], sizes = [4, 10, 16], strides = [1, 1, 1]} : vector<16x10x16xf32> to vector<4x10x16xf32>
    %87 = vector.extract_strided_slice %83 {offsets = [12, 0, 0], sizes = [4, 10, 16], strides = [1, 1, 1]} : vector<16x10x16xf32> to vector<4x10x16xf32>
    %88 = tpu.concatenate %84, %85, %86, %87 in 2 : vector<4x10x16xf32>, vector<4x10x16xf32>, vector<4x10x16xf32>, vector<4x10x16xf32> -> vector<4x10x64xf32>
    %89 = arith.truncf %88 : vector<4x10x64xf32> to vector<4x10x64xbf16>
    %c0_40 = arith.constant 0 : index
    %c0_41 = arith.constant 0 : index
    %c0_42 = arith.constant 0 : index
    %90 = vector.load %arg9[%c0_40, %c0_41, %c0_42] : memref<4x64x64xbf16, #tpu.memory_space<vmem>>, vector<4x64x64xbf16>
    "tpu.trace_start"() <{level = 10 : i32, message = "bqd,bde->bqe"}> : () -> ()
    %cst_43 = arith.constant dense<0.000000e+00> : vector<4x10x64xf32>
    %91 = tpu.matmul %89, %90, %cst_43 {dimension_numbers = #tpu.dot_dimension_numbers<[2], [1], [1], [2], [0, 0, 0, 1, 1, 2], [0], [0]>} : vector<4x10x64xbf16>, vector<4x64x64xbf16>, vector<4x10x64xf32> -> vector<4x10x64xf32>
    "tpu.trace_stop"() : () -> ()
    %92 = vector.broadcast %4 : vector<4x10x1xf32> to vector<4x10x64xf32>
    %93 = arith.mulf %91, %92 : vector<4x10x64xf32>
    %94 = arith.mulf %1, %1 : vector<4x10x64xf32>
    %cst_44 = arith.constant dense<0.000000e+00> : vector<4x10xf32>
    %95 = vector.multi_reduction <add>, %94, %cst_44 [2] : vector<4x10x64xf32> to vector<4x10xf32>
    %96 = vector.shape_cast %95 : vector<4x10xf32> to vector<4x10x1xf32>
    %97 = math.sqrt %96 : vector<4x10x1xf32>
    %cst_45 = arith.constant 9.99999996E-13 : f32
    %98 = vector.broadcast %cst_45 : f32 to vector<4x10x1xf32>
    %99 = arith.maximumf %97, %98 : vector<4x10x1xf32>
    %100 = vector.broadcast %99 : vector<4x10x1xf32> to vector<4x10x64xf32>
    %101 = arith.divf %1, %100 : vector<4x10x64xf32>
    %102 = arith.mulf %2, %2 : vector<4x64x64xf32>
    %cst_46 = arith.constant dense<0.000000e+00> : vector<4x64xf32>
    %103 = vector.multi_reduction <add>, %102, %cst_46 [2] : vector<4x64x64xf32> to vector<4x64xf32>
    %104 = vector.shape_cast %103 : vector<4x64xf32> to vector<4x64x1xf32>
    %105 = math.sqrt %104 : vector<4x64x1xf32>
    %cst_47 = arith.constant 9.99999996E-13 : f32
    %106 = vector.broadcast %cst_47 : f32 to vector<4x64x1xf32>
    %107 = arith.maximumf %105, %106 : vector<4x64x1xf32>
    %108 = vector.broadcast %107 : vector<4x64x1xf32> to vector<4x64x64xf32>
    %109 = arith.divf %2, %108 : vector<4x64x64xf32>
    "tpu.trace_start"() <{level = 10 : i32, message = "bqe,bke->bqk"}> : () -> ()
    %cst_48 = arith.constant dense<0.000000e+00> : vector<4x10x64xf32>
    %110 = tpu.matmul %101, %109, %cst_48 {dimension_numbers = #tpu.dot_dimension_numbers<[2], [2], [1], [1], [0, 0, 0, 1, 1, 1], [0], [0]>} : vector<4x10x64xf32>, vector<4x64x64xf32>, vector<4x10x64xf32> -> vector<4x10x64xf32>
    "tpu.trace_stop"() : () -> ()
    %cst_49 = arith.constant dense<0xFF800000> : vector<4x10xf32>
    %111 = vector.multi_reduction <maximumf>, %110, %cst_49 [2] : vector<4x10x64xf32> to vector<4x10xf32>
    %112 = vector.shape_cast %111 : vector<4x10xf32> to vector<4x10x1xf32>
    %113 = tpu.iota {dimensions = array<i32: 2>} : vector<4x10x64xi32>
    %114 = vector.broadcast %112 : vector<4x10x1xf32> to vector<4x10x64xf32>
    %115 = arith.cmpf oeq, %110, %114 : vector<4x10x64xf32>
    %c64_i32 = arith.constant 64 : i32
    %116 = vector.broadcast %c64_i32 : i32 to vector<4x10x64xi32>
    %117 = arith.select %115, %113, %116 : vector<4x10x64xi1>, vector<4x10x64xi32>
    %cst_50 = arith.constant dense<2147483647> : vector<4x10xi32>
    %118 = vector.multi_reduction <minsi>, %117, %cst_50 [2] : vector<4x10x64xi32> to vector<4x10xi32>
    %119 = vector.shape_cast %118 : vector<4x10xi32> to vector<4x10x1xi32>
    %120 = vector.broadcast %119 : vector<4x10x1xi32> to vector<4x10x64xi32>
    %121 = arith.cmpi eq, %113, %120 : vector<4x10x64xi32>
    %122 = arith.extui %121 : vector<4x10x64xi1> to vector<4x10x64xi32>
    %123 = arith.sitofp %122 : vector<4x10x64xi32> to vector<4x10x64xf32>
    "tpu.trace_start"() <{level = 10 : i32, message = "bqk,bke->bqe"}> : () -> ()
    %cst_51 = arith.constant dense<0.000000e+00> : vector<4x10x64xf32>
    %124 = tpu.matmul %123, %3, %cst_51 {dimension_numbers = #tpu.dot_dimension_numbers<[2], [1], [1], [2], [0, 0, 0, 1, 1, 2], [0], [0]>} : vector<4x10x64xf32>, vector<4x64x64xf32>, vector<4x10x64xf32> -> vector<4x10x64xf32>
    "tpu.trace_stop"() : () -> ()
    %125 = vector.broadcast %4 : vector<4x10x1xf32> to vector<4x10x64xf32>
    %126 = arith.mulf %124, %125 : vector<4x10x64xf32>
    %127 = tpu.concatenate %93, %126 in 2 : vector<4x10x64xf32>, vector<4x10x64xf32> -> vector<4x10x128xf32>
    %c0_52 = arith.constant 0 : index
    %c0_53 = arith.constant 0 : index
    %c0_54 = arith.constant 0 : index
    %128 = vector.load %arg11[%c0_52, %c0_53, %c0_54] : memref<4x10x128xf32, #tpu.memory_space<vmem>>, vector<4x10x128xf32>
    tpu.vector_store %arg11[%c0_52, %c0_53, %c0_54], %127 {strides = array<i32>} : memref<4x10x128xf32, #tpu.memory_space<vmem>>, vector<4x10x128xf32>,
    return
  }
  func.func @transform_0(%arg0: i32) -> (i32, i32, i32) {
    %c0_i32 = arith.constant 0 : i32
    %c0_i32_0 = arith.constant 0 : i32
    %c0_i32_1 = arith.constant 0 : i32
    %c0_i32_2 = arith.constant 0 : i32
    return %c0_i32, %c0_i32_0, %c0_i32_1 : i32, i32, i32
  }
  func.func @transform_1(%arg0: i32) -> (i32, i32, i32) {
    %c0_i32 = arith.constant 0 : i32
    %c0_i32_0 = arith.constant 0 : i32
    %c0_i32_1 = arith.constant 0 : i32
    return %arg0, %c0_i32, %c0_i32_0 : i32, i32, i32
  }
  func.func @transform_2(%arg0: i32) -> (i32, i32, i32) {
    %c0_i32 = arith.constant 0 : i32
    %c0_i32_0 = arith.constant 0 : i32
    %c0_i32_1 = arith.constant 0 : i32
    return %arg0, %c0_i32, %c0_i32_0 : i32, i32, i32
  }
  func.func @transform_3(%arg0: i32) -> (i32, i32, i32) {
    %c0_i32 = arith.constant 0 : i32
    %c0_i32_0 = arith.constant 0 : i32
    %c0_i32_1 = arith.constant 0 : i32
    return %arg0, %c0_i32, %c0_i32_0 : i32, i32, i32
  }
  func.func @transform_4(%arg0: i32) -> (i32, i32, i32) {
    %c0_i32 = arith.constant 0 : i32
    %c0_i32_0 = arith.constant 0 : i32
    %c0_i32_1 = arith.constant 0 : i32
    return %arg0, %c0_i32, %c0_i32_0 : i32, i32, i32
  }
  func.func @transform_5(%arg0: i32) -> (i32, i32, i32) {
    %c0_i32 = arith.constant 0 : i32
    %c0_i32_0 = arith.constant 0 : i32
    %c0_i32_1 = arith.constant 0 : i32
    %c0_i32_2 = arith.constant 0 : i32
    return %c0_i32, %c0_i32_0, %c0_i32_1 : i32, i32, i32
  }
  func.func @transform_6(%arg0: i32) -> (i32, i32, i32) {
    %c0_i32 = arith.constant 0 : i32
    %c0_i32_0 = arith.constant 0 : i32
    %c0_i32_1 = arith.constant 0 : i32
    %c0_i32_2 = arith.constant 0 : i32
    return %c0_i32, %c0_i32_0, %c0_i32_1 : i32, i32, i32
  }
  func.func @transform_7(%arg0: i32) -> (i32, i32, i32) {
    %c0_i32 = arith.constant 0 : i32
    %c0_i32_0 = arith.constant 0 : i32
    %c0_i32_1 = arith.constant 0 : i32
    %c0_i32_2 = arith.constant 0 : i32
    return %c0_i32, %c0_i32_0, %c0_i32_1 : i32, i32, i32
  }
  func.func @transform_8(%arg0: i32) -> (i32, i32, i32) {
    %c0_i32 = arith.constant 0 : i32
    %c0_i32_0 = arith.constant 0 : i32
    %c0_i32_1 = arith.constant 0 : i32
    %c0_i32_2 = arith.constant 0 : i32
    return %c0_i32, %c0_i32_0, %c0_i32_1 : i32, i32, i32
  }
  func.func @transform_9(%arg0: i32) -> (i32, i32, i32) {
    %c0_i32 = arith.constant 0 : i32
    %c0_i32_0 = arith.constant 0 : i32
    %c0_i32_1 = arith.constant 0 : i32
    %c0_i32_2 = arith.constant 0 : i32
    return %c0_i32, %c0_i32_0, %c0_i32_1 : i32, i32, i32
  }
  func.func @transform_10(%arg0: i32) -> (i32, i32, i32) {
    %c0_i32 = arith.constant 0 : i32
    %c0_i32_0 = arith.constant 0 : i32
    %c0_i32_1 = arith.constant 0 : i32
    return %arg0, %c0_i32, %c0_i32_0 : i32, i32, i32
  }
}

module attributes {stable_mosaic.version = 11 : i64} {
  func.func @mlp_bn_kernel(%arg0: i32, %arg1: memref<8x1280xf32, #tpu.memory_space<vmem>>, %arg2: memref<1280x128xbf16, #tpu.memory_space<vmem>>, %arg3: memref<1x128xf32, #tpu.memory_space<vmem>>, %arg4: memref<1x128xf32, #tpu.memory_space<vmem>>, %arg5: memref<128x128xbf16, #tpu.memory_space<vmem>>, %arg6: memref<1x128xf32, #tpu.memory_space<vmem>>, %arg7: memref<1x128xf32, #tpu.memory_space<vmem>>, %arg8: memref<8x128xf32, #tpu.memory_space<vmem>>) attributes {dimension_semantics = [#tpu.dimension_semantics<parallel>], iteration_bounds = array<i64: 1>, scalar_prefetch = 0 : i64, scratch_operands = 0 : i64, tpu.core_type = #tpu.core_type<tc>, window_params = [{transform_indices = @transform_0, window_bounds = array<i64: 8, 1280>}, {pipeline_mode = #tpu.pipeline_mode<synchronous>, transform_indices = @transform_1, window_bounds = array<i64: 1280, 128>}, {pipeline_mode = #tpu.pipeline_mode<synchronous>, transform_indices = @transform_2, window_bounds = array<i64: 1, 128>}, {pipeline_mode = #tpu.pipeline_mode<synchronous>, transform_indices = @transform_3, window_bounds = array<i64: 1, 128>}, {pipeline_mode = #tpu.pipeline_mode<synchronous>, transform_indices = @transform_4, window_bounds = array<i64: 128, 128>}, {pipeline_mode = #tpu.pipeline_mode<synchronous>, transform_indices = @transform_5, window_bounds = array<i64: 1, 128>}, {pipeline_mode = #tpu.pipeline_mode<synchronous>, transform_indices = @transform_6, window_bounds = array<i64: 1, 128>}, {transform_indices = @transform_7, window_bounds = array<i64: 8, 128>}]} {
    %c0 = arith.constant 0 : index
    %c0_0 = arith.constant 0 : index
    %0 = vector.load %arg1[%c0, %c0_0] : memref<8x1280xf32, #tpu.memory_space<vmem>>, vector<8x1280xf32>
    %1 = arith.truncf %0 : vector<8x1280xf32> to vector<8x1280xbf16>
    %c0_1 = arith.constant 0 : index
    %c0_2 = arith.constant 0 : index
    %2 = vector.load %arg2[%c0_1, %c0_2] : memref<1280x128xbf16, #tpu.memory_space<vmem>>, vector<1280x128xbf16>
    %cst = arith.constant dense<0.000000e+00> : vector<8x128xf32>
    %3 = tpu.matmul %1, %2, %cst {dimension_numbers = #tpu.dot_dimension_numbers<[1], [0], [0], [1], [0, 0, 1, 1], [], []>} : vector<8x1280xbf16>, vector<1280x128xbf16>, vector<8x128xf32> -> vector<8x128xf32>
    %c0_3 = arith.constant 0 : index
    %c0_4 = arith.constant 0 : index
    %4 = vector.load %arg3[%c0_3, %c0_4] : memref<1x128xf32, #tpu.memory_space<vmem>>, vector<1x128xf32>
    %5 = vector.broadcast %4 : vector<1x128xf32> to vector<8x128xf32>
    %6 = arith.mulf %3, %5 : vector<8x128xf32>
    %c0_5 = arith.constant 0 : index
    %c0_6 = arith.constant 0 : index
    %7 = vector.load %arg4[%c0_5, %c0_6] : memref<1x128xf32, #tpu.memory_space<vmem>>, vector<1x128xf32>
    %8 = vector.broadcast %7 : vector<1x128xf32> to vector<8x128xf32>
    %9 = arith.addf %6, %8 : vector<8x128xf32>
    %10 = arith.truncf %9 : vector<8x128xf32> to vector<8x128xbf16>
    %c0_7 = arith.constant 0 : index
    %c0_8 = arith.constant 0 : index
    %11 = vector.load %arg5[%c0_7, %c0_8] : memref<128x128xbf16, #tpu.memory_space<vmem>>, vector<128x128xbf16>
    %cst_9 = arith.constant dense<0.000000e+00> : vector<8x128xf32>
    %12 = tpu.matmul %10, %11, %cst_9 {dimension_numbers = #tpu.dot_dimension_numbers<[1], [0], [0], [1], [0, 0, 1, 1], [], []>} : vector<8x128xbf16>, vector<128x128xbf16>, vector<8x128xf32> -> vector<8x128xf32>
    %c0_10 = arith.constant 0 : index
    %c0_11 = arith.constant 0 : index
    %13 = vector.load %arg6[%c0_10, %c0_11] : memref<1x128xf32, #tpu.memory_space<vmem>>, vector<1x128xf32>
    %14 = vector.broadcast %13 : vector<1x128xf32> to vector<8x128xf32>
    %15 = arith.mulf %12, %14 : vector<8x128xf32>
    %c0_12 = arith.constant 0 : index
    %c0_13 = arith.constant 0 : index
    %16 = vector.load %arg7[%c0_12, %c0_13] : memref<1x128xf32, #tpu.memory_space<vmem>>, vector<1x128xf32>
    %17 = vector.broadcast %16 : vector<1x128xf32> to vector<8x128xf32>
    %18 = arith.addf %15, %17 : vector<8x128xf32>
    %c0_14 = arith.constant 0 : index
    %c0_15 = arith.constant 0 : index
    %19 = vector.load %arg8[%c0_14, %c0_15] : memref<8x128xf32, #tpu.memory_space<vmem>>, vector<8x128xf32>
    tpu.vector_store %arg8[%c0_14, %c0_15], %18 {strides = array<i32>} : memref<8x128xf32, #tpu.memory_space<vmem>>, vector<8x128xf32>,
    return
  }
  func.func @transform_0(%arg0: i32) -> (i32, i32) {
    %c0_i32 = arith.constant 0 : i32
    %c0_i32_0 = arith.constant 0 : i32
    return %arg0, %c0_i32 : i32, i32
  }
  func.func @transform_1(%arg0: i32) -> (i32, i32) {
    %c0_i32 = arith.constant 0 : i32
    %c0_i32_0 = arith.constant 0 : i32
    %c0_i32_1 = arith.constant 0 : i32
    return %c0_i32, %c0_i32_0 : i32, i32
  }
  func.func @transform_2(%arg0: i32) -> (i32, i32) {
    %c0_i32 = arith.constant 0 : i32
    %c0_i32_0 = arith.constant 0 : i32
    %c0_i32_1 = arith.constant 0 : i32
    return %c0_i32, %c0_i32_0 : i32, i32
  }
  func.func @transform_3(%arg0: i32) -> (i32, i32) {
    %c0_i32 = arith.constant 0 : i32
    %c0_i32_0 = arith.constant 0 : i32
    %c0_i32_1 = arith.constant 0 : i32
    return %c0_i32, %c0_i32_0 : i32, i32
  }
  func.func @transform_4(%arg0: i32) -> (i32, i32) {
    %c0_i32 = arith.constant 0 : i32
    %c0_i32_0 = arith.constant 0 : i32
    %c0_i32_1 = arith.constant 0 : i32
    return %c0_i32, %c0_i32_0 : i32, i32
  }
  func.func @transform_5(%arg0: i32) -> (i32, i32) {
    %c0_i32 = arith.constant 0 : i32
    %c0_i32_0 = arith.constant 0 : i32
    %c0_i32_1 = arith.constant 0 : i32
    return %c0_i32, %c0_i32_0 : i32, i32
  }
  func.func @transform_6(%arg0: i32) -> (i32, i32) {
    %c0_i32 = arith.constant 0 : i32
    %c0_i32_0 = arith.constant 0 : i32
    %c0_i32_1 = arith.constant 0 : i32
    return %c0_i32, %c0_i32_0 : i32, i32
  }
  func.func @transform_7(%arg0: i32) -> (i32, i32) {
    %c0_i32 = arith.constant 0 : i32
    %c0_i32_0 = arith.constant 0 : i32
    return %arg0, %c0_i32 : i32, i32
  }
}

</mosaic_0001>

<bundles_post_ra>
// kernel: mul.21
= control target key start
LH: loop header
LB: loop body
LE: loop exit
PB: predicated region body
PF: predicated region fallthrough
CT: control target
= control target key end

     0   :  { %vm7_vm0 = vcmask 80896   ;;  %s39_s0 = inlined_call_operand.vmem [shape: f32[20], index: 0, kind: input, shape index: {}]   ;;  %s40_s1 = inlined_call_operand.vmem [shape: f32[2,10], index: 1, kind: output, shape index: {}]  }
   0x1   :  { %v4_v0 = vld [vmem:[%s39_s0] sm:$0x1]  ;;  %s22_s0 = smov 118  }
   0x2   :  { %5 = vst [vmem:[#allocation1] sm:$0x1] %v4_v0 }
   0x9   :  { %v9_v1 = vld [vmem:[#allocation1] sm:$0x1]  }
   0xa   :  { %v6_v2 = vld [vmem:[#allocation1] sm:$0x1]   ;;  %10 = vrot.lane.b32.xlu0 %v9_v1, %s22_s0 }
   0xb   :  { %8 = vst.msk [vmem:[#allocation0] sm:$0x1] %vm7_vm0, %v6_v2  }
  0x7c   :  { %v11_v3 = vpop.permute.xlu0 %10  }
  0x7d   :  { %14 = vst.msk [vmem:[#allocation0 + $0x1] sm:$0x1] %vm7_vm0, %v11_v3  }
  0x84   :  { %v17_v4 = vld [vmem:[#allocation0] sm:$0x3] }
  0x85   :  { %20 = vst [vmem:[%s40_s1] sm:$0x3] %v17_v4 }

// kernel: _lambda_.3
= control target key start
LH: loop header
LB: loop body
LE: loop exit
PB: predicated region body
PF: predicated region fallthrough
CT: control target
= control target key end

     0   :  { %s1753_s0 = inlined_call_operand.vmem [shape: f32[8,1280], index: 0, kind: input, shape index: {}]   ;;  %s1754_s1 = inlined_call_operand.vmem [shape: bf16[1280,128], index: 1, kind: input, shape index: {}]   ;;  %s1755_s2 = inlined_call_operand.vmem [shape: f32[1,128], index: 2, kind: input, shape index: {}]   ;;  %s1756_s3 = inlined_call_operand.vmem [shape: f32[1,128], index: 3, kind: input, shape index: {}]   ;;  %s1757_s4 = inlined_call_operand.vmem [shape: bf16[128,128], index: 4, kind: input, shape index: {}]   ;;  %s1758_s5 = inlined_call_operand.vmem [shape: f32[1,128], index: 5, kind: input, shape index: {}]   ;;  %s1759_s6 = inlined_call_operand.vmem [shape: f32[1,128], index: 6, kind: input, shape index: {}]   ;;  %s1760_s7 = inlined_call_operand.hbm [shape: f32[8,128], index: 7, kind: output, shape index: {}]  }
   0x1   :  { %v1291_v0 = vld [vmem:[%s1754_s1 + $0x38] sm:$0xff]  ;;  %v1290_v4 = vld [vmem:[%s1754_s1 + $0x30] sm:$0xff]  ;;  %v1289_v8 = vld [vmem:[%s1754_s1 + $0x28] sm:$0xff] }
   0x2   :  { %v1299_v1 = vld [vmem:[%s1754_s1 + $0x78] sm:$0xff]  ;;  %687 = vmatpush.bf16.msra.mxu0 %v1291_v0  ;;  %v1298_v5 = vld [vmem:[%s1754_s1 + $0x70] sm:$0xff]  ;;  %v1297_v9 = vld [vmem:[%s1754_s1 + $0x68] sm:$0xff] }
   0x3   :  { %v1307_v2 = vld [vmem:[%s1754_s1 + $0xb8] sm:$0xff]  ;;  %700 = vmatpush.bf16.msra.mxu1 %v1299_v1  ;;  %v1306_v6 = vld [vmem:[%s1754_s1 + $0xb0] sm:$0xff]  ;;  %v1305_v10 = vld [vmem:[%s1754_s1 + $0xa8] sm:$0xff] }
   0x4   :  { %v1315_v3 = vld [vmem:[%s1754_s1 + $0xf8] sm:$0xff]  ;;  %713 = vmatpush.bf16.msra.mxu2 %v1307_v2  ;;  %v1314_v7 = vld [vmem:[%s1754_s1 + $0xf0] sm:$0xff]  ;;  %v1313_v11 = vld [vmem:[%s1754_s1 + $0xe8] sm:$0xff] }
   0x5   :  { %726 = vmatpush.bf16.msra.mxu3 %v1315_v3  ;;  %v1288_v12 = vld [vmem:[%s1754_s1 + $0x20] sm:$0xff]  ;;  %v1287_v16 = vld [vmem:[%s1754_s1 + $0x18] sm:$0xff]  ;;  %v1286_v20 = vld [vmem:[%s1754_s1 + $0x10] sm:$0xff] }
   0x6   :  { %688 = vmatpush.bf16.msra.mxu0 %v1290_v4  ;;  %v1296_v13 = vld [vmem:[%s1754_s1 + $0x60] sm:$0xff]  ;;  %v1295_v17 = vld [vmem:[%s1754_s1 + $0x58] sm:$0xff]  ;;  %v1294_v21 = vld [vmem:[%s1754_s1 + $0x50] sm:$0xff] }
   0x7   :  { %701 = vmatpush.bf16.msra.mxu1 %v1298_v5  ;;  %v1304_v14 = vld [vmem:[%s1754_s1 + $0xa0] sm:$0xff]  ;;  %v1303_v18 = vld [vmem:[%s1754_s1 + $0x98] sm:$0xff]  ;;  %v1302_v22 = vld [vmem:[%s1754_s1 + $0x90] sm:$0xff] }
   0x8   :  { %714 = vmatpush.bf16.msra.mxu2 %v1306_v6  ;;  %v1312_v15 = vld [vmem:[%s1754_s1 + $0xe0] sm:$0xff]  ;;  %v1311_v19 = vld [vmem:[%s1754_s1 + $0xd8] sm:$0xff]  ;;  %v1310_v23 = vld [vmem:[%s1754_s1 + $0xd0] sm:$0xff] }
   0x9   :  { %727 = vmatpush.bf16.msra.mxu3 %v1314_v7 }
   0xa   :  { %689 = vmatpush.bf16.msra.mxu0 %v1289_v8 }
   0xb   :  { %702 = vmatpush.bf16.msra.mxu1 %v1297_v9 }
   0xc   :  { %715 = vmatpush.bf16.msra.mxu2 %v1305_v10 }
   0xd   :  { %728 = vmatpush.bf16.msra.mxu3 %v1313_v11 }
   0xe   :  { %690 = vmatpush.bf16.msra.mxu0 %v1288_v12 }
   0xf   :  { %703 = vmatpush.bf16.msra.mxu1 %v1296_v13 }
  0x10   :  { %716 = vmatpush.bf16.msra.mxu2 %v1304_v14 }
  0x11   :  { %729 = vmatpush.bf16.msra.mxu3 %v1312_v15 }
  0x12   :  { %691 = vmatpush.bf16.msra.mxu0 %v1287_v16 }
  0x13   :  { %704 = vmatpush.bf16.msra.mxu1 %v1295_v17 }
  0x14   :  { %717 = vmatpush.bf16.msra.mxu2 %v1303_v18 }
  0x15   :  { %730 = vmatpush.bf16.msra.mxu3 %v1311_v19 }
  0x16   :  { %12 = vsyncpa [#allocation3], 0  ;;  %692 = vmatpush.bf16.msra.mxu0 %v1286_v20  ;;  %v1285_v24 = vld [vmem:[%s1754_s1 + $0x8] sm:$0xff]  ;;  %v1284_v28 = vld [vmem:[%s1754_s1] sm:$0xff] }
  0x17   :  { %705 = vmatpush.bf16.msra.mxu1 %v1294_v21  ;;  %v1293_v25 = vld [vmem:[%s1754_s1 + $0x48] sm:$0xff]  ;;  %v1292_v29 = vld [vmem:[%s1754_s1 + $0x40] sm:$0xff]  ;;  %v1323_v32 = vld [vmem:[%s1754_s1 + $0x138] sm:$0xff] }
  0x18   :  { %718 = vmatpush.bf16.msra.mxu2 %v1302_v22  ;;  %v1301_v26 = vld [vmem:[%s1754_s1 + $0x88] sm:$0xff]  ;;  %v27_v30 = vld [vmem:[%s1753_s0] sm:$0xff]  ;;  %v29_v33 = vld [vmem:[%s1753_s0 + $0x10] sm:$0xff] }
  0x19   :  { %731 = vmatpush.bf16.msra.mxu3 %v1310_v23  ;;  %v1309_v27 = vld [vmem:[%s1754_s1 + $0xc8] sm:$0xff]  ;;  %v1300_v31 = vld [vmem:[%s1754_s1 + $0x80] sm:$0xff]  ;;  %v1331_v34 = vld [vmem:[%s1754_s1 + $0x178] sm:$0xff]  ;;  %v37_v38 = vpack.c.bf16 %v27_v30, %v27_v30  ;;  %v39_v40 = vpack.c.bf16 %v29_v33, %v29_v33 }
  0x1a   :  { %693 = vmatpush.bf16.msra.mxu0 %v1285_v24  ;;  %v1339_v35 = vld [vmem:[%s1754_s1 + $0x1b8] sm:$0xff]  ;;  %v28_v36 = vld [vmem:[%s1753_s0 + $0x8] sm:$0xff]  ;;  %v1308_v37 = vld [vmem:[%s1754_s1 + $0xc0] sm:$0xff] }
  0x1b   :  { %706 = vmatpush.bf16.msra.mxu1 %v1293_v25  ;;  %v1347_v39 = vld [vmem:[%s1754_s1 + $0x1f8] sm:$0xff]  ;;  %v1322_v42 = vld [vmem:[%s1754_s1 + $0x130] sm:$0xff]  ;;  %v38_v43 = vpack.c.bf16 %v28_v36, %v28_v36  ;;  %v1321_v48 = vld [vmem:[%s1754_s1 + $0x128] sm:$0xff] }
  0x1c   :  { %719 = vmatpush.bf16.msra.mxu2 %v1301_v26  ;;  %v30_v41 = vld [vmem:[%s1753_s0 + $0x18] sm:$0xff]  ;;  %v1330_v44 = vld [vmem:[%s1754_s1 + $0x170] sm:$0xff]  ;;  %v1329_v49 = vld [vmem:[%s1754_s1 + $0x168] sm:$0xff] }
  0x1d   :  { %732 = vmatpush.bf16.msra.mxu3 %v1309_v27  ;;  %v1338_v45 = vld [vmem:[%s1754_s1 + $0x1b0] sm:$0xff]  ;;  %v40_v46 = vpack.c.bf16 %v30_v41, %v30_v41  ;;  %v1337_v50 = vld [vmem:[%s1754_s1 + $0x1a8] sm:$0xff]  ;;  %v1320_v52 = vld [vmem:[%s1754_s1 + $0x120] sm:$0xff] }
  0x1e   :  { %694 = vmatpush.bf16.msra.mxu0 %v1284_v28  ;;  %v1346_v47 = vld [vmem:[%s1754_s1 + $0x1f0] sm:$0xff]  ;;  %v1345_v51 = vld [vmem:[%s1754_s1 + $0x1e8] sm:$0xff]  ;;  %v1328_v53 = vld [vmem:[%s1754_s1 + $0x160] sm:$0xff] }
  0x1f   :  { %707 = vmatpush.bf16.msra.mxu1 %v1292_v29  ;;  %v1336_v54 = vld [vmem:[%s1754_s1 + $0x1a0] sm:$0xff]  ;;  %v1319_v56 = vld [vmem:[%s1754_s1 + $0x118] sm:$0xff]  ;;  %v1318_v60 = vld [vmem:[%s1754_s1 + $0x110] sm:$0xff] }
  0x20   :  { %720 = vmatpush.bf16.msra.mxu2 %v1300_v31  ;;  %v1344_v55 = vld [vmem:[%s1754_s1 + $0x1e0] sm:$0xff]  ;;  %v1327_v57 = vld [vmem:[%s1754_s1 + $0x158] sm:$0xff]  ;;  %v1326_v61 = vld [vmem:[%s1754_s1 + $0x150] sm:$0xff] }
  0x21   :  { %733 = vmatpush.bf16.msra.mxu3 %v1308_v37  ;;  %695 = vmatmul.bf16.vlgmr.msra.gmra.mxu0 %v37_v38  ;;  %v1335_v58 = vld [vmem:[%s1754_s1 + $0x198] sm:$0xff]  ;;  %v1334_v62 = vld [vmem:[%s1754_s1 + $0x190] sm:$0xff]  ;;  %v1317_v0 = vld [vmem:[%s1754_s1 + $0x108] sm:$0xff] }
  0x22   :  { %739 = vmatpush.bf16.msrb.mxu0 %v1323_v32  ;;  %708 = vmatmul.bf16.vlgmr.msra.gmra.mxu1 %v38_v43  ;;  %v1343_v59 = vld [vmem:[%s1754_s1 + $0x1d8] sm:$0xff]  ;;  %v1342_v63 = vld [vmem:[%s1754_s1 + $0x1d0] sm:$0xff]  ;;  %v1325_v1 = vld [vmem:[%s1754_s1 + $0x148] sm:$0xff] }
  0x23   :  { %752 = vmatpush.bf16.msrb.mxu1 %v1331_v34  ;;  %721 = vmatmul.bf16.vlgmr.msra.gmra.mxu2 %v39_v40  ;;  %v1333_v2 = vld [vmem:[%s1754_s1 + $0x188] sm:$0xff]  ;;  %v1316_v4 = vld [vmem:[%s1754_s1 + $0x100] sm:$0xff]  ;;  %v33_v8 = vld [vmem:[%s1753_s0 + $0x30] sm:$0xff] }
  0x24   :  { %765 = vmatpush.bf16.msrb.mxu2 %v1339_v35  ;;  %734 = vmatmul.bf16.vlgmr.msra.gmra.mxu3 %v40_v46  ;;  %v1341_v3 = vld [vmem:[%s1754_s1 + $0x1c8] sm:$0xff]  ;;  %v1324_v5 = vld [vmem:[%s1754_s1 + $0x140] sm:$0xff]  ;;  %v1355_v10 = vld [vmem:[%s1754_s1 + $0x238] sm:$0xff]  ;;  %v43_v14 = vpack.c.bf16 %v33_v8, %v33_v8 }
  0x25   :  { %778 = vmatpush.bf16.msrb.mxu3 %v1347_v39  ;;  %v31_v6 = vld [vmem:[%s1753_s0 + $0x20] sm:$0xff]  ;;  %v32_v9 = vld [vmem:[%s1753_s0 + $0x28] sm:$0xff]  ;;  %v1363_v11 = vld [vmem:[%s1754_s1 + $0x278] sm:$0xff] }
  0x26   :  { %740 = vmatpush.bf16.msrb.mxu0 %v1322_v42  ;;  %v1332_v7 = vld [vmem:[%s1754_s1 + $0x180] sm:$0xff]  ;;  %v41_v13 = vpack.c.bf16 %v31_v6, %v31_v6  ;;  %v34_v15 = vld [vmem:[%s1753_s0 + $0x38] sm:$0xff]  ;;  %v42_v16 = vpack.c.bf16 %v32_v9, %v32_v9  ;;  %v1354_v17 = vld [vmem:[%s1754_s1 + $0x230] sm:$0xff] }
  0x27   :  { %753 = vmatpush.bf16.msrb.mxu1 %v1330_v44  ;;  %v1340_v12 = vld [vmem:[%s1754_s1 + $0x1c0] sm:$0xff]  ;;  %v1362_v18 = vld [vmem:[%s1754_s1 + $0x270] sm:$0xff]  ;;  %v44_v19 = vpack.c.bf16 %v34_v15, %v34_v15  ;;  %v1353_v20 = vld [vmem:[%s1754_s1 + $0x228] sm:$0xff] }
  0x28   :  { %766 = vmatpush.bf16.msrb.mxu2 %v1338_v45  ;;  %v1361_v21 = vld [vmem:[%s1754_s1 + $0x268] sm:$0xff]  ;;  %v1352_v22 = vld [vmem:[%s1754_s1 + $0x220] sm:$0xff]  ;;  %v1351_v24 = vld [vmem:[%s1754_s1 + $0x218] sm:$0xff] }
  0x29   :  { %779 = vmatpush.bf16.msrb.mxu3 %v1346_v47  ;;  %v1360_v23 = vld [vmem:[%s1754_s1 + $0x260] sm:$0xff]  ;;  %v1359_v25 = vld [vmem:[%s1754_s1 + $0x258] sm:$0xff]  ;;  %v1350_v26 = vld [vmem:[%s1754_s1 + $0x210] sm:$0xff] }
  0x2a   :  { %741 = vmatpush.bf16.msrb.mxu0 %v1321_v48  ;;  %v1358_v27 = vld [vmem:[%s1754_s1 + $0x250] sm:$0xff]  ;;  %v1349_v28 = vld [vmem:[%s1754_s1 + $0x208] sm:$0xff]  ;;  %v1348_v30 = vld [vmem:[%s1754_s1 + $0x200] sm:$0xff] }
  0x2b   :  { %754 = vmatpush.bf16.msrb.mxu1 %v1329_v49  ;;  %v1357_v29 = vld [vmem:[%s1754_s1 + $0x248] sm:$0xff]  ;;  %v1356_v31 = vld [vmem:[%s1754_s1 + $0x240] sm:$0xff]  ;;  %v1371_v38 = vld [vmem:[%s1757_s4 + $0x38] sm:$0xff] }
  0x2c   :  { %767 = vmatpush.bf16.msrb.mxu2 %v1337_v50  ;;  %v35_v32 = vld [vmem:[%s1753_s0 + $0x40] sm:$0xff]  ;;  %v36_v33 = vld [vmem:[%s1753_s0 + $0x48] sm:$0xff]  ;;  %v1370_v41 = vld [vmem:[%s1757_s4 + $0x30] sm:$0xff] }
  0x2d   :  { %780 = vmatpush.bf16.msrb.mxu3 %v1345_v51  ;;  %v45_v34 = vpack.c.bf16 %v35_v32, %v35_v32  ;;  %v46_v35 = vpack.c.bf16 %v36_v33, %v36_v33  ;;  %v1369_v44 = vld [vmem:[%s1757_s4 + $0x28] sm:$0xff]  ;;  %v1368_v46 = vld [vmem:[%s1757_s4 + $0x20] sm:$0xff]  ;;  %v1367_v48 = vld [vmem:[%s1757_s4 + $0x18] sm:$0xff] }
  0x2e   :  { %742 = vmatpush.bf16.msrb.mxu0 %v1320_v52  ;;  %v1366_v49 = vld [vmem:[%s1757_s4 + $0x10] sm:$0xff]  ;;  %v1365_v51 = vld [vmem:[%s1757_s4 + $0x8] sm:$0xff]  ;;  %v1373_v6 = vld [vmem:[%s1755_s2] ss:$0 sm:$0xff]  ;;  %s1403_s2 = smov [#allocation2]  }
  0x2f   :  { %755 = vmatpush.bf16.msrb.mxu1 %v1328_v53  ;;  %v1364_v53 = vld [vmem:[%s1757_s4] sm:$0xff]  ;;  %s921_s18 = sshll.u32 %s1403_s2, 4  ;;  %s922_s18 = int_to_ptr.vmem [resolvable:$true] %s921_s18 }
  0x30   :  { %768 = vmatpush.bf16.msrb.mxu2 %v1336_v54  ;;  %v1374_v8 = vld [vmem:[%s1756_s3] ss:$0 sm:$0xff]  ;;  %s923_s3 = sshll.u32 %s1760_s7, 4  ;;  %s924_s3 = int_to_ptr.hbm [resolvable:$true] %s923_s3 }
  0x31   :  { %781 = vmatpush.bf16.msrb.mxu3 %v1344_v55  ;;  %v1376_v15 = vld [vmem:[%s1759_s6] ss:$0 sm:$0xff] }
  0x32   :  { %743 = vmatpush.bf16.msrb.mxu0 %v1319_v56 }
  0x33   :  { %756 = vmatpush.bf16.msrb.mxu1 %v1327_v57 }
  0x34   :  { %769 = vmatpush.bf16.msrb.mxu2 %v1335_v58 }
  0x35   :  { %782 = vmatpush.bf16.msrb.mxu3 %v1343_v59 }
  0x36   :  { %744 = vmatpush.bf16.msrb.mxu0 %v1318_v60 }
  0x37   :  { %757 = vmatpush.bf16.msrb.mxu1 %v1326_v61 }
  0x38   :  { %770 = vmatpush.bf16.msrb.mxu2 %v1334_v62 }
  0x39   :  { %783 = vmatpush.bf16.msrb.mxu3 %v1342_v63 }
  0x3a   :  { %745 = vmatpush.bf16.msrb.mxu0 %v1317_v0 }
  0x3b   :  { %758 = vmatpush.bf16.msrb.mxu1 %v1325_v1 }
  0x3c   :  { %771 = vmatpush.bf16.msrb.mxu2 %v1333_v2 }
  0x3d   :  { %784 = vmatpush.bf16.msrb.mxu3 %v1341_v3 }
  0x3e   :  { %746 = vmatpush.bf16.msrb.mxu0 %v1316_v4 }
  0x3f   :  { %759 = vmatpush.bf16.msrb.mxu1 %v1324_v5 }
  0x40   :  { %772 = vmatpush.bf16.msrb.mxu2 %v1332_v7 }
  0x41   :  { %785 = vmatpush.bf16.msrb.mxu3 %v1340_v12  ;;  %747 = vmatmul.bf16.vlgmr.msrb.gmra.mxu0 %v41_v13 }
  0x42   :  { %791 = vmatpush.bf16.msra.mxu0 %v1355_v10  ;;  %760 = vmatmul.bf16.vlgmr.msrb.gmra.mxu1 %v42_v16 }
  0x43   :  { %804 = vmatpush.bf16.msra.mxu1 %v1363_v11  ;;  %773 = vmatmul.bf16.vlgmr.msrb.gmra.mxu2 %v43_v14  ;;  %v1375_v14 = vld [vmem:[%s1758_s5] ss:$0 sm:$0xff] }
  0x44   :  { %786 = vmatmul.bf16.vlgmr.msrb.gmra.mxu3 %v44_v19  ;;  %892 = vmatpush.bf16.msra.mxu2 %v1371_v38 }
  0x46   :  { %792 = vmatpush.bf16.msra.mxu0 %v1354_v17 }
  0x47   :  { %805 = vmatpush.bf16.msra.mxu1 %v1362_v18 }
  0x48   :  { %893 = vmatpush.bf16.msra.mxu2 %v1370_v41 }
  0x4a   :  { %793 = vmatpush.bf16.msra.mxu0 %v1353_v20 }
  0x4b   :  { %806 = vmatpush.bf16.msra.mxu1 %v1361_v21 }
  0x4c   :  { %894 = vmatpush.bf16.msra.mxu2 %v1369_v44 }
  0x4e   :  { %794 = vmatpush.bf16.msra.mxu0 %v1352_v22 }
  0x4f   :  { %807 = vmatpush.bf16.msra.mxu1 %v1360_v23 }
  0x50   :  { %895 = vmatpush.bf16.msra.mxu2 %v1368_v46 }
  0x52   :  { %795 = vmatpush.bf16.msra.mxu0 %v1351_v24 }
  0x53   :  { %808 = vmatpush.bf16.msra.mxu1 %v1359_v25 }
  0x54   :  { %896 = vmatpush.bf16.msra.mxu2 %v1367_v48 }
  0x56   :  { %796 = vmatpush.bf16.msra.mxu0 %v1350_v26 }
  0x57   :  { %809 = vmatpush.bf16.msra.mxu1 %v1358_v27 }
  0x58   :  { %897 = vmatpush.bf16.msra.mxu2 %v1366_v49 }
  0x5a   :  { %797 = vmatpush.bf16.msra.mxu0 %v1349_v28 }
  0x5b   :  { %810 = vmatpush.bf16.msra.mxu1 %v1357_v29 }
  0x5c   :  { %898 = vmatpush.bf16.msra.mxu2 %v1365_v51 }
  0x5e   :  { %798 = vmatpush.bf16.msra.mxu0 %v1348_v30 }
  0x5f   :  { %811 = vmatpush.bf16.msra.mxu1 %v1356_v31 }
  0x60   :  { %899 = vmatpush.bf16.msra.mxu2 %v1364_v53 }
  0x61   :  { %799 = vmatmul.bf16.vlgmr.msra.gmra.mxu0 %v45_v34 }
  0x62   :  { %812 = vmatmul.bf16.vlgmr.msra.gmra.mxu1 %v46_v35 }
  0x9e   :  { %v696_v36 = vpop.f32.mrf.mxu0 }
  0x9f   :  { %v709_v37 = vpop.f32.mrf.mxu1 }
  0xa0   :  { %v710_v54 = vadd.f32 %v709_v37, %v696_v36 }
  0xa6   :  { %v722_v39 = vpop.f32.mrf.mxu2  ;;  %v698_v40 = vpop.f32.mrf.mxu0 }
  0xa7   :  { %v735_v42 = vpop.f32.mrf.mxu3  ;;  %v711_v43 = vpop.f32.mrf.mxu1  ;;  %v723_v57 = vadd.f32 %v722_v39, %v710_v54 }
  0xa9   :  { %v736_v60 = vadd.f32 %v735_v42, %v723_v57 }
  0xae   :  { %v724_v45 = vpop.f32.mrf.mxu2 }
  0xaf   :  { %v737_v47 = vpop.f32.mrf.mxu3 }
  0xbe   :  { %v748_v50 = vpop.f32.mrf.mxu0 }
  0xbf   :  { %v761_v52 = vpop.f32.mrf.mxu1  ;;  %v749_v62 = vadd.f32 %v748_v50, %v736_v60 }
  0xc1   :  { %v762_v0 = vadd.f32 %v761_v52, %v749_v62 }
  0xc6   :  { %v774_v55 = vpop.f32.mrf.mxu2  ;;  %v750_v56 = vpop.f32.mrf.mxu0 }
  0xc7   :  { %v763_v58 = vpop.f32.mrf.mxu1  ;;  %v787_v59 = vpop.f32.mrf.mxu3  ;;  %v775_v1 = vadd.f32 %v774_v55, %v762_v0 }
  0xc9   :  { %v788_v2 = vadd.f32 %v787_v59, %v775_v1 }
  0xce   :  { %v776_v61 = vpop.f32.mrf.mxu2 }
  0xcf   :  { %v789_v63 = vpop.f32.mrf.mxu3 }
  0xde   :  { %v800_v3 = vpop.f32.mrf.mxu0 }
  0xdf   :  { %v813_v4 = vpop.f32.mrf.mxu1  ;;  %v801_v5 = vadd.f32 %v800_v3, %v788_v2 }
  0xe1   :  { %v814_v7 = vadd.f32 %v813_v4, %v801_v5 }
  0xe3   :  { %v821_v9 = vmul.f32 %v1373_v6, %v814_v7 }
  0xe5   :  { %v826_v10 = vadd.f32 %v1374_v8, %v821_v9 }
  0xe6   :  { %v802_v11 = vpop.f32.mrf.mxu0 }
  0xe7   :  { %v815_v12 = vpop.f32.mrf.mxu1  ;;  %v827_v13 = vpack.c.bf16 %v826_v10, %v826_v10 }
  0xe9   :  { %900 = vmatmul.bf16.vlgmr.msra.gmra.mxu2 %v827_v13 }
 0x16c   :  { %v901_v16 = vpop.f32.mrf.mxu2 }
 0x16d   :  { %v909_v17 = vmul.f32 %v1375_v14, %v901_v16 }
 0x16f   :  { %v914_v18 = vadd.f32 %v1376_v15, %v909_v17 }
 0x171   :  { %915 = vst [vmem:[#allocation2] sm:$0xff] %v914_v18 }
 0x172   :  { %926 = dma.vmem_to_hbm [thread:$0]  %s922_s18, 128, %s924_s3, [#allocation3]  }
 0x174   :  { %v903_v19 = vpop.f32.mrf.mxu2 }
 0x175   :  { %1401 = dma.done.wait [#allocation3], 128  }
 0x176   :  { %1402 = vsyncadd [#allocation3], 4294967168 }
 0x177   :  { %931 = vsyncpa [#allocation3], 1 }

// kernel: _lambda_.2
= control target key start
LH: loop header
LB: loop body
LE: loop exit
PB: predicated region body
PF: predicated region fallthrough
CT: control target
= control target key end

     0   :  { %s9313_s15 = smov 0   ;;  %s16981_s0 = inlined_call_operand.<no memory space> [shape: f32[1,1,1], index: 0, kind: input, shape index: {}]   ;;  %s16982_s1 = inlined_call_operand.vmem [shape: f32[8,10,64], index: 1, kind: input, shape index: {}]   ;;  %s16983_s2 = inlined_call_operand.vmem [shape: f32[8,64,64], index: 2, kind: input, shape index: {}]   ;;  %s16984_s3 = inlined_call_operand.vmem [shape: f32[8,64,64], index: 3, kind: input, shape index: {}]   ;;  %s16985_s4 = inlined_call_operand.vmem [shape: f32[8,10,1], index: 4, kind: input, shape index: {}]   ;;  %s16986_s5 = inlined_call_operand.vmem [shape: bf16[4,64,64], index: 5, kind: input, shape index: {}]   ;;  %s16987_s6 = inlined_call_operand.vmem [shape: bf16[4,64,32], index: 6, kind: input, shape index: {}]   ;;  %s16988_s7 = inlined_call_operand.vmem [shape: bf16[4,64,32], index: 7, kind: input, shape index: {}]   ;;  %s16989_s8 = inlined_call_operand.vmem [shape: bf16[4,64,64], index: 8, kind: input, shape index: {}]   ;;  %s16990_s9 = inlined_call_operand.vmem [shape: f32[1,1,16], index: 9, kind: input, shape index: {}]   ;;  %s16991_s10 = inlined_call_operand.vmem [shape: f32[8,10,128], index: 10, kind: output, shape index: {}]  }
   0x1   :  { %v15_v0 = vstv %s16981_s0 }
   0x2   :  { %16 = vst [vmem:[#allocation2] sm:$0x1] %v15_v0 }
   0x3 LB: > { %s8063_s16 = sadd.s32 4294967295, %s9241_s15   ;;  %p8067_p0 = scmp.ge.s32.totalorder %s9241_s15, 1  ;;  %s9241_s15 = sphi %s9313_s15, %s22_s15  }
   0x4   : > { %p352_p1 = scmp.lt.s32.totalorder %s9241_s15, 3 }
   0x6   : > { %p353_p2 = pnand %p8067_p0, %p352_p1 }
   0x8   : > { %356 = sbr.rel (%p353_p2) target bundleno = 2693 (0xa85), region = 60 }
   0xd   : > { %v8493_v1 = vld [vmem:[%s16986_s5 + $0x18] sm:$0xff]  ;;  %s8068_s22 = sshll.u32 %s8063_s16, 2  ;;  %v8492_v5 = vld [vmem:[%s16986_s5 + $0x10] sm:$0xff]  ;;  %v8491_v9 = vld [vmem:[%s16986_s5 + $0x8] sm:$0xff]  ;;  %vm17158_vm0 = vcmask 523264   ;;  %s9243_s27 = smov 112  }
   0xe   : > { %v8497_v2 = vld [vmem:[%s16986_s5 + $0x38] sm:$0xff]  ;;  %p411_p3 = scmp.lt.s32.totalorder %s8068_s22, 7  ;;  %605 = vmatpush.bf16.msra.mxu0 %v8493_v1  ;;  %v8496_v6 = vld [vmem:[%s16986_s5 + $0x30] sm:$0xff]  ;;  %v8495_v10 = vld [vmem:[%s16986_s5 + $0x28] sm:$0xff]  ;;  %s9244_s28 = smov 96   ;;  %vm2024_vm1 = vcmask 64512  }
   0xf   : > { %v8501_v3 = vld [vmem:[%s16986_s5 + $0x58] sm:$0xff]  ;;  %651 = vmatpush.bf16.msra.mxu1 %v8497_v2  ;;  %v8500_v7 = vld [vmem:[%s16986_s5 + $0x50] sm:$0xff]  ;;  %v8499_v11 = vld [vmem:[%s16986_s5 + $0x48] sm:$0xff]  ;;  %s9245_s19 = smov 80   ;;  %s9247_s13 = smov 104   ;;  %vm17162_vm2 = vcmask 517120  }
  0x10   : > { %v8505_v4 = vld [vmem:[%s16986_s5 + $0x78] sm:$0xff]  ;;  %697 = vmatpush.bf16.msra.mxu2 %v8501_v3  ;;  %v8504_v8 = vld [vmem:[%s16986_s5 + $0x70] sm:$0xff]  ;;  %s18089_s22 = smov (!%p411_p3, %s8068_s22), 7  ;;  %v8503_v12 = vld [vmem:[%s16986_s5 + $0x68] sm:$0xff]  ;;  %s9250_s17 = smov 16  }
  0x11   : > { %743 = vmatpush.bf16.msra.mxu3 %v8505_v4  ;;  %s9351_s16 = sshll.u32 %s18089_s22, 4  ;;  %v8490_v27 = vld [vmem:[%s16986_s5] sm:$0xff]  ;;  %s8486_s30 = sshll.u32 %s18089_s22, 6  ;;  %v8509_v40 = vld [vmem:[%s16987_s6 + $0x18] sm:$0xff]  ;;  %v8508_v49 = vld [vmem:[%s16987_s6 + $0x10] sm:$0xff] }
  0x12   : > { %606 = vmatpush.bf16.msra.mxu0 %v8492_v5  ;;  %s9366_s25 = scalar_lea.vmem %s16982_s1, %s9351_s16  ;;  %v8494_v28 = vld [vmem:[%s16986_s5 + $0x20] sm:$0xff]  ;;  %v8513_v41 = vld [vmem:[%s16987_s6 + $0x38] sm:$0xff]  ;;  %s9400_s23 = scalar_lea.vmem %s16983_s2, %s8486_s30  ;;  %v8512_v50 = vld [vmem:[%s16987_s6 + $0x30] sm:$0xff] }
  0x13   : > { %652 = vmatpush.bf16.msra.mxu1 %v8496_v6  ;;  %v447_v13 = vld [vmem:[%s9366_s25] sm:$0xff]  ;;  %v448_v14 = vld [vmem:[%s9366_s25 + $0x8] sm:$0x3]  ;;  %v449_v15 = vld [vmem:[%s9366_s25 + $0x10] sm:$0xff]  ;;  %s9526_s21 = scalar_lea.vmem %s16984_s3, %s8486_s30  ;;  %s9251_s18 = smov 32  }
  0x14   : > { %698 = vmatpush.bf16.msra.mxu2 %v8500_v7  ;;  %v528_v16 = vpack.c.bf16 %v447_v13, %v447_v13  ;;  %v529_v17 = vpack.c.bf16 %v448_v14, %v448_v14  ;;  %v450_v18 = vld [vmem:[%s9366_s25 + $0x18] sm:$0x3]  ;;  %v530_v19 = vpack.c.bf16 %v449_v15, %v449_v15  ;;  %v451_v20 = vld [vmem:[%s9366_s25 + $0x20] sm:$0xff]  ;;  %v452_v21 = vld [vmem:[%s9366_s25 + $0x28] sm:$0x3]  ;;  %s9252_s0 = smov 48   ;;  %s436_s26 = scalar_lea.vmem %s16985_s4, %s9351_s16 }
  0x15   : > { %744 = vmatpush.bf16.msra.mxu3 %v8504_v8  ;;  %v531_v22 = vpack.c.bf16 %v450_v18, %v450_v18  ;;  %v532_v23 = vpack.c.bf16 %v451_v20, %v451_v20  ;;  %v533_v24 = vpack.c.bf16 %v452_v21, %v452_v21  ;;  %v453_v25 = vld [vmem:[%s9366_s25 + $0x30] sm:$0xff]  ;;  %v454_v26 = vld [vmem:[%s9366_s25 + $0x38] sm:$0x3]  ;;  %v8498_v33 = vld [vmem:[%s16986_s5 + $0x40] sm:$0xff]  ;;  %s9254_s29 = smov 64   ;;  %s16953_s30 = scalar_lea.vmem %s16991_s10, %s9351_s16 }
  0x16   : > { %607 = vmatpush.bf16.msra.mxu0 %v8491_v9  ;;  %v570_v29 = vunpack.c.l.b16 %v528_v16  ;;  %v571_v30 = vunpack.c.l.b16 %v529_v17  ;;  %v617_v31 = vunpack.c.l.b16 %v530_v19  ;;  %v534_v32 = vpack.c.bf16 %v453_v25, %v453_v25  ;;  %v8502_v34 = vld [vmem:[%s16986_s5 + $0x60] sm:$0xff]  ;;  %v8517_v47 = vld [vmem:[%s16987_s6 + $0x58] sm:$0xff]  ;;  %v8516_v52 = vld [vmem:[%s16987_s6 + $0x50] sm:$0xff] }
  0x17   : > { %653 = vmatpush.bf16.msra.mxu1 %v8495_v10  ;;  %v618_v35 = vunpack.c.l.b16 %v531_v22  ;;  %v663_v36 = vunpack.c.l.b16 %v532_v23  ;;  %v664_v37 = vunpack.c.l.b16 %v533_v24  ;;  %v535_v38 = vpack.c.bf16 %v454_v26, %v454_v26  ;;  %v8521_v48 = vld [vmem:[%s16987_s6 + $0x78] sm:$0xff]  ;;  %v455_v51 = vld [vmem:[%s9400_s23] sm:$0xff]  ;;  %v8520_v53 = vld [vmem:[%s16987_s6 + $0x70] sm:$0xff] }
  0x18   : > { %699 = vmatpush.bf16.msra.mxu2 %v8499_v11  ;;  %v709_v39 = vunpack.c.l.b16 %v534_v32  ;;  %v572_v42 = vpack.c.b16 %v571_v30, %v570_v29  ;;  %v456_v54 = vld [vmem:[%s9400_s23 + $0x8] sm:$0xff]  ;;  %v463_v55 = vld [vmem:[%s9400_s23 + $0x40] sm:$0xff]  ;;  %v761_v63 = vpack.c.bf16 %v455_v51, %v455_v51  ;;  %v457_v25 = vld [vmem:[%s9400_s23 + $0x10] sm:$0xff] }
  0x19   : > { %745 = vmatpush.bf16.msra.mxu3 %v8503_v12  ;;  %v619_v43 = vpack.c.b16 %v618_v35, %v617_v31  ;;  %v710_v44 = vunpack.c.l.b16 %v535_v38  ;;  %v665_v45 = vpack.c.b16 %v664_v37, %v663_v36  ;;  %v464_v56 = vld [vmem:[%s9400_s23 + $0x48] sm:$0xff]  ;;  %v471_v57 = vld [vmem:[%s9400_s23 + $0x80] sm:$0xff]  ;;  %v762_v0 = vpack.c.bf16 %v456_v54, %v456_v54  ;;  %v458_v26 = vld [vmem:[%s9400_s23 + $0x18] sm:$0xff] }
  0x1a   : > { %608 = vmatpush.bf16.msra.mxu0 %v8490_v27  ;;  %v472_v58 = vld [vmem:[%s9400_s23 + $0x88] sm:$0xff]  ;;  %v479_v59 = vld [vmem:[%s9400_s23 + $0xc0] sm:$0xff]  ;;  %v769_v1 = vpack.c.bf16 %v463_v55, %v463_v55  ;;  %v770_v2 = vpack.c.bf16 %v464_v56, %v464_v56  ;;  %v777_v3 = vpack.c.bf16 %v471_v57, %v471_v57  ;;  %v833_v11 = vunpack.c.l.b16 %v761_v63  ;;  %v465_v27 = vld [vmem:[%s9400_s23 + $0x50] sm:$0xff] }
  0x1b   : > { %654 = vmatpush.bf16.msra.mxu1 %v8494_v28  ;;  %v711_v46 = vpack.c.b16 %v710_v44, %v709_v39  ;;  %v480_v60 = vld [vmem:[%s9400_s23 + $0xc8] sm:$0xff]  ;;  %v778_v4 = vpack.c.bf16 %v472_v58, %v472_v58  ;;  %v785_v5 = vpack.c.bf16 %v479_v59, %v479_v59  ;;  %v8506_v9 = vld [vmem:[%s16987_s6] sm:$0xff]  ;;  %v834_v12 = vunpack.c.l.b16 %v762_v0  ;;  %v466_v28 = vld [vmem:[%s9400_s23 + $0x58] sm:$0xff] }
  0x1c   : > { %700 = vmatpush.bf16.msra.mxu2 %v8498_v33  ;;  %v8507_v61 = vld [vmem:[%s16987_s6 + $0x8] sm:$0xff]  ;;  %v786_v6 = vpack.c.bf16 %v480_v60, %v480_v60  ;;  %v8510_v10 = vld [vmem:[%s16987_s6 + $0x20] sm:$0xff]  ;;  %v918_v13 = vunpack.c.l.b16 %v769_v1  ;;  %v919_v14 = vunpack.c.l.b16 %v770_v2  ;;  %v1003_v15 = vunpack.c.l.b16 %v777_v3  ;;  %v473_v29 = vld [vmem:[%s9400_s23 + $0x90] sm:$0xff] }
  0x1d   : > { %746 = vmatpush.bf16.msra.mxu3 %v8502_v34  ;;  %8099 = vmatmul.msk.bf16.vlgmr.msra.gmra.mxu0 %vm17158_vm0, %v572_v42  ;;  %v8511_v62 = vld [vmem:[%s16987_s6 + $0x28] sm:$0xff]  ;;  %v1004_v16 = vunpack.c.l.b16 %v778_v4  ;;  %v1088_v17 = vunpack.c.l.b16 %v785_v5  ;;  %v8514_v19 = vld [vmem:[%s16987_s6 + $0x40] sm:$0xff]  ;;  %v841_v21 = vpack.c.b16 %v834_v12, %v833_v11  ;;  %v474_v30 = vld [vmem:[%s9400_s23 + $0x98] sm:$0xff]  ;;  %v763_v33 = vpack.c.bf16 %v457_v25, %v457_v25 }
  0x1e   : > { %885 = vmatpush.bf16.msrb.mxu0 %v8509_v40  ;;  %8116 = vmatmul.msk.bf16.vlgmr.msra.gmra.mxu1 %vm17158_vm0, %v619_v43  ;;  %v8515_v7 = vld [vmem:[%s16987_s6 + $0x48] sm:$0xff]  ;;  %v1089_v18 = vunpack.c.l.b16 %v786_v6  ;;  %v8518_v20 = vld [vmem:[%s16987_s6 + $0x60] sm:$0xff]  ;;  %v926_v22 = vpack.c.b16 %v919_v14, %v918_v13  ;;  %v481_v31 = vld [vmem:[%s9400_s23 + $0xd0] sm:$0xff]  ;;  %v764_v34 = vpack.c.bf16 %v458_v26, %v458_v26  ;;  %v771_v35 = vpack.c.bf16 %v465_v27, %v465_v27 }
  0x1f   : > { %970 = vmatpush.bf16.msrb.mxu1 %v8513_v41  ;;  %8133 = vmatmul.msk.bf16.vlgmr.msra.gmra.mxu2 %vm17158_vm0, %v665_v45  ;;  %v8519_v8 = vld [vmem:[%s16987_s6 + $0x68] sm:$0xff]  ;;  %v1011_v23 = vpack.c.b16 %v1004_v16, %v1003_v15  ;;  %v482_v32 = vld [vmem:[%s9400_s23 + $0xd8] sm:$0xff]  ;;  %v772_v36 = vpack.c.bf16 %v466_v28, %v466_v28  ;;  %v779_v37 = vpack.c.bf16 %v473_v29, %v473_v29  ;;  %v835_v41 = vunpack.c.l.b16 %v763_v33  ;;  %v467_v55 = vld [vmem:[%s9400_s23 + $0x60] sm:$0xff] }
  0x20   : > { %8150 = vmatmul.msk.bf16.vlgmr.msra.gmra.mxu3 %vm17158_vm0, %v711_v46  ;;  %1055 = vmatpush.bf16.msrb.mxu2 %v8517_v47  ;;  %v1096_v24 = vpack.c.b16 %v1089_v18, %v1088_v17  ;;  %v780_v38 = vpack.c.bf16 %v474_v30, %v474_v30  ;;  %v787_v39 = vpack.c.bf16 %v481_v31, %v481_v31  ;;  %v836_v42 = vunpack.c.l.b16 %v764_v34  ;;  %v460_v54 = vld [vmem:[%s9400_s23 + $0x28] sm:$0xff]  ;;  %v475_v57 = vld [vmem:[%s9400_s23 + $0xa0] sm:$0xff]  ;;  %v461_v17 = vld [vmem:[%s9400_s23 + $0x30] sm:$0xff] }
  0x21   : > { %1140 = vmatpush.bf16.msrb.mxu3 %v8521_v48  ;;  %v788_v40 = vpack.c.bf16 %v482_v32, %v482_v32  ;;  %v920_v43 = vunpack.c.l.b16 %v771_v35  ;;  %v921_v44 = vunpack.c.l.b16 %v772_v36  ;;  %v1005_v45 = vunpack.c.l.b16 %v779_v37  ;;  %v468_v56 = vld [vmem:[%s9400_s23 + $0x68] sm:$0xff]  ;;  %v483_v59 = vld [vmem:[%s9400_s23 + $0xe0] sm:$0xff]  ;;  %v462_v18 = vld [vmem:[%s9400_s23 + $0x38] sm:$0xff] }
  0x22   : > { %886 = vmatpush.bf16.msrb.mxu0 %v8508_v49  ;;  %v1006_v46 = vunpack.c.l.b16 %v780_v38  ;;  %v1090_v47 = vunpack.c.l.b16 %v787_v39  ;;  %v842_v49 = vpack.c.b16 %v836_v42, %v835_v41  ;;  %v476_v58 = vld [vmem:[%s9400_s23 + $0xa8] sm:$0xff]  ;;  %v773_v63 = vpack.c.bf16 %v467_v55, %v467_v55 }
  0x23   : > { %971 = vmatpush.bf16.msrb.mxu1 %v8512_v50  ;;  %v1091_v48 = vunpack.c.l.b16 %v788_v40  ;;  %v927_v50 = vpack.c.b16 %v921_v44, %v920_v43  ;;  %v484_v60 = vld [vmem:[%s9400_s23 + $0xe8] sm:$0xff]  ;;  %v774_v0 = vpack.c.bf16 %v468_v56, %v468_v56  ;;  %v781_v1 = vpack.c.bf16 %v475_v57, %v475_v57 }
  0x24   : > { %1056 = vmatpush.bf16.msrb.mxu2 %v8516_v52  ;;  %v1012_v51 = vpack.c.b16 %v1006_v46, %v1005_v45  ;;  %v782_v2 = vpack.c.bf16 %v476_v58, %v476_v58  ;;  %v789_v3 = vpack.c.bf16 %v483_v59, %v483_v59  ;;  %v790_v4 = vpack.c.bf16 %v484_v60, %v484_v60  ;;  %v8525_v45 = vld [vmem:[%s16988_s7 + $0x18] sm:$0xff]  ;;  %v8523_v57 = vld [vmem:[%s16988_s7 + $0x8] sm:$0xff] }
  0x25   : > { %1141 = vmatpush.bf16.msrb.mxu3 %v8520_v53  ;;  %v1097_v52 = vpack.c.b16 %v1091_v48, %v1090_v47  ;;  %v459_v53 = vld [vmem:[%s9400_s23 + $0x20] sm:$0xff]  ;;  %v767_v25 = vpack.c.bf16 %v461_v17, %v461_v17  ;;  %v768_v26 = vpack.c.bf16 %v462_v18, %v462_v18  ;;  %v8529_v46 = vld [vmem:[%s16988_s7 + $0x38] sm:$0xff]  ;;  %v8527_v58 = vld [vmem:[%s16988_s7 + $0x28] sm:$0xff] }
  0x26   : > { %887 = vmatpush.bf16.msrb.mxu0 %v8507_v61  ;;  %v765_v61 = vpack.c.bf16 %v459_v53, %v459_v53  ;;  %v1092_v11 = vunpack.c.l.b16 %v789_v3  ;;  %v1093_v12 = vunpack.c.l.b16 %v790_v4  ;;  %v8533_v53 = vld [vmem:[%s16988_s7 + $0x58] sm:$0xff] }
  0x27   : > { %972 = vmatpush.bf16.msrb.mxu1 %v8511_v62  ;;  %v766_v62 = vpack.c.bf16 %v460_v54, %v460_v54  ;;  %v839_v33 = vunpack.c.l.b16 %v767_v25  ;;  %v840_v34 = vunpack.c.l.b16 %v768_v26  ;;  %v8537_v54 = vld [vmem:[%s16988_s7 + $0x78] sm:$0xff] }
  0x28   : > { %1057 = vmatpush.bf16.msrb.mxu2 %v8515_v7  ;;  %v837_v5 = vunpack.c.l.b16 %v765_v61  ;;  %v922_v7 = vunpack.c.l.b16 %v773_v63  ;;  %v1098_v16 = vpack.c.b16 %v1093_v12, %v1092_v11  ;;  %v8522_v12 = vld [vmem:[%s16988_s7] sm:$0xff] }
  0x29   : > { %1142 = vmatpush.bf16.msrb.mxu3 %v8519_v8  ;;  %v838_v6 = vunpack.c.l.b16 %v766_v62  ;;  %v923_v8 = vunpack.c.l.b16 %v774_v0  ;;  %v844_v41 = vpack.c.b16 %v840_v34, %v839_v33  ;;  %v8532_v0 = vld [vmem:[%s16988_s7 + $0x50] sm:$0xff] }
  0x2a   : > { %888 = vmatpush.bf16.msrb.mxu0 %v8506_v9  ;;  %v1007_v9 = vunpack.c.l.b16 %v781_v1  ;;  %v8536_v1 = vld [vmem:[%s16988_s7 + $0x70] sm:$0xff] }
  0x2b   : > { %973 = vmatpush.bf16.msrb.mxu1 %v8510_v10  ;;  %v1008_v10 = vunpack.c.l.b16 %v782_v2  ;;  %v843_v13 = vpack.c.b16 %v838_v6, %v837_v5  ;;  %v928_v14 = vpack.c.b16 %v923_v8, %v922_v7  ;;  %v487_v2 = vld [vmem:[%s9526_s21] sm:$0xff]  ;;  %v488_v6 = vld [vmem:[%s9526_s21 + $0x8] sm:$0xff] }
  0x2c   : > { %1058 = vmatpush.bf16.msrb.mxu2 %v8514_v19  ;;  %v469_v19 = vld [vmem:[%s9400_s23 + $0x70] sm:$0xff]  ;;  %v1197_v7 = vpack.c.bf16 %v487_v2, %v487_v2  ;;  %v495_v8 = vld [vmem:[%s9526_s21 + $0x40] sm:$0xff] }
  0x2d   : > { %1143 = vmatpush.bf16.msrb.mxu3 %v8518_v20  ;;  %8167 = vmatmul.msk.bf16.vlgmr.msrb.gmra.mxu0 %vm17158_vm0, %v841_v21  ;;  %v1013_v15 = vpack.c.b16 %v1008_v10, %v1007_v9  ;;  %v470_v20 = vld [vmem:[%s9400_s23 + $0x78] sm:$0xff]  ;;  %v477_v21 = vld [vmem:[%s9400_s23 + $0xb0] sm:$0xff]  ;;  %v775_v27 = vpack.c.bf16 %v469_v19, %v469_v19  ;;  %v496_v9 = vld [vmem:[%s9526_s21 + $0x48] sm:$0xff] }
  0x2e   : > { %8187 = vmatmul.msk.bf16.vlgmr.msrb.gmra.mxu1 %vm17158_vm0, %v926_v22  ;;  %v478_v22 = vld [vmem:[%s9400_s23 + $0xb8] sm:$0xff]  ;;  %v776_v28 = vpack.c.bf16 %v470_v20, %v470_v20  ;;  %v783_v29 = vpack.c.bf16 %v477_v21, %v477_v21  ;;  %1321 = vmatpush.bf16.msra.mxu0 %v8525_v45  ;;  %v1206_v17 = vpack.c.bf16 %v496_v9, %v496_v9  ;;  %v8531_v20 = vld [vmem:[%s16988_s7 + $0x48] sm:$0xff] }
  0x2f   : > { %8207 = vmatmul.msk.bf16.vlgmr.msrb.gmra.mxu2 %vm17158_vm0, %v1011_v23  ;;  %v485_v23 = vld [vmem:[%s9400_s23 + $0xf0] sm:$0xff]  ;;  %v784_v30 = vpack.c.bf16 %v478_v22, %v478_v22  ;;  %v924_v35 = vunpack.c.l.b16 %v775_v27  ;;  %1406 = vmatpush.bf16.msra.mxu1 %v8529_v46  ;;  %v8535_v21 = vld [vmem:[%s16988_s7 + $0x68] sm:$0xff] }
  0x30   : > { %8227 = vmatmul.msk.bf16.vlgmr.msrb.gmra.mxu3 %vm17158_vm0, %v1096_v24  ;;  %v486_v24 = vld [vmem:[%s9400_s23 + $0xf8] sm:$0xff]  ;;  %v791_v31 = vpack.c.bf16 %v485_v23, %v485_v23  ;;  %v925_v36 = vunpack.c.l.b16 %v776_v28  ;;  %v1009_v37 = vunpack.c.l.b16 %v783_v29  ;;  %1491 = vmatpush.bf16.msra.mxu2 %v8533_v53 }
  0x31   : > { %v792_v32 = vpack.c.bf16 %v486_v24, %v486_v24  ;;  %v1010_v38 = vunpack.c.l.b16 %v784_v30  ;;  %1576 = vmatpush.bf16.msra.mxu3 %v8537_v54  ;;  %v1355_v24 = vunpack.c.l.b16 %v1206_v17  ;;  %v503_v30 = vld [vmem:[%s9526_s21 + $0x80] sm:$0xff] }
  0x32   : > { %v1094_v39 = vunpack.c.l.b16 %v791_v31  ;;  %v929_v42 = vpack.c.b16 %v925_v36, %v924_v35  ;;  %v504_v31 = vld [vmem:[%s9526_s21 + $0x88] sm:$0xff] }
  0x33   : > { %v1095_v40 = vunpack.c.l.b16 %v792_v32  ;;  %v1014_v43 = vpack.c.b16 %v1010_v38, %v1009_v37  ;;  %v511_v32 = vld [vmem:[%s9526_s21 + $0xc0] sm:$0xff]  ;;  %v1213_v38 = vpack.c.bf16 %v503_v30, %v503_v30 }
  0x34   : > { %1492 = vmatpush.bf16.msra.mxu2 %v8532_v0  ;;  %v1221_v46 = vpack.c.bf16 %v511_v32, %v511_v32  ;;  %v497_v0 = vld [vmem:[%s9526_s21 + $0x50] sm:$0xff] }
  0x35   : > { %v1099_v44 = vpack.c.b16 %v1095_v40, %v1094_v39  ;;  %1577 = vmatpush.bf16.msra.mxu3 %v8536_v1  ;;  %v512_v39 = vld [vmem:[%s9526_s21 + $0xc8] sm:$0xff]  ;;  %v8530_v40 = vld [vmem:[%s16988_s7 + $0x40] sm:$0xff]  ;;  %v1439_v45 = vunpack.c.l.b16 %v1213_v38 }
  0x38   : > { %1493 = vmatpush.bf16.msra.mxu2 %v8531_v20 }
  0x39   : > { %1578 = vmatpush.bf16.msra.mxu3 %v8535_v21 }
  0x3c   : > { %1494 = vmatpush.bf16.msra.mxu2 %v8530_v40  ;;  %v492_v40 = vld [vmem:[%s9526_s21 + $0x28] sm:$0xff] }
  0x3d   : > { %8168 = vmatmul.msk.bf16.gmra.mxu0 %vm17158_vm0, %v842_v49 }
  0x3e   : > { %8188 = vmatmul.msk.bf16.gmra.mxu1 %vm17158_vm0, %v927_v50 }
  0x3f   : > { %8208 = vmatmul.msk.bf16.gmra.mxu2 %vm17158_vm0, %v1012_v51  ;;  %v8524_v51 = vld [vmem:[%s16988_s7 + $0x10] sm:$0xff] }
  0x40   : > { %8228 = vmatmul.msk.bf16.gmra.mxu3 %vm17158_vm0, %v1097_v52  ;;  %v8528_v52 = vld [vmem:[%s16988_s7 + $0x30] sm:$0xff]  ;;  %1322 = vmatpush.bf16.msra.mxu0 %v8524_v51 }
  0x41   : > { %1407 = vmatpush.bf16.msra.mxu1 %v8528_v52  ;;  %v1524_v52 = vunpack.c.l.b16 %v1221_v46 }
  0x44   : > { %1323 = vmatpush.bf16.msra.mxu0 %v8523_v57 }
  0x45   : > { %1408 = vmatpush.bf16.msra.mxu1 %v8527_v58 }
  0x48   : > { %1324 = vmatpush.bf16.msra.mxu0 %v8522_v12 }
  0x4d   : > { %8169 = vmatmul.msk.bf16.gmra.mxu0 %vm17158_vm0, %v843_v13  ;;  %v8526_v13 = vld [vmem:[%s16988_s7 + $0x20] sm:$0xff] }
  0x4e   : > { %8189 = vmatmul.msk.bf16.gmra.mxu1 %vm17158_vm0, %v928_v14  ;;  %v1198_v14 = vpack.c.bf16 %v488_v6, %v488_v6 }
  0x4f   : > { %8209 = vmatmul.msk.bf16.gmra.mxu2 %vm17158_vm0, %v1013_v15  ;;  %v1205_v15 = vpack.c.bf16 %v495_v8, %v495_v8  ;;  %1409 = vmatpush.bf16.msra.mxu1 %v8526_v13 }
  0x50   : > { %8229 = vmatmul.msk.bf16.gmra.mxu3 %vm17158_vm0, %v1098_v16  ;;  %v1269_v16 = vunpack.c.l.b16 %v1197_v7  ;;  %v1270_v22 = vunpack.c.l.b16 %v1198_v14 }
  0x51   : > { %v1354_v23 = vunpack.c.l.b16 %v1205_v15  ;;  %v505_v15 = vld [vmem:[%s9526_s21 + $0x90] sm:$0xff] }
  0x52   : > { %v1277_v29 = vpack.c.b16 %v1270_v22, %v1269_v16  ;;  %v513_v16 = vld [vmem:[%s9526_s21 + $0xd0] sm:$0xff]  ;;  %v1215_v21 = vpack.c.bf16 %v505_v15, %v505_v15  ;;  %v514_v22 = vld [vmem:[%s9526_s21 + $0xd8] sm:$0xff] }
  0x53   : > { %v1362_v37 = vpack.c.b16 %v1355_v24, %v1354_v23  ;;  %v1223_v23 = vpack.c.bf16 %v513_v16, %v513_v16  ;;  %v1224_v24 = vpack.c.bf16 %v514_v22, %v514_v22 }
  0x5d   : > { %8170 = vmatmul.msk.bf16.gmra.mxu0 %vm17158_vm0, %v844_v41  ;;  %v8534_v41 = vld [vmem:[%s16988_s7 + $0x60] sm:$0xff] }
  0x5e   : > { %8190 = vmatmul.msk.bf16.gmra.mxu1 %vm17158_vm0, %v929_v42  ;;  %v1214_v42 = vpack.c.bf16 %v504_v31, %v504_v31  ;;  %1579 = vmatpush.bf16.msra.mxu3 %v8534_v41  ;;  %v499_v41 = vld [vmem:[%s9526_s21 + $0x60] sm:$0xff] }
  0x5f   : > { %8210 = vmatmul.msk.bf16.gmra.mxu2 %vm17158_vm0, %v1014_v43 }
  0x60   : > { %8230 = vmatmul.msk.bf16.gmra.mxu3 %vm17158_vm0, %v1099_v44 }
  0x6d   : > { %8247 = vmatmul.msk.bf16.vlgmr.msra.gmra.mxu0 %vm17158_vm0, %v1277_v29 }
  0x6e   : > { %8267 = vmatmul.msk.bf16.vlgmr.msra.gmra.mxu1 %vm17158_vm0, %v1362_v37 }
  0x9a   : > { %v610_v47 = vpop.f32.mrf.mxu0 }
  0x9b   : > { %v656_v48 = vpop.f32.mrf.mxu1  ;;  %v9502_v49 = vpack.c.bf16 %v610_v47, %v610_v47  ;;  %v1440_v47 = vunpack.c.l.b16 %v1214_v42 }
  0x9c   : > { %v755_v50 = vpack.c.bf16 %v656_v48, %v656_v48  ;;  %v1222_v48 = vpack.c.bf16 %v512_v39, %v512_v39  ;;  %v491_v39 = vld [vmem:[%s9526_s21 + $0x20] sm:$0xff] }
  0x9d   : > { %1657 = vrot.lane.b32.xlu2 %v9502_v49, %s9244_s28  ;;  %1641 = vrot.lane.b32.xlu0 %v9502_v49, %s9243_s27  ;;  %v2009_v3 = vunpack.c.l.b16 %v9502_v49  ;;  %v1201_v42 = vpack.c.bf16 %v491_v39, %v491_v39 }
  0x9e   : > { %1645 = vrot.lane.b32.xlu1 %v755_v50, %s9243_s27  ;;  %v2054_v4 = vunpack.c.l.b16 %v755_v50  ;;  %v1525_v53 = vunpack.c.l.b16 %v1222_v48 }
  0xa2   : > { %v702_v55 = vpop.f32.mrf.mxu2  ;;  %v612_v60 = vpop.f32.mrf.mxu0 }
  0xa3   : > { %v748_v56 = vpop.f32.mrf.mxu3  ;;  %v9534_v59 = vpack.c.bf16 %v702_v55, %v702_v55  ;;  %v658_v61 = vpop.f32.mrf.mxu1  ;;  %v9536_v62 = vpack.c.bf16 %v612_v60, %v612_v60  ;;  %v489_v60 = vld [vmem:[%s9526_s21 + $0x10] sm:$0xff] }
  0xa4   : > { %v9538_v63 = vpack.c.bf16 %v658_v61, %v658_v61  ;;  %v9548_v5 = vpack.c.bf16 %v748_v56, %v748_v56  ;;  %v1532_v56 = vpack.c.b16 %v1525_v53, %v1524_v52  ;;  %v490_v61 = vld [vmem:[%s9526_s21 + $0x18] sm:$0xff]  ;;  %v1199_v1 = vpack.c.bf16 %v489_v60, %v489_v60 }
  0xa5   : > { %v2010_v10 = vunpack.c.l.b16 %v9536_v62  ;;  %1649 = vrot.lane.b32.xlu2 %v9534_v59, %s9243_s27  ;;  %1677 = vrot.lane.b32.xlu0 %v755_v50, %s9245_s19  ;;  %v2098_v25 = vunpack.c.l.b16 %v9534_v59  ;;  %v1200_v2 = vpack.c.bf16 %v490_v61, %v490_v61 }
  0xa6   : > { %v2055_v11 = vunpack.c.l.b16 %v9538_v63  ;;  %1661 = vrot.lane.b32.xlu1 %v755_v50, %s9244_s28  ;;  %v2142_v26 = vunpack.c.l.b16 %v9548_v5  ;;  %8307 = vmatmul.msk.bf16.vlgmr.msra.gmra.mxu3 %vm17158_vm0, %v1532_v56  ;;  %v1271_v7 = vunpack.c.l.b16 %v1199_v1  ;;  %v515_v1 = vld [vmem:[%s9526_s21 + $0xe0] sm:$0xff] }
  0xa7   : > { %v9565_v18 = vpack.c.b16 %v2010_v10, %v2009_v3  ;;  %v498_v3 = vld [vmem:[%s9526_s21 + $0x58] sm:$0xff]  ;;  %v1272_v8 = vunpack.c.l.b16 %v1200_v2 }
  0xa8   : > { %v9567_v19 = vpack.c.b16 %v2055_v11, %v2054_v4  ;;  %v1207_v4 = vpack.c.bf16 %v497_v0, %v497_v0  ;;  %v1208_v6 = vpack.c.bf16 %v498_v3, %v498_v3  ;;  %v507_v0 = vld [vmem:[%s9526_s21 + $0xa0] sm:$0xff] }
  0xa9   : > { %v1278_v11 = vpack.c.b16 %v1272_v8, %v1271_v7  ;;  %v1225_v7 = vpack.c.bf16 %v515_v1, %v515_v1 }
  0xaa   : > { %v704_v27 = vpop.f32.mrf.mxu2  ;;  %v9584_v35 = vpop.f32.mrf.mxu0  ;;  %v1356_v9 = vunpack.c.l.b16 %v1207_v4  ;;  %v1357_v10 = vunpack.c.l.b16 %v1208_v6  ;;  %v1217_v4 = vpack.c.bf16 %v507_v0, %v507_v0  ;;  %v516_v6 = vld [vmem:[%s9526_s21 + $0xe8] sm:$0xff] }
  0xab   : > { %v750_v28 = vpop.f32.mrf.mxu3  ;;  %v9580_v33 = vpack.c.bf16 %v704_v27, %v704_v27  ;;  %v9586_v36 = vpop.f32.mrf.mxu1  ;;  %8248 = vmatmul.msk.bf16.gmra.mxu0 %vm17158_vm0, %v1278_v11  ;;  %v1526_v27 = vunpack.c.l.b16 %v1223_v23  ;;  %v1226_v8 = vpack.c.bf16 %v516_v6, %v516_v6  ;;  %v1528_v11 = vunpack.c.l.b16 %v1225_v7  ;;  %v493_v23 = vld [vmem:[%s9526_s21 + $0x30] sm:$0xff] }
  0xac   : > { %v9582_v34 = vpack.c.bf16 %v750_v28, %v750_v28  ;;  %v1363_v14 = vpack.c.b16 %v1357_v10, %v1356_v9  ;;  %v1527_v28 = vunpack.c.l.b16 %v1224_v24  ;;  %v1443_v9 = vunpack.c.l.b16 %v1217_v4  ;;  %v494_v24 = vld [vmem:[%s9526_s21 + $0x38] sm:$0xff] }
  0xad   : > { %v2099_v43 = vunpack.c.l.b16 %v9580_v33  ;;  %1669 = vrot.lane.b32.xlu2 %v9548_v5, %s9244_s28  ;;  %1653 = vrot.lane.b32.xlu0 %v9548_v5, %s9243_s27 }
  0xae   : > { %v2143_v44 = vunpack.c.l.b16 %v9582_v34  ;;  %1673 = vrot.lane.b32.xlu1 %v9502_v49, %s9245_s19  ;;  %v1447_v49 = vpack.c.b16 %v1440_v47, %v1439_v45  ;;  %8268 = vmatmul.msk.bf16.gmra.mxu1 %vm17158_vm0, %v1363_v14  ;;  %v1533_v30 = vpack.c.b16 %v1527_v28, %v1526_v27  ;;  %v1209_v45 = vpack.c.bf16 %v499_v41, %v499_v41  ;;  %v502_v28 = vld [vmem:[%s9526_s21 + $0x78] sm:$0xff] }
  0xaf   : > { %v9603_v50 = vpack.c.b16 %v2099_v43, %v2098_v25  ;;  %v1441_v25 = vunpack.c.l.b16 %v1215_v21  ;;  %v1202_v43 = vpack.c.bf16 %v492_v40, %v492_v40  ;;  %v1273_v47 = vunpack.c.l.b16 %v1201_v42 }
  0xb0   : > { %v9605_v51 = vpack.c.b16 %v2143_v44, %v2142_v26  ;;  %8287 = vmatmul.msk.bf16.vlgmr.msra.gmra.mxu2 %vm17158_vm0, %v1447_v49  ;;  %v500_v44 = vld [vmem:[%s9526_s21 + $0x68] sm:$0xff]  ;;  %v1358_v52 = vunpack.c.l.b16 %v1209_v45  ;;  %v1529_v14 = vunpack.c.l.b16 %v1226_v8  ;;  %v1204_v27 = vpack.c.bf16 %v494_v24, %v494_v24 }
  0xb1   : > { %v1210_v46 = vpack.c.bf16 %v500_v44, %v500_v44  ;;  %v1274_v48 = vunpack.c.l.b16 %v1202_v43  ;;  %v9707_v44 = vpack.c.bf16 %v9586_v36, %v9586_v36  ;;  %v518_v36 = vld [vmem:[%s9526_s21 + $0xf8] sm:$0xff] }
  0xb2   : > { %v9609_v54 = vpop.f32.mrf.mxu2  ;;  %v9614_v57 = vpop.f32.mrf.mxu0  ;;  %v1276_v40 = vunpack.c.l.b16 %v1204_v27  ;;  %v1228_v4 = vpack.c.bf16 %v518_v36, %v518_v36 }
  0xb3   : > { %v9611_v55 = vpop.f32.mrf.mxu3  ;;  %v9616_v58 = vpop.f32.mrf.mxu1  ;;  %v1359_v49 = vunpack.c.l.b16 %v1210_v46  ;;  %v1279_v53 = vpack.c.b16 %v1274_v48, %v1273_v47  ;;  %v509_v47 = vld [vmem:[%s9526_s21 + $0xb0] sm:$0xff]  ;;  %v510_v48 = vld [vmem:[%s9526_s21 + $0xb8] sm:$0xff] }
  0xb4   : > { %v1220_v0 = vpack.c.bf16 %v510_v48, %v510_v48 }
  0xb5   : > { %1681 = vrot.lane.b32.xlu2 %v9534_v59, %s9245_s19  ;;  %1665 = vrot.lane.b32.xlu0 %v9534_v59, %s9244_s28  ;;  %v1364_v61 = vpack.c.b16 %v1359_v49, %v1358_v52  ;;  %v517_v52 = vld [vmem:[%s9526_s21 + $0xf0] sm:$0xff] }
  0xb6   : > { %1685 = vrot.lane.b32.xlu1 %v9548_v5, %s9245_s19  ;;  %v506_v5 = vld [vmem:[%s9526_s21 + $0x98] sm:$0xff]  ;;  %8308 = vmatmul.msk.bf16.gmra.mxu3 %vm17158_vm0, %v1533_v30  ;;  %v1212_v30 = vpack.c.bf16 %v502_v28, %v502_v28 }
  0xb7   : > { %v1216_v59 = vpack.c.bf16 %v506_v5, %v506_v5  ;;  %v1534_v5 = vpack.c.b16 %v1529_v14, %v1528_v11  ;;  %v9739_v11 = vpack.c.bf16 %v9611_v55, %v9611_v55 }
  0xb8   : > { %v1361_v42 = vunpack.c.l.b16 %v1212_v30  ;;  %v9762_v30 = vpack.c.bf16 %v9614_v57, %v9614_v57 }
  0xb9   : > { %v1442_v26 = vunpack.c.l.b16 %v1216_v59 }
  0xba   : > { %v9629_v12 = vpop.f32.mrf.mxu2  ;;  %v9636_v17 = vpop.f32.mrf.mxu0 }
  0xbb   : > { %v9631_v13 = vpop.f32.mrf.mxu3  ;;  %v9638_v20 = vpop.f32.mrf.mxu1  ;;  %v1448_v29 = vpack.c.b16 %v1442_v26, %v1441_v25  ;;  %8249 = vmatmul.msk.bf16.gmra.mxu0 %vm17158_vm0, %v1279_v53  ;;  %v501_v25 = vld [vmem:[%s9526_s21 + $0x70] sm:$0xff]  ;;  %v1203_v26 = vpack.c.bf16 %v493_v23, %v493_v23 }
  0xbd   : > { %1663 = vrot.lane.b32.xlu2 %v9538_v63, %s9244_s28  ;;  %1643 = vrot.lane.b32.xlu0 %v9536_v62, %s9243_s27  ;;  %v1275_v39 = vunpack.c.l.b16 %v1203_v26 }
  0xbe   : > { %1647 = vrot.lane.b32.xlu1 %v9538_v63, %s9243_s27  ;;  %8269 = vmatmul.msk.bf16.gmra.mxu1 %vm17158_vm0, %v1364_v61  ;;  %v1219_v61 = vpack.c.bf16 %v509_v47, %v509_v47 }
  0xbf   : > { %v1280_v43 = vpack.c.b16 %v1276_v40, %v1275_v39 }
  0xc0   : > { %8288 = vmatmul.msk.bf16.gmra.mxu2 %vm17158_vm0, %v1448_v29  ;;  %v1211_v29 = vpack.c.bf16 %v501_v25, %v501_v25  ;;  %v1445_v1 = vunpack.c.l.b16 %v1219_v61 }
  0xc2   : > { %v9649_v31 = vpop.f32.mrf.mxu2  ;;  %v9654_v37 = vpop.f32.mrf.mxu0  ;;  %v1360_v41 = vunpack.c.l.b16 %v1211_v29 }
  0xc3   : > { %v9651_v32 = vpop.f32.mrf.mxu3  ;;  %v9656_v38 = vpop.f32.mrf.mxu1  ;;  %v9791_v47 = vpack.c.bf16 %v9654_v37, %v9654_v37 }
  0xc5   : > { %1675 = vrot.lane.b32.xlu2 %v9536_v62, %s9245_s19  ;;  %1659 = vrot.lane.b32.xlu0 %v9536_v62, %s9244_s28 }
  0xc6   : > { %1679 = vrot.lane.b32.xlu1 %v9538_v63, %s9245_s19  ;;  %v508_v63 = vld [vmem:[%s9526_s21 + $0xa8] sm:$0xff]  ;;  %8309 = vmatmul.msk.bf16.gmra.mxu3 %vm17158_vm0, %v1534_v5 }
  0xc7   : > { %v1218_v62 = vpack.c.bf16 %v508_v63, %v508_v63  ;;  %v1227_v63 = vpack.c.bf16 %v517_v52, %v517_v52 }
  0xc9   : > { %v1444_v10 = vunpack.c.l.b16 %v1218_v62  ;;  %v1530_v62 = vunpack.c.l.b16 %v1227_v63  ;;  %v9825_v63 = vpack.c.bf16 %v9638_v20, %v9638_v20 }
  0xca   : > { %v9669_v56 = vpop.f32.mrf.mxu2  ;;  %v9676_v2 = vpop.f32.mrf.mxu0 }
  0xcb   : > { %v9671_v60 = vpop.f32.mrf.mxu3  ;;  %v9678_v3 = vpop.f32.mrf.mxu1  ;;  %v1449_v15 = vpack.c.b16 %v1444_v10, %v1443_v9  ;;  %8250 = vmatmul.msk.bf16.gmra.mxu0 %vm17158_vm0, %v1280_v43  ;;  %v1531_v9 = vunpack.c.l.b16 %v1228_v4  ;;  %v9735_v10 = vpack.c.bf16 %v9609_v54, %v9609_v54  ;;  %v9743_v14 = vpack.c.bf16 %v9676_v2, %v9676_v2 }
  0xcc   : > { %v9748_v23 = vpack.c.bf16 %v9678_v3, %v9678_v3  ;;  %v9767_v3 = vpack.c.bf16 %v9616_v58, %v9616_v58 }
  0xcd   : > { %1651 = vrot.lane.b32.xlu2 %v9580_v33, %s9243_s27  ;;  %1671 = vrot.lane.b32.xlu0 %v9582_v34, %s9244_s28  ;;  %v1535_v55 = vpack.c.b16 %v1531_v9, %v1530_v62  ;;  %v2016_v58 = vunpack.c.l.b16 %v9743_v14 }
  0xce   : > { %1655 = vrot.lane.b32.xlu1 %v9582_v34, %s9243_s27 }
  0xd0   : > { %8289 = vmatmul.msk.bf16.gmra.mxu2 %vm17158_vm0, %v1449_v15 }
  0xd2   : > { %v9689_v16 = vpop.f32.mrf.mxu2  ;;  %v902_v59 = vpop.f32.mrf.mxu0 }
  0xd3   : > { %v9691_v21 = vpop.f32.mrf.mxu3  ;;  %v987_v22 = vpop.f32.mrf.mxu1  ;;  %v9750_v24 = vpack.c.bf16 %v902_v59, %v902_v59  ;;  %v9771_v59 = vpack.c.bf16 %v9636_v17, %v9636_v17  ;;  %v2061_v17 = vunpack.c.l.b16 %v9748_v23  ;;  %v9795_v48 = vpack.c.bf16 %v9689_v16, %v9689_v16 }
  0xd4   : > { %v9752_v54 = vpack.c.bf16 %v987_v22, %v987_v22  ;;  %v9799_v52 = vpack.c.bf16 %v9691_v21, %v9691_v21 }
  0xd5   : > { %1687 = vrot.lane.b32.xlu2 %v9582_v34, %s9245_s19  ;;  %1683 = vrot.lane.b32.xlu0 %v9580_v33, %s9245_s19  ;;  %v1365_v34 = vpack.c.b16 %v1361_v42, %v1360_v41  ;;  %v2017_v43 = vunpack.c.l.b16 %v9750_v24  ;;  %v2105_v9 = vunpack.c.l.b16 %v9795_v48 }
  0xd6   : > { %1667 = vrot.lane.b32.xlu1 %v9580_v33, %s9244_s28  ;;  %v9718_v33 = vpack.c.bf16 %v9584_v35, %v9584_v35  ;;  %s9246_s28 = smov 120   ;;  %v1446_v35 = vunpack.c.l.b16 %v1220_v0  ;;  %8310 = vmatmul.msk.bf16.gmra.mxu3 %vm17158_vm0, %v1535_v55  ;;  %v2149_v20 = vunpack.c.l.b16 %v9799_v52 }
  0xd7   : > { %8270 = vmatmul.msk.bf16.gmra.mxu1 %vm17158_vm0, %v1365_v34  ;;  %v2062_v34 = vunpack.c.l.b16 %v9752_v54 }
  0xd8   : > { %v1450_v8 = vpack.c.b16 %v1446_v35, %v1445_v1  ;;  %v9829_v1 = vpack.c.bf16 %v9656_v38, %v9656_v38  ;;  %v2022_v35 = vpack.c.b16 %v2017_v43, %v2016_v58  ;;  %v2015_v38 = vunpack.c.l.b16 %v9791_v47 }
  0xd9   : > { %v2067_v4 = vpack.c.b16 %v2062_v34, %v2061_v17  ;;  %v9869_v43 = vpack.c.bf16 %v9669_v56, %v9669_v56  ;;  %v9875_v34 = vpack.c.bf16 %v9671_v60, %v9671_v60  ;;  %v9885_v56 = vpack.c.bf16 %v9631_v13, %v9631_v13 }
  0xda   : > { %v9709_v45 = vpop.f32.mrf.mxu2  ;;  %v905_v49 = vpop.f32.mrf.mxu0 }
  0xdb   : > { %v9711_v46 = vpop.f32.mrf.mxu3  ;;  %v990_v53 = vpop.f32.mrf.mxu1  ;;  %v9729_v6 = vpack.c.bf16 %v905_v49, %v905_v49  ;;  %v9803_v49 = vpack.c.bf16 %v9709_v45, %v9709_v45 }
  0xdc   : > { %v9731_v7 = vpack.c.bf16 %v990_v53, %v990_v53  ;;  %v9807_v53 = vpack.c.bf16 %v9711_v46, %v9711_v46 }
  0xdd   : > { %1737 = vrot.lane.b32.xlu2 %v9707_v44, %s9246_s28  ;;  %1721 = vrot.lane.b32.xlu0 %v9718_v33, %s9246_s28  ;;  %v2018_v2 = vunpack.c.l.b16 %v9729_v6 }
  0xde   : > { %1801 = vrot.lane.b32.xlu1 %v9707_v44, %s9243_s27  ;;  %v2063_v29 = vunpack.c.l.b16 %v9731_v7  ;;  %v2150_v55 = vunpack.c.l.b16 %v9807_v53 }
  0xe0   : > { %8290 = vmatmul.msk.bf16.gmra.mxu2 %vm17158_vm0, %v1450_v8 }
  0xe2   : > { %v1075_v15 = vpop.f32.mrf.mxu2  ;;  %v907_v25 = vpop.f32.mrf.mxu0 }
  0xe3   : > { %v1160_v5 = vpop.f32.mrf.mxu3  ;;  %v992_v26 = vpop.f32.mrf.mxu1  ;;  %v9754_v27 = vpack.c.bf16 %v907_v25, %v907_v25  ;;  %v9779_v39 = vpack.c.bf16 %v1075_v15, %v1075_v15  ;;  %v2014_v15 = vunpack.c.l.b16 %v9771_v59 }
  0xe4   : > { %v9756_v28 = vpack.c.bf16 %v992_v26, %v992_v26  ;;  %v9781_v40 = vpack.c.bf16 %v1160_v5, %v1160_v5  ;;  %v2106_v26 = vunpack.c.l.b16 %v9803_v49 }
  0xe5   : > { %1785 = vrot.lane.b32.xlu2 %v9718_v33, %s9243_s27  ;;  %v2019_v22 = vunpack.c.l.b16 %v9754_v27  ;;  %1769 = vrot.lane.b32.xlu0 %v9739_v11, %s9246_s28  ;;  %v2107_v45 = vunpack.c.l.b16 %v9779_v39 }
  0xe6   : > { %1753 = vrot.lane.b32.xlu1 %v9735_v10, %s9246_s28  ;;  %v2064_v57 = vunpack.c.l.b16 %v9756_v28  ;;  %v2151_v46 = vunpack.c.l.b16 %v9781_v40 }
  0xe7   : > { %v2023_v41 = vpack.c.b16 %v2019_v22, %v2018_v2  ;;  %v9846_v2 = vsel %vm2024_vm1, %v2022_v35, 0  ;;  %v2059_v22 = vunpack.c.l.b16 %v9825_v63 }
  0xe8   : > { %v2068_v42 = vpack.c.b16 %v2064_v57, %v2063_v29  ;;  %17169 = vst [vmem:[#allocation5_spill] sm:$0xff] %v9846_v2  ;;  %v9849_v29 = vsel %vm2024_vm1, %v2067_v4, 0  ;;  %v2060_v57 = vunpack.c.l.b16 %v9829_v1  ;;  %v2148_v4 = vunpack.c.l.b16 %v9875_v34 }
  0xe9   : > { %v9810_v0 = vsel %vm2024_vm1, %v2023_v41, 0  ;;  %17170 = vst [vmem:[#allocation6_spill] sm:$0xff] %v9849_v29  ;;  %v9861_v41 = vpack.c.bf16 %v9649_v31, %v9649_v31  ;;  %v2111_v31 = vpack.c.b16 %v2106_v26, %v2105_v9 }
  0xea   : > { %v1077_v61 = vpop.f32.mrf.mxu2  ;;  %17167 = vst [vmem:[#allocation3_spill] sm:$0xff] %v9810_v0  ;;  %v9813_v16 = vsel %vm2024_vm1, %v2068_v42, 0  ;;  %2044 = vmatpush.bf16.xpose.msrb.mxu0 %v9810_v0  ;;  %v9865_v42 = vpack.c.bf16 %v9651_v32, %v9651_v32  ;;  %v9881_v32 = vpack.c.bf16 %v9629_v12, %v9629_v12 }
  0xeb   : > { %v1162_v37 = vpop.f32.mrf.mxu3  ;;  %17168 = vst [vmem:[#allocation4_spill] sm:$0xff] %v9813_v16  ;;  %v9815_v36 = vpack.c.bf16 %v1077_v61, %v1077_v61  ;;  %2088 = vmatpush.bf16.xpose.msrb.mxu1 %v9813_v16  ;;  %v2155_v61 = vpack.c.b16 %v2150_v55, %v2149_v20  ;;  %v2103_v60 = vunpack.c.l.b16 %v9861_v41  ;;  %v9896_v12 = vsel %vm2024_vm1, %v2111_v31, 0 }
  0xec   : > { %v9817_v21 = vpack.c.bf16 %v1162_v37, %v1162_v37  ;;  %v2021_v37 = vpack.c.b16 %v2015_v38, %v2014_v15  ;;  %17173 = vst [vmem:[#allocation9_spill] sm:$0xff] %v9896_v12  ;;  %v2147_v35 = vunpack.c.l.b16 %v9865_v42  ;;  %v2012_v20 = vunpack.c.l.b16 %v9718_v33 }
  0xed   : > { %v2108_v62 = vunpack.c.l.b16 %v9815_v36  ;;  %1803 = vrot.lane.b32.xlu2 %v9767_v3, %s9243_s27  ;;  %1817 = vrot.lane.b32.xlu0 %v9735_v10, %s9243_s27  ;;  %v9899_v13 = vsel %vm2024_vm1, %v2155_v61, 0  ;;  %v2013_v15 = vunpack.c.l.b16 %v9762_v30  ;;  %v2057_v38 = vunpack.c.l.b16 %v9707_v44 }
  0xee   : > { %v2152_v8 = vunpack.c.l.b16 %v9817_v21  ;;  %1723 = vrot.lane.b32.xlu1 %v9762_v30, %s9246_s28  ;;  %17174 = vst [vmem:[#allocation10_spill] sm:$0xff] %v9899_v13  ;;  %v2154_v26 = vpack.c.b16 %v2148_v4, %v2147_v35 }
  0xef   : > { %v2112_v5 = vpack.c.b16 %v2108_v62, %v2107_v45  ;;  %v2066_v45 = vpack.c.b16 %v2060_v57, %v2059_v22  ;;  %v2020_v55 = vpack.c.b16 %v2013_v15, %v2012_v20 }
  0xf0   : > { %v2156_v25 = vpack.c.b16 %v2152_v8, %v2151_v46  ;;  %v2104_v46 = vunpack.c.l.b16 %v9869_v43  ;;  %v9906_v8 = vsel %vm2024_vm1, %v2021_v37, 0  ;;  %v9929_v31 = vsel %vm2024_vm1, %v2154_v26, 0 }
  0xf1   : > { %v9854_v58 = vsel %vm2024_vm1, %v2112_v5, 0  ;;  %17176 = vst [vmem:[#allocation12_spill] sm:$0xff] %v9906_v8  ;;  %v9909_v9 = vsel %vm2024_vm1, %v2066_v45, 0  ;;  %v2058_v5 = vunpack.c.l.b16 %v9767_v3  ;;  %v2101_v37 = vunpack.c.l.b16 %v9735_v10 }
  0xf2   : > { %17171 = vst [vmem:[#allocation7_spill] sm:$0xff] %v9854_v58  ;;  %v9857_v17 = vsel %vm2024_vm1, %v2156_v25, 0  ;;  %2132 = vmatpush.bf16.xpose.msrb.mxu2 %v9854_v58  ;;  %2045 = vmatpush.bf16.xpose.msrb.mxu0 %v9846_v2  ;;  %v2110_v25 = vpack.c.b16 %v2104_v46, %v2103_v60  ;;  %v2102_v45 = vunpack.c.l.b16 %v9881_v32  ;;  %v2145_v60 = vunpack.c.l.b16 %v9739_v11 }
  0xf3   : > { %17172 = vst [vmem:[#allocation8_spill] sm:$0xff] %v9857_v17  ;;  %2176 = vmatpush.bf16.xpose.msrb.mxu3 %v9857_v17  ;;  %2089 = vmatpush.bf16.xpose.msrb.mxu1 %v9849_v29  ;;  %v2065_v22 = vpack.c.b16 %v2058_v5, %v2057_v38  ;;  %v2146_v46 = vunpack.c.l.b16 %v9885_v56  ;;  %v9940_v35 = vsel %vm2024_vm1, %v2020_v55, 0 }
  0xf4   : > { %17177 = vst [vmem:[#allocation13_spill] sm:$0xff] %v9909_v9  ;;  %v9926_v57 = vsel %vm2024_vm1, %v2110_v25, 0  ;;  %v2109_v20 = vpack.c.b16 %v2102_v45, %v2101_v37 }
  0xf5   : > { %1755 = vrot.lane.b32.xlu2 %v9881_v32, %s9246_s28  ;;  %1739 = vrot.lane.b32.xlu0 %v9767_v3, %s9246_s28  ;;  %17178 = vst [vmem:[#allocation14_spill] sm:$0xff] %v9926_v57  ;;  %v9943_v4 = vsel %vm2024_vm1, %v2065_v22, 0  ;;  %v2153_v15 = vpack.c.b16 %v2146_v46, %v2145_v60 }
  0xf6   : > { %1771 = vrot.lane.b32.xlu1 %v9885_v56, %s9246_s28  ;;  %17179 = vst [vmem:[#allocation15_spill] sm:$0xff] %v9929_v31  ;;  %v9956_v5 = vsel %vm2024_vm1, %v2109_v20, 0 }
  0xf7   : > { %v9903_v62 = vpop.permute.xlu2 %1657  ;;  %17180 = vst [vmem:[#allocation16_spill] sm:$0xff] %v9940_v35  ;;  %v9959_v25 = vsel %vm2024_vm1, %v2153_v15, 0 }
  0xf8   : > { %17175 = vst [vmem:[#allocation11_spill] sm:$0xff] %v9903_v62 }
  0xf9   : > { %17181 = vst [vmem:[#allocation17_spill] sm:$0xff] %v9943_v4 }
  0xfa   : > { %2133 = vmatpush.bf16.xpose.msrb.mxu2 %v9896_v12  ;;  %2046 = vmatpush.bf16.xpose.msrb.mxu0 %v9906_v8  ;;  %17182 = vst [vmem:[#allocation18_spill] sm:$0xff] %v9956_v5 }
  0xfb   : > { %2177 = vmatpush.bf16.xpose.msrb.mxu3 %v9899_v13  ;;  %2090 = vmatpush.bf16.xpose.msrb.mxu1 %v9909_v9  ;;  %17183 = vst [vmem:[#allocation19_spill] sm:$0xff] %v9959_v25 }
  0xfd   : > { %1725 = vrot.lane.b32.xlu2 %v9771_v59, %s9246_s28  ;;  %1787 = vrot.lane.b32.xlu0 %v9762_v30, %s9243_s27 }
  0xfe   : > { %1819 = vrot.lane.b32.xlu1 %v9881_v32, %s9243_s27 }
  0xff   : > { %v9931_v61 = vpop.permute.xlu2 %1649 }
 0x102   : > { %2134 = vmatpush.bf16.xpose.msrb.mxu2 %v9926_v57  ;;  %2047 = vmatpush.bf16.xpose.msrb.mxu0 %v9940_v35 }
 0x103   : > { %2178 = vmatpush.bf16.xpose.msrb.mxu3 %v9929_v31  ;;  %2091 = vmatpush.bf16.xpose.msrb.mxu1 %v9943_v4 }
 0x105   : > { %1773 = vrot.lane.b32.xlu2 %v9865_v42, %s9246_s28  ;;  %1805 = vrot.lane.b32.xlu0 %v9825_v63, %s9243_s27 }
 0x106   : > { %1741 = vrot.lane.b32.xlu1 %v9825_v63, %s9246_s28 }
 0x107   : > { %v9953_v38 = vpop.permute.xlu2 %1669 }
 0x109   : > { %8311 = vmatmul.msk.bf16.vlgmr.msrb.gmra.mxu0 %vm2024_vm1, %v9565_v18 }
 0x10a   : > { %2135 = vmatpush.bf16.xpose.msrb.mxu2 %v9956_v5  ;;  %8312 = vmatmul.msk.bf16.vlgmr.msrb.gmra.mxu1 %vm2024_vm1, %v9567_v19 }
 0x10b   : > { %2179 = vmatpush.bf16.xpose.msrb.mxu3 %v9959_v25 }
 0x10d   : > { %1821 = vrot.lane.b32.xlu2 %v9861_v41, %s9243_s27  ;;  %1757 = vrot.lane.b32.xlu0 %v9861_v41, %s9246_s28 }
 0x10e   : > { %1789 = vrot.lane.b32.xlu1 %v9771_v59, %s9243_s27 }
 0x10f   : > { %v9975_v55 = vpop.permute.xlu2 %1681  ;;  %v9981_v22 = vpop.permute.xlu0 %1641 }
 0x110   : > { %v9973_v26 = vpop.permute.xlu1 %1645 }
 0x111   : > { %8313 = vmatmul.msk.bf16.vlgmr.msrb.gmra.mxu2 %vm2024_vm1, %v9603_v50 }
 0x112   : > { %8314 = vmatmul.msk.bf16.vlgmr.msrb.gmra.mxu3 %vm2024_vm1, %v9605_v51 }
 0x115   : > { %1837 = vrot.lane.b32.xlu2 %v9865_v42, %s9243_s27  ;;  %1727 = vrot.lane.b32.xlu0 %v9791_v47, %s9246_s28 }
 0x116   : > { %1807 = vrot.lane.b32.xlu1 %v9829_v1, %s9243_s27 }
 0x117   : > { %v9991_v45 = vpop.permute.xlu2 %1663  ;;  %v9993_v60 = vpop.permute.xlu0 %1677 }
 0x118   : > { %v9989_v37 = vpop.permute.xlu1 %1661  ;;  %17185 = vst [vmem:[#allocation21_spill] sm:$0xff] %v9991_v45 }
 0x119   : > { %17184 = vst [vmem:[#allocation20_spill] sm:$0xff] %v9989_v37 }
 0x11a   : > { %17186 = vst [vmem:[#allocation22_spill] sm:$0xff] %v9993_v60 }
 0x11d   : > { %1743 = vrot.lane.b32.xlu2 %v9829_v1, %s9246_s28  ;;  %1775 = vrot.lane.b32.xlu0 %v9875_v34, %s9246_s28 }
 0x11e   : > { %1759 = vrot.lane.b32.xlu1 %v9869_v43, %s9246_s28 }
 0x11f   : > { %v10003_v20 = vpop.permute.xlu2 %1675  ;;  %v10005_v15 = vpop.permute.xlu0 %1653 }
 0x120   : > { %v10001_v46 = vpop.permute.xlu1 %1673  ;;  %17188 = vst [vmem:[#allocation24_spill] sm:$0xff] %v10003_v20 }
 0x121   : > { %17187 = vst [vmem:[#allocation23_spill] sm:$0xff] %v10001_v46 }
 0x125   : > { %1791 = vrot.lane.b32.xlu2 %v9791_v47, %s9243_s27  ;;  %1823 = vrot.lane.b32.xlu0 %v9869_v43, %s9243_s27 }
 0x126   : > { %1729 = vrot.lane.b32.xlu1 %v9743_v14, %s9246_s28 }
 0x127   : > { %v10015_v35 = vpop.permute.xlu2 %1651  ;;  %v10017_v9 = vpop.permute.xlu0 %1665 }
 0x128   : > { %v10013_v4 = vpop.permute.xlu1 %1685 }
 0x12d   : > { %1809 = vrot.lane.b32.xlu2 %v9748_v23, %s9243_s27  ;;  %1745 = vrot.lane.b32.xlu0 %v9748_v23, %s9246_s28 }
 0x12e   : > { %1777 = vrot.lane.b32.xlu1 %v9799_v52, %s9246_s28 }
 0x12f   : > { %v10027_v29 = vpop.permute.xlu2 %1687  ;;  %v10029_v2 = vpop.permute.xlu0 %1643 }
 0x130   : > { %v10025_v8 = vpop.permute.xlu1 %1647 }
 0x135   : > { %1761 = vrot.lane.b32.xlu2 %v9795_v48, %s9246_s28  ;;  %1793 = vrot.lane.b32.xlu0 %v9743_v14, %s9243_s27 }
 0x136   : > { %1825 = vrot.lane.b32.xlu1 %v9795_v48, %s9243_s27 }
 0x137   : > { %v10039_v0 = vpop.permute.xlu2 %1737  ;;  %v10041_v25 = vpop.permute.xlu0 %1659 }
 0x138   : > { %v10037_v16 = vpop.permute.xlu1 %1679  ;;  %17190 = vst [vmem:[#allocation26_spill] sm:$0xff] %v10039_v0 }
 0x139   : > { %17189 = vst [vmem:[#allocation25_spill] sm:$0xff] %v10037_v16 }
 0x13a   : > { %17191 = vst [vmem:[#allocation27_spill] sm:$0xff] %v10041_v25 }
 0x13d   : > { %1731 = vrot.lane.b32.xlu2 %v9750_v24, %s9246_s28  ;;  %1811 = vrot.lane.b32.xlu0 %v9752_v54, %s9243_s27 }
 0x13e   : > { %1841 = vrot.lane.b32.xlu1 %v9799_v52, %s9243_s27 }
 0x13f   : > { %v10051_v31 = vpop.permute.xlu2 %1785  ;;  %v10053_v57 = vpop.permute.xlu0 %1671 }
 0x140   : > { %v10049_v5 = vpop.permute.xlu1 %1655  ;;  %17192 = vst [vmem:[#allocation28_spill] sm:$0xff] %v10051_v31 }
 0x145   : > { %1779 = vrot.lane.b32.xlu2 %v9807_v53, %s9246_s28  ;;  %1763 = vrot.lane.b32.xlu0 %v9803_v49, %s9246_s28 }
 0x146   : > { %1747 = vrot.lane.b32.xlu1 %v9752_v54, %s9246_s28 }
 0x147   : > { %v10063_v12 = vpop.permute.xlu2 %1803  ;;  %v10065_v17 = vpop.permute.xlu0 %1683 }
 0x148   : > { %v10061_v13 = vpop.permute.xlu1 %1667  ;;  %17193 = vst [vmem:[#allocation29_spill] sm:$0xff] %v10063_v12 }
 0x14d   : > { %1827 = vrot.lane.b32.xlu2 %v9803_v49, %s9243_s27  ;;  %1733 = vrot.lane.b32.xlu0 %v9729_v6, %s9246_s28 }
 0x14e   : > { %1795 = vrot.lane.b32.xlu1 %v9750_v24, %s9243_s27 }
 0x14f   : > { %v10075_v31 = vpop.permute.xlu2 %1755  ;;  %v10077_v60 = vpop.permute.xlu0 %1721 }
 0x150   : > { %v10073_v58 = vpop.permute.xlu1 %1801 }
 0x151   : > { %17194 = vst [vmem:[#allocation30_spill] sm:$0xff] %v10073_v58 }
 0x155   : > { %1843 = vrot.lane.b32.xlu2 %v9807_v53, %s9243_s27  ;;  %1781 = vrot.lane.b32.xlu0 %v9781_v40, %s9246_s28 }
 0x156   : > { %1813 = vrot.lane.b32.xlu1 %v9731_v7, %s9243_s27 }
 0x157   : > { %v10087_v16 = vpop.permute.xlu2 %1725  ;;  %v10089_v62 = vpop.permute.xlu0 %1769 }
 0x158   : > { %v10085_v12 = vpop.permute.xlu1 %1753  ;;  %17195 = vst [vmem:[#allocation31_spill] sm:$0xff] %v10089_v62 }
 0x15d   : > { %1749 = vrot.lane.b32.xlu2 %v9731_v7, %s9246_s28  ;;  %1829 = vrot.lane.b32.xlu0 %v9779_v39, %s9243_s27 }
 0x15e   : > { %1765 = vrot.lane.b32.xlu1 %v9779_v39, %s9246_s28 }
 0x15f   : > { %v10099_v45 = vpop.permute.xlu2 %1773  ;;  %v10101_v25 = vpop.permute.xlu0 %1817 }
 0x160   : > { %v10097_v58 = vpop.permute.xlu1 %1723  ;;  %17196 = vst [vmem:[#allocation32_spill] sm:$0xff] %v10101_v25 }
 0x165   : > { %1797 = vrot.lane.b32.xlu2 %v9729_v6, %s9243_s27  ;;  %1893 = vrot.lane.b32.xlu0 %v9779_v39, %s9247_s13 }
 0x166   : > { %1735 = vrot.lane.b32.xlu1 %v9754_v27, %s9246_s28 }
 0x167   : > { %v10111_v0 = vpop.permute.xlu2 %1821  ;;  %v10113_v20 = vpop.permute.xlu0 %1739 }
 0x168   : > { %v10109_v62 = vpop.permute.xlu1 %1771  ;;  %17198 = vst [vmem:[#allocation34_spill] sm:$0xff] %v10111_v0 }
 0x169   : > { %17197 = vst [vmem:[#allocation33_spill] sm:$0xff] %v10109_v62 }
 0x16a   : > { %17199 = vst [vmem:[#allocation35_spill] sm:$0xff] %v10113_v20 }
 0x16d   : > { %1845 = vrot.lane.b32.xlu2 %v9781_v40, %s9243_s27  ;;  %1751 = vrot.lane.b32.xlu0 %v9756_v28, %s9246_s28 }
 0x16e   : > { %1783 = vrot.lane.b32.xlu1 %v9817_v21, %s9246_s28 }
 0x16f   : > { %v10123_v46 = vpop.permute.xlu2 %1837  ;;  %v10125_v39 = vpop.permute.xlu0 %1787 }
 0x170   : > { %v10121_v25 = vpop.permute.xlu1 %1819  ;;  %17201 = vst [vmem:[#allocation37_spill] sm:$0xff] %v10123_v46 }
 0x171   : > { %17200 = vst [vmem:[#allocation36_spill] sm:$0xff] %v10121_v25 }
 0x172   : > { %17202 = vst [vmem:[#allocation38_spill] sm:$0xff] %v10125_v39 }
 0x175   : > { %1815 = vrot.lane.b32.xlu2 %v9756_v28, %s9243_s27  ;;  %1799 = vrot.lane.b32.xlu0 %v9754_v27, %s9243_s27 }
 0x176   : > { %1831 = vrot.lane.b32.xlu1 %v9815_v36, %s9243_s27 }
 0x177   : > { %v10135_v62 = vpop.permute.xlu2 %1743  ;;  %v10137_v20 = vpop.permute.xlu0 %1805 }
 0x178   : > { %v10133_v0 = vpop.permute.xlu1 %1741  ;;  %17203 = vst [vmem:[#allocation39_spill] sm:$0xff] %v10137_v20 }
 0x17d   : > { %1767 = vrot.lane.b32.xlu2 %v9815_v36, %s9246_s28  ;;  %1847 = vrot.lane.b32.xlu0 %v9817_v21, %s9243_s27 }
 0x17e   : > { %1895 = vrot.lane.b32.xlu1 %v9815_v36, %s9247_s13 }
 0x17f   : > { %v10147_v25 = vpop.permute.xlu2 %1791  ;;  %v10149_v39 = vpop.permute.xlu0 %1757 }
 0x180   : > { %v10145_v46 = vpop.permute.xlu1 %1789  ;;  %17205 = vst [vmem:[#allocation41_spill] sm:$0xff] %v10147_v25 }
 0x181   : > { %17204 = vst [vmem:[#allocation40_spill] sm:$0xff] %v10145_v46 }
 0x185   : > { %1911 = vrot.lane.b32.xlu2 %v9817_v21, %s9247_s13  ;;  %1839 = vrot.lane.b32.xlu0 %v9875_v34, %s9243_s27 }
 0x186   : > { %1909 = vrot.lane.b32.xlu1 %v9781_v40, %s9247_s13 }
 0x187   : > { %v10159_v36 = vpop.permute.xlu2 %1809  ;;  %v10161_v37 = vpop.permute.xlu0 %1727 }
 0x188   : > { %v10157_v20 = vpop.permute.xlu1 %1807  ;;  %17207 = vst [vmem:[#allocation43_spill] sm:$0xff] %v10159_v36 }
 0x189   : > { %17206 = vst [vmem:[#allocation42_spill] sm:$0xff] %v10157_v20 }
 0x18d   : > { %1833 = vrot.lane.b32.xlu2 %v9739_v11, %s9243_s27  ;;  %1889 = vrot.lane.b32.xlu0 %v9795_v48, %s9247_s13 }
 0x18e   : > { %1891 = vrot.lane.b32.xlu1 %v9803_v49, %s9247_s13 }
 0x18f   : > { %v10171_v21 = vpop.permute.xlu2 %1761  ;;  %v10173_v25 = vpop.permute.xlu0 %1775 }
 0x190   : > { %v10169_v40 = vpop.permute.xlu1 %1759 }
 0x195   : > { %1907 = vrot.lane.b32.xlu2 %v9807_v53, %s9247_s13  ;;  %1835 = vrot.lane.b32.xlu0 %v9885_v56, %s9243_s27 }
 0x196   : > { %1905 = vrot.lane.b32.xlu1 %v9799_v52, %s9247_s13 }
 0x197   : > { %v10183_v20 = vpop.permute.xlu2 %1731  ;;  %v10185_v48 = vpop.permute.xlu0 %1823 }
 0x198   : > { %v10181_v49 = vpop.permute.xlu1 %1729  ;;  %17208 = vst [vmem:[#allocation44_spill] sm:$0xff] %v10185_v48 }
 0x19d   : > { %1901 = vrot.lane.b32.xlu2 %v9865_v42, %s9247_s13  ;;  %1885 = vrot.lane.b32.xlu0 %v9861_v41, %s9247_s13 }
 0x19e   : > { %1887 = vrot.lane.b32.xlu1 %v9869_v43, %s9247_s13 }
 0x19f   : > { %v10195_v53 = vpop.permute.xlu2 %1779  ;;  %v10197_v36 = vpop.permute.xlu0 %1745 }
 0x1a0   : > { %v10193_v52 = vpop.permute.xlu1 %1777 }
 0x1a5   : > { %1863 = vrot.lane.b32.xlu2 %v9754_v27, %s9247_s13  ;;  %1903 = vrot.lane.b32.xlu0 %v9875_v34, %s9247_s13 }
 0x1a6   : > { %1861 = vrot.lane.b32.xlu1 %v9729_v6, %s9247_s13 }
 0x1a7   : > { %v10207_v42 = vpop.permute.xlu2 %1827  ;;  %v10209_v41 = vpop.permute.xlu0 %1793 }
 0x1a8   : > { %v10205_v43 = vpop.permute.xlu1 %1825  ;;  %17209 = vst [vmem:[#allocation45_spill] sm:$0xff] %v10209_v41 }
 0x1ad   : > { %1881 = vrot.lane.b32.xlu2 %v9735_v10, %s9247_s13  ;;  %1877 = vrot.lane.b32.xlu0 %v9731_v7, %s9247_s13 }
 0x1ae   : > { %1879 = vrot.lane.b32.xlu1 %v9756_v28, %s9247_s13 }
 0x1af   : > { %v10219_v27 = vpop.permute.xlu2 %1843  ;;  %v10221_v34 = vpop.permute.xlu0 %1811 }
 0x1b0   : > { %v10217_v6 = vpop.permute.xlu1 %1841  ;;  %17211 = vst [vmem:[#allocation47_spill] sm:$0xff] %v10219_v27 }
 0x1b1   : > { %17210 = vst [vmem:[#allocation46_spill] sm:$0xff] %v10217_v6 }
 0x1b2   : > { %17212 = vst [vmem:[#allocation48_spill] sm:$0xff] %v10221_v34 }
 0x1b5   : > { %1899 = vrot.lane.b32.xlu2 %v9885_v56, %s9247_s13  ;;  %1883 = vrot.lane.b32.xlu0 %v9881_v32, %s9247_s13 }
 0x1b6   : > { %1897 = vrot.lane.b32.xlu1 %v9739_v11, %s9247_s13 }
 0x1b7   : > { %v10231_v10 = vpop.permute.xlu2 %1749  ;;  %v1764_v7 = vpop.permute.xlu0 %1763 }
 0x1b8   : > { %v10229_v28 = vpop.permute.xlu1 %1747 }
 0x1bd   : > { %1873 = vrot.lane.b32.xlu2 %v9748_v23, %s9247_s13  ;;  %1857 = vrot.lane.b32.xlu0 %v9743_v14, %s9247_s13  ;;  %v10253_v14 = vpop.f32.mrf.mxu0 }
 0x1be   : > { %1859 = vrot.lane.b32.xlu1 %v9750_v24, %s9247_s13  ;;  %17215 = vst [vmem:[#allocation51_spill] sm:$0xff] %v10253_v14 }
 0x1bf   : > { %v10241_v56 = vpop.permute.xlu2 %1797  ;;  %v1734_v27 = vpop.permute.xlu0 %1733 }
 0x1c0   : > { %v10239_v11 = vpop.permute.xlu1 %1795  ;;  %v2195_v34 = vunpack.c.l.b16 %v1734_v27  ;;  %v2193_v27 = vunpack.c.l.b16 %v10181_v49  ;;  %v2318_v49 = vunpack.c.l.b16 %v10005_v15 }
 0x1c5   : > { %1855 = vrot.lane.b32.xlu2 %v9791_v47, %s9247_s13  ;;  %1875 = vrot.lane.b32.xlu0 %v9752_v54, %s9247_s13  ;;  %v10265_v6 = vpop.f32.mrf.mxu0 }
 0x1c6   : > { %1853 = vrot.lane.b32.xlu1 %v9771_v59, %s9247_s13  ;;  %17216 = vst [vmem:[#allocation52_spill] sm:$0xff] %v10265_v6 }
 0x1c7   : > { %v10251_v23 = vpop.permute.xlu2 %1845  ;;  %v1782_v32 = vpop.permute.xlu0 %1781 }
 0x1c8   : > { %v10249_v24 = vpop.permute.xlu1 %1813  ;;  %17214 = vst [vmem:[#allocation50_spill] sm:$0xff] %v10251_v23 }
 0x1c9   : > { %17213 = vst [vmem:[#allocation49_spill] sm:$0xff] %v10249_v24 }
 0x1cd   : > { %1849 = vrot.lane.b32.xlu2 %v9718_v33, %s9247_s13  ;;  %1869 = vrot.lane.b32.xlu0 %v9825_v63, %s9247_s13  ;;  %v2275_v33 = vunpack.c.l.b16 %v10015_v35  ;;  %v2274_v63 = vunpack.c.l.b16 %v9931_v61  ;;  %v10289_v35 = vpop.f32.mrf.mxu0 }
 0x1ce   : > { %1871 = vrot.lane.b32.xlu1 %v9829_v1, %s9247_s13 }
 0x1cf   : > { %v10261_v47 = vpop.permute.xlu2 %1815  ;;  %v10263_v54 = vpop.permute.xlu0 %1829  ;;  %v10277_v24 = vpack.c.b16 %v2275_v33, %v2274_v63 }
 0x1d0   : > { %v1766_v59 = vpop.permute.xlu1 %1765 }
 0x1d1   : > { %v2283_v48 = vunpack.c.l.b16 %v1766_v59 }
 0x1d5   : > { %1867 = vrot.lane.b32.xlu2 %v9767_v3, %s9247_s13  ;;  %1851 = vrot.lane.b32.xlu0 %v9762_v30, %s9247_s13  ;;  %v2282_v3 = vunpack.c.l.b16 %v1764_v7 }
 0x1d6   : > { %1865 = vrot.lane.b32.xlu1 %v9707_v44, %s9247_s13 }
 0x1d7   : > { %v1768_v14 = vpop.permute.xlu2 %1767  ;;  %v10275_v6 = vpop.permute.xlu0 %1893 }
 0x1d8   : > { %v1736_v1 = vpop.permute.xlu1 %1735  ;;  %v2284_v23 = vunpack.c.l.b16 %v1768_v14 }
 0x1d9   : > { %v2196_v46 = vunpack.c.l.b16 %v1736_v1 }
 0x1da   : > { %v2288_v41 = vpack.c.b16 %v2284_v23, %v2283_v48  ;;  %v2319_v48 = vunpack.c.l.b16 %v10049_v5  ;;  %v2187_v5 = vunpack.c.l.b16 %v10029_v2 }
 0x1db   : > { %v2200_v44 = vpack.c.b16 %v2196_v46, %v2195_v34  ;;  %v2194_v46 = vunpack.c.l.b16 %v10183_v20  ;;  %v2327_v34 = vunpack.c.l.b16 %v1782_v32  ;;  %v2239_v20 = vunpack.c.l.b16 %v10231_v10 }
 0x1dc   : > { %v10284_v30 = vsel %vm2024_vm1, %v2288_v41, 0  ;;  %v10303_v1 = vpack.c.b16 %v2319_v48, %v2318_v49  ;;  %v2280_v32 = vunpack.c.l.b16 %v10169_v40  ;;  %v2495_v40 = vunpack.c.l.b16 %v10053_v57  ;;  %v10338_v48 = vpop.f32.mrf.mxu0 }
 0x1dd   : > { %2828 = vrot.lane.b32.xlu2 %v10277_v24, %s9246_s28  ;;  %v10287_v61 = vsel %vm2024_vm1, %v2200_v44, 0  ;;  %2308 = vmatpush.bf16.xpose.msra.mxu2 %v10284_v30  ;;  %v2199_v63 = vpack.c.b16 %v2194_v46, %v2193_v27  ;;  %v2238_v27 = vunpack.c.l.b16 %v10229_v28  ;;  %v2279_v46 = vunpack.c.l.b16 %v10149_v39 }
 0x1de   : > { %2771 = vrot.lane.b32.xlu1 %v9605_v51, %s9246_s28  ;;  %2752 = vrot.lane.b32.xlu0 %v9603_v50, %s9246_s28  ;;  %v2281_v51 = vunpack.c.l.b16 %v10171_v21  ;;  %v10305_v21 = vpop.f32.mrf.mxu1  ;;  %v2451_v28 = vunpack.c.l.b16 %v10061_v13  ;;  %v2494_v39 = vunpack.c.l.b16 %v9953_v38  ;;  %v2627_v38 = vunpack.c.l.b16 %v10065_v17 }
 0x1df   : > { %2220 = vmatpush.bf16.xpose.msra.mxu0 %v10287_v61  ;;  %v1752_v23 = vpop.permute.xlu0 %1751  ;;  %v10301_v59 = vpop.permute.xlu2 %1911  ;;  %v10324_v2 = vsel %vm2024_vm1, %v2199_v63, 0  ;;  %v2190_v63 = vunpack.c.l.b16 %v10097_v58 }
 0x1e0   : > { %v1784_v41 = vpop.permute.xlu1 %1783  ;;  %v2287_v14 = vpack.c.b16 %v2282_v3, %v2281_v51  ;;  %v2240_v33 = vunpack.c.l.b16 %v1752_v23  ;;  %v2192_v3 = vunpack.c.l.b16 %v10161_v37  ;;  %17217 = vst [vmem:[#allocation53_spill] sm:$0xff] %v10324_v2  ;;  %v2326_v37 = vunpack.c.l.b16 %v10195_v53 }
 0x1e1   : > { %v2328_v7 = vunpack.c.l.b16 %v1784_v41  ;;  %v2191_v51 = vunpack.c.l.b16 %v10087_v16  ;;  %v2237_v41 = vunpack.c.l.b16 %v10197_v36  ;;  %v10347_v16 = vpack.c.b16 %v2495_v40, %v2494_v39 }
 0x1e2   : > { %v2244_v44 = vpack.c.b16 %v2240_v33, %v2239_v20  ;;  %v10312_v15 = vsel %vm2024_vm1, %v2287_v14, 0  ;;  %v2671_v36 = vunpack.c.l.b16 %v10027_v29 }
 0x1e3   : > { %v2332_v50 = vpack.c.b16 %v2328_v7, %v2327_v34  ;;  %v2286_v34 = vpack.c.b16 %v2280_v32, %v2279_v46  ;;  %v2450_v7 = vunpack.c.l.b16 %v10017_v9  ;;  %v2198_v23 = vpack.c.b16 %v2192_v3, %v2191_v51 }
 0x1e4   : > { %v2243_v14 = vpack.c.b16 %v2238_v27, %v2237_v41  ;;  %v2231_v3 = vunpack.c.l.b16 %v10025_v8  ;;  %v2189_v27 = vunpack.c.l.b16 %v10077_v60  ;;  %v2323_v46 = vunpack.c.l.b16 %v10099_v45 }
 0x1e5   : > { %2733 = vrot.lane.b32.xlu2 %v9567_v19, %s9246_s28  ;;  %v10315_v10 = vsel %vm2024_vm1, %v2332_v50, 0  ;;  %v10327_v19 = vsel %vm2024_vm1, %v2244_v44, 0  ;;  %2309 = vmatpush.bf16.xpose.msra.mxu2 %v10312_v15  ;;  %v10350_v20 = vpack.c.b16 %v2451_v28, %v2450_v7  ;;  %v10360_v9 = vsel %vm2024_vm1, %v2286_v34, 0  ;;  %v17221_v7 = vld [vmem:[#allocation23_spill] sm:$0xff] }
 0x1e6   : > { %2714 = vrot.lane.b32.xlu1 %v9565_v18, %s9246_s28  ;;  %2847 = vrot.lane.b32.xlu0 %v10303_v1, %s9246_s28  ;;  %v2325_v18 = vunpack.c.l.b16 %v10193_v52  ;;  %v2186_v52 = vunpack.c.l.b16 %v9981_v22  ;;  %v2277_v22 = vunpack.c.l.b16 %v10085_v12  ;;  %v10364_v29 = vpop.f32.mrf.mxu1  ;;  %v2235_v50 = vunpack.c.l.b16 %v10133_v0 }
 0x1e7   : > { %2221 = vmatpush.bf16.xpose.msra.mxu0 %v10324_v2  ;;  %2264 = vmatpush.bf16.xpose.msra.mxu1 %v10327_v19  ;;  %v1800_v53 = vpop.permute.xlu0 %1799  ;;  %v10352_v33 = vpop.permute.xlu2 %1833  ;;  %v2236_v44 = vunpack.c.l.b16 %v10135_v62  ;;  %v10371_v58 = vsel %vm2024_vm1, %v2198_v23, 0  ;;  %v10374_v17 = vsel %vm2024_vm1, %v2243_v14, 0  ;;  %v2278_v12 = vunpack.c.l.b16 %v10075_v31  ;;  %v17266_v2 = vld [vmem:[#allocation30_spill] sm:$0xff] }
 0x1e8   : > { %2352 = vmatpush.bf16.xpose.msra.mxu3 %v10315_v10  ;;  %v1832_v57 = vpop.permute.xlu1 %1831  ;;  %v10345_v13 = vpack.c.b16 %v2187_v5, %v2186_v52  ;;  %v2331_v49 = vpack.c.b16 %v2326_v37, %v2325_v18  ;;  %17218 = vst [vmem:[#allocation54_spill] sm:$0xff] %v10371_v58  ;;  %v2324_v5 = vunpack.c.l.b16 %v10173_v25  ;;  %v2372_v32 = vunpack.c.l.b16 %v1800_v53  ;;  %v17220_v53 = vld [vmem:[#allocation20_spill] sm:$0xff] }
 0x1e9   : > { %17219 = vst [vmem:[#allocation55_spill] sm:$0xff] %v10374_v17  ;;  %v2626_v62 = vunpack.c.l.b16 %v9975_v55  ;;  %v2460_v40 = vunpack.c.l.b16 %v1832_v57  ;;  %v2670_v25 = vunpack.c.l.b16 %v10013_v4  ;;  %v2371_v18 = vunpack.c.l.b16 %v10241_v56  ;;  %v10394_v55 = vpop.f32.mrf.mxu0 }
 0x1ea   : > { %v10382_v0 = vsel %vm2024_vm1, %v2331_v49, 0  ;;  %v2285_v28 = vpack.c.b16 %v2278_v12, %v2277_v22  ;;  %v2230_v51 = vunpack.c.l.b16 %v9973_v26  ;;  %v2459_v8 = vunpack.c.l.b16 %v10263_v54  ;;  %v17222_v26 = vld [vmem:[#allocation24_spill] sm:$0xff]  ;;  %v17223_v49 = vld [vmem:[#allocation26_spill] sm:$0xff] }
 0x1eb   : > { %v2197_v60 = vpack.c.b16 %v2190_v63, %v2189_v27  ;;  %v2242_v41 = vpack.c.b16 %v2236_v44, %v2235_v50  ;;  %v10397_v57 = vpack.c.b16 %v2671_v36, %v2670_v25  ;;  %v10399_v39 = vpack.c.b16 %v2627_v38, %v2626_v62  ;;  %v17224_v36 = vld [vmem:[#allocation27_spill] sm:$0xff] }
 0x1ec   : > { %v2376_v52 = vpack.c.b16 %v2372_v32, %v2371_v18  ;;  %v2330_v4 = vpack.c.b16 %v2324_v5, %v2323_v46  ;;  %v2406_v45 = vunpack.c.l.b16 %v17220_v53  ;;  %v10402_v34 = vpack.c.b16 %v2231_v3, %v2230_v51  ;;  %v17225_v63 = vld [vmem:[#allocation35_spill] sm:$0xff]  ;;  %v17228_v32 = vld [vmem:[#allocation33_spill] sm:$0xff] }
 0x1ed   : > { %2790 = vrot.lane.b32.xlu2 %v10345_v13, %s9246_s28  ;;  %2310 = vmatpush.bf16.xpose.msra.mxu2 %v10360_v9  ;;  %v2464_v56 = vpack.c.b16 %v2460_v40, %v2459_v8  ;;  %v2538_v23 = vunpack.c.l.b16 %v17221_v7  ;;  %v2539_v14 = vunpack.c.l.b16 %v17222_v26  ;;  %v2233_v22 = vunpack.c.l.b16 %v17223_v49  ;;  %v17230_v8 = vld [vmem:[#allocation21_spill] sm:$0xff] }
 0x1ee   : > { %2923 = vrot.lane.b32.xlu1 %v10347_v16, %s9246_s28  ;;  %2904 = vrot.lane.b32.xlu0 %v10350_v20, %s9246_s28  ;;  %v10410_v54 = vsel %vm2024_vm1, %v2285_v28, 0  ;;  %v2363_v38 = vunpack.c.l.b16 %v17224_v36  ;;  %v2234_v50 = vunpack.c.l.b16 %v17225_v63  ;;  %v10421_v12 = vsel %vm2024_vm1, %v2197_v60, 0  ;;  %v10437_v25 = vpop.f32.mrf.mxu1  ;;  %v17234_v26 = vld [vmem:[#allocation49_spill] sm:$0xff]  ;;  %v10459_v63 = vpop.f32.mrf.mxu2 }
 0x1ef   : > { %2222 = vmatpush.bf16.xpose.msra.mxu0 %v10371_v58  ;;  %2265 = vmatpush.bf16.xpose.msra.mxu1 %v10374_v17  ;;  %v1848_v37 = vpop.permute.xlu0 %1847  ;;  %v10416_v44 = vpop.permute.xlu2 %1907  ;;  %17226 = vst [vmem:[#allocation20_spill] sm:$0xff] %v10421_v12  ;;  %v10424_v5 = vsel %vm2024_vm1, %v2242_v41, 0  ;;  %v2322_v62 = vunpack.c.l.b16 %v17228_v32  ;;  %v2370_v3 = vunpack.c.l.b16 %v10239_v11  ;;  %v10432_v27 = vsel %vm2024_vm1, %v2330_v4, 0  ;;  %v17231_v41 = vld [vmem:[#allocation31_spill] sm:$0xff]  ;;  %v17232_v4 = vld [vmem:[#allocation45_spill] sm:$0xff]  ;;  %v17235_v32 = vld [vmem:[#allocation50_spill] sm:$0xff] }
 0x1f0   : > { %2353 = vmatpush.bf16.xpose.msra.mxu3 %v10382_v0  ;;  %v10388_v31 = vpop.permute.xlu1 %1895  ;;  %17227 = vst [vmem:[#allocation23_spill] sm:$0xff] %v10424_v5  ;;  %v10435_v40 = vsel %vm2024_vm1, %v2376_v52, 0  ;;  %v2457_v46 = vunpack.c.l.b16 %v10205_v43  ;;  %v2458_v18 = vunpack.c.l.b16 %v10207_v42  ;;  %v2416_v28 = vunpack.c.l.b16 %v10261_v47  ;;  %v17233_v47 = vld [vmem:[#allocation11_spill] sm:$0xff] }
 0x1f1   : > { %17229 = vst [vmem:[#allocation24_spill] sm:$0xff] %v10435_v40  ;;  %v10445_v11 = vsel %vm2024_vm1, %v2464_v56, 0  ;;  %v2407_v60 = vunpack.c.l.b16 %v17230_v8  ;;  %v2321_v52 = vunpack.c.l.b16 %v17231_v41  ;;  %v2369_v53 = vunpack.c.l.b16 %v17232_v4 }
 0x1f2   : > { %v2504_v43 = vunpack.c.l.b16 %v1848_v37  ;;  %v2362_v7 = vunpack.c.l.b16 %v17233_v47  ;;  %v2415_v49 = vunpack.c.l.b16 %v17234_v26  ;;  %v2241_v36 = vpack.c.b16 %v2234_v50, %v2233_v22  ;;  %v10464_v37 = vpop.f32.mrf.mxu0  ;;  %v17239_v50 = vld [vmem:[#allocation41_spill] sm:$0xff]  ;;  %v17246_v26 = vld [vmem:[#allocation46_spill] sm:$0xff] }
 0x1f3   : > { %v10457_v56 = vpack.c.b16 %v2539_v14, %v2538_v23  ;;  %v2503_v8 = vunpack.c.l.b16 %v17235_v32  ;;  %v2375_v41 = vpack.c.b16 %v2370_v3, %v2369_v53  ;;  %v2463_v58 = vpack.c.b16 %v2458_v18, %v2457_v46  ;;  %v17236_v23 = vld [vmem:[#allocation25_spill] sm:$0xff]  ;;  %v17241_v3 = vld [vmem:[#allocation44_spill] sm:$0xff] }
 0x1f4   : > { %v2420_v4 = vpack.c.b16 %v2416_v28, %v2415_v49  ;;  %v2583_v14 = vunpack.c.l.b16 %v17236_v23  ;;  %v10478_v22 = vsel %vm2024_vm1, %v2241_v36, 0  ;;  %v2456_v46 = vunpack.c.l.b16 %v17241_v3  ;;  %v17242_v18 = vld [vmem:[#allocation48_spill] sm:$0xff]  ;;  %v17247_v36 = vld [vmem:[#allocation47_spill] sm:$0xff] }
 0x1f5   : > { %2999 = vrot.lane.b32.xlu2 %v10397_v57, %s9246_s28  ;;  %2311 = vmatpush.bf16.xpose.msra.mxu2 %v10410_v54  ;;  %v2508_v47 = vpack.c.b16 %v2504_v43, %v2503_v8  ;;  %17237 = vst [vmem:[#allocation26_spill] sm:$0xff] %v10478_v22  ;;  %v2414_v28 = vunpack.c.l.b16 %v17242_v18  ;;  %v17244_v43 = vld [vmem:[#allocation52_spill] sm:$0xff]  ;;  %v2501_v49 = vunpack.c.l.b16 %v17246_v26  ;;  %v2502_v32 = vunpack.c.l.b16 %v17247_v36  ;;  %v17250_v3 = vld [vmem:[#allocation43_spill] sm:$0xff] }
 0x1f6   : > { %2980 = vrot.lane.b32.xlu1 %v10399_v39, %s9246_s28  ;;  %2809 = vrot.lane.b32.xlu0 %v10402_v34, %s9246_s28  ;;  %v10519_v23 = vpop.f32.mrf.mxu1  ;;  %v2413_v18 = vunpack.c.l.b16 %v17250_v3  ;;  %v17253_v3 = vld [vmem:[#allocation28_spill] sm:$0xff] }
 0x1f7   : > { %2223 = vmatpush.bf16.xpose.msra.mxu0 %v10421_v12  ;;  %2266 = vmatpush.bf16.xpose.msra.mxu1 %v10424_v5  ;;  %v10453_v42 = vpop.permute.xlu0 %1839  ;;  %v10462_v12 = vpack.c.b16 %v2363_v38, %v2362_v7  ;;  %v10466_v5 = vpack.c.b16 %v2407_v60, %v2406_v45  ;;  %v17238_v45 = vld [vmem:[#allocation40_spill] sm:$0xff]  ;;  %v10493_v60 = vpop.permute.xlu2 %1901  ;;  %v10507_v7 = vpack.c.bf16 %v17244_v43, %v17244_v43  ;;  %v10514_v8 = vsel %vm2024_vm1, %v2508_v47, 0  ;;  %v17251_v43 = vld [vmem:[#allocation51_spill] sm:$0xff] }
 0x1f8   : > { %2354 = vmatpush.bf16.xpose.msra.mxu3 %v10432_v27  ;;  %v10447_v51 = vpop.permute.xlu1 %1909  ;;  %v2367_v38 = vunpack.c.l.b16 %v17238_v45  ;;  %v17249_v45 = vld [vmem:[#allocation34_spill] sm:$0xff]  ;;  %v10526_v26 = vpack.c.bf16 %v17251_v43, %v17251_v43  ;;  %v2419_v47 = vpack.c.b16 %v2414_v28, %v2413_v18  ;;  %v2365_v43 = vunpack.c.l.b16 %v17253_v3 }
 0x1f9   : > { %17245 = vst [vmem:[#allocation33_spill] sm:$0xff] %v10507_v7  ;;  %v2636_v18 = vunpack.c.l.b16 %v10388_v31  ;;  %v10580_v31 = vpack.c.bf16 %v10338_v48, %v10338_v48  ;;  %v2409_v48 = vunpack.c.l.b16 %v17266_v2 }
 0x1fa   : > { %17252 = vst [vmem:[#allocation21_spill] sm:$0xff] %v10526_v26 }
 0x1fb   : > { %17264 = vst [vmem:[#allocation25_spill] sm:$0xff] %v10580_v31 }
 0x1fc   : > { %8317 = vmatmul.msk.bf16.vlgmr.msra.gmra.mxu2 %vm2024_vm1, %v10277_v24 }
 0x1fd   : > { %2484 = vmatpush.bf16.xpose.msrb.mxu2 %v10445_v11  ;;  %2942 = vrot.lane.b32.xlu2 %v10457_v56, %s9246_s28 }
 0x1fe   : > { %8315 = vmatmul.msk.bf16.vlgmr.msra.gmra.mxu0 %vm2024_vm1, %v10345_v13  ;;  %2866 = vrot.lane.b32.xlu0 %v10462_v12, %s9246_s28  ;;  %v10489_v13 = vsel %vm2024_vm1, %v2375_v41, 0 }
 0x1ff   : > { %2396 = vmatpush.bf16.xpose.msrb.mxu0 %v10435_v40  ;;  %v2329_v40 = vpack.c.b16 %v2322_v62, %v2321_v52  ;;  %v2368_v62 = vunpack.c.l.b16 %v17239_v50  ;;  %2267 = vmatpush.bf16.xpose.msra.mxu1 %v10478_v22  ;;  %17240 = vst [vmem:[#allocation27_spill] sm:$0xff] %v10489_v13  ;;  %v10498_v52 = vsel %vm2024_vm1, %v2420_v4, 0  ;;  %v10516_v41 = vpop.permute.xlu0 %1889  ;;  %v2455_v50 = vunpack.c.l.b16 %v17249_v45  ;;  %v10530_v22 = vpop.f32.mrf.mxu2 }
 0x200   : > { %2885 = vrot.lane.b32.xlu1 %v10466_v5, %s9246_s28  ;;  %17243 = vst [vmem:[#allocation35_spill] sm:$0xff] %v10498_v52  ;;  %v10503_v53 = vpop.permute.xlu1 %1891  ;;  %v1341_v45 = vpop.f32.mrf.mxu0 }
 0x201   : > { %v10484_v24 = vsel %vm2024_vm1, %v2329_v40, 0  ;;  %v10501_v40 = vsel %vm2024_vm1, %v2463_v58, 0  ;;  %v17248_v58 = vld [vmem:[#allocation22_spill] sm:$0xff]  ;;  %v2374_v36 = vpack.c.b16 %v2368_v62, %v2367_v38 }
 0x202   : > { %2355 = vmatpush.bf16.xpose.msra.mxu3 %v10484_v24  ;;  %v2582_v4 = vunpack.c.l.b16 %v17248_v58  ;;  %v2507_v58 = vpack.c.b16 %v2502_v32, %v2501_v49  ;;  %v17254_v38 = vld [vmem:[#allocation38_spill] sm:$0xff]  ;;  %v10551_v32 = vsel %vm2024_vm1, %v2419_v47, 0 }
 0x203   : > { %v10545_v62 = vsel %vm2024_vm1, %v2374_v36, 0  ;;  %v17257_v49 = vld [vmem:[#allocation42_spill] sm:$0xff]  ;;  %17258 = vst [vmem:[#allocation45_spill] sm:$0xff] %v10551_v32  ;;  %v2500_v36 = vunpack.c.l.b16 %v10453_v42  ;;  %v17265_v42 = vld [vmem:[#allocation37_spill] sm:$0xff] }
 0x204   : > { %17255 = vst [vmem:[#allocation31_spill] sm:$0xff] %v10545_v62  ;;  %v10567_v47 = vsel %vm2024_vm1, %v2507_v58, 0  ;;  %v2499_v58 = vunpack.c.l.b16 %v17265_v42  ;;  %v2679_v42 = vunpack.c.l.b16 %v10447_v51 }
 0x205   : > { %2485 = vmatpush.bf16.xpose.msrb.mxu2 %v10501_v40  ;;  %1947 = vrot.lane.b32.xlu2 %v10507_v7, %s9243_s27  ;;  %v10575_v7 = vpop.permute.xlu2 %1863 }
 0x206   : > { %8316 = vmatmul.msk.bf16.vlgmr.msra.gmra.mxu1 %vm2024_vm1, %v10402_v34  ;;  %v2412_v34 = vunpack.c.l.b16 %v17257_v49 }
 0x207   : > { %2397 = vmatpush.bf16.xpose.msrb.mxu0 %v10489_v13  ;;  %2440 = vmatpush.bf16.xpose.msrb.mxu1 %v10498_v52  ;;  %v10528_v13 = vpack.c.b16 %v2583_v14, %v2582_v4  ;;  %v2462_v52 = vpack.c.b16 %v2456_v46, %v2455_v50  ;;  %v2366_v14 = vunpack.c.l.b16 %v17254_v38  ;;  %v17256_v46 = vld [vmem:[#allocation36_spill] sm:$0xff]  ;;  %v1836_v3 = vpop.permute.xlu0 %1835  ;;  %v10591_v17 = vpop.f32.mrf.mxu2 }
 0x208   : > { %1945 = vrot.lane.b32.xlu1 %v10526_v26, %s9243_s27  ;;  %v2454_v28 = vunpack.c.l.b16 %v17256_v46  ;;  %v10556_v50 = vpop.permute.xlu1 %1905  ;;  %v17262_v38 = vld [vmem:[#allocation32_spill] sm:$0xff]  ;;  %v2635_v26 = vunpack.c.l.b16 %v10275_v6 }
 0x209   : > { %2961 = vrot.lane.b32.xlu0 %v10528_v13, %s9246_s28  ;;  %8318 = vmatmul.msk.bf16.vlgmr.msra.gmra.mxu3 %vm2024_vm1, %v10303_v1  ;;  %v10554_v4 = vsel %vm2024_vm1, %v2462_v52, 0  ;;  %v10560_v1 = vpack.c.bf16 %v10394_v55, %v10394_v55  ;;  %v10571_v52 = vpack.c.bf16 %v10289_v35, %v10289_v35  ;;  %v2453_v46 = vunpack.c.l.b16 %v17262_v38  ;;  %v17263_v55 = vld [vmem:[#allocation39_spill] sm:$0xff] }
 0x20a   : > { %2528 = vmatpush.bf16.xpose.msrb.mxu3 %v10514_v8  ;;  %17259 = vst [vmem:[#allocation11_spill] sm:$0xff] %v10554_v4  ;;  %v2411_v49 = vunpack.c.l.b16 %v17263_v55  ;;  %v2640_v38 = vpack.c.b16 %v2636_v18, %v2635_v26  ;;  %v2506_v55 = vpack.c.b16 %v2500_v36, %v2499_v58  ;;  %v2634_v26 = vunpack.c.l.b16 %v10503_v53 }
 0x20b   : > { %17260 = vst [vmem:[#allocation49_spill] sm:$0xff] %v10560_v1  ;;  %v2498_v36 = vunpack.c.l.b16 %v1836_v3  ;;  %v10625_v3 = vpack.c.bf16 %v1341_v45, %v1341_v45  ;;  %v2497_v58 = vunpack.c.l.b16 %v10352_v33  ;;  %v2548_v33 = vunpack.c.l.b16 %v10575_v7 }
 0x20c   : > { %17261 = vst [vmem:[#allocation50_spill] sm:$0xff] %v10571_v52  ;;  %v2418_v35 = vpack.c.b16 %v2412_v34, %v2411_v49  ;;  %v10612_v53 = vsel %vm2024_vm1, %v2506_v55, 0 }
 0x20d   : > { %2486 = vmatpush.bf16.xpose.msrb.mxu2 %v10554_v4  ;;  %v2461_v4 = vpack.c.b16 %v2454_v28, %v2453_v46  ;;  %1953 = vrot.lane.b32.xlu2 %v10560_v1, %s9243_s27  ;;  %v17268_v46 = vld [vmem:[#allocation29_spill] sm:$0xff]  ;;  %v17281_v1 = vld [vmem:[#allocation10_spill] sm:$0xff] }
 0x20e   : > { %v10602_v28 = vsel %vm2024_vm1, %v2418_v35, 0  ;;  %v2410_v49 = vunpack.c.l.b16 %v17268_v46  ;;  %v2680_v35 = vunpack.c.l.b16 %v10301_v59  ;;  %v10641_v59 = vpack.c.bf16 %v10437_v25, %v10437_v25 }
 0x20f   : > { %2398 = vmatpush.bf16.xpose.msrb.mxu0 %v10545_v62  ;;  %2441 = vmatpush.bf16.xpose.msrb.mxu1 %v10551_v32  ;;  %v2373_v62 = vpack.c.b16 %v2366_v14, %v2365_v43  ;;  %v10584_v32 = vpop.f32.mrf.mxu1  ;;  %v1343_v43 = vpop.f32.mrf.mxu0  ;;  %v2633_v14 = vunpack.c.l.b16 %v10516_v41  ;;  %v10605_v2 = vsel %vm2024_vm1, %v2461_v4, 0  ;;  %v10615_v41 = vsel %vm2024_vm1, %v2640_v38, 0 }
 0x210   : > { %1951 = vrot.lane.b32.xlu1 %v10580_v31, %s9243_s27  ;;  %v1888_v34 = vpop.permute.xlu1 %1887  ;;  %v10607_v18 = vpack.c.bf16 %v1343_v43, %v1343_v43  ;;  %v10620_v4 = vpack.c.bf16 %v10464_v37, %v10464_v37  ;;  %v10629_v38 = vpop.permute.xlu2 %1881  ;;  %v2417_v55 = vpack.c.b16 %v2410_v49, %v2409_v48  ;;  %v2505_v37 = vpack.c.b16 %v2498_v36, %v2497_v58 }
 0x211   : > { %1949 = vrot.lane.b32.xlu0 %v10571_v52, %s9243_s27  ;;  %v10596_v6 = vsel %vm2024_vm1, %v2373_v62, 0  ;;  %v1886_v62 = vpop.permute.xlu0 %1885  ;;  %v2639_v43 = vpack.c.b16 %v2634_v26, %v2633_v14  ;;  %v2684_v51 = vpack.c.b16 %v2680_v35, %v2679_v42  ;;  %17270 = vst [vmem:[#allocation44_spill] sm:$0xff] %v10641_v59  ;;  %v10652_v14 = vpop.f32.mrf.mxu2  ;;  %v2632_v36 = vunpack.c.l.b16 %v1888_v34 }
 0x212   : > { %2529 = vmatpush.bf16.xpose.msrb.mxu3 %v10567_v47  ;;  %17267 = vst [vmem:[#allocation40_spill] sm:$0xff] %v10607_v18  ;;  %v10647_v45 = vsel %vm2024_vm1, %v2417_v55, 0  ;;  %v10656_v25 = vsel %vm2024_vm1, %v2505_v37, 0  ;;  %v10662_v42 = vpop.f32.mrf.mxu3  ;;  %v2677_v58 = vunpack.c.l.b16 %v10556_v50 }
 0x213   : > { %17269 = vst [vmem:[#allocation41_spill] sm:$0xff] %v10620_v4  ;;  %v10650_v26 = vsel %vm2024_vm1, %v2639_v43, 0  ;;  %v10668_v34 = vsel %vm2024_vm1, %v2684_v51, 0 }
 0x215   : > { %2487 = vmatpush.bf16.xpose.msrb.mxu2 %v10605_v2  ;;  %1959 = vrot.lane.b32.xlu2 %v10607_v18, %s9243_s27 }
 0x217   : > { %2399 = vmatpush.bf16.xpose.msrb.mxu0 %v10596_v6  ;;  %2442 = vmatpush.bf16.xpose.msrb.mxu1 %v10602_v28  ;;  %v1423_v46 = vpop.f32.mrf.mxu1 }
 0x218   : > { %1957 = vrot.lane.b32.xlu1 %v10625_v3, %s9243_s27  ;;  %v1862_v48 = vpop.permute.xlu1 %1861  ;;  %v1900_v43 = vpop.permute.xlu2 %1899  ;;  %v10688_v51 = vpack.c.bf16 %v1423_v46, %v1423_v46 }
 0x219   : > { %1955 = vrot.lane.b32.xlu0 %v10620_v4, %s9243_s27  ;;  %v2547_v7 = vunpack.c.l.b16 %v1862_v48  ;;  %v1904_v49 = vpop.permute.xlu0 %1903 }
 0x21a   : > { %2530 = vmatpush.bf16.xpose.msrb.mxu3 %v10612_v53  ;;  %17273 = vst [vmem:[#allocation46_spill] sm:$0xff] %v10688_v51 }
 0x21b   : > { %v2552_v35 = vpack.c.b16 %v2548_v33, %v2547_v7  ;;  %v2676_v7 = vunpack.c.l.b16 %v1904_v49 }
 0x21c   : > { %8321 = vmatmul.msk.bf16.vlgmr.msrb.gmra.mxu2 %vm2024_vm1, %v10350_v20  ;;  %v10660_v20 = vpack.c.bf16 %v10305_v21, %v10305_v21  ;;  %v2678_v21 = vunpack.c.l.b16 %v10416_v44 }
 0x21d   : > { %2660 = vmatpush.bf16.xpose.msra.mxu2 %v10615_v41  ;;  %1965 = vrot.lane.b32.xlu2 %v10641_v59, %s9243_s27  ;;  %v10679_v50 = vsel %vm2024_vm1, %v2552_v35, 0  ;;  %v10708_v35 = vpop.f32.mrf.mxu3 }
 0x21e   : > { %8319 = vmatmul.msk.bf16.vlgmr.msrb.gmra.mxu0 %vm2024_vm1, %v10462_v12  ;;  %v2631_v12 = vunpack.c.l.b16 %v1886_v62  ;;  %17271 = vst [vmem:[#allocation48_spill] sm:$0xff] %v10660_v20  ;;  %v10672_v62 = vpack.c.bf16 %v10364_v29, %v10364_v29  ;;  %v2683_v29 = vpack.c.b16 %v2678_v21, %v2677_v58  ;;  %v10705_v58 = vpack.c.bf16 %v10584_v32, %v10584_v32 }
 0x21f   : > { %2443 = vmatpush.bf16.xpose.msrb.mxu1 %v10647_v45  ;;  %2572 = vmatpush.bf16.xpose.msra.mxu0 %v10679_v50  ;;  %v1426_v37 = vpop.f32.mrf.mxu1  ;;  %v2675_v21 = vunpack.c.l.b16 %v10493_v60  ;;  %v10723_v60 = vpack.c.bf16 %v10459_v63, %v10459_v63 }
 0x220   : > { %17272 = vst [vmem:[#allocation52_spill] sm:$0xff] %v10672_v62  ;;  %v2638_v55 = vpack.c.b16 %v2632_v36, %v2631_v12  ;;  %1963 = vrot.lane.b32.xlu1 %v10672_v62, %s9243_s27  ;;  %v1880_v44 = vpop.permute.xlu1 %1879  ;;  %v10697_v12 = vpack.c.bf16 %v10519_v23, %v10519_v23  ;;  %v1874_v32 = vpop.permute.xlu2 %1873 }
 0x221   : > { %1961 = vrot.lane.b32.xlu0 %v10660_v20, %s9243_s27  ;;  %v2592_v33 = vunpack.c.l.b16 %v1880_v44  ;;  %v1878_v36 = vpop.permute.xlu0 %1877  ;;  %17275 = vst [vmem:[#allocation22_spill] sm:$0xff] %v10705_v58  ;;  %v10725_v44 = vpack.c.bf16 %v1426_v37, %v1426_v37  ;;  %v2674_v20 = vunpack.c.l.b16 %v1900_v43  ;;  %v17278_v43 = vld [vmem:[#allocation7_spill] sm:$0xff] }
 0x222   : > { %2531 = vmatpush.bf16.xpose.msrb.mxu3 %v10656_v25  ;;  %v10693_v48 = vsel %vm2024_vm1, %v2638_v55, 0  ;;  %17274 = vst [vmem:[#allocation47_spill] sm:$0xff] %v10697_v12  ;;  %v2591_v46 = vunpack.c.l.b16 %v1878_v36  ;;  %v2682_v55 = vpack.c.b16 %v2676_v7, %v2675_v21 }
 0x223   : > { %17276 = vst [vmem:[#allocation34_spill] sm:$0xff] %v10725_v44 }
 0x224   : > { %v2596_v23 = vpack.c.b16 %v2592_v33, %v2591_v46  ;;  %v2629_v46 = vunpack.c.l.b16 %v10629_v38  ;;  %v10729_v7 = vsel %vm2024_vm1, %v2682_v55, 0 }
 0x225   : > { %2661 = vmatpush.bf16.xpose.msra.mxu2 %v10650_v26  ;;  %1971 = vrot.lane.b32.xlu2 %v10688_v51, %s9243_s27  ;;  %v10736_v63 = vpop.f32.mrf.mxu3 }
 0x226   : > { %8320 = vmatmul.msk.bf16.vlgmr.msrb.gmra.mxu1 %vm2024_vm1, %v10466_v5  ;;  %v10701_v5 = vsel %vm2024_vm1, %v2683_v29, 0  ;;  %v10716_v49 = vsel %vm2024_vm1, %v2596_v23, 0 }
 0x227   : > { %2616 = vmatpush.bf16.xpose.msra.mxu1 %v10716_v49  ;;  %v1428_v36 = vpop.f32.mrf.mxu1 }
 0x228   : > { %1969 = vrot.lane.b32.xlu1 %v10705_v58, %s9243_s27  ;;  %v1898_v29 = vpop.permute.xlu1 %1897  ;;  %v10731_v62 = vpack.c.bf16 %v1428_v36, %v1428_v36 }
 0x229   : > { %8322 = vmatmul.msk.bf16.vlgmr.msrb.gmra.mxu3 %vm2024_vm1, %v10347_v16  ;;  %v1506_v16 = vpop.f32.mrf.mxu2  ;;  %1967 = vrot.lane.b32.xlu0 %v10697_v12, %s9243_s27  ;;  %v1884_v33 = vpop.permute.xlu0 %1883  ;;  %v2673_v23 = vunpack.c.l.b16 %v1898_v29  ;;  %v10749_v29 = vpack.c.bf16 %v10652_v14, %v10652_v14 }
 0x22a   : > { %2704 = vmatpush.bf16.xpose.msra.mxu3 %v10668_v34  ;;  %v2630_v21 = vunpack.c.l.b16 %v1884_v33  ;;  %17277 = vst [vmem:[#allocation43_spill] sm:$0xff] %v10731_v62  ;;  %v10781_v59 = vpack.c.bf16 %v1506_v16, %v1506_v16 }
 0x22b   : > { %v2681_v37 = vpack.c.b16 %v2674_v20, %v2673_v23 }
 0x22c   : > { %v2637_v12 = vpack.c.b16 %v2630_v21, %v2629_v46  ;;  %v10753_v46 = vpack.c.bf16 %v10530_v22, %v10530_v22  ;;  %v10760_v21 = vpack.c.bf16 %v10591_v17, %v10591_v17 }
 0x22d   : > { %2662 = vmatpush.bf16.xpose.msra.mxu2 %v10693_v48  ;;  %1977 = vrot.lane.b32.xlu2 %v10723_v60, %s9243_s27  ;;  %v10756_v20 = vsel %vm2024_vm1, %v2681_v37, 0  ;;  %v10776_v17 = vpop.f32.mrf.mxu3 }
 0x22e   : > { %v10741_v38 = vsel %vm2024_vm1, %v2637_v12, 0  ;;  %v1856_v12 = vpop.permute.xlu2 %1855 }
 0x230   : > { %1975 = vrot.lane.b32.xlu1 %v10731_v62, %s9243_s27  ;;  %v1860_v55 = vpop.permute.xlu1 %1859 }
 0x231   : > { %v1508_v31 = vpop.f32.mrf.mxu2  ;;  %1973 = vrot.lane.b32.xlu0 %v10725_v44, %s9243_s27  ;;  %v2546_v33 = vunpack.c.l.b16 %v1860_v55  ;;  %v1858_v36 = vpop.permute.xlu0 %1857  ;;  %v17280_v55 = vld [vmem:[#allocation9_spill] sm:$0xff] }
 0x232   : > { %2705 = vmatpush.bf16.xpose.msra.mxu3 %v10701_v5  ;;  %v2545_v23 = vunpack.c.l.b16 %v1858_v36  ;;  %v10785_v51 = vpack.c.bf16 %v1508_v31, %v1508_v31 }
 0x234   : > { %v2551_v14 = vpack.c.b16 %v2546_v33, %v2545_v23 }
 0x235   : > { %2663 = vmatpush.bf16.xpose.msra.mxu2 %v10741_v38  ;;  %1983 = vrot.lane.b32.xlu2 %v10749_v29, %s9243_s27 }
 0x236   : > { %v10771_v22 = vsel %vm2024_vm1, %v2551_v14, 0  ;;  %v2589_v14 = vunpack.c.l.b16 %v1874_v32  ;;  %v1850_v58 = vpop.permute.xlu2 %1849 }
 0x237   : > { %2573 = vmatpush.bf16.xpose.msra.mxu0 %v10771_v22 }
 0x238   : > { %1981 = vrot.lane.b32.xlu1 %v10760_v21, %s9243_s27  ;;  %v1854_v33 = vpop.permute.xlu1 %1853 }
 0x239   : > { %1979 = vrot.lane.b32.xlu0 %v10753_v46, %s9243_s27  ;;  %v1511_v37 = vpop.f32.mrf.mxu2  ;;  %v2543_v23 = vunpack.c.l.b16 %v1854_v33 }
 0x23a   : > { %2706 = vmatpush.bf16.xpose.msra.mxu3 %v10729_v7  ;;  %v10779_v36 = vpack.c.bf16 %v1511_v37, %v1511_v37  ;;  %v10807_v37 = vpop.f32.mrf.mxu3 }
 0x23c   : > { %8325 = vmatmul.msk.bf16.vlgmr.msra.gmra.mxu2 %vm2024_vm1, %v10399_v39  ;;  %v2544_v39 = vunpack.c.l.b16 %v1856_v12 }
 0x23d   : > { %2761 = vmatpush.bf16.xpose.msrb.mxu2 %v17278_v43  ;;  %v17279_v43 = vld [vmem:[#allocation8_spill] sm:$0xff]  ;;  %1989 = vrot.lane.b32.xlu2 %v10779_v36, %s9243_s27 }
 0x23e   : > { %v2550_v4 = vpack.c.b16 %v2544_v39, %v2543_v23  ;;  %v10813_v23 = vpack.c.bf16 %v10662_v42, %v10662_v42  ;;  %v17284_v42 = vld [vmem:[#allocation18_spill] sm:$0xff] }
 0x240   : > { %v10791_v12 = vsel %vm2024_vm1, %v2550_v4, 0  ;;  %1987 = vrot.lane.b32.xlu1 %v10785_v51, %s9243_s27 }
 0x241   : > { %1985 = vrot.lane.b32.xlu0 %v10781_v59, %s9243_s27  ;;  %2574 = vmatpush.bf16.xpose.msra.mxu0 %v10791_v12  ;;  %v1513_v31 = vpop.f32.mrf.mxu2 }
 0x242   : > { %2707 = vmatpush.bf16.xpose.msra.mxu3 %v10756_v20  ;;  %v10809_v33 = vpack.c.bf16 %v1513_v31, %v1513_v31  ;;  %v10828_v62 = vpop.f32.mrf.mxu3 }
 0x245   : > { %2762 = vmatpush.bf16.xpose.msrb.mxu2 %v17280_v55 }
 0x248   : > { %1993 = vrot.lane.b32.xlu1 %v10813_v23, %s9243_s27 }
 0x249   : > { %8326 = vmatmul.msk.bf16.vlgmr.msra.gmra.mxu3 %vm2024_vm1, %v10397_v57  ;;  %v17282_v57 = vld [vmem:[#allocation14_spill] sm:$0xff]  ;;  %1991 = vrot.lane.b32.xlu0 %v10809_v33, %s9243_s27 }
 0x24a   : > { %2780 = vmatpush.bf16.xpose.msrb.mxu3 %v17279_v43  ;;  %v1876_v43 = vpop.permute.xlu0 %1875 }
 0x24b   : > { %v2590_v52 = vunpack.c.l.b16 %v1876_v43  ;;  %v17283_v43 = vld [vmem:[#allocation15_spill] sm:$0xff] }
 0x24d   : > { %v2595_v55 = vpack.c.b16 %v2590_v52, %v2589_v14  ;;  %2763 = vmatpush.bf16.xpose.msrb.mxu2 %v17282_v57  ;;  %v10805_v52 = vpack.c.bf16 %v10708_v35, %v10708_v35  ;;  %v1868_v35 = vpop.permute.xlu2 %1867 }
 0x24f   : > { %v10796_v16 = vsel %vm2024_vm1, %v2595_v55, 0  ;;  %1995 = vrot.lane.b32.xlu2 %v10805_v52, %s9243_s27 }
 0x250   : > { %2617 = vmatpush.bf16.xpose.msra.mxu1 %v10796_v16 }
 0x252   : > { %2781 = vmatpush.bf16.xpose.msrb.mxu3 %v17281_v1  ;;  %v1872_v1 = vpop.permute.xlu1 %1871  ;;  %v1870_v32 = vpop.permute.xlu0 %1869 }
 0x253   : > { %v2588_v4 = vunpack.c.l.b16 %v1872_v1  ;;  %v2587_v39 = vunpack.c.l.b16 %v1870_v32  ;;  %v2586_v1 = vunpack.c.l.b16 %v1868_v35  ;;  %v2541_v32 = vunpack.c.l.b16 %v1850_v58  ;;  %v17287_v58 = vld [vmem:[#allocation4_spill] sm:$0xff] }
 0x255   : > { %v2594_v14 = vpack.c.b16 %v2588_v4, %v2587_v39  ;;  %2764 = vmatpush.bf16.xpose.msrb.mxu2 %v17284_v42 }
 0x257   : > { %v10821_v55 = vsel %vm2024_vm1, %v2594_v14, 0  ;;  %v17285_v14 = vld [vmem:[#allocation19_spill] sm:$0xff] }
 0x258   : > { %2618 = vmatpush.bf16.xpose.msra.mxu1 %v10821_v55 }
 0x25a   : > { %2782 = vmatpush.bf16.xpose.msrb.mxu3 %v17283_v43  ;;  %v1866_v57 = vpop.permute.xlu1 %1865  ;;  %v1852_v4 = vpop.permute.xlu0 %1851 }
 0x25b   : > { %v2585_v31 = vunpack.c.l.b16 %v1866_v57  ;;  %v2542_v39 = vunpack.c.l.b16 %v1852_v4  ;;  %v17293_v4 = vld [vmem:[#allocation17_spill] sm:$0xff] }
 0x25d   : > { %2837 = vmatpush.bf16.xpose.msra.mxu2 %v10284_v30  ;;  %v2593_v43 = vpack.c.b16 %v2586_v1, %v2585_v31  ;;  %v2549_v18 = vpack.c.b16 %v2542_v39, %v2541_v32  ;;  %v17286_v30 = vld [vmem:[#allocation3_spill] sm:$0xff]  ;;  %v17289_v1 = vld [vmem:[#allocation6_spill] sm:$0xff]  ;;  %v17290_v31 = vld [vmem:[#allocation12_spill] sm:$0xff] }
 0x25f   : > { %v10833_v44 = vsel %vm2024_vm1, %v2593_v43, 0  ;;  %v10836_v42 = vsel %vm2024_vm1, %v2549_v18, 0  ;;  %v17288_v18 = vld [vmem:[#allocation5_spill] sm:$0xff] }
 0x260   : > { %2575 = vmatpush.bf16.xpose.msra.mxu0 %v10836_v42  ;;  %2619 = vmatpush.bf16.xpose.msra.mxu1 %v10833_v44 }
 0x262   : > { %2783 = vmatpush.bf16.xpose.msrb.mxu3 %v17285_v14  ;;  %v2772_v35 = vpop.permute.xlu1 %2771  ;;  %v2753_v57 = vpop.permute.xlu0 %2752 }
 0x263   : > { %8329 = vmatmul.msk.bf16.vlgmr.msrb.gmra.mxu2 %vm2024_vm1, %v2753_v57 }
 0x265   : > { %2838 = vmatpush.bf16.xpose.msra.mxu2 %v10312_v15 }
 0x267   : > { %8323 = vmatmul.msk.bf16.vlgmr.msra.gmra.mxu0 %vm2024_vm1, %v10457_v56  ;;  %8324 = vmatmul.msk.bf16.vlgmr.msra.gmra.mxu1 %vm2024_vm1, %v10528_v13  ;;  %v10862_v56 = vpop.f32.mrf.mxu2  ;;  %v2829_v13 = vpop.permute.xlu2 %2828 }
 0x268   : > { %2723 = vmatpush.bf16.xpose.msrb.mxu0 %v17286_v30  ;;  %2742 = vmatpush.bf16.xpose.msrb.mxu1 %v17287_v58  ;;  %v17295_v30 = vld [vmem:[#allocation53_spill] sm:$0xff] }
 0x269   : > { %8330 = vmatmul.msk.bf16.vlgmr.msrb.gmra.mxu3 %vm2024_vm1, %v2772_v35 }
 0x26a   : > { %2856 = vmatpush.bf16.xpose.msra.mxu3 %v10315_v10  ;;  %v10846_v10 = vpop.f32.mrf.mxu3  ;;  %v2715_v43 = vpop.permute.xlu1 %2714 }
 0x26d   : > { %2839 = vmatpush.bf16.xpose.msra.mxu2 %v10360_v9  ;;  %v10866_v9 = vpop.f32.mrf.mxu1 }
 0x26f   : > { %v2734_v39 = vpop.permute.xlu2 %2733 }
 0x270   : > { %2724 = vmatpush.bf16.xpose.msrb.mxu0 %v17288_v18  ;;  %2743 = vmatpush.bf16.xpose.msrb.mxu1 %v17289_v1 }
 0x272   : > { %2857 = vmatpush.bf16.xpose.msra.mxu3 %v10382_v0  ;;  %v10856_v15 = vpop.f32.mrf.mxu3  ;;  %v17291_v0 = vld [vmem:[#allocation13_spill] sm:$0xff] }
 0x275   : > { %2840 = vmatpush.bf16.xpose.msra.mxu2 %v10410_v54  ;;  %v10891_v14 = vpop.f32.mrf.mxu1 }
 0x276   : > { %v3028_v57 = vsel %vm17162_vm2, %v10891_v14, -inf }
 0x278   : > { %2725 = vmatpush.bf16.xpose.msrb.mxu0 %v17290_v31  ;;  %2744 = vmatpush.bf16.xpose.msrb.mxu1 %v17291_v0  ;;  %v17297_v31 = vld [vmem:[#allocation23_spill] sm:$0xff]  ;;  %v17298_v0 = vld [vmem:[#allocation54_spill] sm:$0xff] }
 0x27a   : > { %2858 = vmatpush.bf16.xpose.msra.mxu3 %v10432_v27  ;;  %v17292_v27 = vld [vmem:[#allocation16_spill] sm:$0xff]  ;;  %v10872_v54 = vpop.f32.mrf.mxu3 }
 0x27b   : > { %v3037_v32 = vsel %vm17158_vm0, %v10872_v54, -inf }
 0x27c   : > { %8333 = vmatmul.msk.bf16.vlgmr.msra.gmra.mxu2 %vm2024_vm1, %v2829_v13  ;;  %3038 = vmax.xlane.f32.xlu2 %v3037_v32 }
 0x27d   : > { %2913 = vmatpush.bf16.xpose.msrb.mxu2 %v10445_v11  ;;  %v10876_v11 = vpop.f32.mrf.mxu0 }
 0x280   : > { %2726 = vmatpush.bf16.xpose.msrb.mxu0 %v17292_v27  ;;  %2745 = vmatpush.bf16.xpose.msrb.mxu1 %v17293_v4  ;;  %v3018_v27 = vsel %vm17158_vm0, %v10876_v11, -inf  ;;  %v17299_v4 = vld [vmem:[#allocation26_spill] sm:$0xff] }
 0x282   : > { %2859 = vmatpush.bf16.xpose.msra.mxu3 %v10484_v24  ;;  %v2848_v24 = vpop.permute.xlu0 %2847  ;;  %v10895_v58 = vpop.f32.mrf.mxu3 }
 0x283   : > { %v3040_v18 = vsel %vm17162_vm2, %v10895_v58, -inf  ;;  %v10923_v32 = vpop.f32.mrf.mxu1 }
 0x284   : > { %3029 = vmax.xlane.f32.xlu2 %v3028_v57 }
 0x285   : > { %2914 = vmatpush.bf16.xpose.msrb.mxu2 %v10501_v40  ;;  %v17294_v40 = vld [vmem:[#allocation55_spill] sm:$0xff]  ;;  %v10897_v35 = vpop.f32.mrf.mxu0 }
 0x286   : > { %v3022_v1 = vsel %vm17162_vm2, %v10897_v35, -inf }
 0x287   : > { %8327 = vmatmul.msk.bf16.vlgmr.msrb.gmra.mxu0 %vm2024_vm1, %v2715_v43  ;;  %8328 = vmatmul.msk.bf16.vlgmr.msrb.gmra.mxu1 %vm2024_vm1, %v2734_v39  ;;  %v3049_v39 = vsel %vm17158_vm0, %v10923_v32, -inf }
 0x288   : > { %2818 = vmatpush.bf16.xpose.msra.mxu1 %v10327_v19  ;;  %2799 = vmatpush.bf16.xpose.msra.mxu0 %v10287_v61  ;;  %v3031_v61 = vsel %vm17158_vm0, %v10862_v56, -inf }
 0x289   : > { %8334 = vmatmul.msk.bf16.vlgmr.msra.gmra.mxu3 %vm2024_vm1, %v2848_v24  ;;  %3032 = vmax.xlane.f32.xlu0 %v3031_v61  ;;  %v17300_v24 = vld [vmem:[#allocation20_spill] sm:$0xff]  ;;  %v2791_v61 = vpop.permute.xlu2 %2790 }
 0x28a   : > { %2932 = vmatpush.bf16.xpose.msrb.mxu3 %v10514_v8  ;;  %v10879_v8 = vpop.f32.mrf.mxu2  ;;  %v2905_v13 = vpop.permute.xlu0 %2904 }
 0x28b   : > { %v3034_v19 = vsel %vm17162_vm2, %v10879_v8, -inf  ;;  %v10940_v57 = vpop.f32.mrf.mxu1 }
 0x28c   : > { %3035 = vmax.xlane.f32.xlu1 %v3034_v19  ;;  %3050 = vmax.xlane.f32.xlu2 %v3049_v39  ;;  %17305 = vst [vmem:[#allocation51_spill] sm:$0xff] %v10940_v57  ;;  %v4740_v39 = vunpack.c.l.b16 %v10760_v21 }
 0x290   : > { %2819 = vmatpush.bf16.xpose.msra.mxu1 %v17294_v40  ;;  %2800 = vmatpush.bf16.xpose.msra.mxu0 %v17295_v30  ;;  %v17303_v30 = vld [vmem:[#allocation27_spill] sm:$0xff] }
 0x291   : > { %3041 = vmax.xlane.f32.xlu0 %v3040_v18  ;;  %v10948_v18 = vpack.c.bf16 %v10856_v15, %v10856_v15 }
 0x292   : > { %2933 = vmatpush.bf16.xpose.msrb.mxu3 %v10567_v47  ;;  %v17296_v47 = vld [vmem:[#allocation11_spill] sm:$0xff]  ;;  %v2810_v43 = vpop.permute.xlu0 %2809 }
 0x293   : > { %2915 = vmatpush.bf16.xpose.msrb.mxu2 %v17296_v47  ;;  %v17304_v47 = vld [vmem:[#allocation45_spill] sm:$0xff]  ;;  %17307 = vst [vmem:[#allocation38_spill] sm:$0xff] %v10948_v18 }
 0x294   : > { %3023 = vmax.xlane.f32.xlu1 %v3022_v1  ;;  %v3052_v1 = vsel %vm17162_vm2, %v10940_v57, -inf }
 0x298   : > { %2820 = vmatpush.bf16.xpose.msra.mxu1 %v17297_v31  ;;  %2801 = vmatpush.bf16.xpose.msra.mxu0 %v17298_v0  ;;  %v4744_v0 = vunpack.c.l.b16 %v10779_v36  ;;  %v10968_v36 = vpack.c.bf16 %v10828_v62, %v10828_v62 }
 0x299   : > { %3019 = vmax.xlane.f32.xlu0 %v3018_v27 }
 0x29a   : > { %2934 = vmatpush.bf16.xpose.msrb.mxu3 %v10612_v53  ;;  %v10911_v53 = vpop.f32.mrf.mxu0  ;;  %17308 = vst [vmem:[#allocation36_spill] sm:$0xff] %v10968_v36 }
 0x29b   : > { %2916 = vmatpush.bf16.xpose.msrb.mxu2 %v10605_v2  ;;  %v3025_v2 = vsel %vm17158_vm0, %v10866_v9, -inf  ;;  %v3043_v40 = vsel %vm17158_vm0, %v10911_v53, -inf }
 0x29c   : > { %3026 = vmax.xlane.f32.xlu1 %v3025_v2  ;;  %v4742_v2 = vunpack.c.l.b16 %v10781_v59 }
 0x2a0   : > { %2821 = vmatpush.bf16.xpose.msra.mxu1 %v17299_v4  ;;  %2802 = vmatpush.bf16.xpose.msra.mxu0 %v17300_v24  ;;  %v10964_v4 = vpack.c.bf16 %v10807_v37, %v10807_v37  ;;  %v4743_v24 = vunpack.c.l.b16 %v10785_v51  ;;  %v10985_v51 = vpack.c.bf16 %v10736_v63, %v10736_v63 }
 0x2a1   : > { %3053 = vmax.xlane.f32.xlu0 %v3052_v1  ;;  %v4776_v1 = vunpack.c.l.b16 %v10813_v23  ;;  %v2867_v23 = vpop.permute.xlu0 %2866 }
 0x2a2   : > { %2935 = vmatpush.bf16.xpose.msrb.mxu3 %v10656_v25  ;;  %8337 = vmatmul.msk.bf16.vlgmr.msrb.gmra.mxu2 %vm2024_vm1, %v2905_v13  ;;  %v17302_v25 = vld [vmem:[#allocation35_spill] sm:$0xff]  ;;  %v10931_v19 = vpop.f32.mrf.mxu0  ;;  %v4745_v13 = vunpack.c.l.b16 %v10809_v33  ;;  %17310 = vst [vmem:[#allocation42_spill] sm:$0xff] %v10985_v51  ;;  %v4780_v37 = vunpack.c.l.b16 %v10964_v4 }
 0x2a3   : > { %2989 = vmatpush.bf16.xpose.msra.mxu2 %v10615_v41  ;;  %v17301_v41 = vld [vmem:[#allocation24_spill] sm:$0xff]  ;;  %v3046_v31 = vsel %vm17162_vm2, %v10931_v19, -inf }
 0x2a4   : > { %3044 = vmax.xlane.f32.xlu1 %v3043_v40  ;;  %3047 = vmax.xlane.f32.xlu2 %v3046_v31  ;;  %v4749_v27 = vpack.c.b16 %v4745_v13, %v4744_v0  ;;  %v3000_v31 = vpop.permute.xlu2 %2999  ;;  %v4777_v0 = vunpack.c.l.b16 %v10805_v52 }
 0x2a6   : > { %v4784_v52 = vpack.c.b16 %v4777_v0, %v4776_v1  ;;  %v17323_v1 = vld [vmem:[#allocation44_spill] sm:$0xff]  ;;  %v17324_v0 = vld [vmem:[#allocation25_spill] sm:$0xff] }
 0x2a7   : > { %8332 = vmatmul.msk.bf16.vlgmr.msra.gmra.mxu1 %vm2024_vm1, %v2810_v43  ;;  %8331 = vmatmul.msk.bf16.vlgmr.msra.gmra.mxu0 %vm2024_vm1, %v2791_v61  ;;  %v4741_v43 = vunpack.c.l.b16 %v10749_v29  ;;  %v4739_v29 = vunpack.c.l.b16 %v10753_v46 }
 0x2a8   : > { %2875 = vmatpush.bf16.xpose.msrb.mxu0 %v17301_v41  ;;  %2894 = vmatpush.bf16.xpose.msrb.mxu1 %v17302_v25 }
 0x2a9   : > { %v4747_v21 = vpack.c.b16 %v4741_v43, %v4740_v39  ;;  %v17319_v39 = vld [vmem:[#allocation22_spill] sm:$0xff] }
 0x2aa   : > { %3008 = vmatpush.bf16.xpose.msra.mxu3 %v10668_v34  ;;  %v2924_v34 = vpop.permute.xlu1 %2923  ;;  %v10998_v63 = vpop.f32.mrf.mxu0  ;;  %v4704_v43 = vunpack.c.l.b16 %v17319_v39 }
 0x2ab   : > { %2990 = vmatpush.bf16.xpose.msra.mxu2 %v10650_v26  ;;  %8338 = vmatmul.msk.bf16.vlgmr.msrb.gmra.mxu3 %vm2024_vm1, %v2924_v34  ;;  %v10936_v26 = vpop.f32.mrf.mxu3  ;;  %v4748_v34 = vpack.c.b16 %v4743_v24, %v4742_v2  ;;  %17312 = vst [vmem:[#allocation39_spill] sm:$0xff] %v10998_v63 }
 0x2ac   : > { %v3061_v62 = vsel %vm17158_vm0, %v10936_v26, -inf }
 0x2ad   : > { %3062 = vmax.xlane.f32.xlu0 %v3061_v62 }
 0x2b0   : > { %2876 = vmatpush.bf16.xpose.msrb.mxu0 %v17303_v30  ;;  %2895 = vmatpush.bf16.xpose.msrb.mxu1 %v17304_v47 }
 0x2b2   : > { %3009 = vmatpush.bf16.xpose.msra.mxu3 %v10701_v5  ;;  %v10944_v5 = vpack.c.bf16 %v10846_v10, %v10846_v10  ;;  %v10957_v10 = vpop.f32.mrf.mxu2  ;;  %v2981_v61 = vpop.permute.xlu1 %2980 }
 0x2b3   : > { %2991 = vmatpush.bf16.xpose.msra.mxu2 %v10693_v48  ;;  %v4783_v48 = vunpack.c.l.b16 %v10948_v18  ;;  %v10970_v33 = vpop.f32.mrf.mxu3  ;;  %v3055_v59 = vsel %vm17158_vm0, %v10957_v10, -inf  ;;  %v11019_v13 = vpop.f32.mrf.mxu0 }
 0x2b4   : > { %17306 = vst [vmem:[#allocation28_spill] sm:$0xff] %v10944_v5  ;;  %v4782_v15 = vunpack.c.l.b16 %v10944_v5  ;;  %v3064_v41 = vsel %vm17162_vm2, %v10970_v33, -inf  ;;  %3056 = vmax.xlane.f32.xlu2 %v3055_v59  ;;  %v3070_v2 = vsel %vm17162_vm2, %v11019_v13, -inf }
 0x2b5   : > { %3065 = vmax.xlane.f32.xlu1 %v3064_v41  ;;  %17313 = vst [vmem:[#allocation37_spill] sm:$0xff] %v11019_v13  ;;  %v4668_v41 = vunpack.c.l.b16 %v10625_v3  ;;  %v17322_v3 = vld [vmem:[#allocation50_spill] sm:$0xff] }
 0x2b6   : > { %v4787_v25 = vpack.c.b16 %v4783_v48, %v4782_v15 }
 0x2b8   : > { %2896 = vmatpush.bf16.xpose.msrb.mxu1 %v10602_v28  ;;  %v10989_v28 = vpack.c.bf16 %v10776_v17, %v10776_v17  ;;  %v4778_v17 = vunpack.c.l.b16 %v10985_v51 }
 0x2ba   : > { %3010 = vmatpush.bf16.xpose.msra.mxu3 %v10729_v7  ;;  %v17309_v7 = vld [vmem:[#allocation31_spill] sm:$0xff]  ;;  %17311 = vst [vmem:[#allocation32_spill] sm:$0xff] %v10989_v28  ;;  %v10996_v40 = vpop.f32.mrf.mxu2  ;;  %v4779_v30 = vunpack.c.l.b16 %v10989_v28 }
 0x2bb   : > { %2877 = vmatpush.bf16.xpose.msrb.mxu0 %v17309_v7  ;;  %2992 = vmatpush.bf16.xpose.msra.mxu2 %v10741_v38  ;;  %v4781_v38 = vunpack.c.l.b16 %v10968_v36  ;;  %v11022_v15 = vpop.f32.mrf.mxu3 }
 0x2bc   : > { %v3085_v48 = vsel %vm17158_vm0, %v11022_v15, -inf }
 0x2bd   : > { %v4786_v47 = vpack.c.b16 %v4781_v38, %v4780_v37  ;;  %3086 = vmax.xlane.f32.xlu1 %v3085_v48  ;;  %v17318_v38 = vld [vmem:[#allocation49_spill] sm:$0xff]  ;;  %v17328_v48 = vld [vmem:[#allocation48_spill] sm:$0xff] }
 0x2c0   : > { %2897 = vmatpush.bf16.xpose.msrb.mxu1 %v10647_v45  ;;  %v3067_v45 = vsel %vm17158_vm0, %v10998_v63, -inf }
 0x2c1   : > { %3068 = vmax.xlane.f32.xlu2 %v3067_v45  ;;  %v17325_v45 = vld [vmem:[#allocation47_spill] sm:$0xff] }
 0x2c2   : > { %3011 = vmatpush.bf16.xpose.msra.mxu3 %v10756_v20  ;;  %v4738_v20 = vunpack.c.l.b16 %v10723_v60  ;;  %8341 = vmatmul.msk.bf16.vlgmr.msra.gmra.mxu2 %vm2024_vm1, %v2981_v61  ;;  %v4785_v60 = vpack.c.b16 %v4779_v30, %v4778_v17  ;;  %v11016_v46 = vpop.f32.mrf.mxu2  ;;  %v17320_v61 = vld [vmem:[#allocation41_spill] sm:$0xff]  ;;  %v17321_v30 = vld [vmem:[#allocation46_spill] sm:$0xff] }
 0x2c3   : > { %4761 = vmatpush.bf16.msrb.mxu2 %v4749_v27  ;;  %2878 = vmatpush.bf16.xpose.msrb.mxu0 %v10596_v6  ;;  %v3058_v6 = vsel %vm17162_vm2, %v10996_v40, -inf  ;;  %v3079_v7 = vsel %vm17158_vm0, %v11016_v46, -inf  ;;  %v4667_v17 = vunpack.c.l.b16 %v17320_v61 }
 0x2c4   : > { %3059 = vmax.xlane.f32.xlu0 %v3058_v6  ;;  %v4665_v6 = vunpack.c.l.b16 %v17324_v0 }
 0x2c7   : > { %4762 = vmatpush.bf16.msrb.mxu2 %v4748_v34 }
 0x2c8   : > { %2970 = vmatpush.bf16.xpose.msra.mxu1 %v10716_v49  ;;  %v2886_v49 = vpop.permute.xlu1 %2885 }
 0x2c9   : > { %8342 = vmatmul.msk.bf16.vlgmr.msra.gmra.mxu3 %vm2024_vm1, %v3000_v31  ;;  %8336 = vmatmul.msk.bf16.vlgmr.msrb.gmra.mxu1 %vm2024_vm1, %v2886_v49  ;;  %v4702_v31 = vunpack.c.l.b16 %v17323_v1 }
 0x2ca   : > { %4799 = vmatpush.bf16.msrb.mxu3 %v4787_v25  ;;  %8335 = vmatmul.msk.bf16.vlgmr.msrb.gmra.mxu0 %vm2024_vm1, %v2867_v23  ;;  %v11030_v24 = vpop.f32.mrf.mxu2 }
 0x2cb   : > { %2951 = vmatpush.bf16.xpose.msra.mxu0 %v10679_v50  ;;  %4763 = vmatpush.bf16.msrb.mxu2 %v4747_v21  ;;  %v4746_v50 = vpack.c.b16 %v4739_v29, %v4738_v20 }
 0x2cc   : > { %3071 = vmax.xlane.f32.xlu0 %v3070_v2  ;;  %v4700_v2 = vunpack.c.l.b16 %v17328_v48 }
 0x2ce   : > { %4800 = vmatpush.bf16.msrb.mxu3 %v4786_v47 }
 0x2cf   : > { %4764 = vmatpush.bf16.msrb.mxu2 %v4746_v50 }
 0x2d0   : > { %2971 = vmatpush.bf16.xpose.msra.mxu1 %v10796_v16  ;;  %v11070_v39 = vpop.permute.xlu1 %1945 }
 0x2d1   : > { %17333 = vst [vmem:[#allocation9_spill] sm:$0xff] %v11070_v39 }
 0x2d2   : > { %4801 = vmatpush.bf16.msrb.mxu3 %v4785_v60  ;;  %v11056_v49 = vpop.f32.mrf.mxu2 }
 0x2d3   : > { %4865 = vmatpush.bf16.msra.mxu2 %v4749_v27  ;;  %2952 = vmatpush.bf16.xpose.msra.mxu0 %v10771_v22  ;;  %v11032_v27 = vpop.f32.mrf.mxu3  ;;  %v3082_v22 = vsel %vm17162_vm2, %v11030_v24, -inf  ;;  %17326 = vst [vmem:[#allocation29_spill] sm:$0xff] %v11056_v49 }
 0x2d4   : > { %17314 = vst [vmem:[#allocation30_spill] sm:$0xff] %v11032_v27  ;;  %v3088_v16 = vsel %vm17162_vm2, %v11032_v27, -inf  ;;  %3083 = vmax.xlane.f32.xlu1 %v3082_v22  ;;  %3080 = vmax.xlane.f32.xlu0 %v3079_v7  ;;  %v2943_v22 = vpop.permute.xlu2 %2942  ;;  %v17329_v7 = vld [vmem:[#allocation33_spill] sm:$0xff] }
 0x2d5   : > { %3089 = vmax.xlane.f32.xlu2 %v3088_v16  ;;  %v2962_v16 = vpop.permute.xlu0 %2961 }
 0x2d6   : > { %4802 = vmatpush.bf16.msrb.mxu3 %v4784_v52 }
 0x2d7   : > { %4866 = vmatpush.bf16.msra.mxu2 %v4748_v34  ;;  %v4666_v34 = vunpack.c.l.b16 %v17318_v38  ;;  %v11066_v38 = vpop.f32.mrf.mxu1 }
 0x2d8   : > { %2972 = vmatpush.bf16.xpose.msra.mxu1 %v10821_v55  ;;  %v17317_v55 = vld [vmem:[#allocation43_spill] sm:$0xff]  ;;  %17331 = vst [vmem:[#allocation7_spill] sm:$0xff] %v11066_v38 }
 0x2d9   : > { %v4707_v37 = vunpack.c.l.b16 %v17317_v55 }
 0x2da   : > { %4887 = vmatpush.bf16.msra.mxu3 %v4787_v25  ;;  %v17315_v25 = vld [vmem:[#allocation34_spill] sm:$0xff]  ;;  %v11090_v1 = vpop.f32.mrf.mxu2 }
 0x2db   : > { %4867 = vmatpush.bf16.msra.mxu2 %v4747_v21  ;;  %2953 = vmatpush.bf16.xpose.msra.mxu0 %v10791_v12  ;;  %v4706_v62 = vunpack.c.l.b16 %v17315_v25  ;;  %v17316_v12 = vld [vmem:[#allocation40_spill] sm:$0xff]  ;;  %v4664_v21 = vunpack.c.l.b16 %v17322_v3  ;;  %17342 = vst [vmem:[#allocation6_spill] sm:$0xff] %v11090_v1 }
 0x2dc   : > { %v4669_v59 = vunpack.c.l.b16 %v17316_v12  ;;  %v17330_v25 = vld [vmem:[#allocation52_spill] sm:$0xff] }
 0x2dd   : > { %v4711_v29 = vpack.c.b16 %v4707_v37, %v4706_v62  ;;  %v4701_v62 = vunpack.c.l.b16 %v17330_v25  ;;  %v4671_v12 = vpack.c.b16 %v4665_v6, %v4664_v21  ;;  %v3106_v25 = vsel %vm17162_vm2, %v11090_v1, -inf }
 0x2de   : > { %4888 = vmatpush.bf16.msra.mxu3 %v4786_v47  ;;  %v4705_v47 = vunpack.c.l.b16 %v17321_v30  ;;  %v4673_v20 = vpack.c.b16 %v4669_v59, %v4668_v41  ;;  %v4663_v41 = vunpack.c.l.b16 %v17329_v7  ;;  %v11078_v30 = vpop.permute.xlu1 %1951 }
 0x2df   : > { %4868 = vmatpush.bf16.msra.mxu2 %v4746_v50  ;;  %v4672_v50 = vpack.c.b16 %v4667_v17, %v4666_v34  ;;  %v4708_v37 = vpack.c.b16 %v4701_v62, %v4700_v2  ;;  %v11068_v34 = vpop.permute.xlu2 %1947  ;;  %v11074_v61 = vpop.f32.mrf.mxu1  ;;  %17337 = vst [vmem:[#allocation18_spill] sm:$0xff] %v11078_v30 }
 0x2e0   : > { %2973 = vmatpush.bf16.xpose.msra.mxu1 %v10833_v44  ;;  %v4710_v23 = vpack.c.b16 %v4705_v47, %v4704_v43  ;;  %v17327_v44 = vld [vmem:[#allocation21_spill] sm:$0xff]  ;;  %17332 = vst [vmem:[#allocation8_spill] sm:$0xff] %v11068_v34  ;;  %v11072_v43 = vpop.permute.xlu0 %1949 }
 0x2e1   : > { %17334 = vst [vmem:[#allocation10_spill] sm:$0xff] %v11072_v43 }
 0x2e2   : > { %4889 = vmatpush.bf16.msra.mxu3 %v4785_v60  ;;  %v4703_v60 = vunpack.c.l.b16 %v17325_v45  ;;  %17335 = vst [vmem:[#allocation14_spill] sm:$0xff] %v11074_v61 }
 0x2e3   : > { %2954 = vmatpush.bf16.xpose.msra.mxu0 %v10836_v42  ;;  %v3103_v42 = vsel %vm17158_vm0, %v11056_v49, -inf }
 0x2e4   : > { %3104 = vmax.xlane.f32.xlu1 %v3103_v42  ;;  %v4709_v59 = vpack.c.b16 %v4703_v60, %v4702_v31 }
 0x2e6   : > { %4890 = vmatpush.bf16.msra.mxu3 %v4784_v52  ;;  %v4662_v52 = vunpack.c.l.b16 %v17327_v44  ;;  %v11088_v21 = vpop.permute.xlu1 %1957  ;;  %v11100_v60 = vpop.f32.mrf.mxu2 }
 0x2e7   : > { %8340 = vmatmul.msk.bf16.vlgmr.msra.gmra.mxu1 %vm2024_vm1, %v2962_v16  ;;  %v11076_v17 = vpop.permute.xlu2 %1953  ;;  %17341 = vst [vmem:[#allocation5_spill] sm:$0xff] %v11088_v21  ;;  %v3073_v21 = vsel %vm17158_vm0, %v11066_v38, -inf }
 0x2e8   : > { %4723 = vmatpush.bf16.msrb.mxu1 %v4711_v29  ;;  %v4670_v55 = vpack.c.b16 %v4663_v41, %v4662_v52  ;;  %17336 = vst [vmem:[#allocation15_spill] sm:$0xff] %v11076_v17  ;;  %v11080_v47 = vpop.permute.xlu0 %1955 }
 0x2e9   : > { %17338 = vst [vmem:[#allocation19_spill] sm:$0xff] %v11080_v47 }
 0x2ea   : > { %8339 = vmatmul.msk.bf16.vlgmr.msra.gmra.mxu0 %vm2024_vm1, %v2943_v22 }
 0x2eb   : > { %4685 = vmatpush.bf16.msrb.mxu0 %v4673_v20 }
 0x2ec   : > { %4724 = vmatpush.bf16.msrb.mxu1 %v4710_v23 }
 0x2ee   : > { %v11118_v16 = vpop.f32.mrf.mxu2 }
 0x2ef   : > { %4686 = vmatpush.bf16.msrb.mxu0 %v4672_v50  ;;  %v11086_v3 = vpop.permute.xlu2 %1959 }
 0x2f0   : > { %4725 = vmatpush.bf16.msrb.mxu1 %v4709_v59  ;;  %17340 = vst [vmem:[#allocation4_spill] sm:$0xff] %v11086_v3  ;;  %v11092_v31 = vpop.permute.xlu0 %1961 }
 0x2f1   : > { %17343 = vst [vmem:[#allocation12_spill] sm:$0xff] %v11092_v31 }
 0x2f3   : > { %4687 = vmatpush.bf16.msrb.mxu0 %v4671_v12 }
 0x2f4   : > { %4726 = vmatpush.bf16.msrb.mxu1 %v4708_v37 }
 0x2f7   : > { %4688 = vmatpush.bf16.msrb.mxu0 %v4670_v55  ;;  %v11098_v45 = vpop.permute.xlu2 %1965 }
 0x2f8   : > { %4843 = vmatpush.bf16.msra.mxu1 %v4711_v29  ;;  %v11084_v29 = vpop.f32.mrf.mxu0  ;;  %17344 = vst [vmem:[#allocation13_spill] sm:$0xff] %v11098_v45  ;;  %v11108_v44 = vpop.permute.xlu0 %1967 }
 0x2f9   : > { %17339 = vst [vmem:[#allocation3_spill] sm:$0xff] %v11084_v29 }
 0x2fa   : > { %17347 = vst [vmem:[#allocation55_spill] sm:$0xff] %v11108_v44 }
 0x2fb   : > { %4821 = vmatpush.bf16.msra.mxu0 %v4673_v20  ;;  %v11082_v20 = vpop.f32.mrf.mxu1 }
 0x2fc   : > { %4844 = vmatpush.bf16.msra.mxu1 %v4710_v23  ;;  %v11104_v23 = vpop.f32.mrf.mxu3 }
 0x2fd   : > { %17346 = vst [vmem:[#allocation17_spill] sm:$0xff] %v11104_v23 }
 0x2ff   : > { %4822 = vmatpush.bf16.msra.mxu0 %v4672_v50  ;;  %v11102_v50 = vpop.permute.xlu1 %1963  ;;  %v11116_v22 = vpop.permute.xlu2 %1971 }
 0x300   : > { %4845 = vmatpush.bf16.msra.mxu1 %v4709_v59  ;;  %v11096_v6 = vpop.f32.mrf.mxu0  ;;  %17345 = vst [vmem:[#allocation16_spill] sm:$0xff] %v11102_v50  ;;  %v3802_v59 = vsel %vm17162_vm2, %v11118_v16, -inf  ;;  %v11182_v31 = vpop.f32.mrf.mxu2 }
 0x301   : > { %17348 = vst [vmem:[#allocation53_spill] sm:$0xff] %v11116_v22 }
 0x303   : > { %4823 = vmatpush.bf16.msra.mxu0 %v4671_v12  ;;  %v11094_v0 = vpop.f32.mrf.mxu1 }
 0x304   : > { %4846 = vmatpush.bf16.msra.mxu1 %v4708_v37  ;;  %v11128_v12 = vpop.f32.mrf.mxu3 }
 0x305   : > { %17350 = vst [vmem:[#allocation23_spill] sm:$0xff] %v11128_v12  ;;  %v3112_v49 = vsel %vm17162_vm2, %v11128_v12, -inf }
 0x307   : > { %4824 = vmatpush.bf16.msra.mxu0 %v4670_v55  ;;  %v11122_v41 = vpop.permute.xlu1 %1969  ;;  %v11132_v55 = vpop.permute.xlu0 %1973 }
 0x308   : > { %v11110_v52 = vpop.f32.mrf.mxu0  ;;  %17349 = vst [vmem:[#allocation11_spill] sm:$0xff] %v11122_v41 }
 0x309   : > { %v3787_v2 = vsel %vm17158_vm0, %v11110_v52, -inf  ;;  %17351 = vst [vmem:[#allocation54_spill] sm:$0xff] %v11132_v55 }
 0x30a   : > { %3788 = vmax.xlane.f32.xlu1 %v3787_v2  ;;  %v3799_v2 = vsel %vm17158_vm0, %v11100_v60, -inf }
 0x30b   : > { %v11106_v42 = vpop.f32.mrf.mxu1 }
 0x30c   : > { %v3793_v48 = vsel %vm17158_vm0, %v11106_v42, -inf  ;;  %v11142_v51 = vpop.f32.mrf.mxu3 }
 0x30d   : > { %3794 = vmax.xlane.f32.xlu2 %v3793_v48  ;;  %v11136_v48 = vpop.permute.xlu2 %1977  ;;  %v3805_v36 = vsel %vm17158_vm0, %v11142_v51, -inf }
 0x30e   : > { %17352 = vst [vmem:[#allocation26_spill] sm:$0xff] %v11136_v48 }
 0x310   : > { %v11134_v37 = vpop.f32.mrf.mxu0 }
 0x311   : > { %v3790_v28 = vsel %vm17162_vm2, %v11134_v37, -inf }
 0x312   : > { %3803 = vmax.xlane.f32.xlu1 %v3802_v59 }
 0x313   : > { %v11120_v7 = vpop.f32.mrf.mxu1 }
 0x314   : > { %v3796_v62 = vsel %vm17162_vm2, %v11120_v7, -inf }
 0x315   : > { %3107 = vmax.xlane.f32.xlu2 %v3106_v25  ;;  %3797 = vmax.xlane.f32.xlu0 %v3796_v62  ;;  %v11144_v25 = vpop.permute.xlu1 %1975  ;;  %v11146_v62 = vpop.permute.xlu0 %1979 }
 0x316   : > { %17353 = vst [vmem:[#allocation20_spill] sm:$0xff] %v11144_v25  ;;  %v11148_v18 = vpop.permute.xlu2 %1983 }
 0x317   : > { %17354 = vst [vmem:[#allocation24_spill] sm:$0xff] %v11146_v62 }
 0x318   : > { %17355 = vst [vmem:[#allocation35_spill] sm:$0xff] %v11148_v18 }
 0x31d   : > { %3800 = vmax.xlane.f32.xlu0 %v3799_v2  ;;  %3791 = vmax.xlane.f32.xlu2 %v3790_v28  ;;  %v11158_v2 = vpop.f32.mrf.mxu3  ;;  %v11160_v28 = vpop.permute.xlu1 %1981 }
 0x31e   : > { %17356 = vst [vmem:[#allocation27_spill] sm:$0xff] %v11160_v28  ;;  %v11162_v55 = vpop.permute.xlu0 %1985  ;;  %v11172_v44 = vpop.permute.xlu2 %1989 }
 0x31f   : > { %17357 = vst [vmem:[#allocation45_spill] sm:$0xff] %v11162_v55 }
 0x320   : > { %17358 = vst [vmem:[#allocation31_spill] sm:$0xff] %v11172_v44 }
 0x324   : > { %v11150_v59 = vpop.f32.mrf.mxu1  ;;  %v11154_v5 = vpop.f32.mrf.mxu0 }
 0x325   : > { %3806 = vmax.xlane.f32.xlu2 %v3805_v36  ;;  %v3817_v1 = vsel %vm17158_vm0, %v11150_v59, -inf  ;;  %v3811_v25 = vsel %vm17158_vm0, %v11154_v5, -inf  ;;  %v11176_v28 = vpop.f32.mrf.mxu3  ;;  %v11178_v55 = vpop.permute.xlu1 %1987 }
 0x326   : > { %3818 = vmax.xlane.f32.xlu0 %v3817_v1  ;;  %17359 = vst [vmem:[#allocation34_spill] sm:$0xff] %v11178_v55  ;;  %v11180_v41 = vpop.permute.xlu0 %1991  ;;  %v3829_v44 = vsel %vm17158_vm0, %v11176_v28, -inf  ;;  %v11190_v48 = vpop.permute.xlu2 %1995 }
 0x327   : > { %17360 = vst [vmem:[#allocation40_spill] sm:$0xff] %v11180_v41 }
 0x328   : > { %17361 = vst [vmem:[#allocation43_spill] sm:$0xff] %v11190_v48 }
 0x32c   : > { %v11164_v62 = vpop.f32.mrf.mxu1  ;;  %v11168_v18 = vpop.f32.mrf.mxu0 }
 0x32d   : > { %3812 = vmax.xlane.f32.xlu2 %v3811_v25  ;;  %v3820_v36 = vsel %vm17162_vm2, %v11164_v62, -inf  ;;  %v3814_v1 = vsel %vm17162_vm2, %v11168_v18, -inf  ;;  %v3808_v25 = vsel %vm17162_vm2, %v11158_v2, -inf  ;;  %v11194_v55 = vpop.permute.xlu1 %1993 }
 0x32e   : > { %3821 = vmax.xlane.f32.xlu1 %v3820_v36  ;;  %3815 = vmax.xlane.f32.xlu0 %v3814_v1  ;;  %v3823_v36 = vsel %vm17158_vm0, %v11182_v31, -inf  ;;  %v11192_v1 = vpop.f32.mrf.mxu3  ;;  %17362 = vst [vmem:[#allocation49_spill] sm:$0xff] %v11194_v55  ;;  %v3033_v41 = vpop.xlane.xlu0 %3032 }
 0x32f   : > { %v3832_v50 = vsel %vm17162_vm2, %v11192_v1, -inf  ;;  %v3039_v47 = vpop.xlane.xlu2 %3038  ;;  %v3119_v63 = vsub.f32 %v10862_v56, %v3033_v41 }
 0x335   : > { %3809 = vmax.xlane.f32.xlu2 %v3808_v25  ;;  %v3036_v45 = vpop.xlane.xlu1 %3035 }
 0x336   : > { %3830 = vmax.xlane.f32.xlu1 %v3829_v44  ;;  %3824 = vmax.xlane.f32.xlu0 %v3823_v36  ;;  %v11204_v36 = vpop.f32.mrf.mxu2  ;;  %v11208_v55 = vpop.f32.mrf.mxu3  ;;  %v3120_v12 = vsub.f32 %v10879_v8, %v3036_v45  ;;  %v3155_v8 = vmul.f32 1.442695, %v3119_v63 }
 0x337   : > { %v3042_v17 = vpop.xlane.xlu0 %3041  ;;  %v3826_v43 = vsel %vm17162_vm2, %v11204_v36, -inf }
 0x338   : > { %v3122_v41 = vsub.f32 %v10895_v58, %v3042_v17 }
 0x33d   : > { %3833 = vmax.xlane.f32.xlu2 %v3832_v50  ;;  %v11226_v34 = vpop.xlane.xlu1 %3023 }
 0x33e   : > { %v11214_v3 = vpop.f32.mrf.mxu2 }
 0x345   : > { %v11243_v13 = vpop.xlane.xlu1 %3026 }
 0x346   : > { %v11200_v22 = vpop.f32.mrf.mxu1 }
 0x347   : > { %v11198_v25 = vpop.f32.mrf.mxu0  ;;  %17364 = vst [vmem:[#allocation41_spill] sm:$0xff] %v11200_v22  ;;  %v3841_v48 = vsel %vm17158_vm0, %v11200_v22, -inf  ;;  %v11230_v22 = vpop.xlane.xlu0 %3019 }
 0x348   : > { %17363 = vst [vmem:[#allocation22_spill] sm:$0xff] %v11198_v25  ;;  %v3835_v44 = vsel %vm17158_vm0, %v11198_v25, -inf  ;;  %3842 = vmax.xlane.f32.xlu1 %v3841_v48  ;;  %v11220_v48 = vpop.xlane.xlu2 %3029  ;;  %v3853_v25 = vsel %vm17158_vm0, %v11208_v55, -inf }
 0x349   : > { %3836 = vmax.xlane.f32.xlu0 %v3835_v44  ;;  %v11222_v44 = vpop.f32.mrf.mxu3 }
 0x34a   : > { %v3856_v38 = vsel %vm17162_vm2, %v11222_v44, -inf }
 0x34e   : > { %v11210_v50 = vpop.f32.mrf.mxu1 }
 0x34f   : > { %17365 = vst [vmem:[#allocation46_spill] sm:$0xff] %v11210_v50  ;;  %v3844_v30 = vsel %vm17162_vm2, %v11210_v50, -inf  ;;  %v11224_v39 = vpop.f32.mrf.mxu0  ;;  %v3121_v50 = vsub.f32 %v10872_v54, %v3039_v47  ;;  %v11245_v27 = vpop.xlane.xlu0 %3053 }
 0x350   : > { %3827 = vmax.xlane.f32.xlu1 %v3826_v43  ;;  %3845 = vmax.xlane.f32.xlu2 %v3844_v30  ;;  %17366 = vst [vmem:[#allocation50_spill] sm:$0xff] %v11224_v39  ;;  %v3838_v43 = vsel %vm17162_vm2, %v11224_v39, -inf  ;;  %v11236_v30 = vpop.xlane.xlu2 %3050 }
 0x351   : > { %3074 = vmax.xlane.f32.xlu0 %v3073_v21  ;;  %v11238_v21 = vpop.f32.mrf.mxu2  ;;  %17367 = vst [vmem:[#allocation44_spill] sm:$0xff] %v11245_v27  ;;  %v3159_v39 = vmul.f32 1.442695, %v3121_v50  ;;  %v11255_v47 = vpop.f32.mrf.mxu3  ;;  %v3157_v50 = vmul.f32 1.442695, %v3120_v12 }
 0x352   : > { %17369 = vst [vmem:[#allocation47_spill] sm:$0xff] %v11255_v47 }
 0x353   : > { %8639 = vpow2.f32 %v3159_v39 }
 0x354   : > { %8641 = vpow2.f32 %v3157_v50 }
 0x355   : > { %8643 = vpow2.f32 %v3155_v8 }
 0x357   : > { %v11267_v27 = vpop.xlane.xlu0 %3062 }
 0x358   : > { %3854 = vmax.xlane.f32.xlu2 %v3853_v25  ;;  %3839 = vmax.xlane.f32.xlu1 %v3838_v43  ;;  %v3847_v25 = vsel %vm17158_vm0, %v11214_v3, -inf  ;;  %v11253_v54 = vpop.xlane.xlu2 %3047 }
 0x359   : > { %3857 = vmax.xlane.f32.xlu0 %v3856_v38  ;;  %v3850_v38 = vsel %vm17162_vm2, %v11238_v21, -inf  ;;  %v11251_v43 = vpop.f32.mrf.mxu2  ;;  %v11271_v56 = vpop.eup %8639 }
 0x35a   : > { %17368 = vst [vmem:[#allocation25_spill] sm:$0xff] %v11251_v43  ;;  %v3871_v57 = vsel %vm17158_vm0, %v11251_v43, -inf  ;;  %v3229_v12 = vsel %vm17158_vm0, %v11271_v56, 0.0  ;;  %v11284_v8 = vpop.eup %8641  ;;  %v3116_v43 = vsub.f32 %v10897_v35, %v11226_v34 }
 0x35b   : > { %17371 = vst [vmem:[#allocation48_spill] sm:$0xff] %v11271_v56  ;;  %v11286_v17 = vpop.eup %8643 }
 0x35c   : > { %17373 = vst [vmem:[#allocation52_spill] sm:$0xff] %v11284_v8 }
 0x35d   : > { %17374 = vst [vmem:[#allocation56_spill] sm:$0xff] %v11286_v17 }
 0x35f   : > { %v3060_v58 = vpop.xlane.xlu0 %3059 }
 0x360   : > { %3851 = vmax.xlane.f32.xlu2 %v3850_v38  ;;  %3848 = vmax.xlane.f32.xlu1 %v3847_v25  ;;  %v3076_v38 = vsel %vm17162_vm2, %v11074_v61, -inf  ;;  %v11265_v25 = vpop.xlane.xlu1 %3044  ;;  %v3057_v45 = vpop.xlane.xlu2 %3056 }
 0x361   : > { %3113 = vmax.xlane.f32.xlu0 %v3112_v49  ;;  %v3877_v49 = vsel %vm17158_vm0, %v11255_v47, -inf  ;;  %v11269_v39 = vpop.f32.mrf.mxu2 }
 0x362   : > { %17370 = vst [vmem:[#allocation21_spill] sm:$0xff] %v11269_v39 }
 0x364   : > { %v11300_v56 = vpop.f32.mrf.mxu1 }
 0x367   : > { %v11282_v50 = vpop.f32.mrf.mxu0 }
 0x368   : > { %3872 = vmax.xlane.f32.xlu2 %v3871_v57  ;;  %3077 = vmax.xlane.f32.xlu1 %v3076_v38  ;;  %v3109_v57 = vsel %vm17158_vm0, %v11104_v23, -inf  ;;  %v11280_v63 = vpop.xlane.xlu1 %3065  ;;  %v3161_v38 = vmul.f32 1.442695, %v3122_v41  ;;  %17372 = vst [vmem:[#allocation33_spill] sm:$0xff] %v11282_v50  ;;  %v11292_v23 = vpop.xlane.xlu2 %3068  ;;  %v3859_v47 = vsel %vm17158_vm0, %v11282_v50, -inf  ;;  %v3127_v50 = vsub.f32 %v10957_v10, %v3057_v45 }
 0x369   : > { %3878 = vmax.xlane.f32.xlu0 %v3877_v49  ;;  %v3874_v49 = vsel %vm17162_vm2, %v11269_v39, -inf  ;;  %v11288_v39 = vpop.f32.mrf.mxu3  ;;  %v3128_v45 = vsub.f32 %v10996_v40, %v3060_v58 }
 0x36a   : > { %17375 = vst [vmem:[#allocation57_spill] sm:$0xff] %v11288_v39  ;;  %8645 = vpow2.f32 %v3161_v38  ;;  %v3880_v41 = vsel %vm17162_vm2, %v11288_v39, -inf  ;;  %v3171_v35 = vmul.f32 1.442695, %v3127_v50  ;;  %v3094_v50 = vsel %vm17162_vm2, %v11096_v6, -inf }
 0x36b   : > { %v3173_v40 = vmul.f32 1.442695, %v3128_v45 }
 0x36c   : > { %v11318_v39 = vpop.f32.mrf.mxu1 }
 0x36d   : > { %17380 = vst [vmem:[#allocation62_spill] sm:$0xff] %v11318_v39 }
 0x36f   : > { %v11304_v38 = vpop.f32.mrf.mxu0 }
 0x370   : > { %3110 = vmax.xlane.f32.xlu2 %v3109_v57  ;;  %3230 = vadd.xlane.f32.xlu1 %v3229_v12  ;;  %v3223_v57 = vsel %vm17158_vm0, %v11286_v17, 0.0  ;;  %v11298_v12 = vpop.xlane.xlu1 %3086  ;;  %v11302_v61 = vpop.eup %8645  ;;  %17377 = vst [vmem:[#allocation59_spill] sm:$0xff] %v11304_v38 }
 0x371   : > { %3875 = vmax.xlane.f32.xlu0 %v3874_v49  ;;  %v3226_v49 = vsel %vm17162_vm2, %v11284_v8, 0.0  ;;  %17376 = vst [vmem:[#allocation58_spill] sm:$0xff] %v11302_v61  ;;  %v11306_v8 = vpop.xlane.xlu0 %3071  ;;  %v11310_v17 = vpop.xlane.xlu2 %3089 }
 0x372   : > { %17378 = vst [vmem:[#allocation60_spill] sm:$0xff] %v11306_v8  ;;  %v3115_v8 = vsub.f32 %v10876_v11, %v11230_v22  ;;  %v3118_v11 = vsub.f32 %v10891_v14, %v11220_v48  ;;  %v3117_v22 = vsub.f32 %v10866_v9, %v11243_v13 }
 0x373   : > { %17379 = vst [vmem:[#allocation61_spill] sm:$0xff] %v11310_v17  ;;  %v3149_v17 = vmul.f32 1.442695, %v3116_v43  ;;  %v3097_v43 = vsel %vm17158_vm0, %v11082_v20, -inf }
 0x374   : > { %v3147_v10 = vmul.f32 1.442695, %v3115_v8  ;;  %v3100_v8 = vsel %vm17162_vm2, %v11094_v0, -inf  ;;  %v3153_v48 = vmul.f32 1.442695, %v3118_v11 }
 0x375   : > { %8647 = vpow2.f32 %v3149_v17  ;;  %v3151_v9 = vmul.f32 1.442695, %v3117_v22 }
 0x376   : > { %8649 = vpow2.f32 %v3171_v35 }
 0x377   : > { %8651 = vpow2.f32 %v3147_v10 }
 0x378   : > { %3224 = vadd.xlane.f32.xlu2 %v3223_v57  ;;  %3881 = vmax.xlane.f32.xlu1 %v3880_v41  ;;  %v3862_v57 = vsel %vm17162_vm2, %v11304_v38, -inf  ;;  %v11316_v41 = vpop.xlane.xlu1 %3083  ;;  %8653 = vpow2.f32 %v3153_v48  ;;  %v3130_v48 = vsub.f32 %v10970_v33, %v11280_v63 }
 0x379   : > { %3227 = vadd.xlane.f32.xlu0 %v3226_v49  ;;  %v3232_v49 = vsel %vm17162_vm2, %v11302_v61, 0.0  ;;  %v11327_v61 = vpop.xlane.xlu0 %3080  ;;  %8655 = vpow2.f32 %v3151_v9 }
 0x37a   : > { %8657 = vpow2.f32 %v3173_v40 }
 0x37b   : > { %v11348_v13 = vpop.eup %8647 }
 0x37c   : > { %v11350_v58 = vpop.eup %8649  ;;  %v3214_v22 = vsel %vm17162_vm2, %v11348_v13, 0.0 }
 0x37d   : > { %v3247_v11 = vsel %vm17158_vm0, %v11350_v58, 0.0 }
 0x380   : > { %3233 = vadd.xlane.f32.xlu2 %v3232_v49  ;;  %3863 = vmax.xlane.f32.xlu1 %v3862_v57  ;;  %v3865_v49 = vsel %vm17158_vm0, %v11300_v56, -inf  ;;  %v3091_v57 = vsel %vm17158_vm0, %v11084_v29, -inf  ;;  %v3795_v38 = vpop.xlane.xlu2 %3794  ;;  %v11333_v34 = vpop.xlane.xlu1 %3104 }
 0x381   : > { %3860 = vmax.xlane.f32.xlu0 %v3859_v47  ;;  %v3868_v47 = vsel %vm17162_vm2, %v11318_v39, -inf  ;;  %v3885_v35 = vsub.f32 %v11106_v42, %v3795_v38 }
 0x388   : > { %3866 = vmax.xlane.f32.xlu2 %v3865_v49  ;;  %3092 = vmax.xlane.f32.xlu1 %v3091_v57  ;;  %v3798_v14 = vpop.xlane.xlu0 %3797  ;;  %v3789_v17 = vpop.xlane.xlu1 %3788  ;;  %v3129_v57 = vsub.f32 %v10936_v26, %v11267_v27  ;;  %v3919_v26 = vmul.f32 1.442695, %v3885_v35 }
 0x389   : > { %3869 = vmax.xlane.f32.xlu0 %v3868_v47  ;;  %v11346_v47 = vpop.xlane.xlu2 %3107  ;;  %v11352_v49 = vpop.eup %8651  ;;  %v3883_v10 = vsub.f32 %v11110_v52, %v3789_v17  ;;  %v3886_v40 = vsub.f32 %v11120_v7, %v3798_v14 }
 0x38a   : > { %v3211_v45 = vsel %vm17158_vm0, %v11352_v49, 0.0  ;;  %v11364_v27 = vpop.eup %8653 }
 0x38b   : > { %v3915_v42 = vmul.f32 1.442695, %v3883_v10  ;;  %v11366_v52 = vpop.eup %8655  ;;  %v3220_v17 = vsel %vm17162_vm2, %v11364_v27, 0.0  ;;  %v3921_v7 = vmul.f32 1.442695, %v3886_v40 }
 0x38c   : > { %v11368_v38 = vpop.eup %8657 }
 0x38d   : > { %v3250_v35 = vsel %vm17162_vm2, %v11368_v38, 0.0 }
 0x390   : > { %3095 = vmax.xlane.f32.xlu2 %v3094_v50  ;;  %3101 = vmax.xlane.f32.xlu1 %v3100_v8  ;;  %v3175_v8 = vmul.f32 1.442695, %v3129_v57  ;;  %v3217_v57 = vsel %vm17158_vm0, %v11366_v52, 0.0  ;;  %v3804_v33 = vpop.xlane.xlu1 %3803 }
 0x391   : > { %3098 = vmax.xlane.f32.xlu0 %v3097_v43  ;;  %v3801_v43 = vpop.xlane.xlu0 %3800  ;;  %v3792_v50 = vpop.xlane.xlu2 %3791 }
 0x392   : > { %8659 = vpow2.f32 %v3175_v8  ;;  %v3884_v9 = vsub.f32 %v11134_v37, %v3792_v50  ;;  %v3888_v50 = vsub.f32 %v11118_v16, %v3804_v33 }
 0x393   : > { %8661 = vpow2.f32 %v3919_v26  ;;  %v3887_v26 = vsub.f32 %v11100_v60, %v3801_v43 }
 0x394   : > { %8663 = vpow2.f32 %v3915_v42  ;;  %v3917_v37 = vmul.f32 1.442695, %v3884_v9 }
 0x395   : > { %v3923_v60 = vmul.f32 1.442695, %v3887_v26 }
 0x398   : > { %3215 = vadd.xlane.f32.xlu2 %v3214_v22  ;;  %3212 = vadd.xlane.f32.xlu1 %v3211_v45  ;;  %v11382_v22 = vpop.eup %8659 }
 0x399   : > { %3248 = vadd.xlane.f32.xlu0 %v3247_v11  ;;  %v3807_v10 = vpop.xlane.xlu2 %3806  ;;  %v3177_v11 = vmul.f32 1.442695, %v3130_v48  ;;  %v11380_v63 = vpop.xlane.xlu0 %3818  ;;  %17381 = vst [vmem:[#allocation63_spill] sm:$0xff] %v11382_v22  ;;  %v3253_v9 = vsel %vm17158_vm0, %v11382_v22, 0.0 }
 0x39a   : > { %v11384_v14 = vpop.eup %8661  ;;  %v3889_v8 = vsub.f32 %v11142_v51, %v3807_v10 }
 0x39b   : > { %17382 = vst [vmem:[#allocation64_spill] sm:$0xff] %v11384_v14  ;;  %v11386_v45 = vpop.eup %8663  ;;  %8665 = vpow2.f32 %v3177_v11  ;;  %v3985_v42 = vsel %vm17158_vm0, %v11384_v14, 0.0 }
 0x39c   : > { %8667 = vpow2.f32 %v3917_v37  ;;  %v3979_v48 = vsel %vm17158_vm0, %v11386_v45, 0.0  ;;  %v3927_v51 = vmul.f32 1.442695, %v3889_v8 }
 0x39d   : > { %8669 = vpow2.f32 %v3921_v7 }
 0x3a0   : > { %3218 = vadd.xlane.f32.xlu2 %v3217_v57  ;;  %3251 = vadd.xlane.f32.xlu1 %v3250_v35 }
 0x3a1   : > { %3221 = vadd.xlane.f32.xlu0 %v3220_v17  ;;  %v3813_v40 = vpop.xlane.xlu2 %3812  ;;  %v3925_v17 = vmul.f32 1.442695, %v3888_v50  ;;  %v11397_v16 = vpop.xlane.xlu1 %3821 }
 0x3a2   : > { %v3816_v57 = vpop.xlane.xlu0 %3815  ;;  %v11399_v35 = vpop.eup %8665  ;;  %v3891_v11 = vsub.f32 %v11154_v5, %v3813_v40 }
 0x3a3   : > { %17383 = vst [vmem:[#allocation65_spill] sm:$0xff] %v11399_v35  ;;  %v11401_v43 = vpop.eup %8667  ;;  %8671 = vpow2.f32 %v3925_v17  ;;  %v3892_v33 = vsub.f32 %v11168_v18, %v3816_v57  ;;  %v3256_v7 = vsel %vm17162_vm2, %v11399_v35, 0.0 }
 0x3a4   : > { %17384 = vst [vmem:[#allocation66_spill] sm:$0xff] %v11401_v43  ;;  %v11403_v10 = vpop.eup %8669  ;;  %8673 = vpow2.f32 %v3927_v51  ;;  %v3982_v37 = vsel %vm17162_vm2, %v11401_v43, 0.0  ;;  %v3931_v26 = vmul.f32 1.442695, %v3891_v11  ;;  %v17460_v43 = vld [vmem:[#allocation40_spill] sm:$0xff] }
 0x3a5   : > { %17385 = vst [vmem:[#allocation67_spill] sm:$0xff] %v11403_v10  ;;  %8675 = vpow2.f32 %v3923_v60  ;;  %v3988_v50 = vsel %vm17162_vm2, %v11403_v10, 0.0  ;;  %v4985_v35 = vunpack.c.l.b16 %v17460_v43 }
 0x3a6   : > { %8677 = vpow2.f32 %v3931_v26 }
 0x3a8   : > { %3980 = vadd.xlane.f32.xlu2 %v3979_v48  ;;  %3254 = vadd.xlane.f32.xlu1 %v3253_v9  ;;  %v3933_v9 = vmul.f32 1.442695, %v3892_v33 }
 0x3a9   : > { %3986 = vadd.xlane.f32.xlu0 %v3985_v42  ;;  %v3810_v8 = vpop.xlane.xlu2 %3809  ;;  %v3831_v42 = vpop.xlane.xlu1 %3830 }
 0x3aa   : > { %v3825_v48 = vpop.xlane.xlu0 %3824  ;;  %v11413_v5 = vpop.eup %8671  ;;  %v3890_v17 = vsub.f32 %v11158_v2, %v3810_v8  ;;  %8679 = vpow2.f32 %v3933_v9  ;;  %v3897_v51 = vsub.f32 %v11176_v28, %v3831_v42  ;;  %v3135_v2 = vsub.f32 %v11016_v46, %v11327_v61 }
 0x3ab   : > { %17386 = vst [vmem:[#allocation68_spill] sm:$0xff] %v11413_v5  ;;  %v11415_v18 = vpop.eup %8673  ;;  %v3994_v60 = vsel %vm17162_vm2, %v11413_v5, 0.0  ;;  %v17458_v5 = vld [vmem:[#allocation34_spill] sm:$0xff] }
 0x3ac   : > { %17387 = vst [vmem:[#allocation69_spill] sm:$0xff] %v11415_v18  ;;  %v11417_v40 = vpop.eup %8675  ;;  %v3997_v57 = vsel %vm17158_vm0, %v11415_v18, 0.0  ;;  %v3943_v28 = vmul.f32 1.442695, %v3897_v51 }
 0x3ad   : > { %17388 = vst [vmem:[#allocation70_spill] sm:$0xff] %v11417_v40  ;;  %v3991_v11 = vsel %vm17158_vm0, %v11417_v40, 0.0  ;;  %v11432_v26 = vpop.eup %8677 }
 0x3ae   : > { %17389 = vst [vmem:[#allocation71_spill] sm:$0xff] %v11432_v26  ;;  %v4003_v46 = vsel %vm17158_vm0, %v11432_v26, 0.0 }
 0x3b0   : > { %3257 = vadd.xlane.f32.xlu2 %v3256_v7  ;;  %3989 = vadd.xlane.f32.xlu1 %v3988_v50  ;;  %v3929_v7 = vmul.f32 1.442695, %v3890_v17  ;;  %v11436_v9 = vpop.eup %8679 }
 0x3b1   : > { %3983 = vadd.xlane.f32.xlu0 %v3982_v37  ;;  %v3834_v33 = vpop.xlane.xlu2 %3833  ;;  %17390 = vst [vmem:[#allocation72_spill] sm:$0xff] %v11436_v9  ;;  %v4006_v17 = vsel %vm17162_vm2, %v11436_v9, 0.0  ;;  %v17456_v9 = vld [vmem:[#allocation24_spill] sm:$0xff] }
 0x3b2   : > { %v3898_v37 = vsub.f32 %v11192_v1, %v3834_v33  ;;  %v3895_v1 = vsub.f32 %v11182_v31, %v3825_v48  ;;  %v4979_v40 = vunpack.c.l.b16 %v17456_v9  ;;  %v17464_v9 = vld [vmem:[#allocation23_spill] sm:$0xff] }
 0x3b4   : > { %v3945_v50 = vmul.f32 1.442695, %v3898_v37  ;;  %v3939_v51 = vmul.f32 1.442695, %v3895_v1 }
 0x3b6   : > { %8681 = vpow2.f32 %v3945_v50  ;;  %v3894_v50 = vsub.f32 %v11164_v62, %v11397_v16 }
 0x3b7   : > { %8683 = vpow2.f32 %v3929_v7 }
 0x3b8   : > { %3995 = vadd.xlane.f32.xlu2 %v3994_v60  ;;  %3992 = vadd.xlane.f32.xlu1 %v3991_v11  ;;  %8685 = vpow2.f32 %v3943_v28  ;;  %v9248_v11 = vmov 0   ;;  %v3893_v28 = vsub.f32 %v11150_v59, %v11380_v63 }
 0x3b9   : > { %3998 = vadd.xlane.f32.xlu0 %v3997_v57  ;;  %v3187_v57 = vmul.f32 1.442695, %v3135_v2  ;;  %8635 = vset.pattern.permute.xlu1 %v9248_v11 }
 0x3ba   : > { %8574 = vset.pattern.permute.xlu0 %v9248_v11  ;;  %8636 = vset.pattern.permute.xlu2 %v9248_v11  ;;  %v3937_v11 = vmul.f32 1.442695, %v3894_v50 }
 0x3bb   : > { %v11434_v42 = vpop.xlane.xlu1 %3842  ;;  %8687 = vpow2.f32 %v3187_v57 }
 0x3bc   : > { %v11430_v8 = vpop.xlane.xlu0 %3836  ;;  %v11443_v61 = vpop.eup %8681  ;;  %8689 = vpow2.f32 %v3939_v51 }
 0x3bd   : > { %17391 = vst [vmem:[#allocation73_spill] sm:$0xff] %v11443_v61  ;;  %v11447_v33 = vpop.eup %8683  ;;  %v4024_v37 = vsel %vm17162_vm2, %v11443_v61, 0.0 }
 0x3be   : > { %17392 = vst [vmem:[#allocation74_spill] sm:$0xff] %v11447_v33  ;;  %v11453_v7 = vpop.eup %8685 }
 0x3bf   : > { %17393 = vst [vmem:[#allocation75_spill] sm:$0xff] %v11453_v7  ;;  %v4021_v1 = vsel %vm17158_vm0, %v11453_v7, 0.0  ;;  %v17427_v7 = vld [vmem:[#allocation4_spill] sm:$0xff] }
 0x3c0   : > { %4007 = vadd.xlane.f32.xlu2 %v4006_v17  ;;  %4004 = vadd.xlane.f32.xlu1 %v4003_v46  ;;  %v4000_v17 = vsel %vm17162_vm2, %v11447_v33, 0.0 }
 0x3c1   : > { %4025 = vadd.xlane.f32.xlu0 %v4024_v37  ;;  %v11464_v46 = vpop.eup %8687 }
 0x3c2   : > { %17394 = vst [vmem:[#allocation76_spill] sm:$0xff] %v11464_v46  ;;  %v3271_v62 = vsel %vm17158_vm0, %v11464_v46, 0.0  ;;  %v11470_v16 = vpop.eup %8689 }
 0x3c3   : > { %v3828_v31 = vpop.xlane.xlu1 %3827  ;;  %v11449_v48 = vpop.xlane.xlu2 %3845  ;;  %17395 = vst [vmem:[#allocation77_spill] sm:$0xff] %v11470_v16 }
 0x3c4   : > { %v11445_v60 = vpop.xlane.xlu0 %3074  ;;  %v3896_v2 = vsub.f32 %v11204_v36, %v3828_v31  ;;  %v3935_v36 = vmul.f32 1.442695, %v3893_v28 }
 0x3c6   : > { %v3941_v57 = vmul.f32 1.442695, %v3896_v2  ;;  %v4015_v2 = vsel %vm17158_vm0, %v11470_v16, 0.0 }
 0x3c8   : > { %8691 = vpow2.f32 %v3941_v57  ;;  %4022 = vadd.xlane.f32.xlu2 %v4021_v1  ;;  %4001 = vadd.xlane.f32.xlu1 %v4000_v17 }
 0x3c9   : > { %3272 = vadd.xlane.f32.xlu0 %v3271_v62  ;;  %8693 = vpow2.f32 %v3935_v36 }
 0x3ca   : > { %8695 = vpow2.f32 %v3937_v11 }
 0x3cb   : > { %v3855_v59 = vpop.xlane.xlu2 %3854  ;;  %v11466_v63 = vpop.xlane.xlu1 %3839 }
 0x3cc   : > { %v3858_v31 = vpop.xlane.xlu0 %3857  ;;  %v3905_v46 = vsub.f32 %v11208_v55, %v3855_v59  ;;  %v3124_v59 = vsub.f32 %v10931_v19, %v11253_v54 }
 0x3cd   : > { %v3906_v62 = vsub.f32 %v11222_v44, %v3858_v31  ;;  %v8637_v31 = vld [vmem:[#allocation2] ss:$0 sm:$0xff] }
 0x3ce   : > { %v11472_v51 = vpop.eup %8691 }
 0x3cf   : > { %17396 = vst [vmem:[#allocation78_spill] sm:$0xff] %v11472_v51  ;;  %v4018_v37 = vsel %vm17162_vm2, %v11472_v51, 0.0  ;;  %v11480_v50 = vpop.eup %8693  ;;  %v3961_v16 = vmul.f32 1.442695, %v3906_v62  ;;  %v17425_v51 = vld [vmem:[#allocation10_spill] sm:$0xff] }
 0x3d0   : > { %4019 = vadd.xlane.f32.xlu2 %v4018_v37  ;;  %4016 = vadd.xlane.f32.xlu1 %v4015_v2  ;;  %17397 = vst [vmem:[#allocation79_spill] sm:$0xff] %v11480_v50  ;;  %v11482_v17 = vpop.eup %8695  ;;  %v4009_v2 = vsel %vm17158_vm0, %v11480_v50, 0.0 }
 0x3d1   : > { %17398 = vst [vmem:[#allocation80_spill] sm:$0xff] %v11482_v17  ;;  %v4012_v37 = vsel %vm17162_vm2, %v11482_v17, 0.0 }
 0x3d3   : > { %v3852_v57 = vpop.xlane.xlu2 %3851  ;;  %v3849_v1 = vpop.xlane.xlu1 %3848 }
 0x3d4   : > { %v11478_v28 = vpop.xlane.xlu0 %3113  ;;  %v3904_v36 = vsub.f32 %v11238_v21, %v3852_v57  ;;  %v3903_v11 = vsub.f32 %v11214_v3, %v3849_v1  ;;  %v3959_v3 = vmul.f32 1.442695, %v3905_v46 }
 0x3d6   : > { %v3957_v29 = vmul.f32 1.442695, %v3904_v36  ;;  %v3955_v39 = vmul.f32 1.442695, %v3903_v11  ;;  %v3165_v36 = vmul.f32 1.442695, %v3124_v59 }
 0x3d8   : > { %8697 = vpow2.f32 %v3957_v29  ;;  %4013 = vadd.xlane.f32.xlu2 %v4012_v37  ;;  %4010 = vadd.xlane.f32.xlu1 %v4009_v2  ;;  %v3123_v29 = vsub.f32 %v10911_v53, %v11265_v25  ;;  %v3125_v25 = vsub.f32 %v10923_v32, %v11236_v30  ;;  %v3136_v37 = vsub.f32 %v11030_v24, %v11316_v41 }
 0x3d9   : > { %8699 = vpow2.f32 %v3955_v39 }
 0x3da   : > { %8701 = vpow2.f32 %v3961_v16  ;;  %v3163_v19 = vmul.f32 1.442695, %v3123_v29  ;;  %v3189_v32 = vmul.f32 1.442695, %v3136_v37 }
 0x3db   : > { %v11494_v57 = vpop.xlane.xlu2 %3872  ;;  %v11496_v44 = vpop.xlane.xlu1 %3077  ;;  %8703 = vpow2.f32 %v3959_v3 }
 0x3dc   : > { %v11492_v21 = vpop.xlane.xlu0 %3878  ;;  %8705 = vpow2.f32 %v3165_v36  ;;  %v17406_v36 = vld [vmem:[#allocation51_spill] sm:$0xff] }
 0x3dd   : > { %4558 = vperm.xlu0 %8574, %v8637_v31   ;;  %8707 = vpow2.f32 %v3163_v19  ;;  %v3167_v31 = vmul.f32 1.442695, %v3125_v25 }
 0x3de   : > { %v11498_v55 = vpop.eup %8697 }
 0x3df   : > { %17399 = vst [vmem:[#allocation81_spill] sm:$0xff] %v11498_v55  ;;  %v11502_v1 = vpop.eup %8699  ;;  %v4042_v39 = vsel %vm17162_vm2, %v11498_v55, 0.0  ;;  %8709 = vpow2.f32 %v3167_v31 }
 0x3e0   : > { %17400 = vst [vmem:[#allocation82_spill] sm:$0xff] %v11502_v1  ;;  %4043 = vadd.xlane.f32.xlu2 %v4042_v39  ;;  %v4039_v46 = vsel %vm17158_vm0, %v11502_v1, 0.0  ;;  %v11516_v62 = vpop.eup %8701  ;;  %v3137_v39 = vsub.f32 %v11022_v15, %v11298_v12  ;;  %8711 = vpow2.f32 %v3189_v32  ;;  %v17409_v32 = vld [vmem:[#allocation39_spill] sm:$0xff]  ;;  %v17414_v1 = vld [vmem:[#allocation29_spill] sm:$0xff] }
 0x3e1   : > { %4040 = vadd.xlane.f32.xlu1 %v4039_v46  ;;  %17401 = vst [vmem:[#allocation83_spill] sm:$0xff] %v11516_v62  ;;  %v11518_v53 = vpop.eup %8703  ;;  %v4048_v2 = vsel %vm17162_vm2, %v11516_v62, 0.0  ;;  %v17405_v46 = vld [vmem:[#allocation44_spill] sm:$0xff]  ;;  %v17413_v62 = vld [vmem:[#allocation37_spill] sm:$0xff]  ;;  %v3143_v55 = vsub.f32 %v17414_v1, %v11333_v34 }
 0x3e2   : > { %17402 = vst [vmem:[#allocation84_spill] sm:$0xff] %v11518_v53  ;;  %v4045_v3 = vsel %vm17158_vm0, %v11518_v53, 0.0  ;;  %v11536_v24 = vpop.eup %8705  ;;  %v3191_v37 = vmul.f32 1.442695, %v3137_v39 }
 0x3e3   : > { %v11512_v54 = vpop.xlane.xlu2 %3110  ;;  %v11514_v16 = vpop.xlane.xlu1 %3230  ;;  %17403 = vst [vmem:[#allocation85_spill] sm:$0xff] %v11536_v24  ;;  %v3238_v19 = vsel %vm17162_vm2, %v11536_v24, 0.0 }
 0x3e4   : > { %v11510_v11 = vpop.xlane.xlu0 %3875  ;;  %v11538_v41 = vpop.eup %8707  ;;  %8713 = vpow2.f32 %v3191_v37  ;;  %v17415_v37 = vld [vmem:[#allocation22_spill] sm:$0xff]  ;;  %vm3402_vm3 = vweird.f32 %v11514_v16 }
 0x3e5   : > { %2001 = vrot.lane.b32.xlu0 %v10964_v4, %s9243_s27  ;;  %17404 = vst [vmem:[#allocation86_spill] sm:$0xff] %v11538_v41  ;;  %v3126_v4 = vsub.f32 %v17406_v36, %v17405_v46  ;;  %v3235_v25 = vsel %vm17158_vm0, %v11538_v41, 0.0  ;;  %v11552_v53 = vpop.eup %8709  ;;  %v3131_v46 = vsub.f32 %v17409_v32, %v11292_v23  ;;  %v17410_v36 = vld [vmem:[#allocation61_spill] sm:$0xff] }
 0x3e6   : > { %17407 = vst [vmem:[#allocation44_spill] sm:$0xff] %v11552_v53  ;;  %v11556_v12 = vpop.eup %8711  ;;  %v3241_v39 = vsel %vm17158_vm0, %v11552_v53, 0.0 }
 0x3e7   : > { %17408 = vst [vmem:[#allocation51_spill] sm:$0xff] %v11556_v12  ;;  %v3274_v50 = vsel %vm17162_vm2, %v11556_v12, 0.0  ;;  %v3179_v23 = vmul.f32 1.442695, %v3131_v46  ;;  %v17422_v46 = vld [vmem:[#allocation9_spill] sm:$0xff] }
 0x3e8   : > { %4049 = vadd.xlane.f32.xlu2 %v4048_v2  ;;  %v3169_v2 = vmul.f32 1.442695, %v3126_v4  ;;  %v17412_v4 = vld [vmem:[#allocation60_spill] sm:$0xff] }
 0x3e9   : > { %4046 = vadd.xlane.f32.xlu1 %v4045_v3  ;;  %v3132_v17 = vsub.f32 %v17413_v62, %v17412_v4  ;;  %v17419_v4 = vld [vmem:[#allocation7_spill] sm:$0xff] }
 0x3ea   : > { %8715 = vpow2.f32 %v3169_v2  ;;  %v3899_v2 = vsub.f32 %v17415_v37, %v11430_v8  ;;  %v11578_v62 = vpop.eup %8713  ;;  %v3133_v12 = vsub.f32 %v17419_v4, %v11445_v60  ;;  %v4902_v8 = vunpack.c.l.b16 %v17422_v46  ;;  %v17423_v37 = vld [vmem:[#allocation25_spill] sm:$0xff] }
 0x3eb   : > { %v11532_v30 = vpop.xlane.xlu2 %3224  ;;  %v11534_v29 = vpop.xlane.xlu1 %3881  ;;  %17418 = vst [vmem:[#allocation61_spill] sm:$0xff] %v11578_v62  ;;  %8717 = vpow2.f32 %v3179_v23  ;;  %v4909_v60 = vunpack.c.l.b16 %v17427_v7  ;;  %v17428_v46 = vld [vmem:[#allocation5_spill] sm:$0xff] }
 0x3ec   : > { %v11530_v59 = vpop.xlane.xlu0 %3227  ;;  %v3947_v33 = vmul.f32 1.442695, %v3899_v2  ;;  %v3183_v61 = vmul.f32 1.442695, %v3133_v12  ;;  %v17430_v2 = vld [vmem:[#allocation46_spill] sm:$0xff]  ;;  %v17434_v12 = vld [vmem:[#allocation19_spill] sm:$0xff]  ;;  %vm3372_vm5 = vweird.f32 %v11532_v30 }
 0x3ed   : > { %vm3387_vm6 = vweird.f32 %v11530_v59 }
 0x3f0   : > { %3239 = vadd.xlane.f32.xlu2 %v3238_v19  ;;  %v17411_v19 = vld [vmem:[#allocation30_spill] sm:$0xff]  ;;  %v11582_v34 = vpop.eup %8715 }
 0x3f1   : > { %3236 = vadd.xlane.f32.xlu1 %v3235_v25  ;;  %v3138_v25 = vsub.f32 %v17411_v19, %v17410_v36  ;;  %v17416_v36 = vld [vmem:[#allocation41_spill] sm:$0xff]  ;;  %17420 = vst [vmem:[#allocation30_spill] sm:$0xff] %v11582_v34 }
 0x3f2   : > { %v3901_v19 = vsub.f32 %v17416_v36, %v11434_v42  ;;  %v3911_v42 = vsub.f32 %v17423_v37, %v11494_v57  ;;  %v17424_v36 = vld [vmem:[#allocation18_spill] sm:$0xff]  ;;  %v3244_v57 = vsel %vm17162_vm2, %v11582_v34, 0.0  ;;  %v3902_v37 = vsub.f32 %v17430_v2, %v11449_v48  ;;  %v17442_v2 = vld [vmem:[#allocation12_spill] sm:$0xff] }
 0x3f3   : > { %v11548_v3 = vpop.xlane.xlu2 %3233  ;;  %v11550_v31 = vpop.xlane.xlu1 %3863  ;;  %v3193_v32 = vmul.f32 1.442695, %v3138_v25  ;;  %v3203_v25 = vmul.f32 1.442695, %v3143_v55  ;;  %v4905_v24 = vunpack.c.l.b16 %v17424_v36  ;;  %v4908_v55 = vunpack.c.l.b16 %v17428_v46  ;;  %v17433_v36 = vld [vmem:[#allocation13_spill] sm:$0xff] }
 0x3f4   : > { %v11554_v15 = vpop.xlane.xlu0 %3860  ;;  %v3951_v4 = vmul.f32 1.442695, %v3901_v19  ;;  %v3971_v7 = vmul.f32 1.442695, %v3911_v42  ;;  %v4942_v46 = vunpack.c.l.b16 %v17433_v36  ;;  %v11614_v42 = vpop.eup %8717  ;;  %v3953_v36 = vmul.f32 1.442695, %v3902_v37 }
 0x3f5   : > { %8719 = vpow2.f32 %v3193_v32  ;;  %17437 = vst [vmem:[#allocation22_spill] sm:$0xff] %v11614_v42  ;;  %vm3417_vm15 = vweird.f32 %v11548_v3 }
 0x3f8   : > { %3242 = vadd.xlane.f32.xlu2 %v3241_v39  ;;  %v3181_v39 = vmul.f32 1.442695, %v3132_v17 }
 0x3f9   : > { %3275 = vadd.xlane.f32.xlu1 %v3274_v50  ;;  %v17421_v50 = vld [vmem:[#allocation8_spill] sm:$0xff] }
 0x3fa   : > { %v4903_v1 = vunpack.c.l.b16 %v17421_v50  ;;  %v3277_v50 = vsel %vm17158_vm0, %v11578_v62, 0.0  ;;  %8721 = vpow2.f32 %v3181_v39  ;;  %v4907_v39 = vunpack.c.l.b16 %v17434_v12 }
 0x3fb   : > { %v11574_v53 = vpop.xlane.xlu2 %3866  ;;  %v11576_v41 = vpop.xlane.xlu1 %3092  ;;  %8723 = vpow2.f32 %v3203_v25 }
 0x3fc   : > { %17417 = vst [vmem:[#allocation39_spill] sm:$0xff] %v11576_v41  ;;  %v4904_v41 = vunpack.c.l.b16 %v17425_v51  ;;  %v11590_v17 = vpop.xlane.xlu0 %3869  ;;  %v17429_v51 = vld [vmem:[#allocation15_spill] sm:$0xff]  ;;  %v11601_v32 = vpack.c.b16 %v4903_v1, %v4902_v8  ;;  %8725 = vpow2.f32 %v3947_v33  ;;  %v11616_v1 = vpack.c.b16 %v4909_v60, %v4908_v55  ;;  %v17440_v8 = vld [vmem:[#allocation26_spill] sm:$0xff] }
 0x3fd   : > { %17426 = vst [vmem:[#allocation60_spill] sm:$0xff] %v11590_v17  ;;  %v4906_v23 = vunpack.c.l.b16 %v17429_v51  ;;  %8727 = vpow2.f32 %v3951_v4  ;;  %v17436_v51 = vld [vmem:[#allocation50_spill] sm:$0xff]  ;;  %v4978_v33 = vunpack.c.l.b16 %v17440_v8  ;;  %v4940_v4 = vunpack.c.l.b16 %v17442_v2  ;;  %v17446_v60 = vld [vmem:[#allocation55_spill] sm:$0xff]  ;;  %v17449_v8 = vld [vmem:[#allocation20_spill] sm:$0xff] }
 0x3fe   : > { %17431 = vst [vmem:[#allocation37_spill] sm:$0xff] %v11601_v32  ;;  %v11603_v19 = vpack.c.b16 %v4905_v24, %v4904_v41  ;;  %v3900_v25 = vsub.f32 %v17436_v51, %v11466_v63  ;;  %v17439_v24 = vld [vmem:[#allocation16_spill] sm:$0xff]  ;;  %8729 = vpow2.f32 %v3183_v61  ;;  %v17443_v63 = vld [vmem:[#allocation47_spill] sm:$0xff]  ;;  %v4943_v55 = vunpack.c.l.b16 %v17446_v60 }
 0x3ff   : > { %17438 = vst [vmem:[#allocation41_spill] sm:$0xff] %v11616_v1  ;;  %v4941_v41 = vunpack.c.l.b16 %v17439_v24  ;;  %8731 = vpow2.f32 %v3971_v7  ;;  %v3913_v12 = vsub.f32 %v17443_v63, %v11492_v21  ;;  %v17445_v51 = vld [vmem:[#allocation11_spill] sm:$0xff]  ;;  %v17452_v63 = vld [vmem:[#allocation54_spill] sm:$0xff]  ;;  %v11658_v22 = vpack.c.b16 %v4907_v39, %v4906_v23 }
 0x400   : > { %3278 = vadd.xlane.f32.xlu2 %v3277_v50  ;;  %17432 = vst [vmem:[#allocation29_spill] sm:$0xff] %v11603_v19  ;;  %v17435_v50 = vld [vmem:[#allocation53_spill] sm:$0xff]  ;;  %v4944_v34 = vunpack.c.l.b16 %v17445_v51  ;;  %v17447_v32 = vld [vmem:[#allocation35_spill] sm:$0xff]  ;;  %8733 = vrcp.f32 %v11514_v16  ;;  %v4947_v19 = vunpack.c.l.b16 %v17449_v8  ;;  %v3949_v7 = vmul.f32 1.442695, %v3900_v25  ;;  %v17453_v51 = vld [vmem:[#allocation6_spill] sm:$0xff] }
 0x401   : > { %3245 = vadd.xlane.f32.xlu1 %v3244_v57  ;;  %v4945_v62 = vunpack.c.l.b16 %v17435_v50  ;;  %v11620_v57 = vpop.eup %8719  ;;  %v4981_v24 = vunpack.c.l.b16 %v17447_v32  ;;  %v17450_v2 = vld [vmem:[#allocation31_spill] sm:$0xff]  ;;  %8735 = vrcp.f32 %v11530_v59  ;;  %v4946_v1 = vunpack.c.l.b16 %v17452_v63  ;;  %17462 = vst [vmem:[#allocation5_spill] sm:$0xff] %v11658_v22  ;;  %v17467_v23 = vld [vmem:[#allocation14_spill] sm:$0xff] }
 0x402   : > { %17441 = vst [vmem:[#allocation7_spill] sm:$0xff] %v11620_v57  ;;  %v11625_v50 = vpop.eup %8721  ;;  %v4984_v37 = vunpack.c.l.b16 %v17450_v2  ;;  %v3144_v60 = vsub.f32 %v17453_v51, %v11346_v47  ;;  %8737 = vrcp.f32 %v11532_v30  ;;  %v3280_v26 = vsel %vm17162_vm2, %v11620_v57, 0.0  ;;  %v17455_v2 = vld [vmem:[#allocation27_spill] sm:$0xff]  ;;  %v17459_v51 = vld [vmem:[#allocation45_spill] sm:$0xff] }
 0x403   : > { %v11610_v17 = vpop.xlane.xlu2 %3095  ;;  %v11612_v48 = vpop.xlane.xlu1 %3101  ;;  %17444 = vst [vmem:[#allocation8_spill] sm:$0xff] %v11625_v50  ;;  %v4980_v25 = vunpack.c.l.b16 %v17455_v2  ;;  %8739 = vpow2.f32 %v3953_v36  ;;  %v3975_v18 = vmul.f32 1.442695, %v3913_v12  ;;  %v4983_v47 = vunpack.c.l.b16 %v17458_v5 }
 0x404   : > { %v11631_v61 = vpop.eup %8723  ;;  %v11642_v32 = vpop.xlane.xlu0 %3098  ;;  %v4982_v10 = vunpack.c.l.b16 %v17459_v51  ;;  %8741 = vrcp.f32 %v11548_v3  ;;  %v11660_v2 = vpack.c.b16 %v4941_v41, %v4940_v4  ;;  %v11670_v51 = vpack.c.b16 %v4945_v62, %v4944_v34  ;;  %v17473_v34 = vld [vmem:[#allocation21_spill] sm:$0xff] }
 0x405   : > { %17448 = vst [vmem:[#allocation9_spill] sm:$0xff] %v11631_v61  ;;  %v11636_v21 = vpop.eup %8725  ;;  %8743 = vpow2.f32 %v3949_v7  ;;  %v11672_v43 = vpack.c.b16 %v4943_v55, %v4942_v46  ;;  %v3205_v14 = vmul.f32 1.442695, %v3144_v60  ;;  %v3134_v39 = vsub.f32 %v17467_v23, %v11496_v44  ;;  %v17477_v60 = vld [vmem:[#allocation57_spill] sm:$0xff] }
 0x406   : > { %17451 = vst [vmem:[#allocation25_spill] sm:$0xff] %v11636_v21  ;;  %v11646_v8 = vpop.eup %8727  ;;  %v11678_v4 = vpack.c.b16 %v4947_v19, %v4946_v1  ;;  %v11680_v7 = vpack.c.b16 %v4981_v24, %v4980_v25  ;;  %8745 = vpow2.f32 %v3975_v18  ;;  %v11688_v62 = vpack.c.b16 %v4985_v35, %v4984_v37 }
 0x407   : > { %17454 = vst [vmem:[#allocation18_spill] sm:$0xff] %v11646_v8  ;;  %v11650_v63 = vpop.eup %8729  ;;  %v3912_v46 = vsub.f32 %v17473_v34, %v11510_v11  ;;  %v11694_v44 = vsel %vm17162_vm2, %v11625_v50, 0.0  ;;  %v11704_v35 = vsel %vm17158_vm0, %v11614_v42, 0.0  ;;  %8747 = vpow2.f32 %v3205_v14 }
 0x408   : > { %17457 = vst [vmem:[#allocation10_spill] sm:$0xff] %v11650_v63  ;;  %v11656_v57 = vpop.eup %8731  ;;  %v3185_v11 = vmul.f32 1.442695, %v3134_v39  ;;  %v11712_v24 = vsel %vm17158_vm0, %v11631_v61, 0.0  ;;  %v3914_v25 = vsub.f32 %v17477_v60, %v11534_v29  ;;  %v11724_v14 = vsel %vm17158_vm0, %v11636_v21, 0.0 }
 0x409   : > { %3281 = vadd.xlane.f32.xlu1 %v3280_v26  ;;  %17461 = vst [vmem:[#allocation4_spill] sm:$0xff] %v11656_v57  ;;  %v3146_v26 = vsub.f32 %v17464_v9, %v11478_v28  ;;  %v11668_v5 = vpop.eup %8733  ;;  %v11682_v28 = vpack.c.b16 %v4979_v40, %v4978_v33  ;;  %v17475_v40 = vld [vmem:[#allocation17_spill] sm:$0xff]  ;;  %v3408_v23 = vand.u32 2147483648, %v11514_v16  ;;  %v11731_v34 = vsel %vm17158_vm0, %v11650_v63, 0.0 }
 0x40a   : > { %17463 = vst [vmem:[#allocation15_spill] sm:$0xff] %v11660_v2  ;;  %v11676_v41 = vpop.eup %8735  ;;  %v11686_v2 = vpack.c.b16 %v4983_v47, %v4982_v10  ;;  %v3145_v33 = vsub.f32 %v17475_v40, %v11512_v54  ;;  %v3398_v18 = vmul.f32 %v11668_v5, %v11514_v16  ;;  %v4063_v47 = vsel %vm17158_vm0, %v11656_v57, 0.0  ;;  %v17479_v57 = vld [vmem:[#allocation33_spill] sm:$0xff] }
 0x40b   : > { %v11664_v36 = vpop.xlane.xlu2 %3215  ;;  %v11666_v12 = vpop.xlane.xlu1 %3212  ;;  %17465 = vst [vmem:[#allocation46_spill] sm:$0xff] %v11670_v51  ;;  %v3209_v1 = vmul.f32 1.442695, %v3146_v26  ;;  %v3383_v55 = vmul.f32 %v11676_v41, %v11530_v59  ;;  %v3973_v26 = vmul.f32 1.442695, %v3912_v46  ;;  %v11735_v29 = vsel %vm17158_vm0, %v11646_v8, 0.0 }
 0x40c   : > { %17466 = vst [vmem:[#allocation13_spill] sm:$0xff] %v11672_v43  ;;  %v11684_v9 = vpop.eup %8737  ;;  %v11727_v39 = vpop.xlane.xlu0 %3248  ;;  %v3207_v60 = vmul.f32 1.442695, %v3145_v33  ;;  %v3399_v61 = vsub.f32 1.0, %v3398_v18  ;;  %v3977_v18 = vmul.f32 1.442695, %v3914_v25  ;;  %v3907_v8 = vsub.f32 %v17479_v57, %v11554_v15 }
 0x40d   : > { %17468 = vst [vmem:[#allocation19_spill] sm:$0xff] %v11678_v4  ;;  %v11696_v19 = vpop.eup %8739  ;;  %v3368_v54 = vmul.f32 %v11684_v9, %v11532_v30  ;;  %8749 = vpow2.f32 %v3209_v1  ;;  %v3406_v1 = vand.u32 2147483647, %v11514_v16  ;;  %vm3403_vm4 = vweird.f32 %v11668_v5  ;;  %v17482_v25 = vld [vmem:[#allocation28_spill] sm:$0xff] }
 0x40e   : > { %17469 = vst [vmem:[#allocation53_spill] sm:$0xff] %v11680_v7  ;;  %v11706_v10 = vpop.eup %8741  ;;  %8751 = vpow2.f32 %v3185_v11  ;;  %v11751_v50 = vsel %vm17162_vm2, %v11696_v19, 0.0  ;;  %v11759_v11 = vor.u32 1.1754944e-38, %v3408_v23  ;;  %v3400_v7 = vmul.f32 %v11668_v5, %v3399_v61  ;;  %vm11812_vm10 = vmor %vm3402_vm3, %vm3403_vm4 }
 0x40f   : > { %17470 = vst [vmem:[#allocation50_spill] sm:$0xff] %v11682_v28  ;;  %v11714_v37 = vpop.eup %8743  ;;  %4064 = vadd.xlane.f32.xlu0 %v4063_v47  ;;  %v3413_v46 = vmul.f32 %v11706_v10, %v11548_v3  ;;  %v3384_v47 = vsub.f32 1.0, %v3383_v55  ;;  %v3369_v33 = vsub.f32 1.0, %v3368_v54  ;;  %8753 = vpow2.f32 %v3973_v26  ;;  %v17481_v55 = vld [vmem:[#allocation59_spill] sm:$0xff] }
 0x410   : > { %17471 = vst [vmem:[#allocation16_spill] sm:$0xff] %v11686_v2  ;;  %v11737_v40 = vpop.eup %8745  ;;  %v11747_v63 = vsel %vm17162_vm2, %v11714_v37, 0.0  ;;  %8755 = vpow2.f32 %v3207_v60  ;;  %v3376_v15 = vand.u32 2147483647, %v11532_v30  ;;  %v3963_v61 = vmul.f32 1.442695, %v3907_v8 }
 0x411   : > { %17472 = vst [vmem:[#allocation26_spill] sm:$0xff] %v11688_v62  ;;  %v11757_v28 = vpop.eup %8747  ;;  %v3414_v54 = vsub.f32 1.0, %v3413_v46  ;;  %v3385_v57 = vmul.f32 %v11676_v41, %v3384_v47  ;;  %v3370_v26 = vmul.f32 %v11684_v9, %v3369_v33  ;;  %8757 = vpow2.f32 %v3977_v18 }
 0x412   : > { %17474 = vst [vmem:[#allocation12_spill] sm:$0xff] %v11696_v19  ;;  %v4069_v19 = vsel %vm17158_vm0, %v11737_v40, 0.0  ;;  %v3909_v23 = vsub.f32 %v11300_v56, %v11574_v53  ;;  %vm11780_vm7 = vcmp.eq.f32.partialorder %v3406_v1, 8.507059e+37  ;;  %v3378_v47 = vand.u32 2147483648, %v11532_v30 }
 0x413   : > { %17476 = vst [vmem:[#allocation47_spill] sm:$0xff] %v11714_v37  ;;  %v11741_v42 = vpop.xlane.xlu2 %3218  ;;  %v11743_v21 = vpop.xlane.xlu1 %3251  ;;  %v3908_v37 = vsub.f32 %v17481_v55, %v11550_v31  ;;  %v3393_v55 = vand.u32 2147483648, %v11530_v59  ;;  %8759 = vrcp.f32 %v11727_v39  ;;  %v3401_v33 = vadd.f32 %v11668_v5, %v3400_v7 }
 0x414   : > { %17478 = vst [vmem:[#allocation11_spill] sm:$0xff] %v11737_v40  ;;  %v11773_v31 = vpop.eup %8749  ;;  %v3391_v8 = vand.u32 2147483647, %v11530_v59  ;;  %v3415_v56 = vmul.f32 %v11706_v10, %v3414_v54  ;;  %8761 = vrcp.f32 %v11664_v36  ;;  %v3386_v18 = vadd.f32 %v11676_v41, %v3385_v57  ;;  %v11800_v7 = vpop.xlane.xlu0 %3221 }
 0x415   : > { %17480 = vst [vmem:[#allocation55_spill] sm:$0xff] %v11757_v28  ;;  %v11778_v60 = vpop.eup %8751  ;;  %vm3388_vm8 = vweird.f32 %v11676_v41  ;;  %8763 = vrcp.f32 %v11666_v12  ;;  %v3371_v40 = vadd.f32 %v11684_v9, %v3370_v26  ;;  %vm3373_vm9 = vweird.f32 %v11684_v9 }
 0x416   : > { %17483 = vst [vmem:[#allocation35_spill] sm:$0xff] %v11773_v31  ;;  %v11793_v1 = vpop.eup %8753  ;;  %8765 = vpow2.f32 %v3963_v61  ;;  %v3967_v28 = vmul.f32 1.442695, %v3909_v23  ;;  %vm11816_vm11 = vcmp.eq.f32.partialorder %v3376_v15, 8.507059e+37  ;;  %v3394_v57 = vor.u32 1.1754944e-38, %v3393_v55  ;;  %vm11828_vm12 = vmor %vm3387_vm6, %vm3388_vm8 }
 0x417   : > { %17484 = vst [vmem:[#allocation20_spill] sm:$0xff] %v11778_v60  ;;  %4070 = vadd.xlane.f32.xlu0 %v4069_v19  ;;  %v11804_v54 = vpop.eup %8755  ;;  %v3140_v26 = vsub.f32 %v11096_v6, %v11610_v17  ;;  %v3416_v15 = vadd.f32 %v11706_v10, %v3415_v56  ;;  %vm3418_vm13 = vweird.f32 %v11706_v10  ;;  %v3423_v61 = vand.u32 2147483648, %v11548_v3  ;;  %vm11845_vm14 = vmor %vm3372_vm5, %vm3373_vm9 }
 0x418   : > { %2005 = vrot.lane.b32.xlu2 %v17482_v25, %s9243_s27  ;;  %v3965_v25 = vmul.f32 1.442695, %v3908_v37  ;;  %17487 = vst [vmem:[#allocation31_spill] sm:$0xff] %v11793_v1  ;;  %v3141_v37 = vsub.f32 %v11082_v20, %v11642_v32  ;;  %v3405_v6 = vsel %vm11812_vm10, %v11668_v5, %v3401_v33  ;;  %v3390_v17 = vsel %vm11828_vm12, %v11676_v41, %v3386_v18  ;;  %vm11866_vm3 = vmor %vm3417_vm15, %vm3418_vm13 }
 0x419   : > { %17488 = vst [vmem:[#allocation54_spill] sm:$0xff] %v11804_v54  ;;  %v11822_v54 = vpop.eup %8757  ;;  %v3375_v30 = vsel %vm11845_vm14, %v11684_v9, %v3371_v40  ;;  %v3421_v5 = vand.u32 2147483647, %v11548_v3  ;;  %v3379_v41 = vor.u32 1.1754944e-38, %v3378_v47  ;;  %vm3392_vm1 = vcmp.eq.f32.partialorder %v3391_v8, 8.507059e+37  ;;  %v17501_v9 = vld [vmem:[#allocation38_spill] sm:$0xff] }
 0x41a   : > { %8767 = vpow2.f32 %v3965_v25  ;;  %17493 = vst [vmem:[#allocation6_spill] sm:$0xff] %v11822_v54  ;;  %v11836_v23 = vpop.eup %8759  ;;  %v3199_v55 = vmul.f32 1.442695, %v3141_v37  ;;  %v17498_v25 = vld [vmem:[#allocation36_spill] sm:$0xff]  ;;  %v3197_v37 = vmul.f32 1.442695, %v3140_v26  ;;  %v3142_v20 = vsub.f32 %v11094_v0, %v11612_v48 }
 0x41b   : > { %v11791_v53 = vpop.xlane.xlu2 %3980  ;;  %v11802_v19 = vpop.xlane.xlu1 %3254  ;;  %8769 = vrcp.f32 %v11800_v7  ;;  %v3395_v40 = vsel %vm3392_vm1, %v3394_v57, %v3390_v17  ;;  %v3420_v47 = vsel %vm11866_vm3, %v11706_v10, %v3416_v15  ;;  %v3424_v8 = vor.u32 1.1754944e-38, %v3423_v61  ;;  %v17505_v17 = vld [vmem:[#allocation48_spill] sm:$0xff] }
 0x41c   : > { %8771 = vrcp.f32 %v11741_v42  ;;  %v11855_v56 = vpop.eup %8761  ;;  %v3380_v48 = vsel %vm11816_vm11, %v3379_v41, %v3375_v30  ;;  %vm3422_vm4 = vcmp.eq.f32.partialorder %v3421_v5, 8.507059e+37  ;;  %v11900_v57 = vsel %vm17162_vm2, %v11773_v31, 0.0  ;;  %v17508_v5 = vld [vmem:[#allocation52_spill] sm:$0xff] }
 0x41d   : > { %8773 = vpow2.f32 %v3967_v28  ;;  %v11862_v33 = vpop.eup %8763  ;;  %v3410_v28 = vsel %vm11780_vm7, %v11759_v11, %v3405_v6  ;;  %v3488_v11 = vmul.f32 %v11836_v23, %v11727_v39  ;;  %v3425_v16 = vsel %vm3422_vm4, %v3424_v8, %v3420_v47  ;;  %v17509_v47 = vld [vmem:[#allocation58_spill] sm:$0xff] }
 0x41e   : > { %v11875_v3 = vpop.eup %8765  ;;  %8775 = vpow2.f32 %v3199_v55  ;;  %v3308_v10 = vmul.f32 %v11862_v33, %v11666_v12  ;;  %v3201_v15 = vmul.f32 1.442695, %v3142_v20  ;;  %v11908_v6 = vsel %vm17162_vm2, %v11793_v1, 0.0 }
 0x41f   : > { %3263 = vadd.xlane.f32.xlu0 %v11694_v44  ;;  %17502 = vst [vmem:[#allocation27_spill] sm:$0xff] %v11875_v3  ;;  %v3323_v44 = vmul.f32 %v11855_v56, %v11664_v36  ;;  %8777 = vrcp.f32 %v11743_v21  ;;  %v11913_v55 = vmul.f32 %v17505_v17, %v3410_v28  ;;  %v11919_v41 = vmul.f32 %v17508_v5, %v3395_v40 }
 0x420   : > { %2003 = vrot.lane.b32.xlu2 %v17498_v25, %s9243_s27  ;;  %v11885_v0 = vpop.eup %8767  ;;  %8779 = vpow2.f32 %v3197_v37  ;;  %v17507_v25 = vld [vmem:[#allocation56_spill] sm:$0xff]  ;;  %v11923_v18 = vsel %vm17162_vm2, %v11822_v54, 0.0  ;;  %v3489_v20 = vsub.f32 1.0, %v3488_v11  ;;  %v11934_v8 = vmul.f32 %v17509_v47, %v3425_v16 }
 0x421   : > { %17503 = vst [vmem:[#allocation24_spill] sm:$0xff] %v11885_v0  ;;  %v11893_v46 = vpop.eup %8769  ;;  %v11916_v30 = vmul.f32 %v17507_v25, %v3380_v48  ;;  %v3324_v37 = vsub.f32 1.0, %v3323_v44  ;;  %v11931_v28 = vsel %vm17162_vm2, %v11885_v0, 0.0  ;;  %v3309_v48 = vsub.f32 1.0, %v3308_v10  ;;  %v11940_v44 = vpop.xlane.xlu0 %3986 }
 0x422   : > { %2007 = vrot.lane.b32.xlu1 %v17501_v9, %s9243_s27  ;;  %v11902_v32 = vpop.eup %8771  ;;  %17506 = vst [vmem:[#allocation45_spill] sm:$0xff] %v11913_v55  ;;  %v11927_v9 = vsel %vm17158_vm0, %v11875_v3, 0.0  ;;  %v3353_v17 = vmul.f32 %v11893_v46, %v11800_v7  ;;  %8781 = vpow2.f32 %v3201_v15  ;;  %vm3492_vm5 = vweird.f32 %v11727_v39 }
 0x423   : > { %v11883_v26 = vpop.xlane.xlu2 %3257  ;;  %v11904_v61 = vpop.xlane.xlu1 %3989  ;;  %17510 = vst [vmem:[#allocation40_spill] sm:$0xff] %v11934_v8  ;;  %v3338_v40 = vmul.f32 %v11902_v32, %v11741_v42  ;;  %v3498_v25 = vand.u32 2147483648, %v11727_v39  ;;  %vm3327_vm6 = vweird.f32 %v11664_v36  ;;  %v3331_v5 = vand.u32 2147483647, %v11664_v36 }
 0x424   : > { %v11910_v59 = vpop.eup %8773  ;;  %v3333_v47 = vand.u32 2147483648, %v11664_v36  ;;  %v3496_v15 = vand.u32 2147483647, %v11727_v39  ;;  %v3325_v0 = vmul.f32 %v11855_v56, %v3324_v37  ;;  %v3316_v31 = vand.u32 2147483647, %v11666_v12 }
 0x425   : > { %17504 = vst [vmem:[#allocation34_spill] sm:$0xff] %v11910_v59  ;;  %v11942_v11 = vpop.eup %8775  ;;  %v11949_v10 = vsel %vm17158_vm0, %v11910_v59, 0.0  ;;  %8783 = vrcp.f32 %v11791_v53  ;;  %v3310_v59 = vmul.f32 %v11862_v33, %v3309_v48  ;;  %v3339_v54 = vsub.f32 1.0, %v3338_v40 }
 0x426   : > { %17511 = vst [vmem:[#allocation23_spill] sm:$0xff] %v11942_v11  ;;  %v11951_v16 = vpop.eup %8777  ;;  %v3354_v1 = vsub.f32 1.0, %v3353_v17  ;;  %8785 = vrcp.f32 %v11940_v44  ;;  %v3499_v2 = vor.u32 1.1754944e-38, %v3498_v25  ;;  %vm3312_vm7 = vweird.f32 %v11666_v12 }
 0x427   : > { %3266 = vadd.xlane.f32.xlu0 %v11731_v34  ;;  %v11957_v3 = vpop.eup %8779  ;;  %v3490_v34 = vmul.f32 %v11836_v23, %v3489_v20  ;;  %v3318_v60 = vand.u32 2147483648, %v11666_v12  ;;  %v3503_v37 = vmul.f32 %v11951_v16, %v11743_v21  ;;  %vm11971_vm8 = vcmp.eq.f32.partialorder %v3331_v5, 8.507059e+37 }
 0x428   : > { %17512 = vst [vmem:[#allocation14_spill] sm:$0xff] %v11957_v3  ;;  %v3334_v51 = vor.u32 1.1754944e-38, %v3333_v47  ;;  %vm3493_vm9 = vweird.f32 %v11836_v23  ;;  %vm11976_vm10 = vcmp.eq.f32.partialorder %v3496_v15, 8.507059e+37  ;;  %v11982_v40 = vsel %vm17162_vm2, %v11957_v3, 0.0  ;;  %v11988_v25 = vpop.eup %8781 }
 0x429   : > { %v11986_v17 = vsel %vm17158_vm0, %v11942_v11, 0.0  ;;  %17517 = vst [vmem:[#allocation21_spill] sm:$0xff] %v11988_v25  ;;  %v3326_v5 = vadd.f32 %v11855_v56, %v3325_v0  ;;  %vm3328_vm11 = vweird.f32 %v11855_v56  ;;  %v3491_v47 = vadd.f32 %v11836_v23, %v3490_v34  ;;  %vm12010_vm14 = vmor %vm3492_vm5, %vm3493_vm9  ;;  %v12031_v4 = vpop.xlane.xlu0 %3983 }
 0x42a   : > { %vm11993_vm12 = vcmp.eq.f32.partialorder %v3316_v31, 8.507059e+37  ;;  %v3346_v62 = vand.u32 2147483647, %v11741_v42  ;;  %v3311_v22 = vadd.f32 %v11862_v33, %v3310_v59  ;;  %vm3313_vm13 = vweird.f32 %v11862_v33  ;;  %vm12023_vm1 = vmor %vm3327_vm6, %vm3328_vm11 }
 0x42b   : > { %v11965_v43 = vpop.xlane.xlu2 %3995  ;;  %v11998_v3 = vpop.xlane.xlu1 %3992  ;;  %v3340_v11 = vmul.f32 %v11902_v32, %v3339_v54  ;;  %v3355_v0 = vmul.f32 %v11893_v46, %v3354_v1  ;;  %v3319_v34 = vor.u32 1.1754944e-38, %v3318_v60  ;;  %vm3357_vm15 = vweird.f32 %v11800_v7  ;;  %vm12043_vm4 = vmor %vm3312_vm7, %vm3313_vm13 }
 0x42c   : > { %v12004_v25 = vpop.eup %8783  ;;  %v3504_v59 = vsub.f32 1.0, %v3503_v37  ;;  %8787 = vrcp.f32 %v11802_v19  ;;  %vm3342_vm3 = vweird.f32 %v11741_v42  ;;  %v3348_v60 = vand.u32 2147483648, %v11741_v42 }
 0x42d   : > { %v12017_v54 = vpop.eup %8785  ;;  %v3361_v1 = vand.u32 2147483647, %v11800_v7  ;;  %v3363_v37 = vand.u32 2147483648, %v11800_v7  ;;  %v3495_v36 = vsel %vm12010_vm14, %v11836_v23, %v3491_v47  ;;  %vm3343_vm5 = vweird.f32 %v11902_v32 }
 0x42e   : > { %vm12048_vm6 = vcmp.eq.f32.partialorder %v3346_v62, 8.507059e+37  ;;  %vm3358_vm9 = vweird.f32 %v11893_v46  ;;  %v3315_v23 = vsel %vm12043_vm4, %v11862_v33, %v3311_v22  ;;  %v3356_v12 = vadd.f32 %v11893_v46, %v3355_v0  ;;  %vm12088_vm14 = vmor %vm3342_vm3, %vm3343_vm5 }
 0x42f   : > { %3305 = vadd.xlane.f32.xlu0 %v11900_v57  ;;  %v3330_v57 = vsel %vm12023_vm1, %v11855_v56, %v3326_v5  ;;  %v3341_v56 = vadd.f32 %v11902_v32, %v3340_v11  ;;  %8789 = vrcp.f32 %v11883_v26  ;;  %v3505_v5 = vmul.f32 %v11951_v16, %v3504_v59  ;;  %vm12067_vm7 = vmor %vm3357_vm15, %vm3358_vm9 }
 0x430   : > { %v4076_v62 = vmul.f32 %v12004_v25, %v11791_v53  ;;  %v4106_v47 = vmul.f32 %v12017_v54, %v11940_v44  ;;  %8791 = vrcp.f32 %v12031_v4  ;;  %v3349_v31 = vor.u32 1.1754944e-38, %v3348_v60 }
 0x431   : > { %vm12071_vm11 = vcmp.eq.f32.partialorder %v3361_v1, 8.507059e+37  ;;  %v3364_v8 = vor.u32 1.1754944e-38, %v3363_v37  ;;  %vm3507_vm13 = vweird.f32 %v11743_v21  ;;  %v3335_v59 = vsel %vm11971_vm8, %v3334_v51, %v3330_v57 }
 0x432   : > { %v12078_v0 = vpop.eup %8787  ;;  %v3500_v7 = vsel %vm11976_vm10, %v3499_v2, %v3495_v36  ;;  %v3511_v60 = vand.u32 2147483647, %v11743_v21  ;;  %v3513_v1 = vand.u32 2147483648, %v11743_v21  ;;  %v3320_v37 = vsel %vm11993_vm12, %v3319_v34, %v3315_v23 }
 0x433   : > { %v12076_v11 = vpop.xlane.xlu2 %4007  ;;  %v3345_v51 = vsel %vm12088_vm14, %v11902_v32, %v3341_v56  ;;  %v3360_v2 = vsel %vm12067_vm7, %v11893_v46, %v3356_v12  ;;  %vm3508_vm8 = vweird.f32 %v11951_v16  ;;  %v3506_v42 = vadd.f32 %v11951_v16, %v3505_v5  ;;  %v12105_v57 = vpop.xlane.xlu1 %4004 }
 0x434   : > { %v4077_v20 = vsub.f32 1.0, %v4076_v62  ;;  %v4107_v48 = vsub.f32 1.0, %v4106_v47  ;;  %8793 = vrcp.f32 %v11904_v61  ;;  %v12111_v32 = vmul.f32 %v11348_v13, %v3335_v59  ;;  %vm12138_vm12 = vmor %vm3507_vm13, %vm3508_vm8 }
 0x435   : > { %v12108_v15 = vpop.eup %8789  ;;  %v12114_v34 = vmul.f32 %v11350_v58, %v3500_v7  ;;  %v4086_v46 = vand.u32 2147483648, %v11791_v53  ;;  %v3518_v36 = vmul.f32 %v12078_v0, %v11802_v19  ;;  %v12122_v56 = vmul.f32 %v11352_v49, %v3320_v37 }
 0x436   : > { %v12119_v23 = vpop.eup %8791  ;;  %vm12124_vm10 = vcmp.eq.f32.partialorder %v3511_v60, 8.507059e+37  ;;  %v4084_v13 = vand.u32 2147483647, %v11791_v53  ;;  %v4114_v12 = vand.u32 2147483647, %v11940_v44  ;;  %v3350_v58 = vsel %vm12048_vm6, %v3349_v31, %v3345_v51  ;;  %v12171_v51 = vpop.xlane.xlu0 %3998 }
 0x437   : > { %4052 = vadd.xlane.f32.xlu0 %v11927_v9  ;;  %v3365_v5 = vsel %vm12071_vm11, %v3364_v8, %v3360_v2  ;;  %v3514_v62 = vor.u32 1.1754944e-38, %v3513_v1  ;;  %vm4080_vm15 = vweird.f32 %v11791_v53  ;;  %v3510_v47 = vsel %vm12138_vm12, %v11951_v16, %v3506_v42  ;;  %v17567_v53 = vld [vmem:[#allocation66_spill] sm:$0xff] }
 0x438   : > { %v4078_v55 = vmul.f32 %v12004_v25, %v4077_v20  ;;  %v4108_v31 = vmul.f32 %v12017_v54, %v4107_v48  ;;  %v3533_v22 = vmul.f32 %v12108_v15, %v11883_v26  ;;  %v4087_v33 = vor.u32 1.1754944e-38, %v4086_v46 }
 0x439   : > { %vm4110_vm1 = vweird.f32 %v11940_v44  ;;  %v3519_v21 = vsub.f32 1.0, %v3518_v36  ;;  %v4091_v8 = vmul.f32 %v12119_v23, %v12031_v4  ;;  %v12156_v7 = vmul.f32 %v11366_v52, %v3350_v58 }
 0x43a   : > { %v12153_v59 = vpop.eup %8793  ;;  %v12159_v16 = vmul.f32 %v11364_v27, %v3365_v5  ;;  %vm12161_vm3 = vcmp.eq.f32.partialorder %v4084_v13, 8.507059e+37  ;;  %vm12165_vm4 = vcmp.eq.f32.partialorder %v4114_v12, 8.507059e+37  ;;  %v4116_v1 = vand.u32 2147483648, %v11940_v44 }
 0x43b   : > { %v3526_v37 = vand.u32 2147483647, %v11802_v19  ;;  %v3515_v52 = vsel %vm12124_vm10, %v3514_v62, %v3510_v47  ;;  %vm4081_vm5 = vweird.f32 %v12004_v25  ;;  %v3528_v27 = vand.u32 2147483648, %v11802_v19  ;;  %v12178_v2 = vpop.xlane.xlu2 %4022  ;;  %v12197_v5 = vpop.xlane.xlu1 %4001 }
 0x43c   : > { %8795 = vrcp.f32 %v11965_v43  ;;  %v4079_v42 = vadd.f32 %v12004_v25, %v4078_v55  ;;  %v4109_v20 = vadd.f32 %v12017_v54, %v4108_v31  ;;  %vm4111_vm6 = vweird.f32 %v12017_v54  ;;  %vm12190_vm9 = vmor %vm4080_vm15, %vm4081_vm5 }
 0x43d   : > { %v3534_v48 = vsub.f32 1.0, %v3533_v22  ;;  %v3520_v46 = vmul.f32 %v12078_v0, %v3519_v21  ;;  %v4092_v36 = vsub.f32 1.0, %v4091_v8  ;;  %v4121_v9 = vmul.f32 %v12153_v59, %v11904_v61  ;;  %vm12204_vm11 = vmor %vm4110_vm1, %vm4111_vm6 }
 0x43e   : > { %8797 = vrcp.f32 %v12171_v51  ;;  %v4117_v12 = vor.u32 1.1754944e-38, %v4116_v1  ;;  %vm3522_vm7 = vweird.f32 %v11802_v19  ;;  %v3541_v58 = vand.u32 2147483647, %v11883_v26 }
 0x43f   : > { %4055 = vadd.xlane.f32.xlu0 %v11931_v28  ;;  %v3543_v28 = vand.u32 2147483648, %v11883_v26  ;;  %v12200_v49 = vmul.f32 %v11368_v38, %v3515_v52  ;;  %vm12208_vm13 = vcmp.eq.f32.partialorder %v3526_v37, 8.507059e+37  ;;  %v3529_v47 = vor.u32 1.1754944e-38, %v3528_v27  ;;  %v17570_v37 = vld [vmem:[#allocation67_spill] sm:$0xff] }
 0x440   : > { %vm3537_vm14 = vweird.f32 %v11883_v26  ;;  %v4099_v55 = vand.u32 2147483647, %v12031_v4  ;;  %v4083_v38 = vsel %vm12190_vm9, %v12004_v25, %v4079_v42  ;;  %v4113_v44 = vsel %vm12204_vm11, %v12017_v54, %v4109_v20 }
 0x441   : > { %vm3523_vm8 = vweird.f32 %v12078_v0  ;;  %v3535_v31 = vmul.f32 %v12108_v15, %v3534_v48  ;;  %v3521_v21 = vadd.f32 %v12078_v0, %v3520_v46  ;;  %v4093_v8 = vmul.f32 %v12119_v23, %v4092_v36  ;;  %v12245_v46 = vpop.xlane.xlu0 %4025 }
 0x442   : > { %v12222_v22 = vpop.eup %8795  ;;  %v4122_v1 = vsub.f32 1.0, %v4121_v9  ;;  %8799 = vrcp.f32 %v11998_v3  ;;  %vm12227_vm10 = vcmp.eq.f32.partialorder %v3541_v58, 8.507059e+37  ;;  %v3544_v25 = vor.u32 1.1754944e-38, %v3543_v28  ;;  %v17554_v58 = vld [vmem:[#allocation64_spill] sm:$0xff] }
 0x443   : > { %vm4095_vm12 = vweird.f32 %v12031_v4  ;;  %v4101_v54 = vand.u32 2147483648, %v12031_v4  ;;  %v4088_v27 = vsel %vm12161_vm3, %v4087_v33, %v4083_v38  ;;  %v4118_v42 = vsel %vm12165_vm4, %v4117_v12, %v4113_v44  ;;  %vm12252_vm3 = vmor %vm3522_vm7, %vm3523_vm8  ;;  %v12268_v9 = vpop.xlane.xlu2 %4019  ;;  %v17561_v33 = vld [vmem:[#allocation63_spill] sm:$0xff] }
 0x444   : > { %v12233_v52 = vpop.eup %8797  ;;  %vm3538_vm15 = vweird.f32 %v12108_v15  ;;  %vm12240_vm1 = vcmp.eq.f32.partialorder %v4099_v55, 8.507059e+37  ;;  %v4129_v48 = vand.u32 2147483647, %v11904_v61  ;;  %v3536_v39 = vadd.f32 %v12108_v15, %v3535_v31  ;;  %v12310_v31 = vpop.xlane.xlu1 %4016 }
 0x445   : > { %vm4096_vm4 = vweird.f32 %v12119_v23  ;;  %v4151_v60 = vmul.f32 %v12222_v22, %v11965_v43  ;;  %8801 = vrcp.f32 %v12076_v11  ;;  %v4094_v19 = vadd.f32 %v12119_v23, %v4093_v8  ;;  %vm12287_vm6 = vmor %vm3537_vm14, %vm3538_vm15 }
 0x446   : > { %v4123_v36 = vmul.f32 %v12153_v59, %v4122_v1  ;;  %8803 = vrcp.f32 %v12105_v57  ;;  %v4102_v13 = vor.u32 1.1754944e-38, %v4101_v54  ;;  %vm4125_vm5 = vweird.f32 %v11904_v61  ;;  %vm12305_vm7 = vmor %vm4095_vm12, %vm4096_vm4 }
 0x447   : > { %4058 = vadd.xlane.f32.xlu0 %v11949_v10  ;;  %v4166_v12 = vmul.f32 %v12233_v52, %v12171_v51  ;;  %8805 = vrcp.f32 %v12245_v46  ;;  %v12281_v28 = vmul.f32 %v17554_v58, %v4118_v42  ;;  %vm12291_vm9 = vcmp.eq.f32.partialorder %v4129_v48, 8.507059e+37 }
 0x448   : > { %v12275_v10 = vpop.eup %8799  ;;  %v3540_v38 = vsel %vm12287_vm6, %v12108_v15, %v3536_v39  ;;  %vm4126_vm11 = vweird.f32 %v12153_v59  ;;  %v4152_v44 = vsub.f32 1.0, %v4151_v60  ;;  %v4098_v62 = vsel %vm12305_vm7, %v12119_v23, %v4094_v19  ;;  %v17564_v19 = vld [vmem:[#allocation65_spill] sm:$0xff] }
 0x449   : > { %4031 = vadd.xlane.f32.xlu2 %v11747_v63  ;;  %v3525_v63 = vsel %vm12252_vm3, %v12078_v0, %v3521_v21  ;;  %v12278_v0 = vmul.f32 %v11386_v45, %v4088_v27  ;;  %v4161_v15 = vand.u32 2147483648, %v11965_v43  ;;  %8807 = vrcp.f32 %v12178_v2  ;;  %vm12342_vm14 = vmor %vm4125_vm5, %vm4126_vm11 }
 0x44a   : > { %v3530_v45 = vsel %vm12208_vm13, %v3529_v47, %v3525_v63  ;;  %v4124_v47 = vadd.f32 %v12153_v59, %v4123_v36  ;;  %v4159_v21 = vand.u32 2147483647, %v11965_v43  ;;  %v4167_v8 = vsub.f32 1.0, %v4166_v12 }
 0x44b   : > { %v12318_v4 = vpop.eup %8801  ;;  %v4136_v1 = vmul.f32 %v12275_v10, %v11998_v3  ;;  %8809 = vrcp.f32 %v12197_v5  ;;  %v3545_v23 = vsel %vm12227_vm10, %v3544_v25, %v3540_v38  ;;  %vm4155_vm13 = vweird.f32 %v11965_v43  ;;  %v12374_v26 = vpop.xlane.xlu2 %4013 }
 0x44c   : > { %4028 = vadd.xlane.f32.xlu1 %v11724_v14  ;;  %v4131_v14 = vand.u32 2147483648, %v11904_v61  ;;  %v12324_v54 = vpop.eup %8803  ;;  %v4176_v42 = vand.u32 2147483648, %v12171_v51  ;;  %v12334_v39 = vmul.f32 %v17561_v33, %v3530_v45  ;;  %v4103_v60 = vsel %vm12240_vm1, %v4102_v13, %v4098_v62  ;;  %v12394_v33 = vpop.xlane.xlu0 %3272 }
 0x44d   : > { %v12331_v48 = vpop.eup %8805  ;;  %v4153_v25 = vmul.f32 %v12222_v22, %v4152_v44  ;;  %v4128_v63 = vsel %vm12342_vm14, %v12153_v59, %v4124_v47  ;;  %v4162_v20 = vor.u32 1.1754944e-38, %v4161_v15  ;;  %vm4170_vm8 = vweird.f32 %v12171_v51 }
 0x44e   : > { %v4132_v27 = vor.u32 1.1754944e-38, %v4131_v14  ;;  %v4211_v61 = vmul.f32 %v12318_v4, %v12076_v11  ;;  %v12356_v36 = vmul.f32 %v17564_v19, %v3545_v23  ;;  %vm12358_vm10 = vcmp.eq.f32.partialorder %v4159_v21, 8.507059e+37 }
 0x44f   : > { %3287 = vadd.xlane.f32.xlu0 %v11982_v40  ;;  %v4168_v12 = vmul.f32 %v12233_v52, %v4167_v8  ;;  %v4137_v40 = vsub.f32 1.0, %v4136_v1  ;;  %v4196_v58 = vmul.f32 %v12324_v54, %v12105_v57  ;;  %v12366_v59 = vpop.eup %8807  ;;  %v12369_v14 = vmul.f32 %v17567_v53, %v4103_v60  ;;  %v12396_v60 = vpop.xlane.xlu1 %4010 }
 0x450   : > { %vm4156_vm12 = vweird.f32 %v12222_v22  ;;  %v4177_v45 = vor.u32 1.1754944e-38, %v4176_v42  ;;  %v4301_v38 = vmul.f32 %v12331_v48, %v12245_v46  ;;  %v4133_v62 = vsel %vm12291_vm9, %v4132_v27, %v4128_v63 }
 0x451   : > { %4034 = vadd.xlane.f32.xlu2 %v11735_v29  ;;  %v4174_v29 = vand.u32 2147483647, %v12171_v51  ;;  %v12376_v44 = vpop.eup %8809  ;;  %v4144_v15 = vand.u32 2147483647, %v11998_v3  ;;  %v4146_v21 = vand.u32 2147483648, %v11998_v3  ;;  %vm4171_vm1 = vweird.f32 %v12233_v52  ;;  %vm12405_vm4 = vmor %vm4155_vm13, %vm4156_vm12 }
 0x452   : > { %vm4140_vm3 = vweird.f32 %v11998_v3  ;;  %v4212_v8 = vsub.f32 1.0, %v4211_v61  ;;  %v4219_v1 = vand.u32 2147483647, %v12076_v11  ;;  %v4169_v55 = vadd.f32 %v12233_v52, %v4168_v12  ;;  %vm12428_vm9 = vmor %vm4170_vm8, %vm4171_vm1 }
 0x453   : > { %vm12381_vm15 = vcmp.eq.f32.partialorder %v4174_v29, 8.507059e+37  ;;  %v4138_v23 = vmul.f32 %v12275_v10, %v4137_v40  ;;  %v4197_v27 = vsub.f32 1.0, %v4196_v58  ;;  %v4286_v42 = vmul.f32 %v12366_v59, %v12178_v2  ;;  %v17583_v29 = vld [vmem:[#allocation68_spill] sm:$0xff] }
 0x454   : > { %4067 = vadd.xlane.f32.xlu1 %v11908_v6  ;;  %v4154_v6 = vadd.f32 %v12222_v22, %v4153_v25  ;;  %v12399_v25 = vmul.f32 %v17570_v37, %v4133_v62  ;;  %vm4215_vm5 = vweird.f32 %v12076_v11  ;;  %v4221_v63 = vand.u32 2147483648, %v12076_v11 }
 0x455   : > { %v4302_v61 = vsub.f32 1.0, %v4301_v38  ;;  %v4181_v19 = vmul.f32 %v12376_v44, %v12197_v5  ;;  %vm12417_vm6 = vcmp.eq.f32.partialorder %v4144_v15, 8.507059e+37  ;;  %v4147_v40 = vor.u32 1.1754944e-38, %v4146_v21 }
 0x456   : > { %v4158_v12 = vsel %vm12405_vm4, %v12222_v22, %v4154_v6  ;;  %v4204_v58 = vand.u32 2147483647, %v12105_v57  ;;  %v4206_v53 = vand.u32 2147483648, %v12105_v57  ;;  %vm4141_vm7 = vweird.f32 %v12275_v10 }
 0x457   : > { %3290 = vadd.xlane.f32.xlu0 %v11986_v17  ;;  %v4213_v22 = vmul.f32 %v12318_v4, %v4212_v8  ;;  %vm4200_vm11 = vweird.f32 %v12105_v57  ;;  %8811 = vrcp.f32 %v12394_v33  ;;  %v4173_v17 = vsel %vm12428_vm9, %v12233_v52, %v4169_v55 }
 0x458   : > { %v4139_v38 = vadd.f32 %v12275_v10, %v4138_v23  ;;  %v4198_v51 = vmul.f32 %v12324_v54, %v4197_v27  ;;  %v4287_v62 = vsub.f32 1.0, %v4286_v42  ;;  %v4163_v6 = vsel %vm12358_vm10, %v4162_v20, %v4158_v12  ;;  %vm12462_vm10 = vmor %vm4140_vm3, %vm4141_vm7  ;;  %v12469_v27 = vpop.xlane.xlu2 %4043 }
 0x459   : > { %4073 = vadd.xlane.f32.xlu2 %v11923_v18  ;;  %vm12444_vm13 = vcmp.eq.f32.partialorder %v4219_v1, 8.507059e+37  ;;  %v4222_v21 = vor.u32 1.1754944e-38, %v4221_v63  ;;  %v4303_v8 = vmul.f32 %v12331_v48, %v4302_v61  ;;  %v4182_v37 = vsub.f32 1.0, %v4181_v19 }
 0x45a   : > { %vm4216_vm14 = vweird.f32 %v12318_v4  ;;  %vm12450_vm8 = vcmp.eq.f32.partialorder %v4204_v58, 8.507059e+37  ;;  %v4207_v55 = vor.u32 1.1754944e-38, %v4206_v53  ;;  %v4311_v13 = vand.u32 2147483648, %v12245_v46 }
 0x45b   : > { %v4178_v20 = vsel %vm12381_vm15, %v4177_v45, %v4173_v17  ;;  %v4214_v23 = vadd.f32 %v12318_v4, %v4213_v22  ;;  %vm4201_vm12 = vweird.f32 %v12324_v54  ;;  %8813 = vrcp.f32 %v12268_v9  ;;  %vm12493_vm1 = vmor %vm4215_vm5, %vm4216_vm14 }
 0x45c   : > { %4037 = vadd.xlane.f32.xlu1 %v11751_v50  ;;  %v4309_v50 = vand.u32 2147483647, %v12245_v46  ;;  %v4143_v45 = vsel %vm12462_vm10, %v12275_v10, %v4139_v38  ;;  %v4199_v47 = vadd.f32 %v12324_v54, %v4198_v51  ;;  %v4288_v3 = vmul.f32 %v12366_v59, %v4287_v62  ;;  %v17584_v10 = vld [vmem:[#allocation69_spill] sm:$0xff]  ;;  %vm12514_vm5 = vmor %vm4200_vm11, %vm4201_vm12 }
 0x45d   : > { %8815 = vrcp.f32 %v12310_v31  ;;  %v12477_v42 = vpop.eup %8811  ;;  %v12480_v63 = vmul.f32 %v17583_v29, %v4163_v6  ;;  %v4304_v61 = vadd.f32 %v12331_v48, %v4303_v8  ;;  %vm4306_vm15 = vweird.f32 %v12331_v48  ;;  %v17593_v8 = vld [vmem:[#allocation70_spill] sm:$0xff] }
 0x45e   : > { %v4183_v19 = vmul.f32 %v12376_v44, %v4182_v37  ;;  %v12487_v12 = vmul.f32 %v17584_v10, %v4178_v20  ;;  %vm4305_vm3 = vweird.f32 %v12245_v46  ;;  %vm12498_vm4 = vcmp.eq.f32.partialorder %v4309_v50, 8.507059e+37  ;;  %v17638_v46 = vld [vmem:[#allocation15_spill] sm:$0xff] }
 0x45f   : > { %v4294_v18 = vand.u32 2147483647, %v12178_v2  ;;  %v4148_v22 = vsel %vm12417_vm6, %v4147_v40, %v4143_v45  ;;  %v4218_v11 = vsel %vm12493_vm1, %v12318_v4, %v4214_v23  ;;  %v4312_v17 = vor.u32 1.1754944e-38, %v4311_v13  ;;  %vm12524_vm6 = vmor %vm4305_vm3, %vm4306_vm15 }
 0x460   : > { %v4296_v38 = vand.u32 2147483648, %v12178_v2  ;;  %v4203_v43 = vsel %vm12514_vm5, %v12324_v54, %v4199_v47  ;;  %v4289_v4 = vadd.f32 %v12366_v59, %v4288_v3  ;;  %vm4291_vm9 = vweird.f32 %v12366_v59  ;;  %v17600_v3 = vld [vmem:[#allocation72_spill] sm:$0xff] }
 0x461   : > { %3296 = vadd.xlane.f32.xlu2 %v11712_v24  ;;  %v12503_v24 = vpop.xlane.xlu1 %4040  ;;  %v3608_v57 = vmul.f32 %v12477_v42, %v12394_v33  ;;  %v12533_v51 = vpop.eup %8813  ;;  %v4308_v54 = vsel %vm12524_vm6, %v12331_v48, %v4304_v61  ;;  %vm4290_vm7 = vweird.f32 %v12178_v2  ;;  %v4184_v62 = vadd.f32 %v12376_v44, %v4183_v19  ;;  %v17601_v61 = vld [vmem:[#allocation71_spill] sm:$0xff] }
 0x462   : > { %vm4186_vm11 = vweird.f32 %v12376_v44  ;;  %v4149_v37 = vmul.f32 %v17593_v8, %v4148_v22  ;;  %v4223_v50 = vsel %vm12444_vm13, %v4222_v21, %v4218_v11  ;;  %vm12546_vm14 = vcmp.eq.f32.partialorder %v4294_v18, 8.507059e+37  ;;  %vm12553_vm10 = vmor %vm4290_vm7, %vm4291_vm9 }
 0x463   : > { %v12541_v6 = vpop.eup %8815  ;;  %v4191_v13 = vand.u32 2147483648, %v12197_v5  ;;  %v4208_v2 = vsel %vm12450_vm8, %v4207_v55, %v4203_v43  ;;  %v4297_v20 = vor.u32 1.1754944e-38, %v4296_v38  ;;  %vm4185_vm12 = vweird.f32 %v12197_v5  ;;  %v12596_v43 = vpop.permute.xlu0 %4558 }
 0x464   : > { %3260 = vadd.xlane.f32.xlu1 %v11704_v35  ;;  %v4189_v1 = vand.u32 2147483647, %v12197_v5  ;;  %v4313_v15 = vsel %vm12498_vm4, %v4312_v17, %v4308_v54  ;;  %v4293_v21 = vsel %vm12553_vm10, %v12366_v59, %v4289_v4  ;;  %vm12564_vm13 = vmor %vm4185_vm12, %vm4186_vm11  ;;  %v3609_v52 = vsub.f32 1.0, %v3608_v57  ;;  %v12577_v59 = vpop.xlane.xlu2 %4049 }
 0x465   : > { %v3618_v55 = vand.u32 2147483648, %v12394_v33  ;;  %v4188_v45 = vsel %vm12564_vm13, %v12376_v44, %v4184_v62  ;;  %v4271_v5 = vmul.f32 %v12533_v51, %v12268_v9  ;;  %v4256_v47 = vmul.f32 %v12541_v6, %v12310_v31  ;;  %v17602_v44 = vld [vmem:[#allocation73_spill] sm:$0xff]  ;;  %v17603_v62 = vld [vmem:[#allocation75_spill] sm:$0xff] }
 0x466   : > { %8817 = vrcp.f32 %v12469_v27  ;;  %v12580_v29 = vmul.f32 %v17600_v3, %v4223_v50  ;;  %v12583_v19 = vmul.f32 %v17601_v61, %v4208_v2  ;;  %v4192_v10 = vor.u32 1.1754944e-38, %v4191_v13  ;;  %v17604_v2 = vld [vmem:[#allocation74_spill] sm:$0xff] }
 0x467   : > { %v4281_v58 = vand.u32 2147483648, %v12268_v9  ;;  %v12587_v53 = vmul.f32 %v17602_v44, %v4313_v15  ;;  %v4298_v18 = vsel %vm12546_vm14, %v4297_v20, %v4293_v21  ;;  %vm4190_vm8 = vcmp.eq.f32.partialorder %v4189_v1, 8.507059e+37 }
 0x468   : > { %v4266_v22 = vand.u32 2147483648, %v12310_v31  ;;  %v4193_v11 = vsel %vm4190_vm8, %v4192_v10, %v4188_v45  ;;  %v12593_v17 = vor.u32 1.1754944e-38, %v3618_v55  ;;  %v4279_v38 = vand.u32 2147483647, %v12268_v9 }
 0x469   : > { %v12598_v40 = vpop.xlane.xlu1 %4046  ;;  %v3610_v4 = vmul.f32 %v12477_v42, %v3609_v52  ;;  %v4272_v57 = vsub.f32 1.0, %v4271_v5  ;;  %v4257_v54 = vsub.f32 1.0, %v4256_v47  ;;  %8819 = vrcp.f32 %v12374_v26 }
 0x46a   : > { %v12603_v8 = vmul.f32 %v17603_v62, %v4298_v18  ;;  %vm4275_vm15 = vweird.f32 %v12268_v9  ;;  %v12606_v50 = vor.u32 1.1754944e-38, %v4281_v58  ;;  %v4264_v35 = vand.u32 2147483647, %v12310_v31  ;;  %v17618_v9 = vld [vmem:[#allocation5_spill] sm:$0xff] }
 0x46b   : > { %8821 = vrcp.f32 %v12503_v24  ;;  %v4194_v48 = vmul.f32 %v17604_v2, %v4193_v11  ;;  %vm4276_vm1 = vweird.f32 %v12533_v51  ;;  %vm4260_vm3 = vweird.f32 %v12310_v31 }
 0x46c   : > { %v12610_v13 = vpop.eup %8817  ;;  %v12615_v20 = vor.u32 1.1754944e-38, %v4266_v22  ;;  %v4561_v1 = vmul.f32 %v12596_v43, %v12278_v0  ;;  %vm4261_vm4 = vweird.f32 %v12541_v6  ;;  %v4562_v15 = vmul.f32 %v12596_v43, %v12369_v14  ;;  %v12647_v58 = vpop.xlane.xlu2 %3239  ;;  %vm12666_vm9 = vmor %vm4275_vm15, %vm4276_vm1 }
 0x46d   : > { %v4563_v21 = vmul.f32 %v12596_v43, %v12281_v28  ;;  %v4564_v23 = vmul.f32 %v12596_v43, %v12399_v25  ;;  %v12627_v52 = vadd.f32 %v12477_v42, %v3610_v4  ;;  %v4273_v55 = vmul.f32 %v12533_v51, %v4272_v57  ;;  %vm12681_vm7 = vmor %vm4260_vm3, %vm4261_vm4 }
 0x46e   : > { %v4258_v45 = vmul.f32 %v12541_v6, %v4257_v54  ;;  %v4565_v0 = vmul.f32 %v12596_v43, %v4149_v37  ;;  %v4391_v5 = vmul.f32 %v12610_v13, %v12469_v27  ;;  %v4593_v14 = vsub.f32 %v12122_v56, %v4561_v1 }
 0x46f   : > { %v4594_v47 = vsub.f32 %v12111_v32, %v4562_v15  ;;  %v4595_v28 = vsub.f32 %v12156_v7, %v4563_v21  ;;  %v12637_v3 = vpop.eup %8819  ;;  %vm12639_vm5 = vcmp.eq.f32.partialorder %v4279_v38, 8.507059e+37  ;;  %8823 = vrcp.f32 %v12396_v60 }
 0x470   : > { %v4596_v10 = vsub.f32 %v12159_v16, %v4564_v23  ;;  %vm12651_vm6 = vcmp.eq.f32.partialorder %v4264_v35, 8.507059e+37  ;;  %v4625_v7 = vpack.c.bf16 %v4593_v14, %v4593_v14  ;;  %v4566_v22 = vmul.f32 %v12596_v43, %v12480_v63 }
 0x471   : > { %v12649_v56 = vpop.eup %8821  ;;  %v4626_v44 = vpack.c.bf16 %v4594_v47, %v4594_v47  ;;  %v4627_v18 = vpack.c.bf16 %v4595_v28, %v4595_v28  ;;  %v4274_v11 = vadd.f32 %v12533_v51, %v4273_v55  ;;  %v4259_v38 = vadd.f32 %v12541_v6, %v4258_v45  ;;  %v12660_v2 = vpop.xlane.xlu1 %3236 }
 0x472   : > { %v4628_v4 = vpack.c.bf16 %v4596_v10, %v4596_v10  ;;  %v4597_v16 = vsub.f32 %v11916_v30, %v4565_v0  ;;  %v4392_v57 = vsub.f32 1.0, %v4391_v5  ;;  %v4659_v54 = vunpack.c.l.b16 %v4625_v7 }
 0x473   : > { %v4660_v62 = vunpack.c.l.b16 %v4626_v44  ;;  %v4697_v35 = vunpack.c.l.b16 %v4627_v18  ;;  %v12672_v63 = vmul.f32 %v12637_v3, %v12374_v26  ;;  %v4376_v30 = vmul.f32 %v12649_v56, %v12503_v24 }
 0x474   : > { %v4698_v15 = vunpack.c.l.b16 %v4628_v4  ;;  %v4598_v21 = vsub.f32 %v11919_v41, %v4566_v22  ;;  %v4629_v55 = vpack.c.bf16 %v4597_v16, %v4597_v16  ;;  %v4567_v45 = vmul.f32 %v12596_v43, %v12487_v12  ;;  %v17613_v12 = vld [vmem:[#allocation45_spill] sm:$0xff]  ;;  %v17616_v16 = vld [vmem:[#allocation19_spill] sm:$0xff]  ;;  %v12717_v1 = vpop.xlane.xlu2 %3242 }
 0x475   : > { %v4661_v23 = vpack.c.b16 %v4660_v62, %v4659_v54  ;;  %v4568_v0 = vmul.f32 %v12596_v43, %v4194_v48  ;;  %v12688_v5 = vpop.eup %8823  ;;  %v4278_v41 = vsel %vm12666_vm9, %v12533_v51, %v4274_v11  ;;  %v4263_v31 = vsel %vm12681_vm7, %v12541_v6, %v4259_v38  ;;  %v17614_v48 = vld [vmem:[#allocation40_spill] sm:$0xff]  ;;  %v17615_v11 = vld [vmem:[#allocation41_spill] sm:$0xff] }
 0x476   : > { %v4699_v14 = vpack.c.b16 %v4698_v15, %v4697_v35  ;;  %v4630_v47 = vpack.c.bf16 %v4598_v21, %v4598_v21  ;;  %v4393_v28 = vmul.f32 %v12610_v13, %v4392_v57  ;;  %v4735_v10 = vunpack.c.l.b16 %v4629_v55  ;;  %v17617_v15 = vld [vmem:[#allocation78_spill] sm:$0xff] }
 0x477   : > { %8343 = vmatmul.msk.bf16.vlgmr.msrb.gmra.mxu0 %vm17158_vm0, %v4661_v23  ;;  %v4599_v7 = vsub.f32 %v17613_v12, %v4567_v45  ;;  %v4600_v44 = vsub.f32 %v17614_v48, %v4568_v0  ;;  %v4377_v22 = vsub.f32 1.0, %v4376_v30  ;;  %8825 = vrcp.f32 %v12647_v58  ;;  %v17619_v55 = vld [vmem:[#allocation26_spill] sm:$0xff]  ;;  %v17621_v0 = vld [vmem:[#allocation21_spill] sm:$0xff] }
 0x478   : > { %8344 = vmatmul.msk.bf16.vlgmr.msrb.gmra.mxu1 %vm17158_vm0, %v4699_v14  ;;  %v4736_v51 = vunpack.c.l.b16 %v4630_v47  ;;  %4925 = vmatpush.bf16.msrb.mxu0 %v17615_v11  ;;  %v4283_v6 = vsel %vm12639_vm5, %v12606_v50, %v4278_v41  ;;  %vm4395_vm11 = vweird.f32 %v12469_v27  ;;  %v4268_v57 = vsel %vm12651_vm6, %v12615_v20, %v4263_v31  ;;  %v17620_v45 = vld [vmem:[#allocation46_spill] sm:$0xff]  ;;  %v17622_v31 = vld [vmem:[#allocation20_spill] sm:$0xff] }
 0x479   : > { %v4631_v38 = vpack.c.bf16 %v4599_v7, %v4599_v7  ;;  %v4632_v4 = vpack.c.bf16 %v4600_v44, %v4600_v44  ;;  %4963 = vmatpush.bf16.msrb.mxu1 %v17616_v16  ;;  %v12714_v54 = vmul.f32 %v12688_v5, %v12396_v60  ;;  %v4401_v62 = vand.u32 2147483648, %v12469_v27  ;;  %v12736_v47 = vpop.xlane.xlu1 %3275  ;;  %v17637_v7 = vld [vmem:[#allocation53_spill] sm:$0xff] }
 0x47a   : > { %v4737_v35 = vpack.c.b16 %v4736_v51, %v4735_v10  ;;  %v12720_v50 = vadd.f32 %v12610_v13, %v4393_v28  ;;  %vm4396_vm14 = vweird.f32 %v12610_v13  ;;  %v4284_v21 = vmul.f32 %v17617_v15, %v4283_v6  ;;  %v17623_v10 = vld [vmem:[#allocation77_spill] sm:$0xff]  ;;  %v17627_v15 = vld [vmem:[#allocation16_spill] sm:$0xff] }
 0x47b   : > { %v4773_v25 = vunpack.c.l.b16 %v4631_v38  ;;  %v4774_v30 = vunpack.c.l.b16 %v4632_v4  ;;  %v4399_v20 = vand.u32 2147483647, %v12469_v27  ;;  %v4378_v32 = vmul.f32 %v12649_v56, %v4377_v22  ;;  %vm12744_vm10 = vmor %vm4395_vm11, %vm4396_vm14 }
 0x47c   : > { %8345 = vmatmul.msk.bf16.vlgmr.msrb.gmra.mxu2 %vm17158_vm0, %v4737_v35  ;;  %4926 = vmatpush.bf16.msrb.mxu0 %v17618_v9  ;;  %8827 = vrcp.f32 %v12660_v2  ;;  %v3292_v41 = vsel %vm17162_vm2, %v17621_v0, 0.0  ;;  %v3268_v14 = vsel %vm17162_vm2, %v17622_v31, 0.0  ;;  %v4269_v12 = vmul.f32 %v17623_v10, %v4268_v57  ;;  %v17626_v35 = vld [vmem:[#allocation29_spill] sm:$0xff] }
 0x47d   : > { %v4775_v23 = vpack.c.b16 %v4774_v30, %v4773_v25  ;;  %5001 = vmatpush.bf16.msrb.mxu2 %v17619_v55  ;;  %4964 = vmatpush.bf16.msrb.mxu1 %v17620_v45  ;;  %8829 = vrcp.f32 %v12717_v1  ;;  %v8826_v28 = vpop.eup %8825  ;;  %v12748_v44 = vor.u32 1.1754944e-38, %v4401_v62  ;;  %v3451_v38 = vand.u32 2147483647, %v12647_v58  ;;  %v17639_v31 = vld [vmem:[#allocation85_spill] sm:$0xff] }
 0x47e   : > { %3293 = vadd.xlane.f32.xlu0 %v3292_v41  ;;  %3269 = vadd.xlane.f32.xlu2 %v3268_v14  ;;  %v3443_v27 = vmul.f32 %v8826_v28, %v12647_v58  ;;  %v12760_v4 = vadd.f32 %v12649_v56, %v4378_v32  ;;  %v3453_v57 = vand.u32 2147483648, %v12647_v58  ;;  %v3436_v62 = vand.u32 2147483647, %v12660_v2  ;;  %v17629_v32 = vld [vmem:[#allocation55_spill] sm:$0xff] }
 0x47f   : > { %8346 = vmatmul.msk.bf16.vlgmr.msrb.gmra.mxu3 %vm17158_vm0, %v4775_v23  ;;  %8831 = vrcp.f32 %v12736_v47  ;;  %vm3447_vm12 = vweird.f32 %v12647_v58  ;;  %v4570_v30 = vmul.f32 %v12596_v43, %v12580_v29  ;;  %v17628_v23 = vld [vmem:[#allocation13_spill] sm:$0xff]  ;;  %v3298_v41 = vsel %vm17162_vm2, %v17629_v32, 0.0 }
 0x480   : > { %4927 = vmatpush.bf16.msrb.mxu0 %v17626_v35  ;;  %v3444_v25 = vsub.f32 1.0, %v3443_v27  ;;  %vm4381_vm13 = vweird.f32 %v12649_v56  ;;  %v3438_v10 = vand.u32 2147483648, %v12660_v2  ;;  %3299 = vadd.xlane.f32.xlu1 %v3298_v41  ;;  %v4573_v27 = vmul.f32 %v12596_v43, %v4269_v12 }
 0x481   : > { %5002 = vmatpush.bf16.msrb.mxu2 %v17627_v15  ;;  %4965 = vmatpush.bf16.msrb.mxu1 %v17628_v23  ;;  %v4574_v61 = vmul.f32 %v12596_v43, %v4284_v21  ;;  %v4575_v29 = vmul.f32 %v12596_v43, %v12603_v8  ;;  %vm3448_vm8 = vweird.f32 %v8826_v28  ;;  %vm12781_vm15 = vcmp.eq.f32.partialorder %v3451_v38, 8.507059e+37  ;;  %v17634_v8 = vld [vmem:[#allocation37_spill] sm:$0xff] }
 0x482   : > { %v8828_v14 = vpop.eup %8827  ;;  %v3445_v22 = vmul.f32 %v8826_v28, %v3444_v25  ;;  %vm4380_vm1 = vweird.f32 %v12503_v24  ;;  %v3454_v41 = vor.u32 1.1754944e-38, %v3453_v57  ;;  %vm3432_vm3 = vweird.f32 %v12660_v2  ;;  %vm3449_vm6 = vmor %vm3447_vm12, %vm3448_vm8 }
 0x483   : > { %v12779_v37 = vpop.eup %8829  ;;  %v3428_v18 = vmul.f32 %v8828_v14, %v12660_v2  ;;  %vm12788_vm4 = vcmp.eq.f32.partialorder %v3436_v62, 8.507059e+37  ;;  %v4605_v12 = vsub.f32 %v12114_v34, %v4573_v27  ;;  %vm12794_vm5 = vcmp.eq.f32.partialorder %v4399_v20, 8.507059e+37 }
 0x484   : > { %4928 = vmatpush.bf16.msrb.mxu0 %v17634_v8  ;;  %v3446_v25 = vadd.f32 %v8826_v28, %v3445_v22  ;;  %v4606_v57 = vsub.f32 %v12200_v49, %v4574_v61  ;;  %v4576_v62 = vmul.f32 %v12596_v43, %v12587_v53  ;;  %v3439_v34 = vor.u32 1.1754944e-38, %v3438_v10 }
 0x485   : > { %v3429_v51 = vsub.f32 1.0, %v3428_v18  ;;  %5003 = vmatpush.bf16.msrb.mxu2 %v17637_v7  ;;  %4966 = vmatpush.bf16.msrb.mxu1 %v17638_v46  ;;  %v8832_v0 = vpop.eup %8831  ;;  %v3458_v20 = vmul.f32 %v12779_v37, %v12717_v1  ;;  %v4637_v22 = vpack.c.bf16 %v4605_v12, %v4605_v12  ;;  %v4607_v18 = vsub.f32 %v12334_v39, %v4575_v29  ;;  %v17640_v39 = vld [vmem:[#allocation50_spill] sm:$0xff] }
 0x486   : > { %vm3613_vm9 = vweird.f32 %v12477_v42  ;;  %v3450_v27 = vsel %vm3449_vm6, %v8826_v28, %v3446_v25  ;;  %vm3433_vm7 = vweird.f32 %v8828_v14  ;;  %v3623_v49 = vmul.f32 %v8832_v0, %v12736_v47 }
 0x487   : > { %v3430_v32 = vmul.f32 %v8828_v14, %v3429_v51  ;;  %v3455_v53 = vsel %vm12781_vm15, %v3454_v41, %v3450_v27  ;;  %v3631_v61 = vand.u32 2147483647, %v12736_v47  ;;  %v4638_v58 = vpack.c.bf16 %v4606_v57, %v4606_v57  ;;  %vm3434_vm14 = vmor %vm3432_vm3, %vm3433_vm7  ;;  %v12821_v57 = vpop.xlane.xlu2 %3278 }
 0x488   : > { %v4855_v10 = vunpack.c.l.b16 %v4637_v22  ;;  %vm3612_vm11 = vweird.f32 %v12394_v33  ;;  %v3456_v12 = vmul.f32 %v17639_v31, %v3455_v53  ;;  %v3624_v29 = vsub.f32 1.0, %v3623_v49  ;;  %v12823_v22 = vpop.xlane.xlu1 %3245  ;;  %vm12832_vm15 = vmor %vm4380_vm1, %vm4381_vm13 }
 0x489   : > { %v3431_v46 = vadd.f32 %v8828_v14, %v3430_v32  ;;  %5004 = vmatpush.bf16.msrb.mxu2 %v17640_v39  ;;  %v4608_v28 = vsub.f32 %v12356_v36, %v4576_v62  ;;  %v3459_v51 = vsub.f32 1.0, %v3458_v20  ;;  %v3633_v6 = vand.u32 2147483648, %v12736_v47 }
 0x48a   : > { %v4856_v41 = vunpack.c.l.b16 %v4638_v58  ;;  %v4639_v25 = vpack.c.bf16 %v4607_v18, %v4607_v18  ;;  %v3625_v31 = vmul.f32 %v8832_v0, %v3624_v29  ;;  %vm3628_vm12 = vweird.f32 %v8832_v0 }
 0x48b   : > { %v3435_v27 = vsel %vm3434_vm14, %v8828_v14, %v3431_v46  ;;  %v4640_v32 = vpack.c.bf16 %v4608_v28, %v4608_v28  ;;  %vm4230_vm8 = vweird.f32 %v12396_v60  ;;  %v4602_v49 = vsub.f32 %v3456_v12, %v4570_v30  ;;  %v17643_v14 = vld [vmem:[#allocation86_spill] sm:$0xff] }
 0x48c   : > { %v3440_v36 = vsel %vm12788_vm4, %v3439_v34, %v3435_v27  ;;  %v4857_v2 = vpack.c.b16 %v4856_v41, %v4855_v10  ;;  %v4877_v62 = vunpack.c.l.b16 %v4639_v25  ;;  %v4569_v46 = vmul.f32 %v12596_v43, %v12583_v19  ;;  %v17650_v41 = vld [vmem:[#allocation81_spill] sm:$0xff] }
 0x48d   : > { %v3441_v18 = vmul.f32 %v17643_v14, %v3440_v36  ;;  %v3626_v53 = vadd.f32 %v8832_v0, %v3625_v31  ;;  %vm3627_vm3 = vweird.f32 %v12736_v47  ;;  %v17644_v30 = vand.u32 2147483647, %v12394_v33 }
 0x48e   : > { %v17647_v34 = vsub.f32 1.0, %v12714_v54  ;;  %v17648_v19 = vsel %vm12744_vm10, %v12610_v13, %v12720_v50  ;;  %vm3629_vm13 = vmor %vm3627_vm3, %vm3628_vm12  ;;  %v3634_v47 = vor.u32 1.1754944e-38, %v3633_v6  ;;  %8349 = vmatmul.msk.bf16.vlgmr.msra.gmra.mxu2 %vm17158_vm0, %v4857_v2  ;;  %v4878_v12 = vunpack.c.l.b16 %v4640_v32  ;;  %v17656_v32 = vld [vmem:[#allocation51_spill] sm:$0xff] }
 0x48f   : > { %vm12842_vm4 = vcmp.eq.f32.partialorder %v17644_v30, 8.507059e+37  ;;  %v4403_v10 = vsel %vm12794_vm5, %v12748_v44, %v17648_v19  ;;  %v4383_v54 = vsel %vm12832_vm15, %v12649_v56, %v12760_v4  ;;  %v4601_v29 = vsub.f32 %v3441_v18, %v4569_v46  ;;  %5105 = vmatpush.bf16.msra.mxu2 %v17619_v55  ;;  %vm12876_vm5 = vmor %vm3612_vm11, %vm3613_vm9  ;;  %v17659_v30 = vld [vmem:[#allocation42_spill] sm:$0xff] }
 0x490   : > { %v4228_v58 = vmul.f32 %v12688_v5, %v17647_v34  ;;  %v3630_v48 = vsel %vm3629_vm13, %v8832_v0, %v3626_v53  ;;  %vm3632_vm1 = vcmp.eq.f32.partialorder %v3631_v61, 8.507059e+37  ;;  %vm4245_vm10 = vweird.f32 %v12374_v26  ;;  %v12898_v20 = vpop.xlane.xlu1 %3281 }
 0x491   : > { %v4634_v13 = vpack.c.bf16 %v4602_v49, %v4602_v49  ;;  %v3460_v50 = vmul.f32 %v12779_v37, %v3459_v51  ;;  %v3635_v44 = vsel %vm3632_vm1, %v3634_v47, %v3630_v48  ;;  %v4879_v38 = vpack.c.b16 %v4878_v12, %v4877_v62  ;;  %v17655_v51 = vld [vmem:[#allocation54_spill] sm:$0xff]  ;;  %v12896_v62 = vpop.permute.xlu2 %2005 }
 0x492   : > { %v17649_v28 = vsub.f32 1.0, %v12672_v63  ;;  %v4404_v25 = vmul.f32 %v17650_v41, %v4403_v10  ;;  %v17651_v56 = vand.u32 2147483648, %v12503_v24  ;;  %v4633_v0 = vpack.c.bf16 %v4601_v29, %v4601_v29  ;;  %v17661_v10 = vld [vmem:[#allocation82_spill] sm:$0xff]  ;;  %v17668_v41 = vld [vmem:[#allocation79_spill] sm:$0xff] }
 0x493   : > { %v4229_v61 = vadd.f32 %v12688_v5, %v4228_v58  ;;  %vm4231_vm6 = vweird.f32 %v12688_v5  ;;  %v17654_v63 = vand.u32 2147483647, %v12503_v24  ;;  %8350 = vmatmul.msk.bf16.vlgmr.msra.gmra.mxu3 %vm17158_vm0, %v4879_v38  ;;  %v3301_v27 = vsel %vm17158_vm0, %v17655_v51, 0.0  ;;  %5106 = vmatpush.bf16.msra.mxu2 %v17627_v15  ;;  %v17674_v48 = vld [vmem:[#allocation62_spill] sm:$0xff] }
 0x494   : > { %v4243_v6 = vmul.f32 %v12637_v3, %v17649_v28  ;;  %v4387_v4 = vor.u32 1.1754944e-38, %v17651_v56  ;;  %v3615_v33 = vsel %vm12876_vm5, %v12477_v42, %v12627_v52  ;;  %v3636_v49 = vmul.f32 %v17656_v32, %v3635_v44  ;;  %3302 = vadd.xlane.f32.xlu1 %v3301_v27  ;;  %vm12906_vm14 = vmor %vm4230_vm8, %vm4231_vm6 }
 0x495   : > { %vm4385_vm7 = vcmp.eq.f32.partialorder %v17654_v63, 8.507059e+37  ;;  %8833 = vrcp.f32 %v12823_v22  ;;  %v4812_v24 = vunpack.c.l.b16 %v4634_v13  ;;  %v4811_v36 = vunpack.c.l.b16 %v4633_v0 }
 0x496   : > { %v4388_v31 = vsel %vm4385_vm7, %v4387_v4, %v4383_v54  ;;  %v3461_v2 = vadd.f32 %v12779_v37, %v3460_v50  ;;  %vm3463_vm9 = vweird.f32 %v12779_v37  ;;  %vm4246_vm11 = vweird.f32 %v12637_v3  ;;  %1997 = vrot.lane.b32.xlu2 %v17659_v30, %s9243_s27  ;;  %v17667_v50 = vld [vmem:[#allocation76_spill] sm:$0xff] }
 0x497   : > { %v4251_v42 = vand.u32 2147483648, %v12374_v26  ;;  %v3468_v15 = vand.u32 2147483648, %v12717_v1  ;;  %v4582_v46 = vmul.f32 %v12596_v43, %v4404_v25  ;;  %v4244_v14 = vadd.f32 %v12637_v3, %v4243_v6  ;;  %5107 = vmatpush.bf16.msra.mxu2 %v17637_v7  ;;  %vm12943_vm3 = vmor %vm4245_vm10, %vm4246_vm11 }
 0x498   : > { %v4233_v18 = vsel %vm12906_vm14, %v12688_v5, %v4229_v61  ;;  %vm3462_vm12 = vweird.f32 %v12717_v1  ;;  %v3466_v53 = vand.u32 2147483647, %v12717_v1  ;;  %v3620_v34 = vsel %vm12842_vm4, %v12593_v17, %v3615_v33  ;;  %v2008_v4 = vpop.permute.xlu1 %2007  ;;  %v17669_v61 = vld [vmem:[#allocation44_spill] sm:$0xff] }
 0x499   : > { %v17660_v58 = vand.u32 2147483648, %v12396_v60  ;;  %v4389_v47 = vmul.f32 %v17661_v10, %v4388_v31  ;;  %vm12928_vm8 = vmor %vm3462_vm12, %vm3463_vm9  ;;  %v4614_v12 = vsub.f32 %v3636_v49, %v4582_v46  ;;  %v4249_v1 = vand.u32 2147483647, %v12374_v26 }
 0x49a   : > { %v17664_v54 = vand.u32 2147483647, %v12396_v60  ;;  %v3465_v17 = vsel %vm12928_vm8, %v12779_v37, %v3461_v2  ;;  %v4813_v21 = vpack.c.b16 %v4812_v24, %v4811_v36  ;;  %v3469_v13 = vor.u32 1.1754944e-38, %v3468_v15  ;;  %v17670_v24 = vld [vmem:[#allocation80_spill] sm:$0xff]  ;;  %v2002_v2 = vpop.permute.xlu0 %2001 }
 0x49b   : > { %v4237_v19 = vor.u32 1.1754944e-38, %v17660_v58  ;;  %v8834_v29 = vpop.eup %8833  ;;  %v3621_v44 = vmul.f32 %v17667_v50, %v3620_v34  ;;  %v4248_v60 = vsel %vm12943_vm3, %v12637_v3, %v4244_v14  ;;  %vm3467_vm4 = vcmp.eq.f32.partialorder %v3466_v53, 8.507059e+37  ;;  %5108 = vmatpush.bf16.msra.mxu2 %v17640_v39  ;;  %v2004_v39 = vpop.permute.xlu2 %2003 }
 0x49c   : > { %vm4235_vm15 = vcmp.eq.f32.partialorder %v17664_v54, 8.507059e+37  ;;  %v3473_v37 = vmul.f32 %v8834_v29, %v12823_v22  ;;  %8347 = vmatmul.msk.bf16.vlgmr.msra.gmra.mxu0 %vm17158_vm0, %v4813_v21  ;;  %v4252_v38 = vor.u32 1.1754944e-38, %v4251_v42  ;;  %v3470_v28 = vsel %vm3467_vm4, %v3469_v13, %v3465_v17  ;;  %v17672_v17 = vld [vmem:[#allocation32_spill] sm:$0xff] }
 0x49d   : > { %v4238_v7 = vsel %vm4235_vm15, %v4237_v19, %v4233_v18  ;;  %v4646_v26 = vpack.c.bf16 %v4614_v12, %v4614_v12  ;;  %5061 = vmatpush.bf16.msra.mxu0 %v17615_v11  ;;  %v4581_v6 = vmul.f32 %v12596_v43, %v4389_v47  ;;  %vm4250_vm13 = vcmp.eq.f32.partialorder %v4249_v1, 8.507059e+37  ;;  %v17671_v19 = vld [vmem:[#allocation30_spill] sm:$0xff] }
 0x49e   : > { %v4239_v25 = vmul.f32 %v17668_v41, %v4238_v7  ;;  %v3474_v56 = vsub.f32 1.0, %v3473_v37  ;;  %v4253_v3 = vsel %vm4250_vm13, %v4252_v38, %v4248_v60  ;;  %v3483_v0 = vand.u32 2147483648, %v12823_v22  ;;  %v17675_v60 = vld [vmem:[#allocation15_spill] sm:$0xff] }
 0x49f   : > { %v4613_v55 = vsub.f32 %v3621_v44, %v4581_v6  ;;  %v3471_v63 = vmul.f32 %v17669_v61, %v3470_v28  ;;  %vm3478_vm1 = vweird.f32 %v8834_v29  ;;  %v3481_v33 = vand.u32 2147483647, %v12823_v22 }
 0x4a0   : > { %v3475_v27 = vmul.f32 %v8834_v29, %v3474_v56  ;;  %v4976_v31 = vunpack.c.l.b16 %v4646_v26  ;;  %v5022_v11 = vunpack.c.l.b16 %v12896_v62  ;;  %v5023_v49 = vunpack.c.l.b16 %v2008_v4  ;;  %v17677_v26 = vld [vmem:[#allocation3_spill] sm:$0xff] }
 0x4a1   : > { %5062 = vmatpush.bf16.msra.mxu0 %v17618_v9  ;;  %v4645_v32 = vpack.c.bf16 %v4613_v55, %v4613_v55  ;;  %v4254_v36 = vmul.f32 %v17670_v24, %v4253_v3  ;;  %v4571_v42 = vmul.f32 %v12596_v43, %v4239_v25  ;;  %vm3477_vm10 = vweird.f32 %v12823_v22 }
 0x4a2   : > { %v3476_v52 = vadd.f32 %v8834_v29, %v3475_v27  ;;  %vm3479_vm5 = vmor %vm3477_vm10, %vm3478_vm1  ;;  %v3484_v15 = vor.u32 1.1754944e-38, %v3483_v0  ;;  %v5021_v46 = vunpack.c.l.b16 %v2004_v39  ;;  %v12965_v18 = vpack.c.b16 %v5023_v49, %v5022_v11  ;;  %v12976_v1 = vpop.xlane.xlu0 %4064 }
 0x4a3   : > { %v4975_v14 = vunpack.c.l.b16 %v4645_v32  ;;  %v4603_v53 = vsub.f32 %v3471_v63, %v4571_v42  ;;  %vm3482_vm6 = vcmp.eq.f32.partialorder %v3481_v33, 8.507059e+37  ;;  %v5020_v9 = vunpack.c.l.b16 %v2002_v2 }
 0x4a4   : > { %v3480_v62 = vsel %vm3479_vm5, %v8834_v29, %v3476_v52  ;;  %5039 = vmatpush.bf16.msrb.mxu3 %v12965_v18  ;;  %v4572_v58 = vmul.f32 %v12596_v43, %v4254_v36  ;;  %v17673_v29 = vld [vmem:[#allocation60_spill] sm:$0xff]  ;;  %8835 = vrcp.f32 %v12577_v59  ;;  %v4431_v39 = vand.u32 2147483648, %v12577_v59 }
 0x4a5   : > { %v3485_v30 = vsel %vm3482_vm6, %v3484_v15, %v3480_v62  ;;  %v4977_v34 = vpack.c.b16 %v4976_v31, %v4975_v14  ;;  %5063 = vmatpush.bf16.msra.mxu0 %v17626_v35  ;;  %v12971_v10 = vpack.c.b16 %v5021_v46, %v5020_v9  ;;  %v4635_v47 = vpack.c.bf16 %v4603_v53, %v4603_v53 }
 0x4a6   : > { %v3486_v22 = vmul.f32 %v17671_v19, %v3485_v30  ;;  %v3910_v7 = vsub.f32 %v17674_v48, %v17673_v29  ;;  %vm4425_vm9 = vweird.f32 %v12577_v59  ;;  %v4429_v32 = vand.u32 2147483647, %v12577_v59 }
 0x4a7   : > { %8353 = vmatmul.msk.bf16.vlgmr.msrb.gmra.mxu2 %vm17158_vm0, %v4977_v34  ;;  %v4833_v35 = vunpack.c.l.b16 %v4635_v47  ;;  %v4432_v42 = vor.u32 1.1754944e-38, %v4431_v39  ;;  %v4414_v52 = vand.u32 2147483647, %v12598_v40  ;;  %v4416_v46 = vand.u32 2147483648, %v12598_v40 }
 0x4a8   : > { %v4604_v5 = vsub.f32 %v3486_v22, %v4572_v58  ;;  %5040 = vmatpush.bf16.msrb.mxu3 %v12971_v10  ;;  %v3969_v13 = vmul.f32 1.442695, %v3910_v7  ;;  %vm4430_vm12 = vcmp.eq.f32.partialorder %v4429_v32, 8.507059e+37  ;;  %vm4410_vm8 = vweird.f32 %v12598_v40 }
 0x4a9   : > { %5064 = vmatpush.bf16.msra.mxu0 %v17634_v8  ;;  %vm13063_vm3 = vcmp.eq.f32.partialorder %v4414_v52, 8.507059e+37  ;;  %vm3642_vm13 = vweird.f32 %v12821_v57  ;;  %vm4500_vm10 = vweird.f32 %v12976_v1 }
 0x4aa   : > { %v4636_v12 = vpack.c.bf16 %v4604_v5, %v4604_v5  ;;  %v12984_v8 = vpop.xlane.xlu0 %4070  ;;  %8837 = vpow2.f32 %v3969_v13  ;;  %v8836_v50 = vpop.eup %8835  ;;  %v4506_v13 = vand.u32 2147483648, %v12976_v1 }
 0x4ab   : > { %8839 = vrcp.f32 %v12598_v40  ;;  %v4421_v37 = vmul.f32 %v8836_v50, %v12577_v59  ;;  %vm4426_vm7 = vweird.f32 %v8836_v50  ;;  %v4536_v52 = vand.u32 2147483648, %v12984_v8 }
 0x4ac   : > { %v4834_v54 = vunpack.c.l.b16 %v4636_v12  ;;  %8841 = vrcp.f32 %v12821_v57  ;;  %vm13028_vm11 = vmor %vm4425_vm9, %vm4426_vm7  ;;  %v4417_v12 = vor.u32 1.1754944e-38, %v4416_v46 }
 0x4ad   : > { %1999 = vrot.lane.b32.xlu1 %v17672_v17, %s9243_s27  ;;  %v4422_v41 = vsub.f32 1.0, %v4421_v37  ;;  %8843 = vrcp.f32 %v12976_v1  ;;  %v17684_v17 = vld [vmem:[#allocation83_spill] sm:$0xff] }
 0x4ae   : > { %v4835_v21 = vpack.c.b16 %v4834_v54, %v4833_v35 }
 0x4af   : > { %v4423_v3 = vmul.f32 %v8836_v50, %v4422_v41 }
 0x4b0   : > { %8348 = vmatmul.msk.bf16.vlgmr.msra.gmra.mxu1 %vm17158_vm0, %v4835_v21  ;;  %v12990_v44 = vpop.eup %8837 }
 0x4b1   : > { %5083 = vmatpush.bf16.msra.mxu1 %v17616_v16  ;;  %v12999_v28 = vpop.eup %8839  ;;  %v4424_v33 = vadd.f32 %v8836_v50, %v4423_v3 }
 0x4b2   : > { %v12995_v16 = vpop.xlane.xlu0 %3263  ;;  %v4406_v25 = vmul.f32 %v12999_v28, %v12598_v40  ;;  %v13007_v56 = vpop.eup %8841  ;;  %vm4411_vm14 = vweird.f32 %v12999_v28 }
 0x4b3   : > { %v3638_v61 = vmul.f32 %v13007_v56, %v12821_v57  ;;  %v13026_v49 = vpop.eup %8843  ;;  %v4428_v2 = vsel %vm13028_vm11, %v8836_v50, %v4424_v33  ;;  %vm13059_vm15 = vmor %vm4410_vm8, %vm4411_vm14  ;;  %vm3643_vm4 = vweird.f32 %v13007_v56  ;;  %vm3567_vm6 = vweird.f32 %v12995_v16 }
 0x4b4   : > { %v4407_v55 = vsub.f32 1.0, %v4406_v25  ;;  %v4496_v62 = vmul.f32 %v13026_v49, %v12976_v1  ;;  %v4433_v34 = vsel %vm4430_vm12, %v4432_v42, %v4428_v2  ;;  %vm13095_vm1 = vmor %vm3642_vm13, %vm3643_vm4  ;;  %v4534_v42 = vand.u32 2147483647, %v12984_v8 }
 0x4b5   : > { %5084 = vmatpush.bf16.msra.mxu1 %v17620_v45  ;;  %v4060_v45 = vsel %vm17162_vm2, %v12990_v44, 0.0  ;;  %v3639_v11 = vsub.f32 1.0, %v3638_v61  ;;  %v13079_v21 = vmul.f32 %v17684_v17, %v4433_v34  ;;  %vm4501_vm5 = vweird.f32 %v13026_v49 }
 0x4b6   : > { %v4408_v31 = vmul.f32 %v12999_v28, %v4407_v55  ;;  %v4497_v29 = vsub.f32 1.0, %v4496_v62  ;;  %v3571_v34 = vand.u32 2147483647, %v12995_v16  ;;  %v3573_v47 = vand.u32 2147483648, %v12995_v16  ;;  %vm13175_vm4 = vmor %vm4500_vm10, %vm4501_vm5 }
 0x4b7   : > { %v3640_v14 = vmul.f32 %v13007_v56, %v3639_v11  ;;  %v13119_v11 = vor.u32 1.1754944e-38, %v4506_v13 }
 0x4b8   : > { %v4409_v15 = vadd.f32 %v12999_v28, %v4408_v31  ;;  %v4498_v61 = vmul.f32 %v13026_v49, %v4497_v29  ;;  %v4504_v31 = vand.u32 2147483647, %v12976_v1  ;;  %vm13158_vm8 = vcmp.eq.f32.partialorder %v3571_v34, 8.507059e+37 }
 0x4b9   : > { %5085 = vmatpush.bf16.msra.mxu1 %v17628_v23  ;;  %v17676_v23 = vld [vmem:[#allocation39_spill] sm:$0xff]  ;;  %v13073_v35 = vadd.f32 %v13007_v56, %v3640_v14 }
 0x4ba   : > { %v3139_v6 = vsub.f32 %v17677_v26, %v17676_v23  ;;  %v13014_v63 = vpop.xlane.xlu0 %3266  ;;  %v4413_v40 = vsel %vm13059_vm15, %v12999_v28, %v4409_v15  ;;  %v3646_v23 = vand.u32 2147483647, %v12821_v57  ;;  %v3648_v26 = vand.u32 2147483648, %v12821_v57 }
 0x4bb   : > { %v13093_v28 = vsel %vm13063_vm3, %v4417_v12, %v4413_v40  ;;  %v3645_v25 = vsel %vm13095_vm1, %v13007_v56, %v13073_v35  ;;  %vm3582_vm11 = vweird.f32 %v13014_v63  ;;  %vm13153_vm12 = vcmp.eq.f32.partialorder %v4504_v31, 8.507059e+37  ;;  %v17745_v56 = vld [vmem:[#allocation7_spill] sm:$0xff] }
 0x4bc   : > { %v12997_v38 = vpop.xlane.xlu2 %4031  ;;  %v3195_v4 = vmul.f32 1.442695, %v3139_v6  ;;  %vm17157_vm1 = vcmask 130048  }
 0x4bd   : > { %5086 = vmatpush.bf16.msra.mxu1 %v17675_v60  ;;  %8845 = vrcp.f32 %v12997_v38  ;;  %v4341_v29 = vand.u32 2147483648, %v12997_v38  ;;  %vm4335_vm14 = vweird.f32 %v12997_v38  ;;  %v4339_v13 = vand.u32 2147483647, %v12997_v38 }
 0x4be   : > { %8847 = vpow2.f32 %v3195_v4  ;;  %v3661_v4 = vand.u32 2147483647, %v12898_v20 }
 0x4bf   : > { %4061 = vadd.xlane.f32.xlu2 %v4060_v45  ;;  %v13009_v0 = vpop.xlane.xlu1 %4028  ;;  %8849 = vrcp.f32 %v12995_v16  ;;  %vm4340_vm5 = vcmp.eq.f32.partialorder %v4339_v13, 8.507059e+37 }
 0x4c0   : > { %8851 = vrcp.f32 %v13014_v63  ;;  %v4326_v1 = vand.u32 2147483648, %v13009_v0 }
 0x4c2   : > { %v13125_v15 = vpop.xlane.xlu0 %3305 }
 0x4c3   : > { %v13033_v36 = vpop.eup %8845 }
 0x4c4   : > { %v13017_v27 = vpop.xlane.xlu2 %4034  ;;  %v13039_v59 = vpop.eup %8847  ;;  %v4331_v58 = vmul.f32 %v13033_v36, %v12997_v38  ;;  %vm4336_vm7 = vweird.f32 %v13033_v36  ;;  %v3588_v38 = vand.u32 2147483648, %v13014_v63 }
 0x4c5   : > { %8853 = vrcp.f32 %v13017_v27  ;;  %v13045_v53 = vpop.eup %8849  ;;  %v3283_v55 = vsel %vm17158_vm0, %v13039_v59, 0.0  ;;  %vm13167_vm3 = vmor %vm4335_vm14, %vm4336_vm7  ;;  %v4356_v34 = vand.u32 2147483648, %v13017_v27 }
 0x4c6   : > { %8855 = vrcp.f32 %v12898_v20  ;;  %v13051_v30 = vpop.eup %8851  ;;  %v3563_v48 = vmul.f32 %v13045_v53, %v12995_v16  ;;  %v4332_v50 = vsub.f32 1.0, %v4331_v58  ;;  %v13135_v58 = vadd.f32 %v13026_v49, %v4498_v61  ;;  %v17706_v16 = vld [vmem:[#allocation18_spill] sm:$0xff] }
 0x4c7   : > { %8857 = vrcp.f32 %v12984_v8  ;;  %v13049_v9 = vpop.xlane.xlu1 %4067  ;;  %v3578_v7 = vmul.f32 %v13051_v30, %v13014_v63  ;;  %vm3568_vm9 = vweird.f32 %v13045_v53  ;;  %vm3583_vm15 = vweird.f32 %v13051_v30 }
 0x4c8   : > { %8859 = vrcp.f32 %v13009_v0  ;;  %v3564_v33 = vsub.f32 1.0, %v3563_v48  ;;  %v4333_v32 = vmul.f32 %v13033_v36, %v4332_v50  ;;  %vm13189_vm7 = vmor %vm3567_vm6, %vm3568_vm9  ;;  %vm4350_vm6 = vweird.f32 %v13017_v27 }
 0x4c9   : > { %v3579_v39 = vsub.f32 1.0, %v3578_v7  ;;  %8861 = vrcp.f32 %v13125_v15  ;;  %v3586_v7 = vand.u32 2147483647, %v13014_v63  ;;  %vm13203_vm10 = vmor %vm3582_vm11, %vm3583_vm15 }
 0x4ca   : > { %v3565_v22 = vmul.f32 %v13045_v53, %v3564_v33  ;;  %v4334_v12 = vadd.f32 %v13033_v36, %v4333_v32  ;;  %8863 = vrcp.f32 %v13049_v9 }
 0x4cb   : > { %v13057_v19 = vpop.eup %8853  ;;  %v3580_v40 = vmul.f32 %v13051_v30, %v3579_v39  ;;  %vm13213_vm9 = vcmp.eq.f32.partialorder %v3586_v7, 8.507059e+37  ;;  %v4357_v39 = vor.u32 1.1754944e-38, %v4356_v34 }
 0x4cc   : > { %v13067_v5 = vpop.eup %8855  ;;  %v4346_v60 = vmul.f32 %v13057_v19, %v13017_v27  ;;  %v13089_v37 = vpop.xlane.xlu2 %4073  ;;  %v4338_v31 = vsel %vm13167_vm3, %v13033_v36, %v4334_v12  ;;  %vm4351_vm13 = vweird.f32 %v13057_v19  ;;  %v4503_v12 = vsel %vm13175_vm4, %v13026_v49, %v13135_v58 }
 0x4cd   : > { %v13076_v54 = vpop.eup %8857  ;;  %v13103_v6 = vmul.f32 %v13067_v5, %v12898_v20  ;;  %v3581_v61 = vadd.f32 %v13051_v30, %v3580_v40  ;;  %v4354_v40 = vand.u32 2147483647, %v13017_v27  ;;  %vm13219_vm11 = vmor %vm4350_vm6, %vm4351_vm13  ;;  %vm4320_vm3 = vweird.f32 %v13009_v0 }
 0x4ce   : > { %v13105_v41 = vpop.eup %8859  ;;  %v4526_v3 = vmul.f32 %v13076_v54, %v12984_v8  ;;  %v4347_v24 = vsub.f32 1.0, %v4346_v60 }
 0x4cf   : > { %v3654_v2 = vsub.f32 1.0, %v13103_v6  ;;  %v4316_v46 = vmul.f32 %v13105_v41, %v13009_v0  ;;  %v13129_v14 = vpop.xlane.xlu1 %4037  ;;  %v13196_v36 = vpop.eup %8861  ;;  %v3585_v58 = vsel %vm13203_vm10, %v13051_v30, %v3581_v61  ;;  %vm4321_vm14 = vweird.f32 %v13105_v41 }
 0x4d0   : > { %v4527_v62 = vsub.f32 1.0, %v4526_v3  ;;  %v4348_v17 = vmul.f32 %v13057_v19, %v4347_v24  ;;  %v3566_v3 = vadd.f32 %v13045_v53, %v3565_v22  ;;  %8865 = vrcp.f32 %v13129_v14  ;;  %v13225_v27 = vpop.eup %8863  ;;  %vm13265_vm4 = vmor %vm4320_vm3, %vm4321_vm14 }
 0x4d1   : > { %v4317_v48 = vsub.f32 1.0, %v4316_v46  ;;  %v4342_v24 = vor.u32 1.1754944e-38, %v4341_v29  ;;  %v3773_v13 = vmul.f32 %v13196_v36, %v13125_v15  ;;  %vm4355_vm15 = vcmp.eq.f32.partialorder %v4354_v40, 8.507059e+37  ;;  %v17707_v29 = vld [vmem:[#allocation4_spill] sm:$0xff] }
 0x4d2   : > { %v4349_v32 = vadd.f32 %v13057_v19, %v4348_v17  ;;  %v4528_v22 = vmul.f32 %v13076_v54, %v4527_v62  ;;  %v3574_v17 = vor.u32 1.1754944e-38, %v3573_v47  ;;  %v3570_v49 = vsel %vm13189_vm7, %v13045_v53, %v3566_v3  ;;  %v17703_v53 = vld [vmem:[#allocation47_spill] sm:$0xff] }
 0x4d3   : > { %v4318_v46 = vmul.f32 %v13105_v41, %v4317_v48  ;;  %v4343_v63 = vsel %vm4340_vm5, %v4342_v24, %v4338_v31  ;;  %v3589_v47 = vor.u32 1.1754944e-38, %v3588_v38  ;;  %v4511_v38 = vmul.f32 %v13225_v27, %v13049_v9 }
 0x4d4   : > { %v13151_v50 = vpop.xlane.xlu2 %3296  ;;  %v4353_v7 = vsel %vm13219_vm11, %v13057_v19, %v4349_v32  ;;  %v4344_v3 = vmul.f32 %v17703_v53, %v4343_v63  ;;  %v4324_v19 = vand.u32 2147483647, %v13009_v0  ;;  %v13254_v32 = vmul.f32 %v13067_v5, %v3654_v2 }
 0x4d5   : > { %8867 = vrcp.f32 %v13151_v50  ;;  %v4319_v33 = vadd.f32 %v13105_v41, %v4318_v46  ;;  %v4358_v61 = vsel %vm4355_vm15, %v4357_v39, %v4353_v7  ;;  %v4508_v24 = vsel %vm13153_vm12, %v13119_v11, %v4503_v12  ;;  %v17709_v7 = vld [vmem:[#allocation10_spill] sm:$0xff] }
 0x4d6   : > { %v13240_v31 = vpop.eup %8865  ;;  %v3575_v46 = vsel %vm13158_vm8, %v3574_v17, %v3570_v49  ;;  %v3590_v34 = vsel %vm13213_vm9, %v3589_v47, %v3585_v58  ;;  %v3774_v6 = vsub.f32 1.0, %v3773_v13  ;;  %v4578_v60 = vmul.f32 %v12596_v43, %v4344_v3  ;;  %v17708_v58 = vld [vmem:[#allocation8_spill] sm:$0xff] }
 0x4d7   : > { %3284 = vadd.xlane.f32.xlu1 %v3283_v55  ;;  %v13223_v48 = vpop.xlane.xlu1 %3260  ;;  %v4323_v2 = vsel %vm13265_vm4, %v13105_v41, %v4319_v33  ;;  %v4361_v11 = vmul.f32 %v13240_v31, %v13129_v14  ;;  %v4327_v55 = vor.u32 1.1754944e-38, %v4326_v1  ;;  %v4359_v40 = vmul.f32 %v17706_v16, %v4358_v61 }
 0x4d8   : > { %8869 = vrcp.f32 %v13223_v48  ;;  %v13280_v17 = vadd.f32 %v13076_v54, %v4528_v22  ;;  %vm4325_vm12 = vcmp.eq.f32.partialorder %v4324_v19, 8.507059e+37  ;;  %v4512_v62 = vsub.f32 1.0, %v4511_v38 }
 0x4d9   : > { %8871 = vrcp.f32 %v13089_v37  ;;  %v4521_v41 = vand.u32 2147483648, %v13049_v9  ;;  %v13284_v49 = vmul.f32 %v17707_v29, %v4508_v24  ;;  %v3576_v47 = vmul.f32 %v17708_v58, %v3575_v46  ;;  %v17710_v24 = vld [vmem:[#allocation25_spill] sm:$0xff] }
 0x4da   : > { %v3591_v13 = vmul.f32 %v17709_v7, %v3590_v34  ;;  %v4328_v33 = vsel %vm4325_vm12, %v4327_v55, %v4323_v2  ;;  %v13289_v39 = vmul.f32 %v13196_v36, %v3774_v6  ;;  %vm4515_vm8 = vweird.f32 %v13049_v9 }
 0x4db   : > { %v13245_v30 = vpop.eup %8867  ;;  %v4362_v22 = vsub.f32 1.0, %v4361_v11  ;;  %v13293_v3 = vsub.f32 %v3576_v47, %v4578_v60  ;;  %v4579_v1 = vmul.f32 %v12596_v43, %v4359_v40  ;;  %v4519_v19 = vand.u32 2147483647, %v13049_v9  ;;  %v13319_v47 = vpop.xlane.xlu0 %4052 }
 0x4dc   : > { %v3728_v12 = vmul.f32 %v13245_v30, %v13151_v50  ;;  %v4329_v46 = vmul.f32 %v17710_v24, %v4328_v33  ;;  %v4513_v34 = vmul.f32 %v13225_v27, %v4512_v62  ;;  %v4522_v0 = vor.u32 1.1754944e-38, %v4521_v41 }
 0x4dd   : > { %vm4516_vm13 = vweird.f32 %v13225_v27  ;;  %v4549_v2 = vand.u32 2147483647, %v13089_v37  ;;  %v4551_v11 = vand.u32 2147483648, %v13089_v37  ;;  %v3558_v60 = vand.u32 2147483648, %v13223_v48 }
 0x4de   : > { %v8870_v63 = vpop.eup %8869  ;;  %v3729_v61 = vsub.f32 1.0, %v3728_v12  ;;  %v4363_v55 = vmul.f32 %v13240_v31, %v4362_v22  ;;  %v3556_v40 = vand.u32 2147483647, %v13223_v48  ;;  %v13307_v12 = vsub.f32 %v3591_v13, %v4579_v1  ;;  %vm13334_vm15 = vmor %vm4515_vm8, %vm4516_vm13 }
 0x4df   : > { %v3548_v53 = vmul.f32 %v8870_v63, %v13223_v48  ;;  %v13297_v38 = vpop.eup %8871  ;;  %vm3553_vm7 = vweird.f32 %v8870_v63  ;;  %vm13309_vm10 = vcmp.eq.f32.partialorder %v4519_v19, 8.507059e+37  ;;  %vm4365_vm5 = vweird.f32 %v13129_v14 }
 0x4e0   : > { %v4541_v41 = vmul.f32 %v13297_v38, %v13089_v37  ;;  %v3730_v29 = vmul.f32 %v13245_v30, %v3729_v61  ;;  %v4514_v7 = vadd.f32 %v13225_v27, %v4513_v34  ;;  %v4369_v13 = vand.u32 2147483647, %v13129_v14  ;;  %v9121_v61 = vld [vmem:[%s9400_s23 + $0xb8] sm:$0xff] }
 0x4e1   : > { %v3549_v6 = vsub.f32 1.0, %v3548_v53  ;;  %vm3552_vm6 = vweird.f32 %v13223_v48  ;;  %vm4366_vm9 = vweird.f32 %v13240_v31  ;;  %v4371_v22 = vand.u32 2147483648, %v13129_v14 }
 0x4e2   : > { %vm3554_vm11 = vmor %vm3552_vm6, %vm3553_vm7  ;;  %v3559_v53 = vor.u32 1.1754944e-38, %v3558_v60  ;;  %v4364_v1 = vadd.f32 %v13240_v31, %v4363_v55  ;;  %vm3557_vm14 = vcmp.eq.f32.partialorder %v3556_v40, 8.507059e+37  ;;  %v6398_v24 = vmul.f32 %v9121_v61, %v9121_v61  ;;  %v17715_v40 = vld [vmem:[#allocation22_spill] sm:$0xff] }
 0x4e3   : > { %v3550_v16 = vmul.f32 %v8870_v63, %v3549_v6  ;;  %v4542_v34 = vsub.f32 1.0, %v4541_v41  ;;  %v3731_v6 = vadd.f32 %v13245_v30, %v3730_v29  ;;  %vm3733_vm3 = vweird.f32 %v13245_v30  ;;  %vm13352_vm4 = vmor %vm4365_vm5, %vm4366_vm9 }
 0x4e4   : > { %v3738_v55 = vand.u32 2147483648, %v13151_v50  ;;  %v4577_v9 = vmul.f32 %v12596_v43, %v4329_v46  ;;  %vm3732_vm12 = vweird.f32 %v13151_v50  ;;  %v3736_v29 = vand.u32 2147483647, %v13151_v50 }
 0x4e5   : > { %v3551_v33 = vadd.f32 %v8870_v63, %v3550_v16  ;;  %v4643_v46 = vpack.c.bf16 %v13307_v12, %v13307_v12  ;;  %v4368_v14 = vsel %vm13352_vm4, %v13240_v31, %v4364_v1  ;;  %vm13366_vm8 = vmor %vm3732_vm12, %vm3733_vm3  ;;  %v4543_v61 = vmul.f32 %v13297_v38, %v4542_v34 }
 0x4e6   : > { %vm4370_vm13 = vcmp.eq.f32.partialorder %v4369_v13, 8.507059e+37  ;;  %v3735_v48 = vsel %vm13366_vm8, %v13245_v30, %v3731_v6  ;;  %v3739_v1 = vor.u32 1.1754944e-38, %v3738_v55  ;;  %vm4545_vm7 = vweird.f32 %v13089_v37 }
 0x4e7   : > { %v3555_v19 = vsel %vm3554_vm11, %v8870_v63, %v3551_v33  ;;  %v4518_v63 = vsel %vm13334_vm15, %v13225_v27, %v4514_v7  ;;  %v4642_v27 = vpack.c.bf16 %v13293_v3, %v13293_v3  ;;  %v4372_v3 = vor.u32 1.1754944e-38, %v4371_v22  ;;  %v13380_v22 = vpop.xlane.xlu0 %4055  ;;  %v17721_v7 = vld [vmem:[#allocation12_spill] sm:$0xff] }
 0x4e8   : > { %v3560_v60 = vsel %vm3557_vm14, %v3559_v53, %v3555_v19  ;;  %v6476_v19 = vsel %vm17158_vm0, %v6398_v24, 0.0  ;;  %v4523_v31 = vsel %vm13309_vm10, %v4522_v0, %v4518_v63  ;;  %vm3737_vm5 = vcmp.eq.f32.partialorder %v3736_v29, 8.507059e+37  ;;  %v17720_v0 = vld [vmem:[#allocation31_spill] sm:$0xff] }
 0x4e9   : > { %v3561_v33 = vmul.f32 %v17715_v40, %v3560_v60  ;;  %6477 = vadd.xlane.f32.xlu1 %v6476_v19  ;;  %v4373_v24 = vsel %vm4370_vm13, %v4372_v3, %v4368_v14  ;;  %v3740_v34 = vsel %vm3737_vm5, %v3739_v1, %v3735_v48  ;;  %v13386_v63 = vmul.f32 %v17720_v0, %v4523_v31  ;;  %v17722_v19 = vld [vmem:[#allocation9_spill] sm:$0xff] }
 0x4ea   : > { %v13389_v55 = vadd.f32 %v13297_v38, %v4543_v61  ;;  %vm4546_vm10 = vweird.f32 %v13297_v38  ;;  %v4589_v41 = vmul.f32 %v12596_v43, %v13284_v49  ;;  %vm4531_vm9 = vweird.f32 %v13076_v54  ;;  %v9122_v1 = vld [vmem:[%s9400_s23 + $0xf0] sm:$0xff] }
 0x4eb   : > { %v4609_v53 = vsub.f32 %v3561_v33, %v4577_v9  ;;  %v4900_v9 = vunpack.c.l.b16 %v4642_v27  ;;  %v3741_v3 = vmul.f32 %v17722_v19, %v3740_v34  ;;  %vm4530_vm15 = vweird.f32 %v12984_v8  ;;  %vm13426_vm5 = vmor %vm4545_vm7, %vm4546_vm10 }
 0x4ec   : > { %vm3778_vm3 = vweird.f32 %v13196_v36  ;;  %vm3658_vm8 = vweird.f32 %v13067_v5  ;;  %vm13450_vm10 = vcmp.eq.f32.partialorder %v4534_v42, 8.507059e+37  ;;  %v4552_v42 = vor.u32 1.1754944e-38, %v4551_v11 }
 0x4ed   : > { %v4641_v60 = vpack.c.bf16 %v4609_v53, %v4609_v53  ;;  %v4374_v53 = vmul.f32 %v17721_v7, %v4373_v24  ;;  %v9123_v24 = vld [vmem:[%s9400_s23 + $0xf8] sm:$0xff]  ;;  %v3656_v12 = vadd.f32 %v13067_v5, %v13254_v32 }
 0x4ef   : > { %v4899_v33 = vunpack.c.l.b16 %v4641_v60  ;;  %v6405_v60 = vmul.f32 %v9122_v1, %v9122_v1  ;;  %v4580_v0 = vmul.f32 %v12596_v43, %v4374_v53  ;;  %v17738_v1 = vld [vmem:[#allocation6_spill] sm:$0xff] }
 0x4f1   : > { %v13317_v58 = vpop.xlane.xlu2 %3269  ;;  %v4901_v29 = vpack.c.b16 %v4900_v9, %v4899_v33  ;;  %v6406_v9 = vmul.f32 %v9123_v24, %v9123_v24  ;;  %v9126_v24 = vld [vmem:[%s9400_s23 + $0xa8] sm:$0xff] }
 0x4f2   : > { %8873 = vrcp.f32 %v13317_v58  ;;  %v3601_v13 = vand.u32 2147483647, %v13317_v58  ;;  %v3603_v6 = vand.u32 2147483648, %v13317_v58  ;;  %vm3597_vm11 = vweird.f32 %v13317_v58 }
 0x4f3   : > { %v13340_v16 = vpop.xlane.xlu1 %3299  ;;  %8351 = vmatmul.msk.bf16.vlgmr.msrb.gmra.mxu0 %vm17158_vm0, %v4901_v29 }
 0x4f4   : > { %8875 = vrcp.f32 %v13340_v16  ;;  %vm13400_vm14 = vcmp.eq.f32.partialorder %v3601_v13, 8.507059e+37  ;;  %v3604_v48 = vor.u32 1.1754944e-38, %v3603_v6  ;;  %v9124_v13 = vld [vmem:[%s9400_s23 + $0xb0] sm:$0xff]  ;;  %v6497_v6 = vsel %vm17158_vm0, %v6405_v60, 0.0 }
 0x4f5   : > { %v6397_v34 = vmul.f32 %v9124_v13, %v9124_v13  ;;  %vm3747_vm13 = vweird.f32 %v13340_v16  ;;  %6498 = vadd.xlane.f32.xlu1 %v6497_v6 }
 0x4f7   : > { %v6473_v19 = vsel %vm17158_vm0, %v6397_v34, 0.0 }
 0x4f8   : > { %v8874_v50 = vpop.eup %8873  ;;  %6474 = vadd.xlane.f32.xlu2 %v6473_v19  ;;  %v3781_v19 = vand.u32 2147483647, %v13125_v15 }
 0x4f9   : > { %v3593_v40 = vmul.f32 %v8874_v50, %v13317_v58  ;;  %vm3598_vm6 = vweird.f32 %v8874_v50  ;;  %v3753_v58 = vand.u32 2147483648, %v13340_v16 }
 0x4fa   : > { %v13383_v62 = vpop.eup %8875  ;;  %vm3599_vm4 = vmor %vm3597_vm11, %vm3598_vm6  ;;  %vm3657_vm6 = vweird.f32 %v12898_v20 }
 0x4fb   : > { %v3594_v30 = vsub.f32 1.0, %v3593_v40  ;;  %v3743_v14 = vmul.f32 %v13383_v62, %v13340_v16  ;;  %v3751_v40 = vand.u32 2147483647, %v13340_v16  ;;  %vm3748_vm12 = vweird.f32 %v13383_v62  ;;  %v9125_v16 = vld [vmem:[%s9400_s23 + $0x38] sm:$0xff] }
 0x4fc   : > { %v6382_v61 = vmul.f32 %v9125_v16, %v9125_v16  ;;  %vm13443_vm7 = vmor %vm3747_vm13, %vm3748_vm12  ;;  %v3754_v60 = vor.u32 1.1754944e-38, %v3753_v58  ;;  %v9127_v58 = vld [vmem:[%s9400_s23 + $0xe8] sm:$0xff]  ;;  %vm3777_vm12 = vweird.f32 %v13125_v15  ;;  %vm3647_vm13 = vcmp.eq.f32.partialorder %v3646_v23, 8.507059e+37 }
 0x4fd   : > { %v3595_v27 = vmul.f32 %v8874_v50, %v3594_v30  ;;  %v3744_v31 = vsub.f32 1.0, %v3743_v14  ;;  %v17727_v14 = vld [vmem:[#allocation20_spill] sm:$0xff]  ;;  %vm3752_vm11 = vcmp.eq.f32.partialorder %v3751_v40, 8.507059e+37  ;;  %v6404_v34 = vmul.f32 %v9127_v58, %v9127_v58 }
 0x4fe   : > { %v6428_v40 = vsel %vm17158_vm0, %v6382_v61, 0.0  ;;  %v9128_v61 = vld [vmem:[%s9400_s23 + $0xe0] sm:$0xff] }
 0x4ff   : > { %v3596_v49 = vadd.f32 %v8874_v50, %v3595_v27  ;;  %v3745_v30 = vmul.f32 %v13383_v62, %v3744_v31  ;;  %v6500_v27 = vsel %vm17158_vm0, %v6406_v9, 0.0  ;;  %v13439_v31 = vpop.f32.mrf.mxu0  ;;  %v6396_v9 = vmul.f32 %v9126_v24, %v9126_v24  ;;  %6429 = vadd.xlane.f32.xlu1 %v6428_v40  ;;  %v9129_v24 = vld [vmem:[%s9400_s23 + $0x78] sm:$0xff] }
 0x500   : > { %6501 = vadd.xlane.f32.xlu0 %v6500_v27  ;;  %17728 = vst [vmem:[#allocation17_spill] sm:$0xff] %v13439_v31 }
 0x501   : > { %v3600_v33 = vsel %vm3599_vm4, %v8874_v50, %v3596_v49  ;;  %v3746_v53 = vadd.f32 %v13383_v62, %v3745_v30  ;;  %v4548_v49 = vsel %vm13426_vm5, %v13297_v38, %v13389_v55  ;;  %v13454_v38 = vpop.xlane.xlu0 %4058  ;;  %v4590_v30 = vmul.f32 %v12596_v43, %v13386_v63  ;;  %vm13481_vm4 = vmor %vm4530_vm15, %vm4531_vm9 }
 0x502   : > { %v3605_v29 = vsel %vm13400_vm14, %v3604_v48, %v3600_v33  ;;  %v4621_v48 = vsub.f32 %v3741_v3, %v4589_v41  ;;  %vm4550_vm14 = vcmp.eq.f32.partialorder %v4549_v2, 8.507059e+37  ;;  %v4937_v2 = vunpack.c.l.b16 %v4643_v46  ;;  %vm13496_vm9 = vmor %vm3777_vm12, %vm3778_vm3 }
 0x503   : > { %v3606_v7 = vmul.f32 %v17727_v14, %v3605_v29  ;;  %v3750_v41 = vsel %vm13443_vm7, %v13383_v62, %v3746_v53  ;;  %v3776_v29 = vadd.f32 %v13196_v36, %v13289_v39  ;;  %v4553_v37 = vsel %vm4550_vm14, %v4552_v42, %v4548_v49  ;;  %vm13513_vm15 = vmor %vm3657_vm6, %vm3658_vm8 }
 0x504   : > { %v3755_v33 = vsel %vm3752_vm11, %v3754_v60, %v3750_v41  ;;  %v6470_v11 = vsel %vm17158_vm0, %v6396_v9, 0.0  ;;  %v4653_v27 = vpack.c.bf16 %v4621_v48, %v4621_v48  ;;  %v6494_v39 = vsel %vm17158_vm0, %v6404_v34, 0.0 }
 0x505   : > { %v4612_v55 = vsub.f32 %v3606_v7, %v4580_v0  ;;  %v17733_v0 = vld [vmem:[#allocation55_spill] sm:$0xff]  ;;  %v4533_v46 = vsel %vm13481_vm4, %v13076_v54, %v13280_v17  ;;  %v3783_v7 = vand.u32 2147483648, %v13125_v15  ;;  %v6403_v54 = vmul.f32 %v9128_v61, %v9128_v61  ;;  %6495 = vadd.xlane.f32.xlu2 %v6494_v39 }
 0x506   : > { %v3756_v62 = vmul.f32 %v17733_v0, %v3755_v33  ;;  %v4537_v49 = vor.u32 1.1754944e-38, %v4536_v52  ;;  %v3780_v48 = vsel %vm13496_vm9, %v13196_v36, %v3776_v29  ;;  %v4554_v60 = vmul.f32 %v17738_v1, %v4553_v37  ;;  %v9130_v36 = vld [vmem:[%s9400_s23 + $0xa0] sm:$0xff]  ;;  %v17746_v1 = vld [vmem:[#allocation61_spill] sm:$0xff] }
 0x507   : > { %v13459_v3 = vpop.xlane.xlu1 %3302  ;;  %v4644_v6 = vpack.c.bf16 %v4612_v55, %v4612_v55  ;;  %v6390_v9 = vmul.f32 %v9129_v24, %v9129_v24  ;;  %v5095_v55 = vunpack.c.l.b16 %v4653_v27  ;;  %v6395_v41 = vmul.f32 %v9130_v36, %v9130_v36  ;;  %v13566_v24 = vpop.f32.mrf.mxu1 }
 0x508   : > { %8877 = vrcp.f32 %v13459_v3  ;;  %v4622_v14 = vsub.f32 %v3756_v62, %v4590_v30  ;;  %6471 = vadd.xlane.f32.xlu0 %v6470_v11  ;;  %v3660_v58 = vsel %vm13513_vm15, %v13067_v5, %v3656_v12  ;;  %v3663_v34 = vand.u32 2147483648, %v12898_v20  ;;  %v13526_v30 = vpop.f32.mrf.mxu0  ;;  %v17743_v12 = vld [vmem:[#allocation35_spill] sm:$0xff]  ;;  %17747 = vst [vmem:[#allocation33_spill] sm:$0xff] %v13566_v24 }
 0x509   : > { %v4938_v50 = vunpack.c.l.b16 %v4644_v6  ;;  %v4538_v42 = vsel %vm13450_vm10, %v4537_v49, %v4533_v46  ;;  %v3784_v33 = vor.u32 1.1754944e-38, %v3783_v7  ;;  %17741 = vst [vmem:[#allocation57_spill] sm:$0xff] %v13526_v30  ;;  %vm3782_vm3 = vcmp.eq.f32.partialorder %v3781_v19, 8.507059e+37  ;;  %v13528_v6 = vpop.xlane.xlu0 %3287 }
 0x50a   : > { %v4654_v16 = vpack.c.bf16 %v4622_v14, %v4622_v14  ;;  %v6491_v40 = vsel %vm17158_vm0, %v6403_v54, 0.0  ;;  %v3768_v5 = vand.u32 2147483648, %v13459_v3  ;;  %v6452_v37 = vsel %vm17158_vm0, %v6390_v9, 0.0  ;;  %v17742_v14 = vld [vmem:[#allocation11_spill] sm:$0xff] }
 0x50b   : > { %v4939_v32 = vpack.c.b16 %v4938_v50, %v4937_v2  ;;  %v3785_v29 = vsel %vm3782_vm3, %v3784_v33, %v3780_v48  ;;  %v4592_v2 = vmul.f32 %v12596_v43, %v4554_v60  ;;  %v3766_v13 = vand.u32 2147483647, %v13459_v3  ;;  %6492 = vadd.xlane.f32.xlu1 %v6491_v40 }
 0x50c   : > { %v5096_v8 = vunpack.c.l.b16 %v4654_v16  ;;  %v6467_v63 = vsel %vm17158_vm0, %v6395_v41, 0.0  ;;  %v3649_v27 = vor.u32 1.1754944e-38, %v3648_v26  ;;  %vm3662_vm5 = vcmp.eq.f32.partialorder %v3661_v4, 8.507059e+37  ;;  %v9131_v26 = vld [vmem:[%s9400_s23 + $0x30] sm:$0xff]  ;;  %v1998_v41 = vpop.permute.xlu2 %1997 }
 0x50d   : > { %8352 = vmatmul.msk.bf16.vlgmr.msrb.gmra.mxu1 %vm17158_vm0, %v4939_v32  ;;  %v3664_v50 = vor.u32 1.1754944e-38, %v3663_v34  ;;  %v4539_v39 = vmul.f32 %v17742_v14, %v4538_v42  ;;  %v3786_v46 = vmul.f32 %v17743_v12, %v3785_v29  ;;  %vm3762_vm6 = vweird.f32 %v13459_v3  ;;  %6468 = vadd.xlane.f32.xlu2 %v6467_v63  ;;  %v9132_v32 = vld [vmem:[%s9400_s23 + $0x70] sm:$0xff] }
 0x50e   : > { %v8878_v17 = vpop.eup %8877  ;;  %v5097_v0 = vpack.c.b16 %v5096_v8, %v5095_v55  ;;  %v3650_v57 = vsel %vm3647_vm13, %v3649_v27, %v3645_v25  ;;  %v3769_v20 = vor.u32 1.1754944e-38, %v3768_v5  ;;  %v6381_v4 = vmul.f32 %v9131_v26, %v9131_v26  ;;  %v17750_v63 = vld [vmem:[#allocation49_spill] sm:$0xff] }
 0x50f   : > { %v3758_v52 = vmul.f32 %v8878_v17, %v13459_v3  ;;  %vm3763_vm8 = vweird.f32 %v8878_v17  ;;  %v3665_v23 = vsel %vm3662_vm5, %v3664_v50, %v3660_v58  ;;  %v4624_v53 = vsub.f32 %v3786_v46, %v4592_v2  ;;  %v17744_v3 = vld [vmem:[#allocation84_spill] sm:$0xff]  ;;  %v17749_v2 = vld [vmem:[#allocation43_spill] sm:$0xff]  ;;  %v13591_v46 = vpop.f32.mrf.mxu1 }
 0x510   : > { %8357 = vmatmul.msk.bf16.vlgmr.msra.gmra.mxu2 %vm17158_vm0, %v5097_v0  ;;  %6453 = vadd.xlane.f32.xlu0 %v6452_v37  ;;  %vm3764_vm7 = vmor %vm3762_vm6, %vm3763_vm8  ;;  %vm3767_vm10 = vcmp.eq.f32.partialorder %v3766_v13, 8.507059e+37  ;;  %v6389_v16 = vmul.f32 %v9132_v32, %v9132_v32  ;;  %v4419_v61 = vmul.f32 %v17744_v3, %v13093_v28  ;;  %v3666_v35 = vmul.f32 %v17745_v56, %v3665_v23 }
 0x511   : > { %v3759_v62 = vsub.f32 1.0, %v3758_v52  ;;  %v4591_v25 = vmul.f32 %v12596_v43, %v4539_v39  ;;  %v3651_v60 = vmul.f32 %v17746_v1, %v3650_v57  ;;  %v6425_v28 = vsel %vm17158_vm0, %v6381_v4, 0.0  ;;  %v13569_v15 = vpop.xlane.xlu0 %3290  ;;  %v13573_v52 = vpop.f32.mrf.mxu3  ;;  %17751 = vst [vmem:[#allocation28_spill] sm:$0xff] %v13591_v46 }
 0x512   : > { %v4656_v9 = vpack.c.bf16 %v4624_v53, %v4624_v53  ;;  %17748 = vst [vmem:[#allocation59_spill] sm:$0xff] %v13573_v52  ;;  %8879 = vrcp.f32 %v13454_v38  ;;  %v5017_v5 = vunpack.c.l.b16 %v17749_v2  ;;  %v5016_v27 = vunpack.c.l.b16 %v17750_v63 }
 0x513   : > { %v3760_v11 = vmul.f32 %v8878_v17, %v3759_v62  ;;  %v5018_v62 = vunpack.c.l.b16 %v1998_v41  ;;  %8881 = vrcp.f32 %v13569_v15  ;;  %vm5173_vm11 = vcmask 123904  }
 0x514   : > { %v13577_v42 = vunpack.c.l.b16 %v4656_v9  ;;  %v5024_v23 = vpack.c.b16 %v5017_v5, %v5016_v27  ;;  %vm4470_vm4 = vweird.f32 %v13454_v38  ;;  %vm3702_vm3 = vweird.f32 %v13569_v15 }
 0x515   : > { %v3761_v7 = vadd.f32 %v8878_v17, %v3760_v11 }
 0x517   : > { %v3765_v19 = vsel %vm3764_vm7, %v8878_v17, %v3761_v7  ;;  %v4584_v17 = vmul.f32 %v12596_v43, %v13079_v21  ;;  %v4583_v21 = vmul.f32 %v12596_v43, %v4419_v61 }
 0x518   : > { %v3770_v45 = vsel %vm3767_vm10, %v3769_v20, %v3765_v19  ;;  %6426 = vadd.xlane.f32.xlu0 %v6425_v28  ;;  %v8880_v14 = vpop.eup %8879  ;;  %v4474_v28 = vand.u32 2147483647, %v13454_v38 }
 0x519   : > { %v13556_v54 = vpop.f32.mrf.mxu0  ;;  %v3771_v49 = vmul.f32 %v17655_v51, %v3770_v45  ;;  %v6449_v51 = vsel %vm17158_vm0, %v6389_v16, 0.0  ;;  %v4616_v36 = vsub.f32 %v3666_v35, %v4584_v17  ;;  %v4615_v34 = vsub.f32 %v3651_v60, %v4583_v21  ;;  %v13593_v57 = vpop.xlane.xlu0 %3293 }
 0x51a   : > { %v5145_v48 = vmul.f32 %v13556_v54, %v13556_v54  ;;  %6450 = vadd.xlane.f32.xlu2 %v6449_v51  ;;  %v4466_v20 = vmul.f32 %v8880_v14, %v13454_v38  ;;  %v13596_v26 = vpop.f32.mrf.mxu3  ;;  %v13598_v53 = vpop.eup %8881  ;;  %8883 = vrcp.f32 %v13593_v57  ;;  %vm4471_vm14 = vweird.f32 %v8880_v14 }
 0x51b   : > { %v4623_v55 = vsub.f32 %v3771_v49, %v4591_v25  ;;  %v4648_v37 = vpack.c.bf16 %v4616_v36, %v4616_v36  ;;  %v4647_v39 = vpack.c.bf16 %v4615_v34, %v4615_v34  ;;  %17752 = vst [vmem:[#allocation36_spill] sm:$0xff] %v13596_v26  ;;  %v3698_v16 = vmul.f32 %v13598_v53, %v13569_v15  ;;  %vm13629_vm12 = vmor %vm4470_vm4, %vm4471_vm14 }
 0x51c   : > { %v5195_v8 = vsel %vm17157_vm1, %v5145_v48, 0.0  ;;  %v4467_v32 = vsub.f32 1.0, %v4466_v20  ;;  %v4476_v17 = vand.u32 2147483648, %v13454_v38  ;;  %8885 = vrcp.f32 %v13380_v22 }
 0x51d   : > { %5196 = vadd.xlane.f32.xlu1 %v5195_v8  ;;  %v4655_v58 = vpack.c.bf16 %v4623_v55, %v4623_v55  ;;  %v5014_v7 = vunpack.c.l.b16 %v4648_v37  ;;  %v5013_v4 = vunpack.c.l.b16 %v4647_v39  ;;  %v3699_v35 = vsub.f32 1.0, %v3698_v16 }
 0x51e   : > { %v4468_v56 = vmul.f32 %v8880_v14, %v4467_v32  ;;  %v4477_v36 = vor.u32 1.1754944e-38, %v4476_v17  ;;  %vm3703_vm9 = vweird.f32 %v13598_v53  ;;  %vm4475_vm15 = vcmp.eq.f32.partialorder %v4474_v28, 8.507059e+37  ;;  %v17758_v32 = vld [vmem:[#allocation23_spill] sm:$0xff] }
 0x51f   : > { %v13579_v33 = vunpack.c.l.b16 %v4655_v58  ;;  %v2000_v0 = vpop.permute.xlu1 %1999  ;;  %v5015_v19 = vpack.c.b16 %v5014_v7, %v5013_v4  ;;  %v3708_v34 = vand.u32 2147483648, %v13569_v15  ;;  %vm3704_vm8 = vmor %vm3702_vm3, %vm3703_vm9  ;;  %vm3717_vm6 = vweird.f32 %v13593_v57 }
 0x520   : > { %v5019_v40 = vunpack.c.l.b16 %v2000_v0  ;;  %v13610_v45 = vpop.eup %8883  ;;  %v4469_v48 = vadd.f32 %v8880_v14, %v4468_v56  ;;  %vm4455_vm3 = vweird.f32 %v13380_v22 }
 0x521   : > { %v13581_v29 = vpop.f32.mrf.mxu0  ;;  %v5119_v11 = vpack.c.b16 %v13577_v42, %v13579_v33  ;;  %v3713_v49 = vmul.f32 %v13610_v45, %v13593_v57  ;;  %vm3718_vm5 = vweird.f32 %v13610_v45  ;;  %v3723_v33 = vand.u32 2147483648, %v13593_v57 }
 0x522   : > { %v5146_v13 = vmul.f32 %v13581_v29, %v13581_v29  ;;  %v5025_v50 = vpack.c.b16 %v5019_v40, %v5018_v62  ;;  %v13613_v25 = vpop.f32.mrf.mxu3  ;;  %v4473_v21 = vsel %vm13629_vm12, %v8880_v14, %v4469_v48  ;;  %v13644_v0 = vpop.eup %8885  ;;  %v3706_v40 = vand.u32 2147483647, %v13569_v15  ;;  %vm13671_vm10 = vmor %vm3717_vm6, %vm3718_vm5 }
 0x523   : > { %v5151_v1 = vmul.f32 %v13613_v25, %v13613_v25  ;;  %v3714_v8 = vsub.f32 1.0, %v3713_v49  ;;  %v4478_v62 = vsel %vm4475_vm15, %v4477_v36, %v4473_v21  ;;  %v4451_v27 = vmul.f32 %v13644_v0, %v13380_v22 }
 0x524   : > { %v5198_v12 = vsel %vm5173_vm11, %v5146_v13, 0.0  ;;  %5041 = vmatpush.bf16.msrb.mxu3 %v5025_v50  ;;  %v3709_v14 = vor.u32 1.1754944e-38, %v3708_v34  ;;  %vm3707_vm13 = vcmp.eq.f32.partialorder %v3706_v40, 8.507059e+37  ;;  %vm4456_vm15 = vweird.f32 %v13644_v0 }
 0x525   : > { %5199 = vadd.xlane.f32.xlu0 %v5198_v12  ;;  %v5213_v41 = vsel %vm17157_vm1, %v5151_v1, 0.0  ;;  %v3715_v2 = vmul.f32 %v13610_v45, %v3714_v8  ;;  %vm13697_vm5 = vmor %vm4455_vm3, %vm4456_vm15  ;;  %vm3687_vm6 = vweird.f32 %v13528_v6 }
 0x527   : > { %v3716_v39 = vadd.f32 %v13610_v45, %v3715_v2 }
 0x528   : > { %5042 = vmatpush.bf16.msrb.mxu3 %v5024_v23 }
 0x52b   : > { %8354 = vmatmul.msk.bf16.vlgmr.msrb.gmra.mxu3 %vm17158_vm0, %v5015_v19 }
 0x52c   : > { %5127 = vmatpush.bf16.msra.mxu3 %v12965_v18 }
 0x52d   : > { %v13605_v3 = vpop.f32.mrf.mxu1 }
 0x52e   : > { %v5147_v61 = vmul.f32 %v13605_v3, %v13605_v3 }
 0x530   : > { %5128 = vmatpush.bf16.msra.mxu3 %v12971_v10  ;;  %v5201_v18 = vsel %vm17157_vm1, %v5147_v61, 0.0  ;;  %v3700_v10 = vmul.f32 %v13598_v53, %v3699_v35  ;;  %v3720_v61 = vsel %vm13671_vm10, %v13610_v45, %v3716_v39  ;;  %v4452_v35 = vsub.f32 1.0, %v4451_v27 }
 0x531   : > { %5202 = vadd.xlane.f32.xlu2 %v5201_v18  ;;  %v3724_v18 = vor.u32 1.1754944e-38, %v3723_v33  ;;  %v3693_v27 = vand.u32 2147483648, %v13528_v6  ;;  %v3691_v39 = vand.u32 2147483647, %v13528_v6  ;;  %vm4440_vm10 = vweird.f32 %v13319_v47 }
 0x532   : > { %v13622_v60 = vpop.xlane.xlu2 %4061  ;;  %v3701_v38 = vadd.f32 %v13598_v53, %v3700_v10 }
 0x533   : > { %8887 = vrcp.f32 %v13622_v60  ;;  %v4489_v4 = vand.u32 2147483647, %v13622_v60  ;;  %vm4485_vm14 = vweird.f32 %v13622_v60 }
 0x534   : > { %5129 = vmatpush.bf16.msra.mxu3 %v5025_v50  ;;  %8889 = vrcp.f32 %v13528_v6  ;;  %v3705_v37 = vsel %vm3704_vm8, %v13598_v53, %v3701_v38  ;;  %v17755_v50 = vld [vmem:[#allocation34_spill] sm:$0xff] }
 0x535   : > { %v13626_v9 = vpop.f32.mrf.mxu1  ;;  %8891 = vrcp.f32 %v13319_v47  ;;  %v4479_v15 = vmul.f32 %v17755_v50, %v4478_v62  ;;  %v3710_v42 = vsel %vm3707_vm13, %v3709_v14, %v3705_v37  ;;  %vm4490_vm9 = vcmp.eq.f32.partialorder %v4489_v4, 8.507059e+37 }
 0x536   : > { %v5148_v51 = vmul.f32 %v13626_v9, %v13626_v9  ;;  %v3711_v16 = vmul.f32 %v17758_v32, %v3710_v42  ;;  %v3694_v4 = vor.u32 1.1754944e-38, %v3693_v27 }
 0x537   : > { %v4587_v48 = vmul.f32 %v12596_v43, %v4479_v15 }
 0x538   : > { %5130 = vmatpush.bf16.msra.mxu3 %v5024_v23  ;;  %v5204_v58 = vsel %vm5173_vm11, %v5148_v51, 0.0  ;;  %v3721_v23 = vand.u32 2147483647, %v13593_v57  ;;  %v17759_v51 = vld [vmem:[#allocation21_spill] sm:$0xff] }
 0x539   : > { %5214 = vadd.xlane.f32.xlu2 %v5213_v41  ;;  %5205 = vadd.xlane.f32.xlu1 %v5204_v58  ;;  %v8888_v5 = vpop.eup %8887  ;;  %v4619_v55 = vsub.f32 %v3711_v16, %v4587_v48 }
 0x53a   : > { %v4481_v13 = vmul.f32 %v8888_v5, %v13622_v60  ;;  %v13655_v63 = vpop.eup %8889  ;;  %vm4486_vm7 = vweird.f32 %v8888_v5  ;;  %vm3722_vm12 = vcmp.eq.f32.partialorder %v3721_v23, 8.507059e+37  ;;  %v4444_v23 = vand.u32 2147483647, %v13319_v47 }
 0x53b   : > { %8358 = vmatmul.msk.bf16.vlgmr.msra.gmra.mxu3 %vm17158_vm0, %v5119_v11  ;;  %v13662_v7 = vpop.eup %8891  ;;  %v4491_v11 = vand.u32 2147483648, %v13622_v60  ;;  %v3683_v53 = vmul.f32 %v13655_v63, %v13528_v6  ;;  %vm4487_vm4 = vmor %vm4485_vm14, %vm4486_vm7  ;;  %v3725_v1 = vsel %vm3722_vm12, %v3724_v18, %v3720_v61  ;;  %v4453_v60 = vmul.f32 %v13644_v0, %v4452_v35  ;;  %v17765_v35 = vld [vmem:[#allocation14_spill] sm:$0xff] }
 0x53c   : > { %v4482_v12 = vsub.f32 1.0, %v4481_v13  ;;  %v4436_v57 = vmul.f32 %v13662_v7, %v13319_v47  ;;  %v3726_v21 = vmul.f32 %v17759_v51, %v3725_v1  ;;  %v4651_v41 = vpack.c.bf16 %v4619_v55, %v4619_v55 }
 0x53d   : > { %v4492_v49 = vor.u32 1.1754944e-38, %v4491_v11  ;;  %v3684_v10 = vsub.f32 1.0, %v3683_v53  ;;  %v4454_v62 = vadd.f32 %v13644_v0, %v4453_v60  ;;  %vm3688_vm8 = vweird.f32 %v13655_v63 }
 0x53e   : > { %v4483_v20 = vmul.f32 %v8888_v5, %v4482_v12  ;;  %v4437_v8 = vsub.f32 1.0, %v4436_v57  ;;  %vm4441_vm13 = vweird.f32 %v13662_v7  ;;  %v5073_v50 = vunpack.c.l.b16 %v4651_v41  ;;  %vm13709_vm7 = vmor %vm3687_vm6, %vm3688_vm8 }
 0x53f   : > { %v3685_v38 = vmul.f32 %v13655_v63, %v3684_v10  ;;  %v4446_v12 = vand.u32 2147483648, %v13319_v47  ;;  %vm3692_vm12 = vcmp.eq.f32.partialorder %v3691_v39, 8.507059e+37  ;;  %v17764_v47 = vld [vmem:[#allocation24_spill] sm:$0xff]  ;;  %v13753_v39 = vpop.f32.mrf.mxu3 }
 0x540   : > { %v4484_v56 = vadd.f32 %v8888_v5, %v4483_v20  ;;  %v4438_v34 = vmul.f32 %v13662_v7, %v4437_v8  ;;  %17773 = vst [vmem:[#allocation63_spill] sm:$0xff] %v13753_v39 }
 0x541   : > { %v3686_v37 = vadd.f32 %v13655_v63, %v3685_v38  ;;  %v4447_v32 = vor.u32 1.1754944e-38, %v4446_v12  ;;  %v5152_v12 = vmul.f32 %v13753_v39, %v13753_v39 }
 0x542   : > { %v4488_v17 = vsel %vm4487_vm4, %v8888_v5, %v4484_v56  ;;  %v4459_v5 = vand.u32 2147483647, %v13380_v22  ;;  %v4439_v14 = vadd.f32 %v13662_v7, %v4438_v34  ;;  %vm4442_vm4 = vmor %vm4440_vm10, %vm4441_vm13 }
 0x543   : > { %v4493_v28 = vsel %vm4490_vm9, %v4492_v49, %v4488_v17  ;;  %vm4445_vm9 = vcmp.eq.f32.partialorder %v4444_v23, 8.507059e+37  ;;  %v17766_v17 = vld [vmem:[#allocation27_spill] sm:$0xff] }
 0x544   : > { %v4494_v45 = vmul.f32 %v12990_v44, %v4493_v28  ;;  %v4461_v44 = vand.u32 2147483648, %v13380_v22  ;;  %v4458_v22 = vsel %vm13697_vm5, %v13644_v0, %v4454_v62  ;;  %vm4460_vm14 = vcmp.eq.f32.partialorder %v4459_v5, 8.507059e+37  ;;  %v13729_v62 = vpop.f32.mrf.mxu2 }
 0x545   : > { %v3690_v0 = vsel %vm13709_vm7, %v13655_v63, %v3686_v37  ;;  %v4443_v53 = vsel %vm4442_vm4, %v13662_v7, %v4439_v14  ;;  %17767 = vst [vmem:[#allocation38_spill] sm:$0xff] %v13729_v62 }
 0x546   : > { %v4588_v36 = vmul.f32 %v12596_v43, %v4494_v45  ;;  %v4462_v42 = vor.u32 1.1754944e-38, %v4461_v44  ;;  %v3695_v16 = vsel %vm3692_vm12, %v3694_v4, %v3690_v0  ;;  %v4448_v57 = vsel %vm4445_vm9, %v4447_v32, %v4443_v53 }
 0x547   : > { %v3696_v18 = vmul.f32 %v17765_v35, %v3695_v16  ;;  %v4449_v10 = vmul.f32 %v17766_v17, %v4448_v57 }
 0x548   : > { %v4620_v58 = vsub.f32 %v3726_v21, %v4588_v36  ;;  %v4463_v6 = vsel %vm4460_vm14, %v4462_v42, %v4458_v22 }
 0x549   : > { %v4464_v61 = vmul.f32 %v17764_v47, %v4463_v6  ;;  %v4585_v60 = vmul.f32 %v12596_v43, %v4449_v10 }
 0x54a   : > { %v3285_v40 = vpop.xlane.xlu1 %3284  ;;  %v4652_v2 = vpack.c.bf16 %v4620_v58, %v4620_v58 }
 0x54b   : > { %8893 = vrcp.f32 %v3285_v40  ;;  %v3678_v63 = vand.u32 2147483648, %v3285_v40  ;;  %v3676_v48 = vand.u32 2147483647, %v3285_v40  ;;  %v4586_v1 = vmul.f32 %v12596_v43, %v4464_v61 }
 0x54c   : > { %v5074_v15 = vunpack.c.l.b16 %v4652_v2  ;;  %vm3672_vm3 = vweird.f32 %v3285_v40  ;;  %v13733_v44 = vpop.f32.mrf.mxu2 }
 0x54d   : > { %v3679_v28 = vor.u32 1.1754944e-38, %v3678_v63  ;;  %v4618_v55 = vsub.f32 %v3696_v18, %v4586_v1  ;;  %vm3677_vm13 = vcmp.eq.f32.partialorder %v3676_v48, 8.507059e+37  ;;  %17769 = vst [vmem:[#allocation56_spill] sm:$0xff] %v13733_v44 }
 0x54e   : > { %v5075_v11 = vpack.c.b16 %v5074_v15, %v5073_v50 }
 0x54f   : > { %v4650_v21 = vpack.c.bf16 %v4618_v55, %v4618_v55 }
 0x550   : > { %8356 = vmatmul.msk.bf16.vlgmr.msra.gmra.mxu1 %vm17158_vm0, %v5075_v11  ;;  %v5216_v11 = vsel %vm5173_vm11, %v5152_v12, 0.0 }
 0x551   : > { %v8894_v20 = vpop.eup %8893  ;;  %v5052_v41 = vunpack.c.l.b16 %v4650_v21 }
 0x552   : > { %v3668_v19 = vmul.f32 %v8894_v20, %v3285_v40  ;;  %vm3673_vm15 = vweird.f32 %v8894_v20 }
 0x553   : > { %vm3674_vm8 = vmor %vm3672_vm3, %vm3673_vm15 }
 0x554   : > { %v3669_v56 = vsub.f32 1.0, %v3668_v19 }
 0x556   : > { %v3670_v49 = vmul.f32 %v8894_v20, %v3669_v56 }
 0x558   : > { %v3671_v7 = vadd.f32 %v8894_v20, %v3670_v49 }
 0x55a   : > { %v3675_v45 = vsel %vm3674_vm8, %v8894_v20, %v3671_v7 }
 0x55b   : > { %v3680_v8 = vsel %vm3677_vm13, %v3679_v28, %v3675_v45 }
 0x55c   : > { %v3681_v51 = vmul.f32 %v13039_v59, %v3680_v8  ;;  %v13738_v59 = vpop.f32.mrf.mxu2  ;;  %v13773_v32 = vpop.xlane.xlu1 %6477 }
 0x55d   : > { %17770 = vst [vmem:[#allocation52_spill] sm:$0xff] %v13738_v59  ;;  %v5149_v5 = vmul.f32 %v13738_v59, %v13738_v59  ;;  %8895 = vrsqrt.f32 %v13773_v32  ;;  %vm6786_vm5 = vcmp.eq.f32.partialorder %v13773_v32, inf  ;;  %vm6788_vm6 = vcmp.eq.f32.partialorder %v13773_v32, 0.0 }
 0x55e   : > { %v4617_v36 = vsub.f32 %v3681_v51, %v4585_v60 }
 0x55f   : > { %v5207_v14 = vsel %vm17157_vm1, %v5149_v5, 0.0 }
 0x560   : > { %v4649_v38 = vpack.c.bf16 %v4617_v36, %v4617_v36 }
 0x562   : > { %v5051_v58 = vunpack.c.l.b16 %v4649_v38 }
 0x563   : > { %v8896_v48 = vpop.eup %8895 }
 0x564   : > { %v5053_v34 = vpack.c.b16 %v5052_v41, %v5051_v58  ;;  %v13765_v20 = vpop.f32.mrf.mxu2  ;;  %v6780_v10 = vmul.f32 %v8896_v48, %v13773_v32 }
 0x565   : > { %17776 = vst [vmem:[#allocation67_spill] sm:$0xff] %v13765_v20  ;;  %v5150_v4 = vmul.f32 %v13765_v20, %v13765_v20 }
 0x566   : > { %8355 = vmatmul.msk.bf16.vlgmr.msra.gmra.mxu0 %vm17158_vm0, %v5053_v34  ;;  %v6781_v28 = vmul.f32 %v8896_v48, %v6780_v10 }
 0x567   : > { %v5210_v19 = vsel %vm5173_vm11, %v5150_v4, 0.0 }
 0x568   : > { %v13789_v18 = vpop.xlane.xlu1 %6498  ;;  %v6782_v41 = vmul.f32 0.5, %v6781_v28  ;;  %v13853_v28 = vmul.f32 %v13729_v62, %v13729_v62 }
 0x569   : > { %8897 = vrsqrt.f32 %v13789_v18  ;;  %vm6870_vm7 = vcmp.eq.f32.partialorder %v13789_v18, inf  ;;  %vm6872_vm10 = vcmp.eq.f32.partialorder %v13789_v18, 0.0 }
 0x56b   : > { %v13787_v35 = vpop.xlane.xlu2 %6474 }
 0x56c   : > { %v13780_v56 = vpop.f32.mrf.mxu2  ;;  %vm6774_vm12 = vcmp.eq.f32.partialorder %v13787_v35, inf  ;;  %vm6776_vm9 = vcmp.eq.f32.partialorder %v13787_v35, 0.0 }
 0x56d   : > { %17778 = vst [vmem:[#allocation69_spill] sm:$0xff] %v13780_v56  ;;  %v5157_v57 = vmul.f32 %v13780_v56, %v13780_v56 }
 0x56f   : > { %v5231_v17 = vsel %vm17157_vm1, %v5157_v57, 0.0  ;;  %v13800_v7 = vpop.eup %8897 }
 0x570   : > { %v13731_v40 = vpop.f32.mrf.mxu0  ;;  %v6864_v51 = vmul.f32 %v13800_v7, %v13789_v18 }
 0x571   : > { %17768 = vst [vmem:[#allocation48_spill] sm:$0xff] %v13731_v40  ;;  %v5153_v2 = vmul.f32 %v13731_v40, %v13731_v40 }
 0x572   : > { %v6865_v5 = vmul.f32 %v13800_v7, %v6864_v51 }
 0x573   : > { %v5219_v43 = vsel %vm17157_vm1, %v5153_v2, 0.0  ;;  %v13785_v63 = vpop.xlane.xlu0 %6501 }
 0x574   : > { %5220 = vadd.xlane.f32.xlu0 %v5219_v43  ;;  %8899 = vrsqrt.f32 %v13785_v63  ;;  %v13819_v34 = vpop.f32.mrf.mxu2  ;;  %vm6882_vm14 = vcmp.eq.f32.partialorder %v13785_v63, inf  ;;  %vm6884_vm4 = vcmp.eq.f32.partialorder %v13785_v63, 0.0 }
 0x575   : > { %8901 = vrsqrt.f32 %v13787_v35  ;;  %17782 = vst [vmem:[#allocation73_spill] sm:$0xff] %v13819_v34 }
 0x578   : > { %v13744_v13 = vpop.f32.mrf.mxu0  ;;  %v13804_v45 = vpop.xlane.xlu2 %6495 }
 0x579   : > { %17772 = vst [vmem:[#allocation64_spill] sm:$0xff] %v13744_v13  ;;  %v5154_v50 = vmul.f32 %v13744_v13, %v13744_v13 }
 0x57a   : > { %v13807_v60 = vpop.eup %8899 }
 0x57b   : > { %v5222_v22 = vsel %vm5173_vm11, %v5154_v50, 0.0  ;;  %v13802_v55 = vpop.xlane.xlu0 %6471  ;;  %v13815_v38 = vpop.eup %8901  ;;  %v6876_v2 = vmul.f32 %v13807_v60, %v13785_v63 }
 0x57c   : > { %5208 = vadd.xlane.f32.xlu0 %v5207_v14  ;;  %5223 = vadd.xlane.f32.xlu2 %v5222_v22  ;;  %v6783_v22 = vsub.f32 1.5, %v6782_v41  ;;  %vm6762_vm15 = vcmp.eq.f32.partialorder %v13802_v55, inf  ;;  %vm6764_vm13 = vcmp.eq.f32.partialorder %v13802_v55, 0.0 }
 0x57d   : > { %v6877_v12 = vmul.f32 %v13807_v60, %v6876_v2 }
 0x57f   : > { %v6878_v51 = vmul.f32 0.5, %v6877_v12 }
 0x58a   : > { %v13742_v37 = vpop.f32.mrf.mxu1 }
 0x58b   : > { %17771 = vst [vmem:[#allocation58_spill] sm:$0xff] %v13742_v37  ;;  %v5155_v27 = vmul.f32 %v13742_v37, %v13742_v37 }
 0x58d   : > { %v5225_v15 = vsel %vm17157_vm1, %v5155_v27, 0.0  ;;  %v13826_v27 = vpop.xlane.xlu1 %6429 }
 0x58e   : > { %5226 = vadd.xlane.f32.xlu1 %v5225_v15  ;;  %v6768_v15 = vmul.f32 %v13815_v38, %v13787_v35  ;;  %8903 = vrsqrt.f32 %v13826_v27  ;;  %vm6594_vm3 = vcmp.eq.f32.partialorder %v13826_v27, inf }
 0x58f   : > { %8905 = vrsqrt.f32 %v13802_v55 }
 0x592   : > { %v13757_v42 = vpop.f32.mrf.mxu1 }
 0x593   : > { %17774 = vst [vmem:[#allocation65_spill] sm:$0xff] %v13757_v42  ;;  %v5156_v33 = vmul.f32 %v13757_v42, %v13757_v42  ;;  %v13859_v41 = vpop.f32.mrf.mxu2  ;;  %v9141_v42 = vld [vmem:[%s9400_s23 + $0x88] sm:$0xff] }
 0x594   : > { %17785 = vst [vmem:[#allocation45_spill] sm:$0xff] %v13859_v41  ;;  %v6392_v39 = vmul.f32 %v9141_v42, %v9141_v42 }
 0x595   : > { %v5228_v23 = vsel %vm5173_vm11, %v5156_v33, 0.0 }
 0x596   : > { %5217 = vadd.xlane.f32.xlu1 %v5216_v11  ;;  %5229 = vadd.xlane.f32.xlu0 %v5228_v23  ;;  %v6866_v11 = vmul.f32 0.5, %v6865_v5  ;;  %v13837_v23 = vpop.xlane.xlu0 %6453  ;;  %v6458_v59 = vsel %vm17158_vm0, %v6392_v39, 0.0 }
 0x598   : > { %v6867_v2 = vsub.f32 1.5, %v6866_v11 }
 0x59e   : > { %5211 = vadd.xlane.f32.xlu0 %v5210_v19  ;;  %v13842_v19 = vpop.xlane.xlu2 %6468 }
 0x5ae   : > { %v13763_v0 = vpop.f32.mrf.mxu3 }
 0x5af   : > { %17775 = vst [vmem:[#allocation66_spill] sm:$0xff] %v13763_v0  ;;  %v5159_v6 = vmul.f32 %v13763_v0, %v13763_v0 }
 0x5b1   : > { %v5237_v53 = vsel %vm17157_vm1, %v5159_v6, 0.0  ;;  %v9249_v6 = vmov 16.0  }
 0x5b2   : > { %5238 = vadd.xlane.f32.xlu1 %v5237_v53  ;;  %8907 = vrcp.f32 %v9249_v6  ;;  %v6769_v53 = vmul.f32 %v13815_v38, %v6768_v15  ;;  %v13881_v6 = vpop.xlane.xlu1 %6492 }
 0x5b3   : > { %8909 = vrsqrt.f32 %v13804_v45 }
 0x5b4   : > { %v6770_v15 = vmul.f32 0.5, %v6769_v53  ;;  %8911 = vrsqrt.f32 %v13881_v6 }
 0x5b5   : > { %8913 = vrsqrt.f32 %v13837_v23 }
 0x5b6   : > { %v13791_v49 = vpop.f32.mrf.mxu3  ;;  %8915 = vrsqrt.f32 %v13842_v19 }
 0x5b7   : > { %17779 = vst [vmem:[#allocation70_spill] sm:$0xff] %v13791_v49  ;;  %v5160_v1 = vmul.f32 %v13791_v49, %v13791_v49 }
 0x5b9   : > { %v5240_v8 = vsel %vm5173_vm11, %v5160_v1, 0.0  ;;  %v13849_v1 = vpop.eup %8903 }
 0x5be   : > { %v13811_v21 = vpop.f32.mrf.mxu3 }
 0x5bf   : > { %17780 = vst [vmem:[#allocation72_spill] sm:$0xff] %v13811_v21  ;;  %v5167_v43 = vmul.f32 %v13811_v21, %v13811_v21  ;;  %v13910_v21 = vpop.xlane.xlu2 %6450 }
 0x5c1   : > { %v5261_v33 = vsel %vm17157_vm1, %v5167_v43, 0.0 }
 0x5cd   : > { %v13775_v16 = vpop.f32.mrf.mxu1 }
 0x5ce   : > { %17777 = vst [vmem:[#allocation68_spill] sm:$0xff] %v13775_v16  ;;  %v5163_v47 = vmul.f32 %v13775_v16, %v13775_v16 }
 0x5d0   : > { %v5249_v61 = vsel %vm17157_vm1, %v5163_v47, 0.0 }
 0x5d1   : > { %5250 = vadd.xlane.f32.xlu0 %v5249_v61  ;;  %v9133_v61 = vld [vmem:[%s9400_s23 + $0xd8] sm:$0xff] }
 0x5d2   : > { %v6402_v57 = vmul.f32 %v9133_v61, %v9133_v61  ;;  %v6879_v61 = vsub.f32 1.5, %v6878_v51 }
 0x5d5   : > { %v13832_v14 = vpop.f32.mrf.mxu1 }
 0x5d6   : > { %17783 = vst [vmem:[#allocation75_spill] sm:$0xff] %v13832_v14  ;;  %v5164_v4 = vmul.f32 %v13832_v14, %v13832_v14 }
 0x5d8   : > { %v5252_v43 = vsel %vm5173_vm11, %v5164_v4, 0.0  ;;  %v9134_v4 = vld [vmem:[%s9400_s23 + $0x98] sm:$0xff] }
 0x5d9   : > { %5232 = vadd.xlane.f32.xlu0 %v5231_v17  ;;  %v6784_v17 = vmul.f32 %v8896_v48, %v6783_v22  ;;  %v13865_v48 = vmul.f32 %v13733_v44, %v13733_v44  ;;  %v6488_v22 = vsel %vm17158_vm0, %v6402_v57, 0.0  ;;  %v6394_v53 = vmul.f32 %v9134_v4, %v9134_v4  ;;  %v9135_v4 = vld [vmem:[%s9400_s23 + $0x90] sm:$0xff] }
 0x5da   : > { %v6588_v57 = vmul.f32 %v13849_v1, %v13826_v27 }
 0x5db   : > { %v6785_v11 = vmul.f32 %v6784_v17, %v13773_v32  ;;  %v6789_v17 = vand.u32 2147483648, %v13773_v32  ;;  %v6464_v62 = vsel %vm17158_vm0, %v6394_v53, 0.0 }
 0x5e1   : > { %5241 = vadd.xlane.f32.xlu0 %v5240_v8  ;;  %v13857_v8 = vmul.f32 %v13573_v52, %v13573_v52  ;;  %v6393_v52 = vmul.f32 %v9135_v4, %v9135_v4  ;;  %v13908_v4 = vpop.xlane.xlu0 %6426 }
 0x5e2   : > { %8917 = vrsqrt.f32 %v13908_v4 }
 0x5e3   : > { %v13813_v36 = vpop.f32.mrf.mxu0 }
 0x5e4   : > { %17781 = vst [vmem:[#allocation71_spill] sm:$0xff] %v13813_v36  ;;  %v5161_v58 = vmul.f32 %v13813_v36, %v13813_v36 }
 0x5e6   : > { %v5243_v50 = vsel %vm17157_vm1, %v5161_v58, 0.0  ;;  %v13861_v58 = vpop.eup %8905 }
 0x5e7   : > { %5244 = vadd.xlane.f32.xlu2 %v5243_v50  ;;  %v13871_v50 = vmul.f32 %v13596_v26, %v13596_v26  ;;  %v13875_v12 = vpop.eup %8907  ;;  %v6873_v26 = vand.u32 2147483648, %v13789_v18 }
 0x5e8   : > { %v5268_v51 = vmul.f32 16.0, %v13875_v12  ;;  %v13900_v44 = vpop.eup %8909  ;;  %vm5272_vm8 = vweird.f32 %v13875_v12 }
 0x5e9   : > { %5262 = vadd.xlane.f32.xlu0 %v5261_v33  ;;  %v5158_v33 = vmul.f32 %v13819_v34, %v13819_v34  ;;  %v6885_v34 = vand.u32 2147483648, %v13785_v63 }
 0x5eb   : > { %v13844_v47 = vpop.f32.mrf.mxu0  ;;  %v5234_v53 = vsel %vm5173_vm11, %v5158_v33, 0.0  ;;  %v6852_v33 = vmul.f32 %v13900_v44, %v13804_v45 }
 0x5ec   : > { %17784 = vst [vmem:[#allocation74_spill] sm:$0xff] %v13844_v47  ;;  %v5162_v10 = vmul.f32 %v13844_v47, %v13844_v47  ;;  %v13916_v47 = vpop.eup %8911 }
 0x5ed   : > { %v6853_v56 = vmul.f32 %v13900_v44, %v6852_v33 }
 0x5ee   : > { %v5246_v5 = vsel %vm5173_vm11, %v5162_v10, 0.0  ;;  %v6756_v10 = vmul.f32 %v13861_v58, %v13802_v55 }
 0x5ef   : > { %5253 = vadd.xlane.f32.xlu2 %v5252_v43  ;;  %5247 = vadd.xlane.f32.xlu1 %v5246_v5  ;;  %v6868_v43 = vmul.f32 %v13800_v7, %v6867_v2  ;;  %v6771_v5 = vsub.f32 1.5, %v6770_v15  ;;  %v6787_v7 = vsel %vm6786_vm5, %v13773_v32, %v6785_v11  ;;  %v6880_v2 = vmul.f32 %v13807_v60, %v6879_v61 }
 0x5f0   : > { %v6757_v15 = vmul.f32 %v13861_v58, %v6756_v10  ;;  %v5269_v61 = vsub.f32 1.0, %v5268_v51  ;;  %v13920_v10 = vpop.f32.mrf.mxu2  ;;  %v6790_v14 = vsel %vm6788_vm6, %v6789_v17, %v6787_v7  ;;  %v6840_v32 = vmul.f32 %v13916_v47, %v13881_v6 }
 0x5f1   : > { %6489 = vadd.xlane.f32.xlu0 %v6488_v22  ;;  %v6589_v22 = vmul.f32 %v13849_v1, %v6588_v57  ;;  %v6869_v60 = vmul.f32 %v6868_v43, %v13789_v18  ;;  %v6772_v11 = vmul.f32 %v13815_v38, %v6771_v5  ;;  %17786 = vst [vmem:[#allocation40_spill] sm:$0xff] %v13920_v10  ;;  %v6461_v57 = vsel %vm17158_vm0, %v6393_v52, 0.0  ;;  %v13929_v43 = vpop.eup %8913 }
 0x5f2   : > { %v6881_v38 = vmul.f32 %v6880_v2, %v13785_v63  ;;  %v6758_v5 = vmul.f32 0.5, %v6757_v15  ;;  %v13933_v51 = vpop.eup %8915  ;;  %v6777_v52 = vand.u32 2147483648, %v13787_v35  ;;  %v5165_v17 = vmul.f32 %v13859_v41, %v13859_v41 }
 0x5f3   : > { %v5166_v7 = vmul.f32 %v13920_v10, %v13920_v10  ;;  %v6871_v2 = vsel %vm6870_vm7, %v13789_v18, %v6869_v60  ;;  %v6773_v15 = vmul.f32 %v6772_v11, %v13787_v35  ;;  %v13949_v49 = vpop.eup %8917  ;;  %v6744_v11 = vmul.f32 %v13933_v51, %v13842_v19 }
 0x5f4   : > { %v6759_v60 = vsub.f32 1.5, %v6758_v5  ;;  %v6841_v36 = vmul.f32 %v13916_v47, %v6840_v32  ;;  %v5255_v41 = vsel %vm17157_vm1, %v5165_v17, 0.0  ;;  %v6576_v18 = vmul.f32 %v13949_v49, %v13908_v4  ;;  %v5203_v5 = vpop.xlane.xlu2 %5202 }
 0x5f5   : > { %v5258_v33 = vsel %vm5173_vm11, %v5166_v7, 0.0  ;;  %v6854_v32 = vmul.f32 0.5, %v6853_v56  ;;  %v5197_v7 = vpop.xlane.xlu1 %5196  ;;  %v6745_v16 = vmul.f32 %v13933_v51, %v6744_v11  ;;  %vm6596_vm5 = vcmp.eq.f32.partialorder %v13826_v27, 0.0 }
 0x5f6   : > { %v6861_v56 = vand.u32 2147483648, %v13804_v45  ;;  %vm6858_vm6 = vcmp.eq.f32.partialorder %v13804_v45, inf  ;;  %vm6846_vm7 = vcmp.eq.f32.partialorder %v13881_v6, inf }
 0x5f7   : > { %5235 = vadd.xlane.f32.xlu2 %v5234_v53  ;;  %6465 = vadd.xlane.f32.xlu1 %v6464_v62  ;;  %v6590_v62 = vmul.f32 0.5, %v6589_v22  ;;  %v13942_v53 = vmax.f32 %v6790_v14, 1e-12  ;;  %v5270_v22 = vmul.f32 %v13875_v12, %v5269_v61  ;;  %v6684_v14 = vmul.f32 %v13929_v43, %v13837_v23 }
 0x5f8   : > { %v6874_v61 = vsel %vm6872_vm10, %v6873_v26, %v6871_v2  ;;  %v6760_v2 = vmul.f32 %v13861_v58, %v6759_v60  ;;  %vm6860_vm10 = vcmp.eq.f32.partialorder %v13804_v45, 0.0 }
 0x5f9   : > { %6462 = vadd.xlane.f32.xlu0 %v6461_v57  ;;  %v6883_v57 = vsel %vm6882_vm14, %v13785_v63, %v6881_v38  ;;  %v6591_v10 = vsub.f32 1.5, %v6590_v62  ;;  %8919 = vrcp.f32 %v13942_v53  ;;  %v6775_v38 = vsel %vm6774_vm12, %v13787_v35, %v6773_v15 }
 0x5fa   : > { %v5271_v26 = vadd.f32 %v13875_v12, %v5270_v22  ;;  %v6886_v62 = vsel %vm6884_vm4, %v6885_v34, %v6883_v57  ;;  %v6685_v17 = vmul.f32 %v13929_v43, %v6684_v14  ;;  %v6778_v63 = vsel %vm6776_vm9, %v6777_v52, %v6775_v38  ;;  %v5200_v22 = vpop.xlane.xlu0 %5199  ;;  %v9136_v14 = vld [vmem:[%s9400_s23 + $0x28] sm:$0xff] }
 0x5fb   : > { %v6592_v15 = vmul.f32 %v13849_v1, %v6591_v10  ;;  %v6842_v34 = vmul.f32 0.5, %v6841_v36  ;;  %8921 = vrsqrt.f32 %v13910_v21  ;;  %v13990_v1 = vmax.f32 %v6886_v62, 1e-12  ;;  %v9137_v36 = vld [vmem:[%s9400_s23 + $0x68] sm:$0xff] }
 0x5fc   : > { %v13992_v58 = vmax.f32 %v6874_v61, 1e-12  ;;  %v13998_v35 = vsel %vm5272_vm8, %v13875_v12, %v5271_v26  ;;  %v6855_v10 = vsub.f32 1.5, %v6854_v32  ;;  %v6686_v52 = vmul.f32 0.5, %v6685_v17 }
 0x5fd   : > { %v6380_v57 = vmul.f32 %v9136_v14, %v9136_v14  ;;  %v6388_v60 = vmul.f32 %v9137_v36, %v9137_v36  ;;  %v6761_v61 = vmul.f32 %v6760_v2, %v13802_v55  ;;  %v6593_v38 = vmul.f32 %v6592_v15, %v13826_v27 }
 0x5fe   : > { %v6843_v12 = vsub.f32 1.5, %v6842_v34  ;;  %v5282_v26 = vmul.f32 %v13998_v35, %v5197_v7  ;;  %8923 = vrcp.f32 %v13992_v58  ;;  %v6687_v7 = vsub.f32 1.5, %v6686_v52 }
 0x5ff   : > { %5256 = vadd.xlane.f32.xlu2 %v5255_v41  ;;  %5259 = vadd.xlane.f32.xlu1 %v5258_v33  ;;  %v5186_v41 = vsel %vm5173_vm11, %v13865_v48, 0.0  ;;  %v6577_v48 = vmul.f32 %v13949_v49, %v6576_v18  ;;  %v14002_v11 = vpop.eup %8919  ;;  %v14004_v33 = vmax.f32 %v6778_v63, 1e-12  ;;  %v6746_v18 = vmul.f32 0.5, %v6745_v16  ;;  %v5206_v63 = vpop.xlane.xlu1 %5205 }
 0x600   : > { %v6422_v62 = vsel %vm17158_vm0, %v6380_v57, 0.0  ;;  %v6446_v32 = vsel %vm17158_vm0, %v6388_v60, 0.0  ;;  %8925 = vrcp.f32 %v13990_v1  ;;  %v6856_v16 = vmul.f32 %v13900_v44, %v6855_v10 }
 0x601   : > { %5187 = vadd.xlane.f32.xlu0 %v5186_v41  ;;  %v6578_v17 = vmul.f32 0.5, %v6577_v48  ;;  %v5283_v41 = vmul.f32 %v13998_v35, %v5200_v22  ;;  %v14015_v2 = vpop.eup %8921  ;;  %v5284_v15 = vmul.f32 %v13998_v35, %v5203_v5  ;;  %8927 = vrcp.f32 %v14004_v33  ;;  %v5215_v22 = vpop.xlane.xlu2 %5214 }
 0x602   : > { %vm6690_vm14 = vcmp.eq.f32.partialorder %v13837_v23, inf  ;;  %v6693_v34 = vand.u32 2147483648, %v13837_v23  ;;  %v6747_v48 = vsub.f32 1.5, %v6746_v18  ;;  %v5192_v14 = vsel %vm5173_vm11, %v13871_v50, 0.0  ;;  %v14040_v18 = vpop.f32.mrf.mxu3 }
 0x603   : > { %v6763_v44 = vsel %vm6762_vm15, %v13802_v55, %v6761_v61  ;;  %v6595_v5 = vsel %vm6594_vm3, %v13826_v27, %v6593_v38  ;;  %v6844_v10 = vmul.f32 %v13916_v47, %v6843_v12  ;;  %v14033_v52 = vadd.f32 1e-05, %v5282_v26  ;;  %17787 = vst [vmem:[#allocation41_spill] sm:$0xff] %v14040_v18 }
 0x604   : > { %v6579_v57 = vsub.f32 1.5, %v6578_v17  ;;  %v6672_v36 = vmul.f32 %v14015_v2, %v13910_v21  ;;  %v14037_v60 = vadd.f32 1e-05, %v5283_v41  ;;  %v5285_v50 = vmul.f32 %v13998_v35, %v5206_v63  ;;  %v14048_v12 = vpop.eup %8923 }
 0x605   : > { %v6857_v61 = vmul.f32 %v6856_v16, %v13804_v45  ;;  %vm6692_vm4 = vcmp.eq.f32.partialorder %v13837_v23, 0.0  ;;  %v14045_v47 = vadd.f32 1e-05, %v5284_v15  ;;  %v5288_v38 = vmul.f32 %v13998_v35, %v5215_v22 }
 0x606   : > { %v17788_v26 = vand.u32 2147483648, %v13802_v55  ;;  %v17789_v17 = vand.u32 2147483648, %v13826_v27  ;;  %vm6848_vm12 = vcmp.eq.f32.partialorder %v13881_v6, 0.0  ;;  %v14060_v16 = vpop.eup %8925  ;;  %8929 = vrsqrt.f32 %v14033_v52 }
 0x607   : > { %6423 = vadd.xlane.f32.xlu2 %v6422_v62  ;;  %6447 = vadd.xlane.f32.xlu1 %v6446_v32  ;;  %v6688_v62 = vmul.f32 %v13929_v43, %v6687_v7  ;;  %v6748_v43 = vmul.f32 %v13933_v51, %v6747_v48  ;;  %v6845_v7 = vmul.f32 %v6844_v10, %v13881_v6  ;;  %v5183_v55 = vsel %vm17157_vm1, %v13853_v28, 0.0  ;;  %v14068_v63 = vpop.eup %8927 }
 0x608   : > { %v6766_v32 = vsel %vm6764_vm13, %v17788_v26, %v6763_v44  ;;  %v6598_v41 = vsel %vm6596_vm5, %v17789_v17, %v6595_v5  ;;  %v5168_v15 = vmul.f32 %v14040_v18, %v14040_v18  ;;  %v6580_v27 = vmul.f32 %v13949_v49, %v6579_v57 }
 0x609   : > { %5193 = vadd.xlane.f32.xlu0 %v5192_v14  ;;  %v6673_v22 = vmul.f32 %v14015_v2, %v6672_v36  ;;  %8931 = vrsqrt.f32 %v14037_v60  ;;  %v14073_v51 = vadd.f32 1e-05, %v5285_v50  ;;  %v6859_v48 = vsel %vm6858_vm6, %v13804_v45, %v6857_v61  ;;  %v5221_v36 = vpop.xlane.xlu0 %5220  ;;  %v8549_v61 = vld [vmem:[%s16989_s8 + $0x58] sm:$0xff] }
 0x60a   : > { %v6689_v14 = vmul.f32 %v6688_v62, %v13837_v23  ;;  %8933 = vrsqrt.f32 %v14045_v47  ;;  %v14080_v28 = vadd.f32 1e-05, %v5288_v38  ;;  %v14082_v44 = vmax.f32 %v6598_v41, 1e-12  ;;  %v8553_v62 = vld [vmem:[%s16989_s8 + $0x78] sm:$0xff]  ;;  %6015 = vmatpush.bf16.msrb.mxu2 %v8549_v61 }
 0x60b   : > { %v6849_v49 = vand.u32 2147483648, %v13881_v6  ;;  %v6749_v5 = vmul.f32 %v6748_v43, %v13842_v19  ;;  %vm6750_vm9 = vcmp.eq.f32.partialorder %v13842_v19, inf  ;;  %v14087_v10 = vmax.f32 %v6766_v32, 1e-12  ;;  %6061 = vmatpush.bf16.msrb.mxu3 %v8553_v62  ;;  %v8552_v62 = vld [vmem:[%s16989_s8 + $0x70] sm:$0xff] }
 0x60c   : > { %v6847_v57 = vsel %vm6846_vm7, %v13881_v6, %v6845_v7  ;;  %vm6752_vm15 = vcmp.eq.f32.partialorder %v13842_v19, 0.0  ;;  %v5264_v50 = vsel %vm5173_vm11, %v5168_v15, 0.0  ;;  %v6862_v38 = vsel %vm6860_vm10, %v6861_v56, %v6859_v48  ;;  %v14106_v17 = vpop.eup %8929 }
 0x60d   : > { %v6581_v26 = vmul.f32 %v6580_v27, %v13908_v4  ;;  %v6674_v32 = vmul.f32 0.5, %v6673_v22  ;;  %8935 = vrsqrt.f32 %v14073_v51  ;;  %v6691_v41 = vsel %vm6690_vm14, %v13837_v23, %v6689_v14  ;;  %v8548_v23 = vld [vmem:[%s16989_s8 + $0x50] sm:$0xff] }
 0x60e   : > { %v6753_v43 = vand.u32 2147483648, %v13842_v19  ;;  %vm6582_vm3 = vcmp.eq.f32.partialorder %v13908_v4, inf  ;;  %8937 = vrsqrt.f32 %v14080_v28  ;;  %v6850_v56 = vsel %vm6848_vm12, %v6849_v49, %v6847_v57  ;;  %6016 = vmatpush.bf16.msrb.mxu2 %v8548_v23 }
 0x60f   : > { %5184 = vadd.xlane.f32.xlu1 %v5183_v55  ;;  %5265 = vadd.xlane.f32.xlu2 %v5264_v50  ;;  %v14114_v45 = vpop.eup %8931  ;;  %8939 = vrcp.f32 %v14082_v44  ;;  %v6751_v7 = vsel %vm6750_vm9, %v13842_v19, %v6749_v5  ;;  %v5290_v15 = vmul.f32 %v13998_v35, %v5221_v36  ;;  %v14125_v27 = vmax.f32 %v6862_v38, 1e-12  ;;  %v9138_v19 = vld [vmem:[%s9400_s23 + $0xd0] sm:$0xff] }
 0x610   : > { %v14123_v55 = vpop.eup %8933  ;;  %vm6584_vm8 = vcmp.eq.f32.partialorder %v13908_v4, 0.0  ;;  %v6585_v22 = vand.u32 2147483648, %v13908_v4  ;;  %v5189_v48 = vsel %vm17157_vm1, %v13857_v8, 0.0  ;;  %v6694_v6 = vsel %vm6692_vm4, %v6693_v34, %v6691_v41  ;;  %6062 = vmatpush.bf16.msrb.mxu3 %v8552_v62 }
 0x611   : > { %v6583_v14 = vsel %vm6582_vm3, %v13908_v4, %v6581_v26  ;;  %v5419_v49 = vmul.f32 %v14106_v17, %v14033_v52  ;;  %v6675_v5 = vsub.f32 1.5, %v6674_v32  ;;  %8941 = vrcp.f32 %v14087_v10  ;;  %v9139_v26 = vld [vmem:[%s9400_s23 + $0xc8] sm:$0xff]  ;;  %v14192_v62 = vpop.xlane.xlu0 %5208 }
 0x612   : > { %v14139_v57 = vmax.f32 %v6850_v56, 1e-12  ;;  %v6754_v8 = vsel %vm6752_vm15, %v6753_v43, %v6751_v7  ;;  %v5429_v36 = vmul.f32 %v14114_v45, %v14037_v60  ;;  %v5439_v50 = vmul.f32 %v14123_v55, %v14045_v47 }
 0x613   : > { %v14148_v34 = vpop.eup %8935  ;;  %v14152_v61 = vadd.f32 1e-05, %v5290_v15  ;;  %v6401_v38 = vmul.f32 %v9138_v19, %v9138_v19  ;;  %v6400_v32 = vmul.f32 %v9139_v26, %v9139_v26  ;;  %v5137_v43 = vmul.f32 %v13439_v31, %v13439_v31  ;;  %v8547_v15 = vld [vmem:[%s16989_s8 + $0x48] sm:$0xff] }
 0x614   : > { %v14159_v41 = vpop.eup %8937  ;;  %8943 = vrcp.f32 %v14125_v27  ;;  %v14164_v56 = vmax.f32 %v6694_v6, 1e-12  ;;  %v6586_v7 = vsel %vm6584_vm8, %v6585_v22, %v6583_v14  ;;  %v5420_v19 = vmul.f32 %v14106_v17, %v5419_v49  ;;  %v8551_v6 = vld [vmem:[%s16989_s8 + $0x68] sm:$0xff]  ;;  %6017 = vmatpush.bf16.msrb.mxu2 %v8547_v15  ;;  %v5227_v15 = vpop.xlane.xlu1 %5226 }
 0x615   : > { %v6676_v26 = vmul.f32 %v14015_v2, %v6675_v5  ;;  %v6485_v31 = vsel %vm17158_vm0, %v6401_v38, 0.0  ;;  %v6482_v4 = vsel %vm17158_vm0, %v6400_v32, 0.0  ;;  %v5139_v22 = vmul.f32 %v13566_v24, %v13566_v24  ;;  %6063 = vmatpush.bf16.msrb.mxu3 %v8551_v6 }
 0x616   : > { %8945 = vrcp.f32 %v14139_v57  ;;  %v14183_v14 = vmax.f32 %v6754_v8, 1e-12  ;;  %v5430_v49 = vmul.f32 %v14114_v45, %v5429_v36  ;;  %6483 = vadd.xlane.f32.xlu0 %v6482_v4  ;;  %v5440_v2 = vmul.f32 %v14123_v55, %v5439_v50  ;;  %v8546_v50 = vld [vmem:[%s16989_s8 + $0x40] sm:$0xff] }
 0x617   : > { %5190 = vadd.xlane.f32.xlu1 %v5189_v48  ;;  %v14171_v48 = vpop.eup %8939  ;;  %6486 = vadd.xlane.f32.xlu2 %v6485_v31  ;;  %v5479_v5 = vmul.f32 %v14159_v41, %v14080_v28  ;;  %v5449_v23 = vmul.f32 %v14148_v34, %v14073_v51  ;;  %8947 = vrsqrt.f32 %v14152_v61  ;;  %v5138_v8 = vmul.f32 %v13526_v30, %v13526_v30 }
 0x618   : > { %v14194_v38 = vpop.eup %8941  ;;  %v14200_v31 = vmul.f32 %v13591_v46, %v13591_v46  ;;  %8949 = vrcp.f32 %v14164_v56  ;;  %v14203_v36 = vmax.f32 %v6586_v7, 1e-12  ;;  %v5421_v32 = vmul.f32 0.5, %v5420_v19  ;;  %6018 = vmatpush.bf16.msrb.mxu2 %v8546_v50 }
 0x619   : > { %v6677_v4 = vmul.f32 %v6676_v26, %v13910_v21  ;;  %vm6678_vm13 = vcmp.eq.f32.partialorder %v13910_v21, inf  ;;  %vm6680_vm5 = vcmp.eq.f32.partialorder %v13910_v21, 0.0  ;;  %v6681_v46 = vand.u32 2147483648, %v13910_v21 }
 0x61a   : > { %v14211_v24 = vpop.eup %8943  ;;  %v5431_v7 = vmul.f32 0.5, %v5430_v49  ;;  %v14215_v30 = vsel %vm17157_vm1, %v5137_v43, 0.0  ;;  %v14218_v19 = vsel %vm17157_vm1, %v5139_v22, 0.0  ;;  %8951 = vrcp.f32 %v14183_v14  ;;  %v8550_v43 = vld [vmem:[%s16989_s8 + $0x60] sm:$0xff] }
 0x61b   : > { %v5441_v26 = vmul.f32 0.5, %v5440_v2  ;;  %v5480_v18 = vmul.f32 %v14159_v41, %v5479_v5  ;;  %v5450_v6 = vmul.f32 %v14148_v34, %v5449_v23  ;;  %8953 = vrcp.f32 %v14203_v36  ;;  %v9140_v22 = vld [vmem:[%s9400_s23 + $0x20] sm:$0xff]  ;;  %v8545_v5 = vld [vmem:[%s16989_s8 + $0x38] sm:$0xff]  ;;  %6064 = vmatpush.bf16.msrb.mxu3 %v8550_v43 }
 0x61c   : > { %v14223_v0 = vpop.eup %8945  ;;  %vm5424_vm6 = vweird.f32 %v14033_v52  ;;  %v6379_v49 = vmul.f32 %v9140_v22, %v9140_v22  ;;  %v7265_v2 = vmul.f32 %v14002_v11, %v13942_v53  ;;  %v5422_v13 = vsub.f32 1.5, %v5421_v32  ;;  %5969 = vmatpush.bf16.msrb.mxu1 %v8545_v5 }
 0x61d   : > { %17790 = vst [vmem:[#allocation19_spill] sm:$0xff] %v14223_v0  ;;  %v14237_v23 = vpop.eup %8947  ;;  %v6679_v50 = vsel %vm6678_vm13, %v13910_v21, %v6677_v4  ;;  %vm5434_vm7 = vweird.f32 %v14037_v60  ;;  %v5292_v22 = vmul.f32 %v13998_v35, %v5227_v15  ;;  %v14245_v42 = vsel %vm5173_vm11, %v5138_v8, 0.0  ;;  %v14267_v21 = vpop.xlane.xlu0 %5229 }
 0x61e   : > { %v14247_v37 = vpop.eup %8949  ;;  %vm5425_vm10 = vweird.f32 %v14106_v17  ;;  %v5432_v40 = vsub.f32 1.5, %v5431_v7  ;;  %vm5444_vm14 = vweird.f32 %v14045_v47  ;;  %v6419_v32 = vsel %vm17158_vm0, %v6379_v49, 0.0 }
 0x61f   : > { %v5442_v4 = vsub.f32 1.5, %v5441_v26  ;;  %v5481_v20 = vmul.f32 0.5, %v5480_v18  ;;  %v5451_v0 = vmul.f32 0.5, %v5450_v6  ;;  %6420 = vadd.xlane.f32.xlu2 %v6419_v32  ;;  %6459 = vadd.xlane.f32.xlu1 %v6458_v59  ;;  %v7266_v8 = vsub.f32 1.0, %v7265_v2  ;;  %vm14295_vm13 = vmor %vm5424_vm6, %vm5425_vm10 }
 0x620   : > { %v6682_v15 = vsel %vm6680_vm5, %v6681_v46, %v6679_v50  ;;  %vm5454_vm4 = vweird.f32 %v14073_v51  ;;  %v5499_v7 = vmul.f32 %v14237_v23, %v14152_v61  ;;  %vm7269_vm12 = vweird.f32 %v13942_v53  ;;  %v14260_v39 = vpop.eup %8951  ;;  %v5224_v46 = vpop.xlane.xlu2 %5223 }
 0x621   : > { %vm7270_vm9 = vweird.f32 %v14002_v11  ;;  %v5423_v18 = vmul.f32 %v14106_v17, %v5422_v13  ;;  %vm5435_vm15 = vweird.f32 %v14114_v45  ;;  %vm5445_vm3 = vweird.f32 %v14123_v55  ;;  %v14269_v26 = vpop.eup %8953  ;;  %v5218_v51 = vpop.xlane.xlu1 %5217 }
 0x622   : > { %v14265_v59 = vadd.f32 1e-05, %v5292_v22  ;;  %v5433_v6 = vmul.f32 %v14114_v45, %v5432_v40  ;;  %v5286_v43 = vmul.f32 %v13998_v35, %v14192_v62  ;;  %v7267_v49 = vmul.f32 %v14002_v11, %v7266_v8  ;;  %vm14281_vm8 = vmor %vm7269_vm12, %vm7270_vm9 }
 0x623   : > { %v7273_v13 = vand.u32 2147483647, %v13942_v53  ;;  %v5443_v2 = vmul.f32 %v14123_v55, %v5442_v4  ;;  %v5482_v5 = vsub.f32 1.5, %v5481_v20  ;;  %v5452_v50 = vsub.f32 1.5, %v5451_v0  ;;  %vm14307_vm12 = vmor %vm5434_vm7, %vm5435_vm15 }
 0x624   : > { %v7275_v40 = vand.u32 2147483648, %v13942_v53  ;;  %v5500_v62 = vmul.f32 %v14237_v23, %v5499_v7  ;;  %v5291_v32 = vmul.f32 %v13998_v35, %v5224_v46  ;;  %v7268_v8 = vadd.f32 %v14002_v11, %v7267_v49  ;;  %vm14327_vm7 = vmor %vm5444_vm14, %vm5445_vm3 }
 0x625   : > { %v7385_v20 = vmul.f32 %v14060_v16, %v13990_v1  ;;  %v14299_v4 = vmax.f32 %v6682_v15, 1e-12  ;;  %vm5455_vm5 = vweird.f32 %v14148_v34  ;;  %8955 = vrsqrt.f32 %v14265_v59 }
 0x626   : > { %v7276_v53 = vor.u32 1.1754944e-38, %v7275_v40  ;;  %vm5485_vm6 = vweird.f32 %v14159_v41  ;;  %v14312_v52 = vadd.f32 1e-05, %v5286_v43  ;;  %v7272_v15 = vsel %vm14281_vm8, %v14002_v11, %v7268_v8  ;;  %vm14344_vm14 = vmor %vm5454_vm4, %vm5455_vm5 }
 0x627   : > { %vm7274_vm10 = vcmp.eq.f32.partialorder %v7273_v13, 8.507059e+37  ;;  %v5427_v46 = vsel %vm14295_vm13, %v14106_v17, %v5423_v18  ;;  %v5437_v60 = vsel %vm14307_vm12, %v14114_v45, %v5433_v6  ;;  %v5483_v49 = vmul.f32 %v14159_v41, %v5482_v5 }
 0x628   : > { %v5453_v11 = vmul.f32 %v14148_v34, %v5452_v50  ;;  %v5447_v17 = vsel %vm14327_vm7, %v14123_v55, %v5443_v2  ;;  %v5501_v18 = vmul.f32 0.5, %v5500_v62  ;;  %v14336_v13 = vadd.f32 1e-05, %v5291_v32  ;;  %v5212_v32 = vpop.xlane.xlu0 %5211 }
 0x629   : > { %v7386_v45 = vsub.f32 1.0, %v7385_v20  ;;  %8957 = vrcp.f32 %v14299_v4  ;;  %vm5484_vm9 = vweird.f32 %v14080_v28  ;;  %v7277_v6 = vsel %vm7274_vm10, %v7276_v53, %v7272_v15  ;;  %v9142_v20 = vld [vmem:[%s9400_s23 + $0xb8] sm:$0xff] }
 0x62a   : > { %v14350_v55 = vsel %vm5173_vm11, %v14200_v31, 0.0  ;;  %v14353_v2 = vmul.f32 %v5427_v46, %v13556_v54  ;;  %vm14357_vm15 = vmor %vm5484_vm9, %vm5485_vm6  ;;  %8959 = vrsqrt.f32 %v14312_v52  ;;  %vm7389_vm4 = vweird.f32 %v13990_v1  ;;  %v8541_v31 = vld [vmem:[%s16989_s8 + $0x18] sm:$0xff]  ;;  %v8544_v54 = vld [vmem:[%s16989_s8 + $0x30] sm:$0xff] }
 0x62b   : > { %vm7390_vm3 = vweird.f32 %v14060_v16  ;;  %v14370_v5 = vpop.eup %8955  ;;  %v14373_v50 = vmul.f32 %v5437_v60, %v13581_v29  ;;  %v14376_v22 = vmul.f32 %v5447_v17, %v13605_v3  ;;  %v5487_v40 = vsel %vm14357_vm15, %v14159_v41, %v5483_v49  ;;  %5923 = vmatpush.bf16.msrb.mxu0 %v8541_v31  ;;  %5970 = vmatpush.bf16.msrb.mxu1 %v8544_v54  ;;  %v8540_v3 = vld [vmem:[%s16989_s8 + $0x10] sm:$0xff]  ;;  %v8543_v41 = vld [vmem:[%s16989_s8 + $0x28] sm:$0xff] }
 0x62c   : > { %v5457_v62 = vsel %vm14344_vm14, %v14148_v34, %v5453_v11  ;;  %v5502_v8 = vsub.f32 1.5, %v5501_v18  ;;  %8961 = vrsqrt.f32 %v14336_v13  ;;  %v7278_v0 = vmul.f32 %v9142_v20, %v7277_v6  ;;  %vm14398_vm11 = vmor %vm7389_vm4, %vm7390_vm3 }
 0x62d   : > { %v7387_v29 = vmul.f32 %v14060_v16, %v7386_v45  ;;  %v5289_v34 = vmul.f32 %v13998_v35, %v5218_v51  ;;  %v7393_v7 = vand.u32 2147483647, %v13990_v1  ;;  %v7395_v15 = vand.u32 2147483648, %v13990_v1 }
 0x62e   : > { %v7250_v46 = vmul.f32 %v14068_v63, %v14004_v33  ;;  %v5519_v60 = vmul.f32 %v14370_v5, %v14265_v59  ;;  %v5293_v43 = vmul.f32 %v13998_v35, %v14267_v21  ;;  %v5287_v49 = vmul.f32 %v13998_v35, %v5212_v32  ;;  %8447 = vmatpush.xpose.msk.msra.mxu2 %vm17158_vm0, %v7278_v0  ;;  %v8542_v32 = vld [vmem:[%s16989_s8 + $0x20] sm:$0xff] }
 0x62f   : > { %v7388_v11 = vadd.f32 %v14060_v16, %v7387_v29  ;;  %v14413_v17 = vpop.eup %8957  ;;  %vm7394_vm8 = vcmp.eq.f32.partialorder %v7393_v7, 8.507059e+37  ;;  %v7396_v18 = vor.u32 1.1754944e-38, %v7395_v15  ;;  %vm7254_vm13 = vweird.f32 %v14004_v33  ;;  %5924 = vmatpush.bf16.msrb.mxu0 %v8540_v3  ;;  %5971 = vmatpush.bf16.msrb.mxu1 %v8543_v41  ;;  %v9144_v15 = vld [vmem:[%s9400_s23 + $0x80] sm:$0xff] }
 0x630   : > { %v7251_v1 = vsub.f32 1.0, %v7250_v46  ;;  %v14416_v45 = vpop.eup %8959  ;;  %vm7255_vm5 = vweird.f32 %v14068_v63  ;;  %v7258_v47 = vand.u32 2147483647, %v14004_v33  ;;  %v7260_v6 = vand.u32 2147483648, %v14004_v33  ;;  %v9148_v7 = vld [vmem:[%s9366_s25 + $0x20] sm:$0xff] }
 0x631   : > { %v7392_v21 = vsel %vm14398_vm11, %v14060_v16, %v7388_v11  ;;  %v14425_v28 = vmul.f32 %v5487_v40, %v13613_v25  ;;  %v14428_v51 = vmul.f32 %v5457_v62, %v13626_v9  ;;  %v14430_v31 = vadd.f32 1e-05, %v5289_v34  ;;  %v8539_v16 = vld [vmem:[%s16989_s8 + $0x8] sm:$0xff]  ;;  %v9143_v40 = vld [vmem:[%s9400_s23 + $0xf8] sm:$0xff]  ;;  %vm14456_vm12 = vmor %vm7254_vm13, %vm7255_vm5 }
 0x632   : > { %v7397_v54 = vsel %vm7394_vm8, %v7396_v18, %v7392_v21  ;;  %v14438_v20 = vpop.eup %8961  ;;  %v14441_v25 = vmul.f32 %v14237_v23, %v5502_v8  ;;  %v14443_v9 = vadd.f32 1e-05, %v5287_v49  ;;  %v7252_v0 = vmul.f32 %v14068_v63, %v7251_v1  ;;  %v9146_v49 = vld [vmem:[%s9400_s23 + $0x58] sm:$0xff]  ;;  %v8538_v1 = vld [vmem:[%s16989_s8] sm:$0xff] }
 0x633   : > { %v7398_v62 = vmul.f32 %v9143_v40, %v7397_v54  ;;  %v5520_v29 = vmul.f32 %v14370_v5, %v5519_v60  ;;  %v5459_v3 = vmul.f32 %v14416_v45, %v14312_v52  ;;  %v14450_v41 = vadd.f32 1e-05, %v5293_v43  ;;  %v9145_v60 = vld [vmem:[%s9400_s23 + $0x60] sm:$0xff]  ;;  %5925 = vmatpush.bf16.msrb.mxu0 %v8539_v16  ;;  %5972 = vmatpush.bf16.msrb.mxu1 %v8542_v32 }
 0x634   : > { %v7261_v34 = vor.u32 1.1754944e-38, %v7260_v6  ;;  %v7253_v53 = vadd.f32 %v14068_v63, %v7252_v0  ;;  %vm14462_vm6 = vcmp.eq.f32.partialorder %v7258_v47, 8.507059e+37  ;;  %v6391_v46 = vmul.f32 %v9144_v15, %v9144_v15 }
 0x635   : > { %8457 = vmatpush.xpose.msk.msra.mxu3 %vm17158_vm0, %v7398_v62  ;;  %v6387_v43 = vmul.f32 %v9145_v60, %v9145_v60  ;;  %v5509_v33 = vmul.f32 %v14438_v20, %v14336_v13  ;;  %8963 = vrsqrt.f32 %v14430_v31  ;;  %v6386_v11 = vmul.f32 %v9146_v49, %v9146_v49 }
 0x636   : > { %v7235_v18 = vmul.f32 %v14194_v38, %v14087_v10  ;;  %8965 = vrsqrt.f32 %v14443_v9  ;;  %v7257_v21 = vsel %vm14456_vm12, %v14068_v63, %v7253_v53  ;;  %v6455_v47 = vsel %vm17158_vm0, %v6391_v46, 0.0  ;;  %v9147_v63 = vld [vmem:[%s9400_s23 + $0xb0] sm:$0xff]  ;;  %v9149_v46 = vld [vmem:[%s9400_s23 + $0x18] sm:$0xff] }
 0x637   : > { %v6443_v6 = vsel %vm17158_vm0, %v6387_v43, 0.0  ;;  %v7262_v54 = vsel %vm14462_vm6, %v7261_v34, %v7257_v21  ;;  %6456 = vadd.xlane.f32.xlu0 %v6455_v47  ;;  %v6440_v16 = vsel %vm17158_vm0, %v6386_v11, 0.0  ;;  %vm7239_vm10 = vweird.f32 %v14087_v10  ;;  %5926 = vmatpush.bf16.msrb.mxu0 %v8538_v1  ;;  %v9150_v43 = vld [vmem:[%s9400_s23 + $0x10] sm:$0xff] }
 0x638   : > { %6444 = vadd.xlane.f32.xlu2 %v6443_v6  ;;  %v7236_v32 = vsub.f32 1.0, %v7235_v18  ;;  %v5460_v40 = vmul.f32 %v14416_v45, %v5459_v3  ;;  %8967 = vrsqrt.f32 %v14450_v41  ;;  %v7263_v62 = vmul.f32 %v9147_v63, %v7262_v54  ;;  %6441 = vadd.xlane.f32.xlu1 %v6440_v16 }
 0x639   : > { %vm7240_vm7 = vweird.f32 %v14194_v38  ;;  %v14491_v0 = vmul.f32 0.5, %v5520_v29  ;;  %v7243_v34 = vand.u32 2147483647, %v14087_v10  ;;  %v7245_v53 = vand.u32 2147483648, %v14087_v10 }
 0x63a   : > { %v7237_v8 = vmul.f32 %v14194_v38, %v7236_v32  ;;  %8448 = vmatpush.xpose.msk.msra.mxu2 %vm17158_vm0, %v7263_v62  ;;  %vm14497_vm9 = vmor %vm7239_vm10, %vm7240_vm7  ;;  %v6123_v15 = vmul.f32 %v9148_v7, %v9148_v7  ;;  %v6378_v60 = vmul.f32 %v9149_v46, %v9149_v46  ;;  %v6377_v29 = vmul.f32 %v9150_v43, %v9150_v43 }
 0x63b   : > { %v7145_v49 = vmul.f32 %v14247_v37, %v14164_v56  ;;  %v14506_v11 = vpop.eup %8963  ;;  %v5510_v10 = vmul.f32 %v14438_v20, %v5509_v33  ;;  %vm7244_vm14 = vcmp.eq.f32.partialorder %v7243_v34, 8.507059e+37  ;;  %v7246_v1 = vor.u32 1.1754944e-38, %v7245_v53 }
 0x63c   : > { %v7238_v18 = vadd.f32 %v14194_v38, %v7237_v8  ;;  %v14510_v21 = vpop.eup %8965  ;;  %v14512_v47 = vmul.f32 0.5, %v5460_v40  ;;  %v6139_v6 = vsel %vm17158_vm0, %v6123_v15, 0.0  ;;  %v6416_v54 = vsel %vm17158_vm0, %v6378_v60, 0.0 }
 0x63d   : > { %v6413_v16 = vsel %vm17158_vm0, %v6377_v29, 0.0  ;;  %v7146_v33 = vsub.f32 1.0, %v7145_v49  ;;  %vm7149_vm15 = vweird.f32 %v14164_v56  ;;  %vm7150_vm4 = vweird.f32 %v14247_v37 }
 0x63e   : > { %v7242_v32 = vsel %vm14497_vm9, %v14194_v38, %v7238_v18  ;;  %v14522_v63 = vpop.eup %8967  ;;  %v7153_v40 = vand.u32 2147483647, %v14164_v56  ;;  %v7155_v8 = vand.u32 2147483648, %v14164_v56  ;;  %v7370_v34 = vmul.f32 %v14048_v12, %v13992_v58  ;;  %v9151_v38 = vld [vmem:[%s9400_s23 + $0xa8] sm:$0xff]  ;;  %vm14539_vm3 = vmor %vm7149_vm15, %vm7150_vm4 }
 0x63f   : > { %v7247_v62 = vsel %vm7244_vm14, %v7246_v1, %v7242_v32  ;;  %v5522_v53 = vsub.f32 1.5, %v14491_v0  ;;  %v14529_v7 = vmul.f32 0.5, %v5510_v10  ;;  %6140 = vadd.xlane.f32.xlu0 %v6139_v6  ;;  %v7147_v15 = vmul.f32 %v14247_v37, %v7146_v33  ;;  %v9165_v0 = vld [vmem:[%s9400_s23 + $0x70] sm:$0xff] }
 0x640   : > { %v7248_v3 = vmul.f32 %v9151_v38, %v7247_v62  ;;  %6417 = vadd.xlane.f32.xlu2 %v6416_v54  ;;  %v5469_v46 = vmul.f32 %v14510_v21, %v14443_v9  ;;  %6414 = vadd.xlane.f32.xlu1 %v6413_v16  ;;  %v7156_v43 = vor.u32 1.1754944e-38, %v7155_v8  ;;  %v7371_v29 = vsub.f32 1.0, %v7370_v34  ;;  %v5239_v54 = vpop.xlane.xlu1 %5238 }
 0x641   : > { %vm7374_vm11 = vweird.f32 %v13992_v58  ;;  %v7148_v49 = vadd.f32 %v14247_v37, %v7147_v15  ;;  %vm7154_vm8 = vcmp.eq.f32.partialorder %v7153_v40, 8.507059e+37  ;;  %vm7375_vm13 = vweird.f32 %v14048_v12 }
 0x642   : > { %8449 = vmatpush.xpose.msk.msra.mxu2 %vm17158_vm0, %v7248_v3  ;;  %v7378_v10 = vand.u32 2147483647, %v13992_v58  ;;  %v14550_v56 = vmul.f32 %v14506_v11, %v14430_v31  ;;  %v7372_v18 = vmul.f32 %v14048_v12, %v7371_v29  ;;  %v7380_v1 = vand.u32 2147483648, %v13992_v58  ;;  %vm14559_vm5 = vmor %vm7374_vm11, %vm7375_vm13 }
 0x643   : > { %v7025_v6 = vmul.f32 %v14171_v48, %v14082_v44  ;;  %v7152_v16 = vsel %vm14539_vm3, %v14247_v37, %v7148_v49  ;;  %vm7029_vm6 = vweird.f32 %v14082_v44  ;;  %vm7030_vm10 = vweird.f32 %v14171_v48  ;;  %v9152_v37 = vld [vmem:[%s9400_s23 + $0x78] sm:$0xff] }
 0x644   : > { %vm14563_vm12 = vcmp.eq.f32.partialorder %v7378_v10, 8.507059e+37  ;;  %v7157_v58 = vsel %vm7154_vm8, %v7156_v43, %v7152_v16  ;;  %v7373_v62 = vadd.f32 %v14048_v12, %v7372_v18  ;;  %v7381_v40 = vor.u32 1.1754944e-38, %v7380_v1  ;;  %v14574_v60 = vpop.xlane.xlu0 %5250  ;;  %vm14590_vm7 = vmor %vm7029_vm6, %vm7030_vm10 }
 0x645   : > { %v7026_v8 = vsub.f32 1.0, %v7025_v6  ;;  %v5470_v34 = vmul.f32 %v14510_v21, %v5469_v46  ;;  %v7158_v38 = vmul.f32 %v9152_v37, %v7157_v58  ;;  %v7033_v3 = vand.u32 2147483647, %v14082_v44  ;;  %v9153_v6 = vld [vmem:[%s9400_s23 + $0xf0] sm:$0xff] }
 0x646   : > { %v7035_v15 = vand.u32 2147483648, %v14082_v44  ;;  %v5296_v29 = vmul.f32 %v13998_v35, %v5239_v54  ;;  %v7377_v43 = vsel %vm14559_vm5, %v14048_v12, %v7373_v62  ;;  %v7355_v46 = vmul.f32 %v14211_v24, %v14125_v27  ;;  %v9154_v62 = vld [vmem:[%s9400_s23 + $0xc0] sm:$0xff] }
 0x647   : > { %v7027_v49 = vmul.f32 %v14171_v48, %v7026_v8  ;;  %8437 = vmatpush.xpose.msk.msra.mxu1 %vm17158_vm0, %v7158_v38  ;;  %v7382_v10 = vsel %vm14563_vm12, %v7381_v40, %v7377_v43  ;;  %vm14594_vm9 = vcmp.eq.f32.partialorder %v7033_v3, 8.507059e+37  ;;  %5175 = vadd.xlane.f32.xlu0 %v14245_v42  ;;  %vm7359_vm14 = vweird.f32 %v14125_v27 }
 0x648   : > { %v7036_v1 = vor.u32 1.1754944e-38, %v7035_v15  ;;  %v7383_v54 = vmul.f32 %v9153_v6, %v7382_v10  ;;  %v7356_v32 = vsub.f32 1.0, %v7355_v46  ;;  %vm7360_vm15 = vweird.f32 %v14211_v24  ;;  %5171 = vadd.xlane.f32.xlu1 %v14215_v30  ;;  %v9160_v6 = vld [vmem:[%s9366_s25 + $0x30] sm:$0xff] }
 0x649   : > { %v7028_v16 = vadd.f32 %v14171_v48, %v7027_v49  ;;  %v14604_v44 = vmul.f32 0.5, %v5470_v34  ;;  %v7363_v33 = vand.u32 2147483647, %v14125_v27  ;;  %v7365_v58 = vand.u32 2147483648, %v14125_v27  ;;  %vm14622_vm4 = vmor %vm7359_vm14, %vm7360_vm15 }
 0x64a   : > { %v6399_v42 = vmul.f32 %v9154_v62, %v9154_v62  ;;  %v14609_v40 = vadd.f32 1e-05, %v5296_v29  ;;  %8458 = vmatpush.xpose.msk.msra.mxu3 %vm17158_vm0, %v7383_v54  ;;  %v7357_v37 = vmul.f32 %v14211_v24, %v7356_v32  ;;  %v7010_v30 = vmul.f32 %v14269_v26, %v14203_v36  ;;  %v9155_v29 = vld [vmem:[%s9400_s23 + $0x38] sm:$0xff] }
 0x64b   : > { %v7032_v8 = vsel %vm14590_vm7, %v14171_v48, %v7028_v16  ;;  %vm14626_vm3 = vcmp.eq.f32.partialorder %v7363_v33, 8.507059e+37  ;;  %v7366_v15 = vor.u32 1.1754944e-38, %v7365_v58  ;;  %vm5505_vm11 = vweird.f32 %v14237_v23  ;;  %v9156_v33 = vld [vmem:[%s9400_s23 + $0xe8] sm:$0xff] }
 0x64c   : > { %v7037_v34 = vsel %vm14594_vm9, %v7036_v1, %v7032_v8  ;;  %v6479_v48 = vsel %vm17158_vm0, %v6399_v42, 0.0  ;;  %v7358_v49 = vadd.f32 %v14211_v24, %v7357_v37  ;;  %v7011_v46 = vsub.f32 1.0, %v7010_v30  ;;  %v5233_v32 = vpop.xlane.xlu0 %5232  ;;  %v9157_v30 = vld [vmem:[%s9400_s23 + $0x50] sm:$0xff] }
 0x64d   : > { %v7038_v43 = vmul.f32 %v9155_v29, %v7037_v34  ;;  %6480 = vadd.xlane.f32.xlu2 %v6479_v48  ;;  %vm7014_vm8 = vweird.f32 %v14203_v36  ;;  %vm7015_vm13 = vweird.f32 %v14269_v26  ;;  %v7018_v27 = vand.u32 2147483647, %v14203_v36 }
 0x64e   : > { %v7020_v10 = vand.u32 2147483648, %v14203_v36  ;;  %v7220_v18 = vmul.f32 %v14260_v39, %v14183_v14  ;;  %vm5504_vm5 = vweird.f32 %v14152_v61  ;;  %v7362_v12 = vsel %vm14622_vm4, %v14211_v24, %v7358_v49  ;;  %vm14650_vm10 = vmor %vm7014_vm8, %vm7015_vm13 }
 0x64f   : > { %8427 = vmatpush.xpose.msk.msra.mxu0 %vm17158_vm0, %v7038_v43  ;;  %v7012_v1 = vmul.f32 %v14269_v26, %v7011_v46  ;;  %vm7224_vm12 = vweird.f32 %v14183_v14  ;;  %vm7225_vm6 = vweird.f32 %v14260_v39  ;;  %v7367_v36 = vsel %vm14626_vm3, %v7366_v15, %v7362_v12  ;;  %5181 = vadd.xlane.f32.xlu0 %v14350_v55  ;;  %v9158_v43 = vld [vmem:[%s9400_s23 + $0x30] sm:$0xff]  ;;  %vm14717_vm8 = vmor %vm5504_vm5, %vm5505_vm11 }
 0x650   : > { %vm14654_vm7 = vcmp.eq.f32.partialorder %v7018_v27, 8.507059e+37  ;;  %v7021_v16 = vor.u32 1.1754944e-38, %v7020_v10  ;;  %v7221_v24 = vsub.f32 1.0, %v7220_v18  ;;  %v7368_v58 = vmul.f32 %v9156_v33, %v7367_v36  ;;  %5178 = vadd.xlane.f32.xlu1 %v14218_v19  ;;  %vm14677_vm14 = vmor %vm7224_vm12, %vm7225_vm6  ;;  %v9159_v10 = vld [vmem:[%s9400_s23] sm:$0xff] }
 0x651   : > { %v7013_v62 = vadd.f32 %v14269_v26, %v7012_v1  ;;  %v7228_v42 = vand.u32 2147483647, %v14183_v14  ;;  %v7230_v8 = vand.u32 2147483648, %v14183_v14  ;;  %v6385_v34 = vmul.f32 %v9157_v30, %v9157_v30 }
 0x652   : > { %v7222_v37 = vmul.f32 %v14260_v39, %v7221_v24  ;;  %v7130_v55 = vmul.f32 %v14413_v17, %v14299_v4  ;;  %vm7134_vm9 = vweird.f32 %v14299_v4  ;;  %8459 = vmatpush.xpose.msk.msra.mxu3 %vm17158_vm0, %v7368_v58  ;;  %vm7135_vm4 = vweird.f32 %v14413_v17 }
 0x653   : > { %v7017_v38 = vsel %vm14650_vm10, %v14269_v26, %v7013_v62  ;;  %vm14681_vm15 = vcmp.eq.f32.partialorder %v7228_v42, 8.507059e+37  ;;  %v7231_v15 = vor.u32 1.1754944e-38, %v7230_v8  ;;  %v6437_v14 = vsel %vm17158_vm0, %v6385_v34, 0.0  ;;  %vm14708_vm3 = vmor %vm7134_vm9, %vm7135_vm4  ;;  %v9162_v8 = vld [vmem:[%s9400_s23 + $0xa0] sm:$0xff] }
 0x654   : > { %v7022_v48 = vsel %vm14654_vm7, %v7021_v16, %v7017_v38  ;;  %v7223_v26 = vadd.f32 %v14260_v39, %v7222_v37  ;;  %v7131_v29 = vsub.f32 1.0, %v7130_v55  ;;  %v7138_v46 = vand.u32 2147483647, %v14299_v4  ;;  %v9161_v16 = vld [vmem:[%s9400_s23 + $0x48] sm:$0xff]  ;;  %v9163_v38 = vld [vmem:[%s9366_s25 + $0x38] sm:$0x3] }
 0x655   : > { %v7023_v49 = vmul.f32 %v9158_v43, %v7022_v48  ;;  %6438 = vadd.xlane.f32.xlu2 %v6437_v14  ;;  %v7140_v27 = vand.u32 2147483648, %v14299_v4  ;;  %v6375_v18 = vmul.f32 %v9159_v10, %v9159_v10  ;;  %v6125_v54 = vmul.f32 %v9160_v6, %v9160_v6  ;;  %v5242_v43 = vpop.xlane.xlu0 %5241 }
 0x656   : > { %v7227_v1 = vsel %vm14677_vm14, %v14260_v39, %v7223_v26  ;;  %v7132_v36 = vmul.f32 %v14413_v17, %v7131_v29  ;;  %v6384_v24 = vmul.f32 %v9161_v16, %v9161_v16  ;;  %8969 = vrsqrt.f32 %v14609_v40  ;;  %v9164_v26 = vld [vmem:[%s9400_s23 + $0x40] sm:$0xff] }
 0x657   : > { %8428 = vmatpush.xpose.msk.msra.mxu0 %vm17158_vm0, %v7023_v49  ;;  %v7232_v33 = vsel %vm14681_vm15, %v7231_v15, %v7227_v1  ;;  %v7141_v58 = vor.u32 1.1754944e-38, %v7140_v27  ;;  %v6407_v62 = vsel %vm17158_vm0, %v6375_v18, 0.0  ;;  %vm14723_vm13 = vcmp.eq.f32.partialorder %v7138_v46, 8.507059e+37 }
 0x658   : > { %v7233_v37 = vmul.f32 %v9162_v8, %v7232_v33  ;;  %v7133_v4 = vadd.f32 %v14413_v17, %v7132_v36  ;;  %6408 = vadd.xlane.f32.xlu0 %v6407_v62  ;;  %v6434_v34 = vsel %vm17158_vm0, %v6384_v24, 0.0  ;;  %v5507_v61 = vsel %vm14717_vm8, %v14237_v23, %v14441_v25 }
 0x659   : > { %v5462_v55 = vsub.f32 1.5, %v14512_v47  ;;  %6435 = vadd.xlane.f32.xlu1 %v6434_v34  ;;  %v6126_v19 = vmul.f32 %v9163_v38, %v9163_v38  ;;  %v5300_v3 = vmul.f32 %v13998_v35, %v14574_v60  ;;  %v6145_v48 = vsel %vm17158_vm0, %v6125_v54, 0.0  ;;  %v17839_v54 = vld [vmem:[#allocation19_spill] sm:$0xff]  ;;  %v9167_v38 = vld [vmem:[%s9366_s25 + $0x10] sm:$0xff] }
 0x65a   : > { %v5245_v12 = vpop.xlane.xlu2 %5244  ;;  %8450 = vmatpush.xpose.msk.msra.mxu2 %vm17158_vm0, %v7233_v37  ;;  %v7137_v15 = vsel %vm14708_vm3, %v14413_v17, %v7133_v4  ;;  %v6383_v14 = vmul.f32 %v9164_v26, %v9164_v26  ;;  %v5294_v29 = vmul.f32 %v13998_v35, %v5233_v32  ;;  %v14746_v49 = vmul.f32 %v14370_v5, %v5522_v53 }
 0x65b   : > { %v5512_v60 = vsub.f32 1.5, %v14529_v7  ;;  %v5529_v46 = vmul.f32 %v14522_v63, %v14450_v41  ;;  %v7142_v17 = vsel %vm14723_vm13, %v7141_v58, %v7137_v15  ;;  %vm5465_vm11 = vweird.f32 %v14416_v45 }
 0x65c   : > { %v5490_v32 = vmul.f32 %v14506_v11, %v14550_v56  ;;  %v5472_v27 = vsub.f32 1.5, %v14604_v44  ;;  %v7143_v10 = vmul.f32 %v9165_v0, %v7142_v17  ;;  %v14758_v53 = vadd.f32 1e-05, %v5300_v3  ;;  %v14760_v18 = vpop.eup %8969  ;;  %v9166_v44 = vld [vmem:[%s9400_s23 + $0x8] sm:$0xff] }
 0x65d   : > { %vm5525_vm5 = vweird.f32 %v14370_v5  ;;  %6146 = vadd.xlane.f32.xlu2 %v6145_v48  ;;  %v6148_v1 = vsel %vm17162_vm2, %v6126_v19, 0.0  ;;  %v14764_v36 = vadd.f32 1e-05, %v5294_v29  ;;  %v5298_v6 = vmul.f32 %v13998_v35, %v5245_v12  ;;  %v5263_v0 = vpop.xlane.xlu0 %5262 }
 0x65e   : > { %v7340_v56 = vmul.f32 %v17839_v54, %v14139_v57  ;;  %vm5464_vm12 = vweird.f32 %v14312_v52  ;;  %8438 = vmatpush.xpose.msk.msra.mxu1 %vm17158_vm0, %v7143_v10  ;;  %v6376_v24 = vmul.f32 %v9166_v44, %v9166_v44  ;;  %v6431_v33 = vsel %vm17158_vm0, %v6383_v14, 0.0  ;;  %v17857_v52 = vld [vmem:[#allocation58_spill] sm:$0xff] }
 0x65f   : > { %8971 = vrsqrt.f32 %v14758_v53  ;;  %vm7344_vm6 = vweird.f32 %v14139_v57  ;;  %vm5524_vm10 = vweird.f32 %v14265_v59  ;;  %v14776_v12 = vadd.f32 1e-05, %v5298_v6  ;;  %v9168_v6 = vld [vmem:[%s9366_s25 + $0x28] sm:$0x3] }
 0x660   : > { %v7341_v39 = vsub.f32 1.0, %v7340_v56  ;;  %vm7345_vm7 = vweird.f32 %v17839_v54  ;;  %v7348_v58 = vand.u32 2147483647, %v14139_v57  ;;  %v5530_v62 = vmul.f32 %v14522_v63, %v5529_v46  ;;  %6149 = vadd.xlane.f32.xlu0 %v6148_v1 }
 0x661   : > { %v5559_v8 = vmul.f32 %v14760_v18, %v14609_v40  ;;  %v7350_v37 = vand.u32 2147483648, %v14139_v57  ;;  %v5297_v4 = vmul.f32 %v13998_v35, %v5242_v43  ;;  %vm5515_vm9 = vweird.f32 %v14438_v20  ;;  %6432 = vadd.xlane.f32.xlu1 %v6431_v33  ;;  %vm14795_vm14 = vmor %vm7344_vm6, %vm7345_vm7 }
 0x662   : > { %v5254_v16 = vpop.xlane.xlu2 %5253  ;;  %v5248_v30 = vpop.xlane.xlu1 %5247  ;;  %v5491_v34 = vmul.f32 0.5, %v5490_v32  ;;  %v6121_v19 = vmul.f32 %v9167_v38, %v9167_v38  ;;  %8973 = vrsqrt.f32 %v14764_v36  ;;  %v7342_v3 = vmul.f32 %v17839_v54, %v7341_v39  ;;  %v9169_v39 = vld [vmem:[%s9400_s23 + $0xe0] sm:$0xff] }
 0x663   : > { %v6410_v15 = vsel %vm17158_vm0, %v6376_v24, 0.0  ;;  %8975 = vrsqrt.f32 %v14776_v12  ;;  %v7351_v26 = vor.u32 1.1754944e-38, %v7350_v37  ;;  %v14799_v14 = vadd.f32 1e-05, %v5297_v4 }
 0x664   : > { %vm5514_vm15 = vweird.f32 %v14336_v13  ;;  %v5473_v29 = vmul.f32 %v14510_v21, %v5472_v27  ;;  %vm5475_vm4 = vweird.f32 %v14510_v21  ;;  %v7343_v43 = vadd.f32 %v17839_v54, %v7342_v3 }
 0x665   : > { %vm14805_vm3 = vcmp.eq.f32.partialorder %v7348_v58, 8.507059e+37  ;;  %v14809_v57 = vpop.eup %8971  ;;  %v5463_v17 = vmul.f32 %v14416_v45, %v5462_v55  ;;  %vm5494_vm13 = vweird.f32 %v14430_v31  ;;  %v5560_v32 = vmul.f32 %v14760_v18, %v5559_v8  ;;  %6411 = vadd.xlane.f32.xlu2 %v6410_v15  ;;  %v17850_v15 = vld [vmem:[#allocation67_spill] sm:$0xff] }
 0x666   : > { %8977 = vrsqrt.f32 %v14799_v14  ;;  %v5301_v27 = vmul.f32 %v13998_v35, %v5254_v16  ;;  %v5492_v10 = vsub.f32 1.5, %v5491_v34  ;;  %v5531_v1 = vmul.f32 0.5, %v5530_v62 }
 0x667   : > { %vm5474_vm6 = vweird.f32 %v14443_v9  ;;  %v7347_v47 = vsel %vm14795_vm14, %v17839_v54, %v7343_v43  ;;  %vm5495_vm7 = vweird.f32 %v14506_v11  ;;  %v6124_v56 = vmul.f32 %v9168_v6, %v9168_v6  ;;  %vm14839_vm14 = vmor %vm5464_vm12, %vm5465_vm11  ;;  %v14932_v54 = vpop.xlane.xlu0 %6489 }
 0x668   : > { %vm14825_vm1 = vmor %vm5474_vm6, %vm5475_vm4  ;;  %v6133_v16 = vsel %vm17158_vm0, %v6121_v19, 0.0  ;;  %v7352_v9 = vsel %vm14805_vm3, %v7351_v26, %v7347_v47  ;;  %v14833_v44 = vpop.eup %8973  ;;  %vm5535_vm4 = vweird.f32 %v14522_v63  ;;  %v5599_v33 = vmul.f32 %v14809_v57, %v14758_v53 }
 0x669   : > { %v5477_v24 = vsel %vm14825_vm1, %v14510_v21, %v5473_v29  ;;  %v7353_v58 = vmul.f32 %v9169_v39, %v7352_v9  ;;  %v5299_v62 = vmul.f32 %v13998_v35, %v5248_v30  ;;  %v14851_v37 = vpop.eup %8975  ;;  %vm14857_vm11 = vmor %vm5524_vm10, %vm5525_vm5  ;;  %v5467_v21 = vsel %vm14839_vm14, %v14416_v45, %v5463_v17  ;;  %6134 = vadd.xlane.f32.xlu1 %v6133_v16  ;;  %v9170_v16 = vld [vmem:[%s9366_s25] sm:$0xff] }
 0x66a   : > { %v5236_v8 = vpop.xlane.xlu2 %5235  ;;  %v5561_v4 = vmul.f32 0.5, %v5560_v32  ;;  %v14864_v34 = vadd.f32 1e-05, %v5301_v27  ;;  %v5304_v30 = vmul.f32 %v13998_v35, %v5263_v0  ;;  %v5527_v38 = vsel %vm14857_vm11, %v14370_v5, %v14746_v49  ;;  %v14883_v7 = vpop.xlane.xlu1 %6465  ;;  %v17851_v49 = vld [vmem:[#allocation52_spill] sm:$0xff]  ;;  %vm14895_vm1 = vmor %vm5514_vm15, %vm5515_vm9 }
 0x66b   : > { %v5513_v59 = vmul.f32 %v14438_v20, %v5512_v60  ;;  %v5493_v19 = vmul.f32 %v14506_v11, %v5492_v10  ;;  %v5532_v3 = vsub.f32 1.5, %v5531_v1  ;;  %8460 = vmatpush.xpose.msk.msra.mxu3 %vm17158_vm0, %v7353_v58  ;;  %v5671_v48 = vmul.f32 %v5477_v24, %v17850_v15  ;;  %v14904_v10 = vld [vmem:[%s16990_s9] ss:$0 sm:$0xff]  ;;  %vm14916_vm5 = vmor %vm5494_vm13, %vm5495_vm7 }
 0x66c   : > { %v14876_v45 = vpop.eup %8977  ;;  %v6142_v26 = vsel %vm17162_vm2, %v6124_v56, 0.0  ;;  %v5539_v29 = vmul.f32 %v14833_v44, %v14764_v36  ;;  %v5295_v5 = vmul.f32 %v13998_v35, %v5236_v8  ;;  %v5670_v60 = vmul.f32 %v5467_v21, %v17851_v49 }
 0x66d   : > { %v5600_v43 = vmul.f32 %v14809_v57, %v5599_v33  ;;  %v5579_v46 = vmul.f32 %v14851_v37, %v14776_v12  ;;  %v14889_v17 = vadd.f32 1e-05, %v5299_v62  ;;  %v5562_v27 = vsub.f32 1.5, %v5561_v4  ;;  %6143 = vadd.xlane.f32.xlu2 %v6142_v26  ;;  %v17856_v62 = vld [vmem:[#allocation48_spill] sm:$0xff] }
 0x66e   : > { %v5569_v0 = vmul.f32 %v14876_v45, %v14799_v14  ;;  %8979 = vrsqrt.f32 %v14864_v34  ;;  %v14907_v1 = vadd.f32 1e-05, %v5304_v30  ;;  %v5517_v13 = vsel %vm14895_vm1, %v14438_v20, %v5513_v59  ;;  %v17861_v59 = vld [vmem:[#allocation63_spill] sm:$0xff] }
 0x66f   : > { %v14921_v55 = vmul.f32 %v14522_v63, %v5532_v3  ;;  %v14923_v6 = vadd.f32 1e-05, %v5295_v5  ;;  %8981 = vrsqrt.f32 %v14883_v7  ;;  %v5497_v20 = vsel %vm14916_vm5, %v14506_v11, %v5493_v19 }
 0x670   : > { %v5540_v56 = vmul.f32 %v14833_v44, %v5539_v29  ;;  %v6119_v31 = vmul.f32 %v9170_v16, %v9170_v16  ;;  %v5706_v9 = vmul.f32 %v14904_v10, %v5671_v48  ;;  %vm5565_vm12 = vweird.f32 %v14760_v18 }
 0x671   : > { %v5601_v24 = vmul.f32 0.5, %v5600_v43  ;;  %v5580_v33 = vmul.f32 %v14851_v37, %v5579_v46  ;;  %8983 = vrsqrt.f32 %v14889_v17  ;;  %v14938_v39 = vmul.f32 %v14760_v18, %v5562_v27 }
 0x672   : > { %v5570_v11 = vmul.f32 %v14876_v45, %v5569_v0  ;;  %v5705_v58 = vmul.f32 %v14904_v10, %v5670_v60  ;;  %8985 = vrsqrt.f32 %v14907_v1  ;;  %v14949_v8 = vmul.f32 %v5507_v61, %v17856_v62  ;;  %v5257_v48 = vpop.xlane.xlu2 %5256  ;;  %v5260_v0 = vpop.xlane.xlu1 %5259 }
 0x673   : > { %v14952_v21 = vmul.f32 %v5527_v38, %v17857_v52  ;;  %vm5534_vm10 = vweird.f32 %v14450_v41  ;;  %8987 = vrsqrt.f32 %v14923_v6  ;;  %vm5564_vm15 = vweird.f32 %v14609_v40  ;;  %v17860_v38 = vld [vmem:[#allocation64_spill] sm:$0xff] }
 0x674   : > { %v14956_v4 = vpop.eup %8979  ;;  %vm14960_vm9 = vmor %vm5534_vm10, %vm5535_vm4  ;;  %v5541_v23 = vmul.f32 0.5, %v5540_v56  ;;  %v6127_v25 = vsel %vm17158_vm0, %v6119_v31, 0.0  ;;  %v8575_v42 = vpack.i.bf16 %v5706_v9, %v5705_v58  ;;  %v14969_v41 = vmul.f32 %v5517_v13, %v17860_v38  ;;  %v15011_v31 = vpop.xlane.xlu0 %6462 }
 0x675   : > { %v14966_v61 = vpop.eup %8981  ;;  %v5673_v19 = vmul.f32 %v5497_v20, %v17861_v59  ;;  %vm14974_vm8 = vmor %vm5564_vm15, %vm5565_vm12  ;;  %v5602_v15 = vsub.f32 1.5, %v5601_v24  ;;  %v5581_v40 = vmul.f32 0.5, %v5580_v33  ;;  %v5537_v26 = vsel %vm14960_vm9, %v14522_v63, %v14921_v55  ;;  %6128 = vadd.xlane.f32.xlu2 %v6127_v25  ;;  %v9171_v63 = vld [vmem:[%s9366_s25 + $0x8] sm:$0x3] }
 0x676   : > { %v5567_v29 = vsel %vm14974_vm8, %v14760_v18, %v14938_v39  ;;  %vm5604_vm3 = vweird.f32 %v14758_v53  ;;  %v5571_v5 = vmul.f32 0.5, %v5570_v11  ;;  %8576 = vrot.lane.b32.xlu0 %v8575_v42, %s9250_s17  ;;  %vm5544_vm13 = vweird.f32 %v14764_v36  ;;  %v17877_v39 = vld [vmem:[#allocation70_spill] sm:$0xff] }
 0x677   : > { %v14988_v49 = vpop.eup %8983  ;;  %v5609_v60 = vmul.f32 %v14956_v4, %v14864_v34  ;;  %v6120_v43 = vmul.f32 %v9171_v63, %v9171_v63  ;;  %8989 = vrsqrt.f32 %v14932_v54  ;;  %v5542_v32 = vsub.f32 1.5, %v5541_v23 }
 0x678   : > { %v14995_v46 = vpop.eup %8985  ;;  %vm5584_vm6 = vweird.f32 %v14776_v12  ;;  %vm5574_vm7 = vweird.f32 %v14799_v14  ;;  %v6732_v27 = vmul.f32 %v14966_v61, %v14883_v7  ;;  %v5603_v47 = vmul.f32 %v14809_v57, %v5602_v15 }
 0x679   : > { %v15001_v13 = vpop.eup %8987  ;;  %vm5605_vm14 = vweird.f32 %v14809_v57  ;;  %vm5545_vm4 = vweird.f32 %v14833_v44  ;;  %v5582_v55 = vsub.f32 1.5, %v5581_v40  ;;  %vm5585_vm11 = vweird.f32 %v14851_v37 }
 0x67a   : > { %v5572_v20 = vsub.f32 1.5, %v5571_v5  ;;  %v5589_v56 = vmul.f32 %v14988_v49, %v14889_v17  ;;  %v5549_v16 = vmul.f32 %v15001_v13, %v14923_v6  ;;  %vm5575_vm1 = vweird.f32 %v14876_v45  ;;  %vm15020_vm5 = vmor %vm5604_vm3, %vm5605_vm14 }
 0x67b   : > { %v5610_v9 = vmul.f32 %v14956_v4, %v5609_v60  ;;  %v6130_v24 = vsel %vm17162_vm2, %v6120_v43, 0.0  ;;  %v5639_v33 = vmul.f32 %v14995_v46, %v14907_v1  ;;  %v5543_v58 = vmul.f32 %v14833_v44, %v5542_v32  ;;  %vm15045_vm12 = vmor %vm5544_vm13, %vm5545_vm4 }
 0x67c   : > { %v5550_v62 = vmul.f32 %v15001_v13, %v5549_v16  ;;  %v6733_v52 = vmul.f32 %v14966_v61, %v6732_v27  ;;  %v5302_v30 = vmul.f32 %v13998_v35, %v5257_v48  ;;  %v5607_v25 = vsel %vm15020_vm5, %v14809_v57, %v5603_v47  ;;  %vm15060_vm10 = vmor %vm5584_vm6, %vm5585_vm11  ;;  %v17873_v16 = vld [vmem:[#allocation66_spill] sm:$0xff] }
 0x67d   : > { %v15028_v23 = vpop.eup %8989  ;;  %v5583_v53 = vmul.f32 %v14851_v37, %v5582_v55  ;;  %v5303_v42 = vmul.f32 %v13998_v35, %v5260_v0  ;;  %8991 = vrsqrt.f32 %v15011_v31  ;;  %v5573_v38 = vmul.f32 %v14876_v45, %v5572_v20  ;;  %6131 = vadd.xlane.f32.xlu2 %v6130_v24  ;;  %vm15080_vm9 = vmor %vm5574_vm7, %vm5575_vm1 }
 0x67e   : > { %v5590_v59 = vmul.f32 %v14988_v49, %v5589_v56  ;;  %v5708_v15 = vmul.f32 %v14904_v10, %v5673_v19  ;;  %v15039_v40 = vadd.f32 1e-05, %v5302_v30  ;;  %v5611_v48 = vmul.f32 0.5, %v5610_v9  ;;  %v15054_v19 = vpop.xlane.xlu2 %6423  ;;  %v15089_v56 = vpop.xlane.xlu1 %6447  ;;  %v17874_v9 = vld [vmem:[#allocation68_spill] sm:$0xff]  ;;  %v17875_v30 = vld [vmem:[#allocation69_spill] sm:$0xff] }
 0x67f   : > { %v5640_v5 = vmul.f32 %v14995_v46, %v5639_v33  ;;  %v5707_v60 = vmul.f32 %v14904_v10, %v14425_v28  ;;  %v15052_v63 = vadd.f32 1e-05, %v5303_v42  ;;  %v5551_v43 = vmul.f32 0.5, %v5550_v62  ;;  %v17870_v28 = vld [vmem:[#allocation65_spill] sm:$0xff] }
 0x680   : > { %v6734_v32 = vmul.f32 0.5, %v6733_v52  ;;  %v6828_v27 = vmul.f32 %v15028_v23, %v14932_v54  ;;  %8993 = vrsqrt.f32 %v15039_v40  ;;  %v15068_v0 = vmul.f32 %v5537_v26, %v17870_v28 }
 0x681   : > { %v5547_v47 = vsel %vm15045_vm12, %v14833_v44, %v5543_v58  ;;  %v5587_v12 = vsel %vm15060_vm10, %v14851_v37, %v5583_v53  ;;  %8995 = vrsqrt.f32 %v15052_v63  ;;  %v5577_v26 = vsel %vm15080_vm9, %v14876_v45, %v5573_v38  ;;  %v17876_v53 = vld [vmem:[#allocation71_spill] sm:$0xff] }
 0x682   : > { %v5591_v20 = vmul.f32 0.5, %v5590_v59  ;;  %v8585_v44 = vpack.i.bf16 %v5708_v15, %v5707_v60  ;;  %8997 = vrsqrt.f32 %v15054_v19  ;;  %v5680_v14 = vmul.f32 %v5567_v29, %v17873_v16  ;;  %v5188_v16 = vpop.xlane.xlu0 %5187 }
 0x683   : > { %v15091_v37 = vpop.eup %8991  ;;  %v15100_v24 = vmul.f32 %v5607_v25, %v17874_v9  ;;  %v5612_v33 = vsub.f32 1.5, %v5611_v48  ;;  %v5641_v45 = vmul.f32 0.5, %v5640_v5  ;;  %v5552_v11 = vsub.f32 1.5, %v5551_v43 }
 0x684   : > { %v6735_v58 = vsub.f32 1.5, %v6734_v32  ;;  %v6829_v62 = vmul.f32 %v15028_v23, %v6828_v27  ;;  %8586 = vrot.lane.b32.xlu1 %v8585_v44, %s9250_s17  ;;  %v6720_v52 = vmul.f32 %v15091_v37, %v15011_v31  ;;  %v15107_v3 = vmul.f32 %v5547_v47, %v17875_v30 }
 0x685   : > { %v15110_v18 = vmul.f32 %v5587_v12, %v17876_v53  ;;  %v5681_v29 = vmul.f32 %v5577_v26, %v17877_v39  ;;  %vm6738_vm15 = vcmp.eq.f32.partialorder %v14883_v7, inf  ;;  %8999 = vrsqrt.f32 %v15089_v56 }
 0x686   : > { %v15115_v25 = vpop.eup %8993  ;;  %v5592_v42 = vsub.f32 1.5, %v5591_v20  ;;  %vm5554_vm8 = vweird.f32 %v14923_v6  ;;  %v6741_v38 = vand.u32 2147483648, %v14883_v7  ;;  %v6721_v59 = vmul.f32 %v15091_v37, %v6720_v52  ;;  %v5266_v53 = vpop.xlane.xlu2 %5265 }
 0x687   : > { %v15120_v15 = vpop.eup %8995  ;;  %v15123_v57 = vmul.f32 %v14956_v4, %v5612_v33  ;;  %v5642_v48 = vsub.f32 1.5, %v5641_v45  ;;  %vm5555_vm3 = vweird.f32 %v15001_v13  ;;  %v5619_v5 = vmul.f32 %v15115_v25, %v15039_v40 }
 0x688   : > { %v8998_v60 = vpop.eup %8997  ;;  %v5553_v36 = vmul.f32 %v15001_v13, %v5552_v11  ;;  %v6736_v43 = vmul.f32 %v14966_v61, %v6735_v58  ;;  %v6830_v32 = vmul.f32 0.5, %v6829_v62  ;;  %v5629_v27 = vmul.f32 %v15120_v15, %v15052_v63  ;;  %vm15149_vm6 = vmor %vm5554_vm8, %vm5555_vm3 }
 0x689   : > { %v5620_v28 = vmul.f32 %v15115_v25, %v5619_v5  ;;  %v6564_v47 = vmul.f32 %v8998_v60, %v15054_v19  ;;  %v5715_v12 = vmul.f32 %v14904_v10, %v5680_v14  ;;  %v5716_v55 = vmul.f32 %v14904_v10, %v5681_v29 }
 0x68a   : > { %v15137_v26 = vmul.f32 %v14988_v49, %v5592_v42  ;;  %vm6740_vm13 = vcmp.eq.f32.partialorder %v14883_v7, 0.0  ;;  %v6837_v20 = vand.u32 2147483648, %v14932_v54  ;;  %v5630_v61 = vmul.f32 %v15120_v15, %v5629_v27 }
 0x68b   : > { %v6722_v44 = vmul.f32 0.5, %v6721_v59  ;;  %v9000_v9 = vpop.eup %8999  ;;  %v15143_v33 = vmul.f32 %v14995_v46, %v5642_v48  ;;  %v5621_v45 = vmul.f32 0.5, %v5620_v28  ;;  %v6565_v11 = vmul.f32 %v8998_v60, %v6564_v47  ;;  %v5185_v59 = vpop.xlane.xlu1 %5184 }
 0x68c   : > { %v8595_v14 = vpack.i.bf16 %v5716_v55, %v5715_v12  ;;  %v6737_v62 = vmul.f32 %v6736_v43, %v14883_v7  ;;  %vm5624_vm7 = vweird.f32 %v15039_v40  ;;  %v5631_v52 = vmul.f32 0.5, %v5630_v61 }
 0x68d   : > { %v6660_v30 = vmul.f32 %v9000_v9, %v15089_v56  ;;  %v5557_v39 = vsel %vm15149_vm6, %v15001_v13, %v5553_v36  ;;  %v6831_v29 = vsub.f32 1.5, %v6830_v32  ;;  %v6566_v42 = vmul.f32 0.5, %v6565_v11  ;;  %v17880_v32 = vld [vmem:[#allocation73_spill] sm:$0xff] }
 0x68e   : > { %8596 = vrot.lane.b32.xlu1 %v8595_v14, %s9251_s18  ;;  %v5279_v6 = vmul.f32 %v13998_v35, %v5188_v16  ;;  %vm6834_vm14 = vcmp.eq.f32.partialorder %v14932_v54, inf  ;;  %v5622_v48 = vsub.f32 1.5, %v5621_v45  ;;  %vm5634_vm4 = vweird.f32 %v15052_v63 }
 0x68f   : > { %v6723_v5 = vsub.f32 1.5, %v6722_v44  ;;  %v6661_v43 = vmul.f32 %v9000_v9, %v6660_v30  ;;  %v5632_v27 = vsub.f32 1.5, %v5631_v52  ;;  %vm6726_vm11 = vcmp.eq.f32.partialorder %v15011_v31, inf  ;;  %v5194_v30 = vpop.xlane.xlu0 %5193 }
 0x690   : > { %v6567_v28 = vsub.f32 1.5, %v6566_v42  ;;  %v15164_v13 = vadd.f32 1e-05, %v5279_v6  ;;  %v5305_v36 = vmul.f32 %v13998_v35, %v5266_v53  ;;  %v5679_v47 = vmul.f32 %v5557_v39, %v17880_v32  ;;  %v15222_v42 = vpop.xlane.xlu2 %6486 }
 0x691   : > { %v6739_v12 = vsel %vm6738_vm15, %v14883_v7, %v6737_v62  ;;  %v6662_v55 = vmul.f32 0.5, %v6661_v43  ;;  %v5278_v61 = vmul.f32 %v13998_v35, %v5185_v59  ;;  %v6832_v44 = vmul.f32 %v15028_v23, %v6831_v29 }
 0x692   : > { %vm5625_vm1 = vweird.f32 %v15115_v25  ;;  %v5702_v16 = vmul.f32 %v14904_v10, %v14373_v50  ;;  %9001 = vrsqrt.f32 %v15164_v13  ;;  %v5623_v45 = vmul.f32 %v15115_v25, %v5622_v48 }
 0x693   : > { %vm5635_vm5 = vweird.f32 %v15120_v15  ;;  %v6724_v11 = vmul.f32 %v15091_v37, %v6723_v5  ;;  %v6663_v14 = vsub.f32 1.5, %v6662_v55  ;;  %v5633_v58 = vmul.f32 %v15120_v15, %v5632_v27  ;;  %vm15202_vm3 = vmor %vm5624_vm7, %vm5625_vm1  ;;  %v5191_v5 = vpop.xlane.xlu1 %5190 }
 0x694   : > { %v6568_v62 = vmul.f32 %v8998_v60, %v6567_v28  ;;  %v5701_v23 = vmul.f32 %v14904_v10, %v14353_v2  ;;  %v15183_v52 = vadd.f32 1e-05, %v5305_v36  ;;  %vm5615_vm12 = vweird.f32 %v14956_v4  ;;  %v17885_v36 = vld [vmem:[#allocation45_spill] sm:$0xff] }
 0x695   : > { %vm6836_vm10 = vcmp.eq.f32.partialorder %v14932_v54, 0.0  ;;  %vm6728_vm9 = vcmp.eq.f32.partialorder %v15011_v31, 0.0  ;;  %v6729_v50 = vand.u32 2147483648, %v15011_v31  ;;  %vm6570_vm15 = vcmp.eq.f32.partialorder %v15054_v19, inf }
 0x696   : > { %v15190_v37 = vadd.f32 1e-05, %v5278_v61  ;;  %vm5595_vm8 = vweird.f32 %v14988_v49  ;;  %v6742_v2 = vsel %vm6740_vm13, %v6741_v38, %v6739_v12  ;;  %v6833_v60 = vmul.f32 %v6832_v44, %v14932_v54  ;;  %vm15216_vm13 = vmor %vm5634_vm4, %vm5635_vm5 }
 0x697   : > { %v8580_v39 = vpack.i.bf16 %v5702_v16, %v5701_v23  ;;  %9003 = vrsqrt.f32 %v15183_v52  ;;  %vm5614_vm6 = vweird.f32 %v14864_v34  ;;  %vm5645_vm0 = vweird.f32 %v14995_v46 }
 0x698   : > { %v5627_v7 = vsel %vm15202_vm3, %v15115_v25, %v5623_v45  ;;  %v6725_v38 = vmul.f32 %v6724_v11, %v15011_v31  ;;  %v6664_v29 = vmul.f32 %v9000_v9, %v6663_v14  ;;  %9005 = vrsqrt.f32 %v15190_v37  ;;  %v15224_v6 = vpop.eup %9001 }
 0x699   : > { %vm5594_vm7 = vweird.f32 %v14889_v17  ;;  %v5637_v25 = vsel %vm15216_vm13, %v15120_v15, %v5633_v58  ;;  %v6569_v63 = vmul.f32 %v6568_v62, %v15054_v19  ;;  %8581 = vrot.lane.b32.xlu2 %v8580_v39, %s9250_s17  ;;  %v5714_v59 = vmul.f32 %v14904_v10, %v5679_v47  ;;  %v17886_v47 = vld [vmem:[#allocation40_spill] sm:$0xff] }
 0x69a   : > { %9007 = vrsqrt.f32 %v15222_v42  ;;  %vm5644_vm4 = vweird.f32 %v14907_v1  ;;  %vm6572_vm1 = vcmp.eq.f32.partialorder %v15054_v19, 0.0  ;;  %v6573_v9 = vand.u32 2147483648, %v15054_v19 }
 0x69b   : > { %v5389_v48 = vmul.f32 %v15224_v6, %v15164_v13  ;;  %v5281_v15 = vmul.f32 %v13998_v35, %v5194_v30  ;;  %v15240_v43 = vmax.f32 %v6742_v2, 1e-12  ;;  %v6835_v27 = vsel %vm6834_vm14, %v14932_v54, %v6833_v60  ;;  %v15288_v54 = vpop.xlane.xlu0 %6483 }
 0x69c   : > { %vm6666_vm5 = vcmp.eq.f32.partialorder %v15089_v56, inf  ;;  %v5713_v28 = vmul.f32 %v14904_v10, %v15107_v3  ;;  %v5686_v32 = vmul.f32 %v5627_v7, %v17885_v36  ;;  %v5687_v12 = vmul.f32 %v5637_v25, %v17886_v47  ;;  %v9172_v3 = vld [vmem:[%s9366_s25 + $0x18] sm:$0x3]  ;;  %v17893_v47 = vld [vmem:[#allocation75_spill] sm:$0xff] }
 0x69d   : > { %v6727_v55 = vsel %vm6726_vm11, %v15011_v31, %v6725_v38  ;;  %v6665_v61 = vmul.f32 %v6664_v29, %v15089_v56  ;;  %v15254_v44 = vpop.eup %9003  ;;  %v6571_v16 = vsel %vm6570_vm15, %v15054_v19, %v6569_v63  ;;  %v5390_v45 = vmul.f32 %v15224_v6, %v5389_v48  ;;  %vm15294_vm11 = vmor %vm5614_vm6, %vm5615_vm12 }
 0x69e   : > { %v8590_v11 = vpack.i.bf16 %v5714_v59, %v5713_v28  ;;  %v6122_v14 = vmul.f32 %v9172_v3, %v9172_v3  ;;  %v15261_v58 = vpop.eup %9005  ;;  %vm6668_vm14 = vcmp.eq.f32.partialorder %v15089_v56, 0.0  ;;  %v6669_v62 = vand.u32 2147483648, %v15089_v56  ;;  %vm15310_vm12 = vmor %vm5594_vm7, %vm5595_vm8  ;;  %v15345_v28 = vpop.xlane.xlu1 %6459 }
 0x69f   : > { %v5649_v23 = vmul.f32 %v15254_v44, %v15183_v52  ;;  %v15267_v30 = vadd.f32 1e-05, %v5281_v15  ;;  %9009 = vrcp.f32 %v15240_v43  ;;  %v6838_v60 = vsel %vm6836_vm10, %v6837_v20, %v6835_v27  ;;  %vm15326_vm10 = vmor %vm5644_vm4, %vm5645_vm0  ;;  %v15343_v27 = vpop.xlane.xlu2 %6420 }
 0x6a0   : > { %v15269_v2 = vpop.eup %9007  ;;  %v6730_v53 = vsel %vm6728_vm9, %v6729_v50, %v6727_v55  ;;  %v6136_v39 = vsel %vm17162_vm2, %v6122_v14, 0.0  ;;  %v6574_v7 = vsel %vm6572_vm1, %v6573_v9, %v6571_v16  ;;  %v6667_v40 = vsel %vm6666_vm5, %v15089_v56, %v6665_v61  ;;  %v17894_v55 = vld [vmem:[#allocation74_spill] sm:$0xff]  ;;  %v17895_v16 = vld [vmem:[#allocation72_spill] sm:$0xff] }
 0x6a1   : > { %v5379_v38 = vmul.f32 %v15261_v58, %v15190_v37  ;;  %v6816_v29 = vmul.f32 %v15269_v2, %v15222_v42  ;;  %v5391_v19 = vmul.f32 0.5, %v5390_v45  ;;  %v5650_v20 = vmul.f32 %v15254_v44, %v5649_v23  ;;  %8591 = vrot.lane.b32.xlu2 %v8590_v11, %s9251_s18  ;;  %6137 = vadd.xlane.f32.xlu0 %v6136_v39 }
 0x6a2   : > { %v5721_v50 = vmul.f32 %v14904_v10, %v5686_v32  ;;  %v5722_v25 = vmul.f32 %v14904_v10, %v5687_v12  ;;  %v5617_v63 = vsel %vm15294_vm11, %v14956_v4, %v15123_v57  ;;  %v15314_v59 = vmax.f32 %v6838_v60, 1e-12 }
 0x6a3   : > { %9011 = vrsqrt.f32 %v15267_v30  ;;  %v6817_v9 = vmul.f32 %v15269_v2, %v6816_v29  ;;  %v5597_v4 = vsel %vm15310_vm12, %v14988_v49, %v15137_v26  ;;  %v6670_v57 = vsel %vm6668_vm14, %v6669_v62, %v6667_v40 }
 0x6a4   : > { %v5280_v48 = vmul.f32 %v13998_v35, %v5191_v5  ;;  %9013 = vrsqrt.f32 %v15288_v54  ;;  %v5647_v49 = vsel %vm15326_vm10, %v14995_v46, %v15143_v33  ;;  %v15338_v26 = vmax.f32 %v6730_v53, 1e-12 }
 0x6a5   : > { %v15340_v15 = vmax.f32 %v6574_v7, 1e-12  ;;  %v5380_v1 = vmul.f32 %v15261_v58, %v5379_v38  ;;  %v15347_v56 = vpop.eup %9009  ;;  %v5392_v5 = vsub.f32 1.5, %v5391_v19  ;;  %v5651_v36 = vmul.f32 0.5, %v5650_v20 }
 0x6a6   : > { %v8600_v32 = vpack.i.bf16 %v5722_v25, %v5721_v50  ;;  %9015 = vrsqrt.f32 %v15343_v27  ;;  %v15351_v12 = vmul.f32 %v5617_v63, %v17893_v47  ;;  %v15354_v46 = vmax.f32 %v6670_v57, 1e-12 }
 0x6a7   : > { %9017 = vrcp.f32 %v15314_v59  ;;  %v6818_v33 = vmul.f32 0.5, %v6817_v9  ;;  %v15357_v61 = vmul.f32 %v5597_v4, %v17894_v55  ;;  %v15360_v45 = vmul.f32 %v5647_v49, %v17895_v16 }
 0x6a8   : > { %v15362_v11 = vadd.f32 1e-05, %v5280_v48  ;;  %9019 = vrsqrt.f32 %v15345_v28  ;;  %vm5394_vm0 = vweird.f32 %v15164_v13  ;;  %vm5654_vm9 = vweird.f32 %v15183_v52 }
 0x6a9   : > { %v15365_v3 = vpop.eup %9011  ;;  %9021 = vrcp.f32 %v15338_v26  ;;  %v5381_v14 = vmul.f32 0.5, %v5380_v1  ;;  %v15372_v23 = vmul.f32 %v15224_v6, %v5392_v5  ;;  %vm5395_vm15 = vweird.f32 %v15224_v6  ;;  %8601 = vrot.lane.b32.xlu2 %v8600_v32, %s9252_s0 }
 0x6aa   : > { %v9014_v62 = vpop.eup %9013  ;;  %9023 = vrcp.f32 %v15340_v15  ;;  %v5652_v60 = vsub.f32 1.5, %v5651_v36  ;;  %v6819_v53 = vsub.f32 1.5, %v6818_v33  ;;  %v6825_v39 = vand.u32 2147483648, %v15222_v42  ;;  %vm15392_vm6 = vmor %vm5394_vm0, %vm5395_vm15  ;;  %v15449_v19 = vpop.xlane.xlu0 %6456 }
 0x6ab   : > { %9025 = vrcp.f32 %v15354_v46  ;;  %v6804_v7 = vmul.f32 %v9014_v62, %v15288_v54  ;;  %vm5655_vm8 = vweird.f32 %v15254_v44  ;;  %v5409_v38 = vmul.f32 %v15365_v3, %v15267_v30 }
 0x6ac   : > { %v9016_v40 = vpop.eup %9015  ;;  %vm6822_vm3 = vcmp.eq.f32.partialorder %v15222_v42, inf  ;;  %9027 = vrsqrt.f32 %v15362_v11  ;;  %v7205_v29 = vmul.f32 %v15347_v56, %v15240_v43  ;;  %v5382_v20 = vsub.f32 1.5, %v5381_v14  ;;  %vm15425_vm12 = vmor %vm5654_vm9, %vm5655_vm8 }
 0x6ad   : > { %v15386_v31 = vpop.eup %9017  ;;  %vm5385_vm13 = vweird.f32 %v15261_v58  ;;  %v6805_v50 = vmul.f32 %v9014_v62, %v6804_v7  ;;  %v6552_v25 = vmul.f32 %v9016_v40, %v15343_v27  ;;  %v5397_v34 = vsel %vm15392_vm6, %v15224_v6, %v15372_v23 }
 0x6ae   : > { %v9020_v63 = vpop.eup %9019  ;;  %v15403_v9 = vmul.f32 %v15254_v44, %v5652_v60  ;;  %vm5384_vm7 = vweird.f32 %v15190_v37  ;;  %v6813_v13 = vand.u32 2147483648, %v15288_v54  ;;  %v7206_v4 = vsub.f32 1.0, %v7205_v29 }
 0x6af   : > { %v15407_v17 = vpop.eup %9021  ;;  %v6820_v57 = vmul.f32 %v15269_v2, %v6819_v53  ;;  %vm6824_vm4 = vcmp.eq.f32.partialorder %v15222_v42, 0.0  ;;  %v6806_v48 = vmul.f32 0.5, %v6805_v50  ;;  %vm7209_vm1 = vweird.f32 %v15240_v43  ;;  %vm15468_vm15 = vmor %vm5384_vm7, %vm5385_vm13 }
 0x6b0   : > { %vm7210_vm5 = vweird.f32 %v15347_v56  ;;  %v15413_v6 = vpop.eup %9023  ;;  %v5410_v49 = vmul.f32 %v15365_v3, %v5409_v38  ;;  %vm6810_vm14 = vcmp.eq.f32.partialorder %v15288_v54, inf  ;;  %v6553_v1 = vmul.f32 %v9016_v40, %v6552_v25 }
 0x6b1   : > { %vm6558_vm11 = vcmp.eq.f32.partialorder %v15343_v27, inf  ;;  %v6708_v5 = vmul.f32 %v9020_v63, %v15345_v28  ;;  %v15419_v36 = vpop.eup %9025  ;;  %v5383_v32 = vmul.f32 %v15261_v58, %v5382_v20  ;;  %v6807_v47 = vsub.f32 1.5, %v6806_v48  ;;  %vm15442_vm10 = vmor %vm7209_vm1, %vm7210_vm5 }
 0x6b2   : > { %v7207_v33 = vmul.f32 %v15347_v56, %v7206_v4  ;;  %v7213_v55 = vand.u32 2147483647, %v15240_v43  ;;  %v15432_v16 = vpop.eup %9027  ;;  %v5657_v14 = vsel %vm15425_vm12, %v15254_v44, %v15403_v9  ;;  %v6554_v23 = vmul.f32 0.5, %v6553_v1  ;;  %v15462_v1 = vpop.xlane.xlu2 %6444 }
 0x6b3   : > { %v6709_v52 = vmul.f32 %v9020_v63, %v6708_v5  ;;  %v7215_v53 = vand.u32 2147483648, %v15240_v43  ;;  %v6821_v7 = vmul.f32 %v6820_v57, %v15222_v42  ;;  %v6808_v38 = vmul.f32 %v9014_v62, %v6807_v47 }
 0x6b4   : > { %v7208_v29 = vadd.f32 %v15347_v56, %v7207_v33  ;;  %vm7214_vm0 = vcmp.eq.f32.partialorder %v7213_v55, 8.507059e+37  ;;  %v5411_v44 = vmul.f32 0.5, %v5410_v49  ;;  %v6555_v20 = vsub.f32 1.5, %v6554_v23  ;;  %v17904_v23 = vld [vmem:[#allocation56_spill] sm:$0xff] }
 0x6b5   : > { %v6710_v50 = vmul.f32 0.5, %v6709_v52  ;;  %v7216_v25 = vor.u32 1.1754944e-38, %v7215_v53  ;;  %v5399_v9 = vmul.f32 %v15432_v16, %v15362_v11  ;;  %vm6812_vm9 = vcmp.eq.f32.partialorder %v15288_v54, 0.0  ;;  %v15489_v53 = vpop.xlane.xlu1 %6441 }
 0x6b6   : > { %v7212_v43 = vsel %vm15442_vm10, %v15347_v56, %v7208_v29  ;;  %v5709_v62 = vmul.f32 %v14904_v10, %v14949_v8  ;;  %v5710_v4 = vmul.f32 %v14904_v10, %v14969_v41  ;;  %v6556_v57 = vmul.f32 %v9016_v40, %v6555_v20  ;;  %v9173_v56 = vld [vmem:[%s9400_s23 + $0x98] sm:$0xff] }
 0x6b7   : > { %v6711_v48 = vsub.f32 1.5, %v6710_v50  ;;  %v7217_v49 = vsel %vm7214_vm0, %v7216_v25, %v7212_v43  ;;  %9029 = vrsqrt.f32 %v15449_v19  ;;  %v6823_v8 = vsel %vm6822_vm3, %v15222_v42, %v6821_v7 }
 0x6b8   : > { %v6809_v41 = vmul.f32 %v6808_v38, %v15288_v54  ;;  %v7218_v40 = vmul.f32 %v9173_v56, %v7217_v49  ;;  %v8615_v2 = vpack.i.bf16 %v5710_v4, %v5709_v62  ;;  %v5387_v47 = vsel %vm15468_vm15, %v15261_v58, %v5383_v32  ;;  %v17906_v58 = vld [vmem:[#allocation41_spill] sm:$0xff]  ;;  %v17907_v38 = vld [vmem:[#allocation38_spill] sm:$0xff] }
 0x6b9   : > { %v5412_v33 = vsub.f32 1.5, %v5411_v44  ;;  %v6557_v37 = vmul.f32 %v6556_v57, %v15343_v27  ;;  %v6712_v55 = vmul.f32 %v9020_v63, %v6711_v48  ;;  %v15482_v52 = vmul.f32 %v5397_v34, %v17904_v23 }
 0x6ba   : > { %v5400_v60 = vmul.f32 %v15432_v16, %v5399_v9  ;;  %vm6560_vm8 = vcmp.eq.f32.partialorder %v15343_v27, 0.0  ;;  %vm17905_vm3 = vcmask 523264   ;;  %8616 = vrot.lane.b32.xlu2 %v8615_v2, %s9251_s18  ;;  %9031 = vrsqrt.f32 %v15462_v1 }
 0x6bb   : > { %8451 = vmatpush.xpose.msk.msra.mxu2 %vm17905_vm3, %v7218_v40  ;;  %v5689_v32 = vmul.f32 %v5657_v14, %v17906_v58  ;;  %v6826_v63 = vsel %vm6824_vm4, %v6825_v39, %v6823_v8  ;;  %v6561_v34 = vand.u32 2147483648, %v15343_v27  ;;  %v6713_v7 = vmul.f32 %v6712_v55, %v15345_v28 }
 0x6bc   : > { %v15499_v29 = vmul.f32 %v5387_v47, %v17907_v38  ;;  %v6811_v44 = vsel %vm6810_vm14, %v15288_v54, %v6809_v41  ;;  %v6559_v14 = vsel %vm6558_vm11, %v15343_v27, %v6557_v37  ;;  %vm6714_vm6 = vcmp.eq.f32.partialorder %v15345_v28, inf  ;;  %vm17910_vm11 = vmmov %vm17905_vm3 }
 0x6bd   : > { %v9030_v20 = vpop.eup %9029  ;;  %v15509_v42 = vmul.f32 %v15365_v3, %v5412_v33  ;;  %vm6716_vm13 = vcmp.eq.f32.partialorder %v15345_v28, 0.0  ;;  %v6717_v39 = vand.u32 2147483648, %v15345_v28  ;;  %9033 = vrsqrt.f32 %v15489_v53  ;;  %v15544_v33 = vpop.xlane.xlu0 %6140 }
 0x6be   : > { %v15514_v50 = vmax.f32 %v6826_v63, 1e-12  ;;  %v15516_v25 = vmul.f32 0.5, %v5400_v60  ;;  %v6696_v9 = vmul.f32 %v9030_v20, %v15449_v19  ;;  %v7325_v43 = vmul.f32 %v15386_v31, %v15314_v59 }
 0x6bf   : > { %v6814_v62 = vsel %vm6812_vm9, %v6813_v13, %v6811_v44  ;;  %v6562_v4 = vsel %vm6560_vm8, %v6561_v34, %v6559_v14  ;;  %v6715_v57 = vsel %vm6714_vm6, %v15345_v28, %v6713_v7  ;;  %v7333_v48 = vand.u32 2147483647, %v15314_v59 }
 0x6c0   : > { %v9032_v49 = vpop.eup %9031  ;;  %v6697_v5 = vmul.f32 %v9030_v20, %v6696_v9  ;;  %v7326_v8 = vsub.f32 1.0, %v7325_v43  ;;  %vm7329_vm7 = vweird.f32 %v15314_v59  ;;  %vm7330_vm4 = vweird.f32 %v15386_v31 }
 0x6c1   : > { %v6648_v41 = vmul.f32 %v9032_v49, %v15462_v1  ;;  %v7335_v56 = vand.u32 2147483648, %v15314_v59  ;;  %v5719_v54 = vmul.f32 %v14904_v10, %v15100_v24  ;;  %v5720_v27 = vmul.f32 %v14904_v10, %v15351_v12  ;;  %vm7331_vm5 = vmor %vm7329_vm7, %vm7330_vm4 }
 0x6c2   : > { %v6698_v13 = vmul.f32 0.5, %v6697_v5  ;;  %v7327_v40 = vmul.f32 %v15386_v31, %v7326_v8  ;;  %vm15538_vm1 = vcmp.eq.f32.partialorder %v7333_v48, 8.507059e+37  ;;  %v5723_v47 = vmul.f32 %v14904_v10, %v15360_v45  ;;  %v15568_v48 = vpop.xlane.xlu1 %6414  ;;  %v9174_v8 = vld [vmem:[%s9400_s23 + $0xd8] sm:$0xff] }
 0x6c3   : > { %v9034_v37 = vpop.eup %9033  ;;  %v6649_v55 = vmul.f32 %v9032_v49, %v6648_v41  ;;  %v8630_v23 = vpack.i.bf16 %v5720_v27, %v5719_v54  ;;  %v5724_v24 = vmul.f32 %v14904_v10, %v5689_v32  ;;  %v5717_v12 = vmul.f32 %v14904_v10, %v15110_v18  ;;  %v15559_v18 = vpop.xlane.xlu2 %6417 }
 0x6c4   : > { %v6699_v60 = vsub.f32 1.5, %v6698_v13  ;;  %v6636_v58 = vmul.f32 %v9034_v37, %v15489_v53  ;;  %v7328_v63 = vadd.f32 %v15386_v31, %v7327_v40  ;;  %v5718_v34 = vmul.f32 %v14904_v10, %v15357_v61 }
 0x6c5   : > { %v6650_v7 = vmul.f32 0.5, %v6649_v55  ;;  %v7336_v45 = vor.u32 1.1754944e-38, %v7335_v56  ;;  %8631 = vrot.lane.b32.xlu0 %v8630_v23, %s9252_s0  ;;  %v8605_v32 = vpack.i.bf16 %v5724_v24, %v5723_v47  ;;  %9035 = vrsqrt.f32 %v15544_v33 }
 0x6c6   : > { %v6700_v38 = vmul.f32 %v9030_v20, %v6699_v60  ;;  %v6637_v44 = vmul.f32 %v9034_v37, %v6636_v58  ;;  %v7332_v14 = vsel %vm7331_vm5, %v15386_v31, %v7328_v63  ;;  %v8625_v10 = vpack.i.bf16 %v5718_v34, %v5717_v12 }
 0x6c7   : > { %v5402_v61 = vsub.f32 1.5, %v15516_v25  ;;  %v6718_v59 = vsel %vm6716_vm13, %v6717_v39, %v6715_v57  ;;  %v6651_v9 = vsub.f32 1.5, %v6650_v7  ;;  %v7337_v43 = vsel %vm15538_vm1, %v7336_v45, %v7332_v14  ;;  %8606 = vrot.lane.b32.xlu1 %v8605_v32, %s9252_s0 }
 0x6c8   : > { %v15570_v5 = vmax.f32 %v6814_v62, 1e-12  ;;  %v6638_v20 = vmul.f32 0.5, %v6637_v44  ;;  %v7338_v41 = vmul.f32 %v9174_v8, %v7337_v43  ;;  %8626 = vrot.lane.b32.xlu2 %v8625_v10, %s9252_s0  ;;  %9037 = vrsqrt.f32 %v15559_v18 }
 0x6c9   : > { %9039 = vrcp.f32 %v15514_v50  ;;  %v15576_v28 = vmax.f32 %v6562_v4, 1e-12  ;;  %v6701_v31 = vmul.f32 %v6700_v38, %v15449_v19  ;;  %v6652_v39 = vmul.f32 %v9032_v49, %v6651_v9 }
 0x6ca   : > { %v15579_v57 = vmax.f32 %v6718_v59, 1e-12  ;;  %vm6702_vm14 = vcmp.eq.f32.partialorder %v15449_v19, inf  ;;  %v6639_v62 = vsub.f32 1.5, %v6638_v20  ;;  %8461 = vmatpush.xpose.msk.msra.mxu3 %vm17910_vm11, %v7338_v41  ;;  %9041 = vrsqrt.f32 %v15568_v48 }
 0x6cb   : > { %v9036_v56 = vpop.eup %9035  ;;  %vm6704_vm12 = vcmp.eq.f32.partialorder %v15449_v19, 0.0  ;;  %v6705_v54 = vand.u32 2147483648, %v15449_v19  ;;  %vm6654_vm10 = vcmp.eq.f32.partialorder %v15462_v1, inf  ;;  %v6657_v4 = vand.u32 2147483648, %v15462_v1 }
 0x6cc   : > { %9043 = vrcp.f32 %v15570_v5  ;;  %v6640_v49 = vmul.f32 %v9034_v37, %v6639_v62  ;;  %v6200_v27 = vmul.f32 %v9036_v56, %v15544_v33  ;;  %v7190_v13 = vmul.f32 %v15407_v17, %v15338_v26 }
 0x6cd   : > { %9045 = vrcp.f32 %v15576_v28  ;;  %v6703_v40 = vsel %vm6702_vm14, %v15449_v19, %v6701_v31  ;;  %v6653_v2 = vmul.f32 %v6652_v39, %v15462_v1  ;;  %vm6656_vm0 = vcmp.eq.f32.partialorder %v15462_v1, 0.0 }
 0x6ce   : > { %vm6642_vm9 = vcmp.eq.f32.partialorder %v15489_v53, inf  ;;  %v9038_v47 = vpop.eup %9037  ;;  %9047 = vrcp.f32 %v15579_v57  ;;  %vm6644_vm15 = vcmp.eq.f32.partialorder %v15489_v53, 0.0  ;;  %v6645_v37 = vand.u32 2147483648, %v15489_v53 }
 0x6cf   : > { %v6201_v55 = vmul.f32 %v9036_v56, %v6200_v27  ;;  %v7198_v23 = vand.u32 2147483647, %v15338_v26  ;;  %v15601_v24 = vpop.eup %9039  ;;  %v6641_v12 = vmul.f32 %v6640_v49, %v15489_v53  ;;  %vm6206_vm8 = vcmp.eq.f32.partialorder %v15544_v33, inf }
 0x6d0   : > { %v6209_v60 = vand.u32 2147483648, %v15544_v33  ;;  %v6540_v58 = vmul.f32 %v9038_v47, %v15559_v18  ;;  %v7191_v63 = vsub.f32 1.0, %v7190_v13  ;;  %v15607_v34 = vpop.eup %9041  ;;  %v6706_v7 = vsel %vm6704_vm12, %v6705_v54, %v6703_v40  ;;  %v5176_v13 = vpop.xlane.xlu0 %5175 }
 0x6d1   : > { %v6202_v45 = vmul.f32 0.5, %v6201_v55  ;;  %v7200_v32 = vand.u32 2147483648, %v15338_v26  ;;  %v6995_v38 = vmul.f32 %v15413_v6, %v15340_v15  ;;  %v6655_v44 = vsel %vm6654_vm10, %v15462_v1, %v6653_v2 }
 0x6d2   : > { %v6541_v14 = vmul.f32 %v9038_v47, %v6540_v58  ;;  %v6528_v10 = vmul.f32 %v15607_v34, %v15568_v48  ;;  %vm7194_vm3 = vweird.f32 %v15338_v26  ;;  %v15620_v59 = vpop.eup %9043  ;;  %v7192_v9 = vmul.f32 %v15407_v17, %v7191_v63 }
 0x6d3   : > { %v6203_v19 = vsub.f32 1.5, %v6202_v45  ;;  %vm7195_vm6 = vweird.f32 %v15407_v17  ;;  %vm15624_vm13 = vcmp.eq.f32.partialorder %v7198_v23, 8.507059e+37  ;;  %v15628_v20 = vpop.eup %9045  ;;  %v6643_v8 = vsel %vm6642_vm9, %v15489_v53, %v6641_v12 }
 0x6d4   : > { %v6542_v41 = vmul.f32 0.5, %v6541_v14  ;;  %v6529_v31 = vmul.f32 %v15607_v34, %v6528_v10  ;;  %v6996_v39 = vsub.f32 1.0, %v6995_v38  ;;  %v15634_v62 = vpop.eup %9047  ;;  %vm6208_vm7 = vcmp.eq.f32.partialorder %v15544_v33, 0.0  ;;  %vm7196_vm5 = vmor %vm7194_vm3, %vm7195_vm6  ;;  %v9175_v14 = vld [vmem:[%s9400_s23 + $0x90] sm:$0xff] }
 0x6d5   : > { %v6204_v54 = vmul.f32 %v9036_v56, %v6203_v19  ;;  %vm6546_vm4 = vcmp.eq.f32.partialorder %v15559_v18, inf  ;;  %v7193_v49 = vadd.f32 %v15407_v17, %v7192_v9  ;;  %v7201_v27 = vor.u32 1.1754944e-38, %v7200_v32  ;;  %v5172_v19 = vpop.xlane.xlu1 %5171 }
 0x6d6   : > { %vm7000_vm1 = vweird.f32 %v15413_v6  ;;  %v6543_v40 = vsub.f32 1.5, %v6542_v41  ;;  %v6530_v2 = vmul.f32 0.5, %v6529_v31  ;;  %v6997_v56 = vmul.f32 %v15413_v6, %v6996_v39 }
 0x6d7   : > { %v7003_v55 = vand.u32 2147483647, %v15340_v15  ;;  %v6205_v23 = vmul.f32 %v6204_v54, %v15544_v33  ;;  %v7197_v12 = vsel %vm7196_vm5, %v15407_v17, %v7193_v49  ;;  %v7005_v58 = vand.u32 2147483648, %v15340_v15 }
 0x6d8   : > { %v7115_v63 = vmul.f32 %v15419_v36, %v15354_v46  ;;  %v6544_v45 = vmul.f32 %v9038_v47, %v6543_v40  ;;  %vm6548_vm14 = vcmp.eq.f32.partialorder %v15559_v18, 0.0  ;;  %v7202_v26 = vsel %vm15624_vm13, %v7201_v27, %v7197_v12 }
 0x6d9   : > { %v6998_v32 = vadd.f32 %v15413_v6, %v6997_v56  ;;  %vm6999_vm11 = vweird.f32 %v15340_v15  ;;  %v15656_v38 = vmax.f32 %v6706_v7, 1e-12  ;;  %v6658_v17 = vsel %vm6656_vm0, %v6657_v4, %v6655_v44  ;;  %v15668_v7 = vpop.xlane.xlu2 %6480 }
 0x6da   : > { %v7203_v10 = vmul.f32 %v9175_v14, %v7202_v26  ;;  %vm7001_vm12 = vmor %vm6999_vm11, %vm7000_vm1  ;;  %v7006_v47 = vor.u32 1.1754944e-38, %v7005_v58  ;;  %v6646_v9 = vsel %vm6644_vm15, %v6645_v37, %v6643_v8  ;;  %v6531_v43 = vsub.f32 1.5, %v6530_v2  ;;  %v9176_v37 = vld [vmem:[%s9400_s23 + $0x28] sm:$0xff] }
 0x6db   : > { %v7002_v15 = vsel %vm7001_vm12, %v15413_v6, %v6998_v32  ;;  %vm7004_vm10 = vcmp.eq.f32.partialorder %v7003_v55, 8.507059e+37  ;;  %v6207_v1 = vsel %vm6206_vm8, %v15544_v33, %v6205_v23  ;;  %vm17913_vm0 = vcmask 523264   ;;  %v15708_v33 = vld [vmem:[%s16990_s9] ss:$0 sm:$0xff]  ;;  %v5182_v23 = vpop.xlane.xlu0 %5181 }
 0x6dc   : > { %8452 = vmatpush.xpose.msk.msra.mxu2 %vm17913_vm0, %v7203_v10  ;;  %v7007_v4 = vsel %vm7004_vm10, %v7006_v47, %v7002_v15  ;;  %v7116_v44 = vsub.f32 1.0, %v7115_v63  ;;  %vm7119_vm9 = vweird.f32 %v15354_v46  ;;  %v15675_v41 = vmax.f32 %v6658_v17, 1e-12  ;;  %vm17914_vm3 = vmmov %vm17913_vm0 }
 0x6dd   : > { %v6545_v53 = vmul.f32 %v6544_v45, %v15559_v18  ;;  %v7008_v8 = vmul.f32 %v9176_v37, %v7007_v4  ;;  %vm7120_vm15 = vweird.f32 %v15419_v36  ;;  %9049 = vrcp.f32 %v15656_v38  ;;  %v5179_v47 = vpop.xlane.xlu1 %5178  ;;  %vm17920_vm5 = vmmov %vm17913_vm0 }
 0x6de   : > { %v6549_v6 = vand.u32 2147483648, %v15559_v18  ;;  %v7117_v31 = vmul.f32 %v15419_v36, %v7116_v44  ;;  %v7123_v39 = vand.u32 2147483647, %v15354_v46  ;;  %vm5415_vm8 = vweird.f32 %v15365_v3  ;;  %vm15695_vm6 = vmor %vm7119_vm9, %vm7120_vm15 }
 0x6df   : > { %v15685_v54 = vmax.f32 %v6646_v9, 1e-12  ;;  %v6210_v49 = vsel %vm6208_vm7, %v6209_v60, %v6207_v1  ;;  %v6532_v27 = vmul.f32 %v15607_v34, %v6531_v43  ;;  %8429 = vmatpush.xpose.msk.msra.mxu0 %vm17914_vm3, %v7008_v8  ;;  %v7125_v2 = vand.u32 2147483648, %v15354_v46 }
 0x6e0   : > { %v7118_v56 = vadd.f32 %v15419_v36, %v7117_v31  ;;  %vm15701_vm13 = vcmp.eq.f32.partialorder %v7123_v39, 8.507059e+37  ;;  %v5703_v60 = vmul.f32 %v15708_v33, %v14376_v22  ;;  %v5704_v34 = vmul.f32 %v15708_v33, %v14428_v51 }
 0x6e1   : > { %vm5414_vm7 = vweird.f32 %v15267_v30  ;;  %9051 = vrcp.f32 %v15675_v41  ;;  %v6547_v46 = vsel %vm6546_vm4, %v15559_v18, %v6545_v53  ;;  %v7126_v12 = vor.u32 1.1754944e-38, %v7125_v2  ;;  %v15746_v15 = vpop.xlane.xlu2 %6438 }
 0x6e2   : > { %v5275_v58 = vmul.f32 %v13998_v35, %v5176_v13  ;;  %vm6534_vm1 = vcmp.eq.f32.partialorder %v15568_v48, inf  ;;  %v7122_v22 = vsel %vm15695_vm6, %v15419_v36, %v7118_v56  ;;  %v8610_v51 = vpack.i.bf16 %v5704_v34, %v5703_v60  ;;  %v9178_v36 = vld [vmem:[%s9400_s23 + $0x68] sm:$0xff]  ;;  %vm15779_vm11 = vmor %vm5414_vm7, %vm5415_vm8 }
 0x6e3   : > { %9053 = vrsqrt.f32 %v15668_v7  ;;  %v15726_v63 = vmax.f32 %v6210_v49, 1e-12  ;;  %v7127_v45 = vsel %vm15701_vm13, %v7126_v12, %v7122_v22  ;;  %v15732_v32 = vpop.eup %9049  ;;  %v6550_v13 = vsel %vm6548_vm14, %v6549_v6, %v6547_v46  ;;  %v15786_v56 = vpop.xlane.xlu0 %6408  ;;  %vm17926_vm13 = vmmov %vm17920_vm5 }
 0x6e4   : > { %9055 = vrcp.f32 %v15685_v54  ;;  %v15730_v26 = vadd.f32 1e-05, %v5275_v58  ;;  %v6533_v17 = vmul.f32 %v6532_v27, %v15568_v48  ;;  %v7128_v14 = vmul.f32 %v9178_v36, %v7127_v45  ;;  %8611 = vrot.lane.b32.xlu1 %v8610_v51, %s9250_s17 }
 0x6e5   : > { %17919 = vst [vmem:[#allocation78_spill] sm:$0xff] %v15726_v63  ;;  %v5274_v10 = vmul.f32 %v13998_v35, %v5172_v19  ;;  %v5711_v9 = vmul.f32 %v15708_v33, %v14952_v21  ;;  %v5712_v43 = vmul.f32 %v15708_v33, %v15068_v0  ;;  %v5277_v18 = vmul.f32 %v13998_v35, %v5182_v23 }
 0x6e6   : > { %9057 = vrsqrt.f32 %v15730_v26  ;;  %vm6536_vm4 = vcmp.eq.f32.partialorder %v15568_v48, 0.0  ;;  %v6537_v1 = vand.u32 2147483648, %v15568_v48  ;;  %8439 = vmatpush.xpose.msk.msra.mxu1 %vm17920_vm5, %v7128_v14  ;;  %v5276_v44 = vmul.f32 %v13998_v35, %v5179_v47 }
 0x6e7   : > { %v15751_v19 = vadd.f32 1e-05, %v5274_v10  ;;  %9059 = vrsqrt.f32 %v15746_v15  ;;  %v15754_v4 = vpop.eup %9051  ;;  %v8620_v21 = vpack.i.bf16 %v5712_v43, %v5711_v9  ;;  %v15757_v0 = vadd.f32 1e-05, %v5277_v18 }
 0x6e8   : > { %9061 = vrcp.f32 %v15726_v63  ;;  %v15760_v37 = vmax.f32 %v6550_v13, 1e-12  ;;  %v6535_v8 = vsel %vm6534_vm1, %v15568_v48, %v6533_v17  ;;  %v7310_v6 = vmul.f32 %v15601_v24, %v15514_v50 }
 0x6e9   : > { %v9054_v53 = vpop.eup %9053  ;;  %9063 = vrsqrt.f32 %v15751_v19  ;;  %v15772_v49 = vadd.f32 1e-05, %v5276_v44  ;;  %vm7314_vm14 = vweird.f32 %v15514_v50  ;;  %vm7315_vm12 = vweird.f32 %v15601_v24 }
 0x6ea   : > { %v15768_v31 = vpop.eup %9055  ;;  %v6792_v39 = vmul.f32 %v9054_v53, %v15668_v7  ;;  %9065 = vrsqrt.f32 %v15757_v0  ;;  %v7311_v27 = vsub.f32 1.0, %v7310_v6  ;;  %v7318_v40 = vand.u32 2147483647, %v15514_v50  ;;  %vm15814_vm10 = vmor %vm7314_vm14, %vm7315_vm12 }
 0x6eb   : > { %v7320_v2 = vand.u32 2147483648, %v15514_v50  ;;  %v6538_v60 = vsel %vm6536_vm4, %v6537_v1, %v6535_v8  ;;  %9067 = vrsqrt.f32 %v15772_v49  ;;  %v15800_v46 = vmul.f32 %v15432_v16, %v5402_v61 }
 0x6ec   : > { %v15788_v55 = vpop.eup %9057  ;;  %v6793_v34 = vmul.f32 %v9054_v53, %v6792_v39  ;;  %9069 = vrcp.f32 %v15760_v37  ;;  %8621 = vrot.lane.b32.xlu1 %v8620_v21, %s9251_s18  ;;  %v7312_v58 = vmul.f32 %v15601_v24, %v7311_v27  ;;  %vm5405_vm0 = vweird.f32 %v15432_v16 }
 0x6ed   : > { %v9060_v23 = vpop.eup %9059  ;;  %v5349_v12 = vmul.f32 %v15788_v55, %v15730_v26  ;;  %v7321_v61 = vor.u32 1.1754944e-38, %v7320_v2  ;;  %9071 = vrsqrt.f32 %v15786_v56  ;;  %v15822_v13 = vmax.f32 %v6538_v60, 1e-12 }
 0x6ee   : > { %v15807_v48 = vpop.eup %9061  ;;  %v6794_v22 = vmul.f32 0.5, %v6793_v34  ;;  %v6624_v51 = vmul.f32 %v9060_v23, %v15746_v15  ;;  %v7313_v36 = vadd.f32 %v15601_v24, %v7312_v58  ;;  %vm7319_vm9 = vcmp.eq.f32.partialorder %v7318_v40, 8.507059e+37 }
 0x6ef   : > { %17923 = vst [vmem:[#allocation5_spill] sm:$0xff] %v15807_v48  ;;  %v15819_v45 = vpop.eup %9063  ;;  %v5350_v17 = vmul.f32 %v15788_v55, %v5349_v12  ;;  %vm6798_vm15 = vcmp.eq.f32.partialorder %v15668_v7, inf  ;;  %vm5404_vm8 = vweird.f32 %v15362_v11  ;;  %vm6800_vm3 = vcmp.eq.f32.partialorder %v15668_v7, 0.0  ;;  %v9179_v12 = vld [vmem:[%s9400_s23 + $0xd0] sm:$0xff] }
 0x6f0   : > { %v15826_v14 = vpop.eup %9065  ;;  %v6795_v50 = vsub.f32 1.5, %v6794_v22  ;;  %v5339_v10 = vmul.f32 %v15819_v45, %v15751_v19  ;;  %v6625_v47 = vmul.f32 %v9060_v23, %v6624_v51  ;;  %v7317_v18 = vsel %vm15814_vm10, %v15601_v24, %v7313_v36  ;;  %vm15875_vm12 = vmor %vm5404_vm8, %vm5405_vm0 }
 0x6f1   : > { %v5351_v9 = vmul.f32 0.5, %v5350_v17  ;;  %v5369_v43 = vmul.f32 %v15826_v14, %v15757_v0  ;;  %v15838_v1 = vpop.eup %9067  ;;  %v7322_v6 = vsel %vm7319_vm9, %v7321_v61, %v7317_v18  ;;  %vm5354_vm6 = vweird.f32 %v15730_v26  ;;  %v15852_v17 = vpop.xlane.xlu2 %6146 }
 0x6f2   : > { %v6796_v21 = vmul.f32 %v9054_v53, %v6795_v50  ;;  %v5340_v44 = vmul.f32 %v15819_v45, %v5339_v10  ;;  %v6626_v8 = vmul.f32 0.5, %v6625_v47  ;;  %v15841_v39 = vpop.eup %9069  ;;  %v6801_v27 = vand.u32 2147483648, %v15668_v7 }
 0x6f3   : > { %v5370_v40 = vmul.f32 %v15826_v14, %v5369_v43  ;;  %v5359_v2 = vmul.f32 %v15838_v1, %v15772_v49  ;;  %v9072_v60 = vpop.eup %9071  ;;  %v7323_v58 = vmul.f32 %v9179_v12, %v7322_v6  ;;  %v5352_v22 = vsub.f32 1.5, %v5351_v9  ;;  %v17977_v12 = vld [vmem:[#allocation33_spill] sm:$0xff] }
 0x6f4   : > { %v6797_v24 = vmul.f32 %v6796_v21, %v15668_v7  ;;  %v5341_v34 = vmul.f32 0.5, %v5340_v44  ;;  %v6627_v53 = vsub.f32 1.5, %v6626_v8  ;;  %v6504_v61 = vmul.f32 %v9072_v60, %v15786_v56  ;;  %v17974_v44 = vld [vmem:[#allocation28_spill] sm:$0xff] }
 0x6f5   : > { %v5371_v51 = vmul.f32 0.5, %v5370_v40  ;;  %v5360_v25 = vmul.f32 %v15838_v1, %v5359_v2  ;;  %8462 = vmatpush.xpose.msk.msra.mxu3 %vm17926_vm13, %v7323_v58  ;;  %9073 = vrsqrt.f32 %v15852_v17  ;;  %vm6630_vm7 = vcmp.eq.f32.partialorder %v15746_v15, inf  ;;  %v15888_v2 = vpop.xlane.xlu1 %6435 }
 0x6f6   : > { %v6799_v36 = vsel %vm6798_vm15, %v15668_v7, %v6797_v24  ;;  %v5342_v50 = vsub.f32 1.5, %v5341_v34  ;;  %v6628_v10 = vmul.f32 %v9060_v23, %v6627_v53  ;;  %vm5355_vm1 = vweird.f32 %v15788_v55 }
 0x6f7   : > { %v6802_v47 = vsel %vm6800_vm3, %v6801_v27, %v6799_v36  ;;  %v5372_v9 = vsub.f32 1.5, %v5371_v51  ;;  %v5361_v43 = vmul.f32 0.5, %v5360_v25  ;;  %vm6632_vm4 = vcmp.eq.f32.partialorder %v15746_v15, 0.0  ;;  %vm15899_vm10 = vmor %vm5354_vm6, %vm5355_vm1 }
 0x6f8   : > { %v6629_v18 = vmul.f32 %v6628_v10, %v15746_v15  ;;  %v6633_v21 = vand.u32 2147483648, %v15746_v15  ;;  %v15867_v23 = vmul.f32 %v15788_v55, %v5352_v22  ;;  %vm5345_vm5 = vweird.f32 %v15819_v45 }
 0x6f9   : > { %vm5375_vm14 = vweird.f32 %v15826_v14  ;;  %v6505_v7 = vmul.f32 %v9072_v60, %v6504_v61  ;;  %v15879_v8 = vmax.f32 %v6802_v47, 1e-12  ;;  %v15882_v6 = vmul.f32 %v15819_v45, %v5342_v50 }
 0x6fa   : > { %v15885_v27 = vmul.f32 %v15826_v14, %v5372_v9  ;;  %v6631_v40 = vsel %vm6630_vm7, %v15746_v15, %v6629_v18  ;;  %9075 = vrcp.f32 %v15822_v13  ;;  %vm5344_vm0 = vweird.f32 %v15751_v19 }
 0x6fb   : > { %v5362_v34 = vsub.f32 1.5, %v5361_v43  ;;  %v9074_v53 = vpop.eup %9073  ;;  %vm15906_vm9 = vmor %vm5344_vm0, %vm5345_vm5  ;;  %vm5374_vm15 = vweird.f32 %v15757_v0  ;;  %v6634_v58 = vsel %vm6632_vm4, %v6633_v21, %v6631_v40  ;;  %v6506_v26 = vmul.f32 0.5, %v6505_v7 }
 0x6fc   : > { %vm6510_vm8 = vcmp.eq.f32.partialorder %v15786_v56, inf  ;;  %vm15920_vm3 = vmor %vm5374_vm15, %vm5375_vm14  ;;  %vm6512_vm6 = vcmp.eq.f32.partialorder %v15786_v56, 0.0  ;;  %v6513_v0 = vand.u32 2147483648, %v15786_v56  ;;  %v6224_v15 = vmul.f32 %v9074_v53, %v15852_v17 }
 0x6fd   : > { %9077 = vrsqrt.f32 %v15888_v2  ;;  %v6507_v61 = vsub.f32 1.5, %v6506_v26  ;;  %vm6230_vm13 = vcmp.eq.f32.partialorder %v15852_v17, inf  ;;  %v15938_v36 = vmax.f32 %v6634_v58, 1e-12  ;;  %v15954_v58 = vpop.xlane.xlu0 %6149 }
 0x6fe   : > { %9079 = vrcp.f32 %v15879_v8  ;;  %v15941_v50 = vmul.f32 %v15838_v1, %v5362_v34  ;;  %v6225_v10 = vmul.f32 %v9074_v53, %v6224_v15  ;;  %vm6232_vm7 = vcmp.eq.f32.partialorder %v15852_v17, 0.0 }
 0x6ff   : > { %v7295_v47 = vmul.f32 %v15620_v59, %v15570_v5  ;;  %v6508_v9 = vmul.f32 %v9072_v60, %v6507_v61  ;;  %v6233_v43 = vand.u32 2147483648, %v15852_v17  ;;  %vm7299_vm1 = vweird.f32 %v15570_v5 }
 0x700   : > { %vm7300_vm4 = vweird.f32 %v15620_v59  ;;  %v15949_v18 = vpop.eup %9075  ;;  %v6226_v21 = vmul.f32 0.5, %v6225_v10  ;;  %v7303_v40 = vand.u32 2147483647, %v15570_v5  ;;  %v7175_v34 = vmul.f32 %v15634_v62, %v15579_v57 }
 0x701   : > { %v7296_v7 = vsub.f32 1.0, %v7295_v47  ;;  %v6509_v26 = vmul.f32 %v6508_v9, %v15786_v56  ;;  %v7305_v60 = vand.u32 2147483648, %v15570_v5  ;;  %vm7179_vm5 = vweird.f32 %v15579_v57  ;;  %vm15975_vm0 = vmor %vm7299_vm1, %vm7300_vm4 }
 0x702   : > { %vm7180_vm14 = vweird.f32 %v15634_v62  ;;  %v6227_v61 = vsub.f32 1.5, %v6226_v21  ;;  %v7176_v47 = vsub.f32 1.0, %v7175_v34  ;;  %v7183_v25 = vand.u32 2147483647, %v15579_v57 }
 0x703   : > { %v9078_v15 = vpop.eup %9077  ;;  %v7297_v10 = vmul.f32 %v15620_v59, %v7296_v7  ;;  %v6511_v19 = vsel %vm6510_vm8, %v15786_v56, %v6509_v26  ;;  %v7185_v11 = vand.u32 2147483648, %v15579_v57  ;;  %9081 = vrsqrt.f32 %v15954_v58  ;;  %vm15986_vm8 = vmor %vm7179_vm5, %vm7180_vm14  ;;  %v9181_v7 = vld [vmem:[%s9400_s23 + $0x88] sm:$0xff] }
 0x704   : > { %v15962_v51 = vpop.eup %9079  ;;  %v6612_v9 = vmul.f32 %v9078_v15, %v15888_v2  ;;  %v6228_v30 = vmul.f32 %v9074_v53, %v6227_v61  ;;  %vm7304_vm15 = vcmp.eq.f32.partialorder %v7303_v40, 8.507059e+37  ;;  %v7177_v34 = vmul.f32 %v15634_v62, %v7176_v47 }
 0x705   : > { %v7298_v21 = vadd.f32 %v15620_v59, %v7297_v10  ;;  %v6514_v26 = vsel %vm6512_vm6, %v6513_v0, %v6511_v19  ;;  %v7306_v63 = vor.u32 1.1754944e-38, %v7305_v60  ;;  %v7186_v5 = vor.u32 1.1754944e-38, %v7185_v11  ;;  %v15995_v19 = vpop.xlane.xlu2 %6411  ;;  %v9180_v11 = vld [vmem:[%s9400_s23 + $0xc8] sm:$0xff]  ;;  %v16008_v10 = vpop.xlane.xlu1 %6432 }
 0x706   : > { %v6613_v48 = vmul.f32 %v9078_v15, %v6612_v9  ;;  %v6229_v61 = vmul.f32 %v6228_v30, %v15852_v17  ;;  %v7178_v56 = vadd.f32 %v15634_v62, %v7177_v34  ;;  %vm7184_vm6 = vcmp.eq.f32.partialorder %v7183_v25, 8.507059e+37 }
 0x707   : > { %v7302_v40 = vsel %vm15975_vm0, %v15620_v59, %v7298_v21  ;;  %9083 = vrcp.f32 %v15938_v36  ;;  %vm6618_vm1 = vcmp.eq.f32.partialorder %v15888_v2, inf  ;;  %v15999_v60 = vmax.f32 %v6514_v26, 1e-12 }
 0x708   : > { %v6614_v0 = vmul.f32 0.5, %v6613_v48  ;;  %v7307_v57 = vsel %vm7304_vm15, %v7306_v63, %v7302_v40  ;;  %v6231_v30 = vsel %vm6230_vm13, %v15852_v17, %v6229_v61  ;;  %v7182_v25 = vsel %vm15986_vm8, %v15634_v62, %v7178_v56 }
 0x709   : > { %v7308_v59 = vmul.f32 %v9180_v11, %v7307_v57  ;;  %v9082_v47 = vpop.eup %9081  ;;  %v6234_v48 = vsel %vm6232_vm7, %v6233_v43, %v6231_v30  ;;  %v7187_v63 = vsel %vm7184_vm6, %v7186_v5, %v7182_v25  ;;  %9085 = vrsqrt.f32 %v15995_v19 }
 0x70a   : > { %v6615_v9 = vsub.f32 1.5, %v6614_v0  ;;  %v16013_v21 = vmax.f32 %v6234_v48, 1e-12  ;;  %vm6620_vm13 = vcmp.eq.f32.partialorder %v15888_v2, 0.0  ;;  %vm17940_vm4 = vcmask 523264  }
 0x70b   : > { %8463 = vmatpush.xpose.msk.msra.mxu3 %vm17940_vm4, %v7308_v59  ;;  %v7188_v34 = vmul.f32 %v9181_v7, %v7187_v63  ;;  %v6236_v62 = vmul.f32 %v9082_v47, %v15954_v58  ;;  %v6621_v53 = vand.u32 2147483648, %v15888_v2  ;;  %vm6242_vm5 = vcmp.eq.f32.partialorder %v15954_v58, inf  ;;  %vm17941_vm7 = vmmov %vm17940_vm4 }
 0x70c   : > { %17939 = vst [vmem:[#allocation26_spill] sm:$0xff] %v16013_v21  ;;  %v6616_v26 = vmul.f32 %v9078_v15, %v6615_v9  ;;  %9087 = vrsqrt.f32 %v16008_v10  ;;  %v6245_v43 = vand.u32 2147483648, %v15954_v58  ;;  %v7160_v56 = vmul.f32 %v15732_v32, %v15656_v38 }
 0x70d   : > { %9089 = vrcp.f32 %v15999_v60  ;;  %8453 = vmatpush.xpose.msk.msra.mxu2 %vm17941_vm7, %v7188_v34  ;;  %v6237_v17 = vmul.f32 %v9082_v47, %v6236_v62  ;;  %v16026_v61 = vpop.eup %9083  ;;  %vm6244_vm14 = vcmp.eq.f32.partialorder %v15954_v58, 0.0  ;;  %vm7164_vm0 = vweird.f32 %v15656_v38  ;;  %v16047_v34 = vpop.xlane.xlu2 %6143 }
 0x70e   : > { %9091 = vrcp.f32 %v16013_v21  ;;  %v6617_v15 = vmul.f32 %v6616_v26, %v15888_v2  ;;  %vm7165_vm15 = vweird.f32 %v15732_v32  ;;  %v7168_v57 = vand.u32 2147483647, %v15656_v38 }
 0x70f   : > { %v6238_v0 = vmul.f32 0.5, %v6237_v17  ;;  %v9086_v30 = vpop.eup %9085  ;;  %v7161_v59 = vsub.f32 1.0, %v7160_v56  ;;  %v7170_v25 = vand.u32 2147483648, %v15656_v38  ;;  %v7100_v48 = vmul.f32 %v15754_v4, %v15675_v41  ;;  %vm16070_vm2 = vmor %vm7164_vm0, %vm7165_vm15 }
 0x710   : > { %v6619_v11 = vsel %vm6618_vm1, %v15888_v2, %v6617_v15  ;;  %v6516_v7 = vmul.f32 %v9086_v30, %v15995_v19  ;;  %vm7104_vm8 = vweird.f32 %v15675_v41  ;;  %vm6522_vm6 = vcmp.eq.f32.partialorder %v15995_v19, inf }
 0x711   : > { %v6622_v9 = vsel %vm6620_vm13, %v6621_v53, %v6619_v11  ;;  %v6239_v63 = vsub.f32 1.5, %v6238_v0  ;;  %v7162_v17 = vmul.f32 %v15732_v32, %v7161_v59  ;;  %vm16053_vm1 = vcmp.eq.f32.partialorder %v7168_v57, 8.507059e+37  ;;  %v9182_v59 = vld [vmem:[%s9400_s23 + $0x80] sm:$0xff] }
 0x712   : > { %v9088_v62 = vpop.eup %9087  ;;  %v16049_v26 = vmax.f32 %v6622_v9, 1e-12  ;;  %v7101_v2 = vsub.f32 1.0, %v7100_v48  ;;  %v6517_v0 = vmul.f32 %v9086_v30, %v6516_v7  ;;  %vm7105_vm4 = vweird.f32 %v15754_v4 }
 0x713   : > { %v16057_v53 = vpop.eup %9089  ;;  %v6240_v56 = vmul.f32 %v9082_v47, %v6239_v63  ;;  %v6600_v11 = vmul.f32 %v9088_v62, %v16008_v10  ;;  %v7163_v57 = vadd.f32 %v15732_v32, %v7162_v17  ;;  %v7171_v47 = vor.u32 1.1754944e-38, %v7170_v25  ;;  %vm16081_vm0 = vmor %vm7104_vm8, %vm7105_vm4 }
 0x714   : > { %17944 = vst [vmem:[#allocation46_spill] sm:$0xff] %v16057_v53  ;;  %v16062_v9 = vpop.eup %9091  ;;  %v7102_v48 = vmul.f32 %v15754_v4, %v7101_v2  ;;  %v7108_v63 = vand.u32 2147483647, %v15675_v41  ;;  %vm5365_vm13 = vweird.f32 %v15838_v1  ;;  %v6518_v40 = vmul.f32 0.5, %v6517_v0 }
 0x715   : > { %17945 = vst [vmem:[#allocation77_spill] sm:$0xff] %v16062_v9  ;;  %v6241_v7 = vmul.f32 %v6240_v56, %v15954_v58  ;;  %v6601_v17 = vmul.f32 %v9088_v62, %v6600_v11  ;;  %vm6608_vm7 = vcmp.eq.f32.partialorder %v16008_v10, 0.0  ;;  %v7110_v25 = vand.u32 2147483648, %v15675_v41 }
 0x716   : > { %v7167_v2 = vsel %vm16070_vm2, %v15732_v32, %v7163_v57  ;;  %v7103_v5 = vadd.f32 %v15754_v4, %v7102_v48  ;;  %vm16090_vm15 = vcmp.eq.f32.partialorder %v7108_v63, 8.507059e+37  ;;  %v6980_v0 = vmul.f32 %v15628_v20, %v15576_v28 }
 0x717   : > { %vm5364_vm8 = vweird.f32 %v15772_v49  ;;  %v6243_v11 = vsel %vm6242_vm5, %v15954_v58, %v6241_v7  ;;  %v6519_v41 = vsub.f32 1.5, %v6518_v40  ;;  %v6602_v9 = vmul.f32 0.5, %v6601_v17 }
 0x718   : > { %v7172_v32 = vsel %vm16053_vm1, %v7171_v47, %v7167_v2  ;;  %v6246_v57 = vsel %vm6244_vm14, %v6245_v43, %v6243_v11  ;;  %v7107_v63 = vsel %vm16081_vm0, %v15754_v4, %v7103_v5  ;;  %v7111_v21 = vor.u32 1.1754944e-38, %v7110_v25  ;;  %v9183_v47 = vld [vmem:[%s9400_s23 + $0x60] sm:$0xff] }
 0x719   : > { %v7173_v48 = vmul.f32 %v9182_v59, %v7172_v32  ;;  %9093 = vrcp.f32 %v16049_v26  ;;  %v6520_v53 = vmul.f32 %v9086_v30, %v6519_v41  ;;  %v6603_v7 = vsub.f32 1.5, %v6602_v9  ;;  %v16119_v9 = vpop.xlane.xlu2 %6128 }
 0x71a   : > { %v6981_v40 = vsub.f32 1.0, %v6980_v0  ;;  %vm17952_vm2 = vcmask 523264   ;;  %v7112_v15 = vsel %vm16090_vm15, %v7111_v21, %v7107_v63  ;;  %vm6984_vm5 = vweird.f32 %v15576_v28 }
 0x71b   : > { %8454 = vmatpush.xpose.msk.msra.mxu2 %vm17952_vm2, %v7173_v48  ;;  %vm6985_vm14 = vweird.f32 %v15628_v20  ;;  %v6988_v58 = vand.u32 2147483647, %v15576_v28  ;;  %v16115_v43 = vmax.f32 %v6246_v57, 1e-12  ;;  %v6521_v4 = vmul.f32 %v6520_v53, %v15995_v19  ;;  %vm17955_vm4 = vmmov %vm17952_vm2 }
 0x71c   : > { %v6604_v5 = vmul.f32 %v9088_v62, %v6603_v7  ;;  %v7113_v30 = vmul.f32 %v9183_v47, %v7112_v15  ;;  %v6982_v17 = vmul.f32 %v15628_v20, %v6981_v40  ;;  %v6990_v21 = vand.u32 2147483648, %v15576_v28  ;;  %vm16138_vm0 = vmor %vm6984_vm5, %vm6985_vm14  ;;  %v9184_v47 = vld [vmem:[%s9400_s23 + $0x20] sm:$0xff] }
 0x71d   : > { %vm16122_vm1 = vcmp.eq.f32.partialorder %v6988_v58, 8.507059e+37  ;;  %v7085_v25 = vmul.f32 %v15768_v31, %v15685_v54  ;;  %v6523_v53 = vsel %vm6522_vm6, %v15995_v19, %v6521_v4  ;;  %vm7089_vm15 = vweird.f32 %v15685_v54  ;;  %vm16162_vm14 = vmor %vm5364_vm8, %vm5365_vm13 }
 0x71e   : > { %v6605_v62 = vmul.f32 %v6604_v5, %v16008_v10  ;;  %8440 = vmatpush.xpose.msk.msra.mxu1 %vm17955_vm4, %v7113_v30  ;;  %vm7090_vm2 = vweird.f32 %v15768_v31  ;;  %v17958_v56 = vand.u32 2147483648, %v15995_v19  ;;  %vm17959_vm6 = vcmp.eq.f32.partialorder %v15995_v19, 0.0  ;;  %v16192_v5 = vpop.xlane.xlu1 %6134 }
 0x71f   : > { %v6983_v11 = vadd.f32 %v15628_v20, %v6982_v17  ;;  %v6991_v41 = vor.u32 1.1754944e-38, %v6990_v21  ;;  %v7086_v32 = vsub.f32 1.0, %v7085_v25  ;;  %v16149_v57 = vpop.eup %9093  ;;  %vm17960_vm5 = vcmp.eq.f32.partialorder %v16008_v10, inf  ;;  %vm16188_vm13 = vmor %vm7089_vm15, %vm7090_vm2  ;;  %v17966_v17 = vld [vmem:[#allocation36_spill] sm:$0xff]  ;;  %v17968_v21 = vld [vmem:[#allocation59_spill] sm:$0xff] }
 0x720   : > { %v6526_v0 = vsel %vm17959_vm6, %v17958_v56, %v6523_v53  ;;  %v6607_v59 = vsel %vm17960_vm5, %v16008_v10, %v6605_v62  ;;  %v7093_v48 = vand.u32 2147483647, %v15685_v54  ;;  %v7095_v63 = vand.u32 2147483648, %v15685_v54  ;;  %v17970_v62 = vld [vmem:[#allocation57_spill] sm:$0xff] }
 0x721   : > { %v16151_v28 = vmax.f32 %v6526_v0, 1e-12  ;;  %v17963_v7 = vand.u32 2147483648, %v16008_v10  ;;  %v6987_v15 = vsel %vm16138_vm0, %v15628_v20, %v6983_v11  ;;  %v7087_v58 = vmul.f32 %v15768_v31, %v7086_v32 }
 0x722   : > { %9095 = vrsqrt.f32 %v16047_v34  ;;  %v5367_v49 = vsel %vm16162_vm14, %v15838_v1, %v15941_v50  ;;  %v6992_v10 = vsel %vm16122_vm1, %v6991_v41, %v6987_v15  ;;  %v7096_v50 = vor.u32 1.1754944e-38, %v7095_v63 }
 0x723   : > { %v6610_v40 = vsel %vm6608_vm7, %v17963_v7, %v6607_v59  ;;  %9097 = vrcp.f32 %v16115_v43  ;;  %v6993_v30 = vmul.f32 %v9184_v47, %v6992_v10  ;;  %v7088_v1 = vadd.f32 %v15768_v31, %v7087_v58 }
 0x724   : > { %v16180_v4 = vmax.f32 %v6610_v40, 1e-12  ;;  %vm7094_vm7 = vcmp.eq.f32.partialorder %v7093_v48, 8.507059e+37  ;;  %v17967_v38 = vsel %vm15779_vm11, %v15365_v3, %v15509_v42  ;;  %v17969_v25 = vsel %vm15875_vm12, %v15432_v16, %v15800_v46  ;;  %v16221_v3 = vpop.xlane.xlu2 %6131  ;;  %v17972_v42 = vld [vmem:[#allocation17_spill] sm:$0xff]  ;;  %vm17976_vm11 = vmmov %vm17955_vm4 }
 0x725   : > { %v16202_v54 = vmul.f32 %v17967_v38, %v17966_v17  ;;  %v16210_v53 = vmul.f32 %v17969_v25, %v17968_v21  ;;  %v17971_v35 = vsel %vm15899_vm10, %v15788_v55, %v15867_v23  ;;  %9099 = vrcp.f32 %v16151_v28  ;;  %8430 = vmatpush.xpose.msk.msra.mxu0 %vm17976_vm11, %v6993_v30 }
 0x726   : > { %v16218_v2 = vmul.f32 %v17971_v35, %v17970_v62  ;;  %v17973_v16 = vsel %vm15906_vm9, %v15819_v45, %v15882_v6  ;;  %v17975_v55 = vsel %vm15920_vm3, %v15826_v14, %v15885_v27  ;;  %v7092_v24 = vsel %vm16188_vm13, %v15768_v31, %v7088_v1  ;;  %v9185_v27 = vld [vmem:[%s9400_s23 + $0x58] sm:$0xff]  ;;  %vm17978_vm9 = vmmov %vm17955_vm4 }
 0x727   : > { %v16229_v46 = vmul.f32 %v17973_v16, %v17972_v42  ;;  %v16237_v23 = vmul.f32 %v17975_v55, %v17974_v44  ;;  %9101 = vrsqrt.f32 %v16192_v5  ;;  %v16245_v45 = vmul.f32 %v5367_v49, %v17977_v12  ;;  %v8577_v16 = vpop.permute.xlu0 %8576  ;;  %vm17985_vm13 = vmmov %vm17978_vm9 }
 0x728   : > { %9103 = vrcp.f32 %v16180_v4  ;;  %v7097_v6 = vsel %vm7094_vm7, %v7096_v50, %v7092_v24  ;;  %v6965_v22 = vmul.f32 %v15841_v39, %v15760_v37  ;;  %v9096_v14 = vpop.eup %9095  ;;  %v6973_v0 = vand.u32 2147483647, %v15760_v37 }
 0x729   : > { %v7098_v56 = vmul.f32 %v9185_v27, %v7097_v6  ;;  %v6975_v11 = vand.u32 2147483648, %v15760_v37  ;;  %v6950_v31 = vmul.f32 %v15949_v18, %v15822_v13  ;;  %v16255_v41 = vpop.eup %9097  ;;  %v6212_v32 = vmul.f32 %v9096_v14, %v16047_v34 }
 0x72a   : > { %v6966_v59 = vsub.f32 1.0, %v6965_v22  ;;  %vm6969_vm12 = vweird.f32 %v15760_v37  ;;  %vm6970_vm10 = vweird.f32 %v15841_v39  ;;  %vm6218_vm3 = vcmp.eq.f32.partialorder %v16047_v34, inf }
 0x72b   : > { %8441 = vmatpush.xpose.msk.msra.mxu1 %vm17978_vm9, %v7098_v56  ;;  %v6951_v48 = vsub.f32 1.0, %v6950_v31  ;;  %vm6954_vm8 = vweird.f32 %v15822_v13  ;;  %vm6955_vm1 = vweird.f32 %v15949_v18  ;;  %v6958_v63 = vand.u32 2147483647, %v15822_v13  ;;  %v16265_v19 = vpop.eup %9099  ;;  %vm16273_vm0 = vmor %vm6969_vm12, %vm6970_vm10  ;;  %v9186_v56 = vld [vmem:[%s9400_s23 + $0x18] sm:$0xff] }
 0x72c   : > { %v6213_v7 = vmul.f32 %v9096_v14, %v6212_v32  ;;  %v6967_v40 = vmul.f32 %v15841_v39, %v6966_v59  ;;  %v6960_v15 = vand.u32 2147483648, %v15822_v13  ;;  %9105 = vrsqrt.f32 %v16119_v9  ;;  %vm16290_vm2 = vmor %vm6954_vm8, %vm6955_vm1  ;;  %v16294_v21 = vpop.permute.xlu2 %8581 }
 0x72d   : > { %v9102_v58 = vpop.eup %9101  ;;  %vm6220_vm4 = vcmp.eq.f32.partialorder %v16047_v34, 0.0  ;;  %vm16277_vm15 = vcmp.eq.f32.partialorder %v6973_v0, 8.507059e+37  ;;  %v6976_v20 = vor.u32 1.1754944e-38, %v6975_v11  ;;  %v6952_v47 = vmul.f32 %v15949_v18, %v6951_v48 }
 0x72e   : > { %v16282_v30 = vpop.eup %9103  ;;  %v6214_v1 = vmul.f32 0.5, %v6213_v7  ;;  %v6176_v50 = vmul.f32 %v9102_v58, %v16192_v5  ;;  %v6968_v17 = vadd.f32 %v15841_v39, %v6967_v40  ;;  %v6961_v38 = vor.u32 1.1754944e-38, %v6960_v15 }
 0x72f   : > { %v6221_v25 = vand.u32 2147483648, %v16047_v34  ;;  %vm6182_vm6 = vcmp.eq.f32.partialorder %v16192_v5, inf  ;;  %v6953_v62 = vadd.f32 %v15949_v18, %v6952_v47  ;;  %vm6959_vm5 = vcmp.eq.f32.partialorder %v6958_v63, 8.507059e+37  ;;  %v9187_v63 = vld [vmem:[%s9400_s23 + $0x10] sm:$0xff] }
 0x730   : > { %v6215_v35 = vsub.f32 1.5, %v6214_v1  ;;  %v6177_v42 = vmul.f32 %v9102_v58, %v6176_v50  ;;  %vm6184_vm14 = vcmp.eq.f32.partialorder %v16192_v5, 0.0  ;;  %v6972_v13 = vsel %vm16273_vm0, %v15841_v39, %v6968_v17 }
 0x731   : > { %v6185_v44 = vand.u32 2147483648, %v16192_v5  ;;  %v6977_v55 = vsel %vm16277_vm15, %v6976_v20, %v6972_v13  ;;  %v6957_v24 = vsel %vm16290_vm2, %v15949_v18, %v6953_v62  ;;  %v6161_v12 = vand.u32 2147483648, %v16119_v9 }
 0x732   : > { %v9106_v6 = vpop.eup %9105  ;;  %v6216_v22 = vmul.f32 %v9096_v14, %v6215_v35  ;;  %v6178_v27 = vmul.f32 0.5, %v6177_v42  ;;  %v6978_v0 = vmul.f32 %v9186_v56, %v6977_v55  ;;  %v6962_v11 = vsel %vm6959_vm5, %v6961_v38, %v6957_v24  ;;  %vm17994_vm5 = vmmov %vm17978_vm9 }
 0x733   : > { %v6152_v39 = vmul.f32 %v9106_v6, %v16119_v9  ;;  %v5698_v31 = vmul.f32 %v15708_v33, %v15482_v52  ;;  %v8579_v32 = vunpack.i.h.bf16 %v8577_v16  ;;  %9107 = vrsqrt.f32 %v16221_v3 }
 0x734   : > { %v6217_v59 = vmul.f32 %v6216_v22, %v16047_v34  ;;  %v6179_v18 = vsub.f32 1.5, %v6178_v27  ;;  %8431 = vmatpush.xpose.msk.msra.mxu0 %vm17985_vm13, %v6978_v0  ;;  %vm6158_vm7 = vcmp.eq.f32.partialorder %v16119_v9, inf  ;;  %v8578_v14 = vunpack.i.l.bf16 %v8577_v16  ;;  %v16343_v38 = vpop.permute.xlu2 %8591  ;;  %v8587_v27 = vpop.permute.xlu1 %8586 }
 0x735   : > { %v5697_v48 = vmul.f32 %v15708_v33, %v15499_v29  ;;  %v6963_v7 = vmul.f32 %v9187_v63, %v6962_v11  ;;  %v6153_v40 = vmul.f32 %v9106_v6, %v6152_v39  ;;  %vm6160_vm11 = vcmp.eq.f32.partialorder %v16119_v9, 0.0 }
 0x736   : > { %v7070_v52 = vmul.f32 %v16026_v61, %v15938_v36  ;;  %vm7074_vm12 = vweird.f32 %v15938_v36  ;;  %v6219_v15 = vsel %vm6218_vm3, %v16047_v34, %v6217_v59  ;;  %v6180_v49 = vmul.f32 %v9102_v58, %v6179_v18 }
 0x737   : > { %vm7075_vm10 = vweird.f32 %v16026_v61  ;;  %v7078_v10 = vand.u32 2147483647, %v15938_v36  ;;  %v6222_v29 = vsel %vm6220_vm4, %v6221_v25, %v6219_v15  ;;  %v6154_v20 = vmul.f32 0.5, %v6153_v40 }
 0x738   : > { %v7071_v47 = vsub.f32 1.0, %v7070_v52  ;;  %v7080_v1 = vand.u32 2147483648, %v15938_v36  ;;  %v16333_v50 = vmax.f32 %v6222_v29, 1e-12  ;;  %v6181_v17 = vmul.f32 %v6180_v49, %v16192_v5  ;;  %8432 = vmatpush.xpose.msk.msra.mxu0 %vm17978_vm9, %v6963_v7  ;;  %vm16356_vm1 = vmor %vm7074_vm12, %vm7075_vm10 }
 0x739   : > { %vm17986_vm8 = vcmask 130048   ;;  %v9108_v34 = vpop.eup %9107  ;;  %v6155_v25 = vsub.f32 1.5, %v6154_v20  ;;  %v6173_v62 = vand.u32 2147483648, %v16221_v3  ;;  %v8584_v42 = vunpack.i.h.bf16 %v16294_v21 }
 0x73a   : > { %v16338_v37 = vsel %vm17986_vm8, %v5698_v31, %v8579_v32  ;;  %vm17987_vm3 = vmmov %vm17986_vm8  ;;  %v7072_v35 = vmul.f32 %v16026_v61, %v7071_v47  ;;  %v6183_v13 = vsel %vm6182_vm6, %v16192_v5, %v6181_v17  ;;  %v6164_v16 = vmul.f32 %v9108_v34, %v16221_v3 }
 0x73b   : > { %v16341_v58 = vsel %vm17987_vm3, %v5697_v48, %v8578_v14  ;;  %vm16360_vm4 = vcmp.eq.f32.partialorder %v7078_v10, 8.507059e+37  ;;  %v7081_v22 = vor.u32 1.1754944e-38, %v7080_v1  ;;  %v6186_v56 = vsel %vm6184_vm14, %v6185_v44, %v6183_v13  ;;  %vm17992_vm2 = vmmov %vm17987_vm3  ;;  %v9188_v48 = vld [vmem:[%s9400_s23 + $0x50] sm:$0xff] }
 0x73c   : > { %v6156_v0 = vmul.f32 %v9106_v6, %v6155_v25  ;;  %vm6170_vm0 = vcmp.eq.f32.partialorder %v16221_v3, inf  ;;  %v7073_v11 = vadd.f32 %v16026_v61, %v7072_v35  ;;  %v5694_v36 = vmul.f32 %v15708_v33, %v16218_v2  ;;  %vm17993_vm6 = vmmov %vm17992_vm2  ;;  %v16416_v29 = vpop.permute.xlu2 %8601 }
 0x73d   : > { %9109 = vrcp.f32 %v16333_v50  ;;  %v16371_v39 = vmax.f32 %v6186_v56, 1e-12  ;;  %v6165_v31 = vmul.f32 %v9108_v34, %v6164_v16  ;;  %v8583_v32 = vunpack.i.l.bf16 %v16294_v21  ;;  %vm17995_vm14 = vmmov %vm17992_vm2 }
 0x73e   : > { %v6157_v59 = vmul.f32 %v6156_v0, %v16119_v9  ;;  %vm6172_vm15 = vcmp.eq.f32.partialorder %v16221_v3, 0.0  ;;  %v7077_v5 = vsel %vm16356_vm1, %v16026_v61, %v7073_v11  ;;  %v16380_v44 = vsel %vm17992_vm2, %v5694_v36, %v8584_v42  ;;  %vm18000_vm3 = vmmov %vm17992_vm2  ;;  %v16540_v0 = vpop.xlane.xlu0 %6137 }
 0x73f   : > { %v8589_v2 = vunpack.i.h.bf16 %v8587_v27  ;;  %v6166_v6 = vmul.f32 0.5, %v6165_v31  ;;  %v7082_v18 = vsel %vm16360_vm4, %v7081_v22, %v7077_v5  ;;  %v5693_v14 = vmul.f32 %v15708_v33, %v16229_v46  ;;  %vm18003_vm2 = vmmov %vm17994_vm5 }
 0x740   : > { %v5699_v21 = vmul.f32 %v15708_v33, %v16210_v53  ;;  %9111 = vrcp.f32 %v16371_v39  ;;  %v6159_v61 = vsel %vm6158_vm7, %v16119_v9, %v6157_v59  ;;  %v7083_v63 = vmul.f32 %v9188_v48, %v7082_v18  ;;  %v9190_v48 = vld [vmem:[%s9400_s23 + $0xc0] sm:$0xff] }
 0x741   : > { %v5700_v7 = vmul.f32 %v15708_v33, %v16202_v54  ;;  %v6162_v40 = vsel %vm6160_vm11, %v6161_v12, %v6159_v61  ;;  %v6167_v46 = vsub.f32 1.5, %v6166_v6  ;;  %v16400_v52 = vsel %vm17993_vm6, %v5693_v14, %v8583_v32 }
 0x742   : > { %v7055_v53 = vmul.f32 %v16149_v57, %v16049_v26  ;;  %8442 = vmatpush.xpose.msk.msra.mxu1 %vm17994_vm5, %v7083_v63  ;;  %vm7059_vm13 = vweird.f32 %v16049_v26  ;;  %vm7060_vm7 = vweird.f32 %v16149_v57  ;;  %v7063_v33 = vand.u32 2147483647, %v16049_v26 }
 0x743   : > { %v16406_v15 = vsel %vm17995_vm14, %v5700_v7, %v8589_v2  ;;  %v16411_v9 = vpop.eup %9109  ;;  %v6168_v54 = vmul.f32 %v9108_v34, %v6167_v46  ;;  %v7065_v49 = vand.u32 2147483648, %v16049_v26  ;;  %v7280_v10 = vmul.f32 %v15962_v51, %v15879_v8  ;;  %vm16434_vm9 = vmor %vm7059_vm13, %vm7060_vm7 }
 0x744   : > { %v7056_v12 = vsub.f32 1.0, %v7055_v53  ;;  %v16418_v20 = vmax.f32 %v6162_v40, 1e-12  ;;  %v8588_v47 = vunpack.i.l.bf16 %v8587_v27  ;;  %vm16420_vm11 = vcmp.eq.f32.partialorder %v7063_v33, 8.507059e+37  ;;  %v16492_v7 = vpop.permute.xlu2 %8616  ;;  %vm18004_vm14 = vmmov %vm18003_vm2 }
 0x745   : > { %vm7284_vm12 = vweird.f32 %v15879_v8  ;;  %v6169_v17 = vmul.f32 %v6168_v54, %v16221_v3  ;;  %v7281_v25 = vsub.f32 1.0, %v7280_v10  ;;  %vm7285_vm10 = vweird.f32 %v15962_v51  ;;  %v18009_v10 = vld [vmem:[#allocation46_spill] sm:$0xff] }
 0x746   : > { %v7057_v34 = vmul.f32 %v16149_v57, %v7056_v12  ;;  %v16428_v35 = vpop.eup %9111  ;;  %v7066_v13 = vor.u32 1.1754944e-38, %v7065_v49  ;;  %v7288_v16 = vand.u32 2147483647, %v15879_v8  ;;  %v7290_v55 = vand.u32 2147483648, %v15879_v8  ;;  %vm16452_vm1 = vmor %vm7284_vm12, %vm7285_vm10 }
 0x747   : > { %v8594_v24 = vunpack.i.h.bf16 %v16343_v38  ;;  %v6171_v22 = vsel %vm6170_vm0, %v16221_v3, %v6169_v17  ;;  %v7282_v26 = vmul.f32 %v15962_v51, %v7281_v25  ;;  %vm5829_vm8 = vcmask 261120   ;;  %v9189_v3 = vld [vmem:[%s9400_s23 + $0x48] sm:$0xff] }
 0x748   : > { %v7058_v27 = vadd.f32 %v16149_v57, %v7057_v34  ;;  %9113 = vrcp.f32 %v16418_v20  ;;  %v16448_v56 = vsel %vm18000_vm3, %v5699_v21, %v8588_v47  ;;  %v7291_v11 = vor.u32 1.1754944e-38, %v7290_v55  ;;  %v16483_v21 = vpop.permute.xlu1 %8596 }
 0x749   : > { %v8593_v36 = vunpack.i.l.bf16 %v16343_v38  ;;  %v6174_v31 = vsel %vm6172_vm15, %v6173_v62, %v6171_v22  ;;  %v7283_v59 = vadd.f32 %v15962_v51, %v7282_v26  ;;  %vm7289_vm4 = vcmp.eq.f32.partialorder %v7288_v16, 8.507059e+37 }
 0x74a   : > { %v7062_v32 = vsel %vm16434_vm9, %v16149_v57, %v7058_v27  ;;  %v16469_v5 = vsel %vm5829_vm8, %v16338_v37, %v8594_v24  ;;  %v6935_v38 = vmul.f32 %v16265_v19, %v16151_v28  ;;  %vm6939_vm0 = vweird.f32 %v16151_v28 }
 0x74b   : > { %v7067_v8 = vsel %vm16420_vm11, %v7066_v13, %v7062_v32  ;;  %v7287_v57 = vsel %vm16452_vm1, %v15962_v51, %v7283_v59  ;;  %vm6940_vm15 = vweird.f32 %v16265_v19  ;;  %v6943_v2 = vand.u32 2147483647, %v16151_v28 }
 0x74c   : > { %v7068_v62 = vmul.f32 %v9189_v3, %v7067_v8  ;;  %v7292_v6 = vsel %vm7289_vm4, %v7291_v11, %v7287_v57  ;;  %v6936_v18 = vsub.f32 1.0, %v6935_v38  ;;  %v6945_v37 = vand.u32 2147483648, %v16151_v28  ;;  %vm16504_vm13 = vmor %vm6939_vm0, %vm6940_vm15  ;;  %v9191_v11 = vld [vmem:[%s9400_s23 + $0x8] sm:$0xff]  ;;  %v9192_v57 = vld [vmem:[%s9400_s23 + $0x40] sm:$0xff] }
 0x74d   : > { %v7040_v14 = vmul.f32 %v16282_v30, %v16180_v4  ;;  %v16485_v61 = vmax.f32 %v6174_v31, 1e-12  ;;  %v7293_v63 = vmul.f32 %v9190_v48, %v7292_v6  ;;  %v5834_v51 = vsel %vm5829_vm8, %v16341_v58, %v8593_v36  ;;  %vm18016_vm4 = vmmov %vm18003_vm2  ;;  %v9194_v31 = vld [vmem:[%s9526_s21 + $0xb8] sm:$0xff] }
 0x74e   : > { %8443 = vmatpush.xpose.msk.msra.mxu1 %vm18003_vm2, %v7068_v62  ;;  %vm7044_vm6 = vweird.f32 %v16180_v4  ;;  %v16494_v40 = vpop.eup %9113  ;;  %v6937_v46 = vmul.f32 %v16265_v19, %v6936_v18  ;;  %vm7045_vm5 = vweird.f32 %v16282_v30  ;;  %v7048_v33 = vand.u32 2147483647, %v16180_v4  ;;  %vm18017_vm15 = vmmov %vm18003_vm2 }
 0x74f   : > { %v7041_v53 = vsub.f32 1.0, %v7040_v14  ;;  %8464 = vmatpush.xpose.msk.msra.mxu3 %vm18004_vm14, %v7293_v63  ;;  %vm16508_vm7 = vcmp.eq.f32.partialorder %v6943_v2, 8.507059e+37  ;;  %v6946_v12 = vor.u32 1.1754944e-38, %v6945_v37  ;;  %v7050_v49 = vand.u32 2147483648, %v16180_v4  ;;  %vm16521_vm11 = vmor %vm7044_vm6, %vm7045_vm5 }
 0x750   : > { %v6920_v47 = vmul.f32 %v18009_v10, %v15999_v60  ;;  %v6938_v1 = vadd.f32 %v16265_v19, %v6937_v46  ;;  %v8599_v28 = vunpack.i.h.bf16 %v16483_v21  ;;  %v8598_v34 = vunpack.i.l.bf16 %v16483_v21  ;;  %v16551_v59 = vpop.permute.xlu1 %8606  ;;  %v8627_v21 = vpop.permute.xlu2 %8626  ;;  %vm18020_vm14 = vmmov %vm18003_vm2 }
 0x751   : > { %v7042_v17 = vmul.f32 %v16282_v30, %v7041_v53  ;;  %vm16525_vm12 = vcmp.eq.f32.partialorder %v7048_v33, 8.507059e+37  ;;  %v7051_v13 = vor.u32 1.1754944e-38, %v7050_v49  ;;  %vm6924_vm10 = vweird.f32 %v15999_v60  ;;  %v18018_v49 = vld [vmem:[#allocation78_spill] sm:$0xff] }
 0x752   : > { %v6921_v16 = vsub.f32 1.0, %v6920_v47  ;;  %v6942_v55 = vsel %vm16504_vm13, %v16265_v19, %v6938_v1  ;;  %vm6925_vm9 = vweird.f32 %v18009_v10  ;;  %v6928_v4 = vand.u32 2147483647, %v15999_v60  ;;  %v16589_v1 = vpop.permute.xlu0 %8631 }
 0x753   : > { %v7043_v24 = vadd.f32 %v16282_v30, %v7042_v17  ;;  %v6947_v22 = vsel %vm16508_vm7, %v6946_v12, %v6942_v55  ;;  %v6930_v26 = vand.u32 2147483648, %v15999_v60  ;;  %vm5838_vm3 = vcmask 392192   ;;  %vm6926_vm0 = vmor %vm6924_vm10, %vm6925_vm9 }
 0x754   : > { %v6922_v27 = vmul.f32 %v18009_v10, %v6921_v16  ;;  %v6948_v36 = vmul.f32 %v9191_v11, %v6947_v22  ;;  %vm16546_vm1 = vcmp.eq.f32.partialorder %v6928_v4, 8.507059e+37  ;;  %v8604_v32 = vunpack.i.h.bf16 %v16416_v29 }
 0x755   : > { %v7047_v19 = vsel %vm16521_vm11, %v16282_v30, %v7043_v24  ;;  %v6931_v3 = vor.u32 1.1754944e-38, %v6930_v26  ;;  %v8603_v62 = vunpack.i.l.bf16 %v16416_v29  ;;  %v8619_v6 = vunpack.i.h.bf16 %v16492_v7 }
 0x756   : > { %v7052_v8 = vsel %vm16525_vm12, %v7051_v13, %v7047_v19  ;;  %v6923_v38 = vadd.f32 %v18009_v10, %v6922_v27  ;;  %8433 = vmatpush.xpose.msk.msra.mxu0 %vm18016_vm4, %v6948_v36  ;;  %v5844_v2 = vsel %vm5838_vm3, %v16469_v5, %v8604_v32  ;;  %v8618_v18 = vunpack.i.l.bf16 %v16492_v7  ;;  %v9193_v7 = vld [vmem:[%s9400_s23] sm:$0xff] }
 0x757   : > { %v7053_v30 = vmul.f32 %v9192_v57, %v7052_v8  ;;  %v5852_v29 = vpack.c.bf16 %v5844_v2, %v5844_v2  ;;  %v5843_v14 = vsel %vm5838_vm3, %v5834_v51, %v8603_v62  ;;  %9115 = vrsqrt.f32 %v16540_v0 }
 0x758   : > { %v6927_v37 = vsel %vm6926_vm0, %v18009_v10, %v6923_v38  ;;  %9117 = vrcp.f32 %v16485_v61  ;;  %v5836_v60 = vsel %vm5829_vm8, %v16448_v56, %v8598_v34  ;;  %v5851_v48 = vpack.c.bf16 %v5843_v14, %v5843_v14  ;;  %v18019_v10 = vld [vmem:[#allocation5_spill] sm:$0xff]  ;;  %v16604_v27 = vpop.permute.xlu1 %8611 }
 0x759   : > { %8444 = vmatpush.xpose.msk.msra.mxu1 %vm18017_vm15, %v7053_v30  ;;  %v6932_v5 = vsel %vm16546_vm1, %v6931_v3, %v6927_v37  ;;  %v5837_v63 = vsel %vm5829_vm8, %v16406_v15, %v8599_v28  ;;  %v5982_v51 = vunpack.c.l.b16 %v5852_v29  ;;  %v5831_v53 = vsel %vm5829_vm8, %v16380_v44, %v8619_v6  ;;  %v9195_v30 = vld [vmem:[%s9526_s21 + $0xb0] sm:$0xff]  ;;  %vm18023_vm1 = vmmov %vm18003_vm2 }
 0x75a   : > { %v6933_v46 = vmul.f32 %v9193_v7, %v6932_v5  ;;  %v5981_v33 = vunpack.c.l.b16 %v5851_v48  ;;  %v5830_v58 = vsel %vm5829_vm8, %v16400_v52, %v8618_v18  ;;  %v8629_v54 = vunpack.i.h.bf16 %v8627_v21  ;;  %v9196_v5 = vld [vmem:[%s9526_s21 + $0xa8] sm:$0xff] }
 0x75b   : > { %v8628_v12 = vunpack.i.l.bf16 %v8627_v21  ;;  %v6197_v56 = vand.u32 2147483648, %v16540_v0  ;;  %v6316_v47 = vmul.f32 %v18019_v10, %v18018_v49  ;;  %vm6320_vm6 = vweird.f32 %v18018_v49 }
 0x75c   : > { %8434 = vmatpush.xpose.msk.msra.mxu0 %vm18003_vm2, %v6933_v46  ;;  %v6324_v15 = vand.u32 2147483647, %v18018_v49  ;;  %v5983_v44 = vpack.c.b16 %v5982_v51, %v5981_v33  ;;  %v5840_v52 = vsel %vm5838_vm3, %v5831_v53, %v8629_v54  ;;  %v6326_v28 = vand.u32 2147483648, %v18018_v49  ;;  %v9197_v46 = vld [vmem:[%s9526_s21 + $0x38] sm:$0xff]  ;;  %v9198_v51 = vld [vmem:[%s9366_s25 + $0x20] sm:$0xff]  ;;  %v9213_v54 = vld [vmem:[%s9526_s21 + $0x8] sm:$0xff] }
 0x75d   : > { %v5839_v17 = vsel %vm5838_vm3, %v5830_v58, %v8628_v12  ;;  %v9116_v34 = vpop.eup %9115  ;;  %v5848_v42 = vpack.c.bf16 %v5840_v52, %v5840_v52  ;;  %v6317_v13 = vsub.f32 1.0, %v6316_v47  ;;  %vm6321_vm5 = vweird.f32 %v18019_v10  ;;  %v9199_v49 = vld [vmem:[%s9526_s21 + $0xa0] sm:$0xff] }
 0x75e   : > { %v5847_v25 = vpack.c.bf16 %v5839_v17, %v5839_v17  ;;  %v16595_v16 = vpop.eup %9117  ;;  %8409 = vmatmul.msk.bf16.vlgmr.msrb.gmra.mxu2 %vm18020_vm14, %v5983_v44  ;;  %v6188_v55 = vmul.f32 %v9116_v34, %v16540_v0  ;;  %vm16599_vm13 = vcmp.eq.f32.partialorder %v6324_v15, 8.507059e+37  ;;  %v6327_v4 = vor.u32 1.1754944e-38, %v6326_v28  ;;  %vm6322_vm9 = vmor %vm6320_vm6, %vm6321_vm5  ;;  %v9201_v17 = vld [vmem:[%s9526_s21 + $0x30] sm:$0xff]  ;;  %v18038_v15 = vld [vmem:[#allocation26_spill] sm:$0xff] }
 0x75f   : > { %v8634_v22 = vunpack.i.h.bf16 %v16589_v1  ;;  %vm6194_vm7 = vcmp.eq.f32.partialorder %v16540_v0, inf  ;;  %v5890_v11 = vunpack.c.l.b16 %v5848_v42  ;;  %v6318_v36 = vmul.f32 %v18019_v10, %v6317_v13  ;;  %7869 = vmatpush.msrb.mxu2 %v9194_v31  ;;  %v9202_v42 = vld [vmem:[%s9526_s21 + $0x98] sm:$0xff]  ;;  %vm18029_vm6 = vmmov %vm18023_vm1 }
 0x760   : > { %v5889_v26 = vunpack.c.l.b16 %v5847_v25  ;;  %v8609_v19 = vunpack.i.h.bf16 %v16551_v59  ;;  %v6189_v32 = vmul.f32 %v9116_v34, %v6188_v55  ;;  %v8608_v8 = vunpack.i.l.bf16 %v16551_v59  ;;  %v8622_v24 = vpop.permute.xlu1 %8621 }
 0x761   : > { %v6331_v38 = vmul.f32 %v16411_v9, %v16333_v50  ;;  %vm6335_vm11 = vweird.f32 %v16333_v50  ;;  %v6319_v62 = vadd.f32 %v18019_v10, %v6318_v36  ;;  %vm6336_vm12 = vweird.f32 %v16411_v9  ;;  %7870 = vmatpush.msrb.mxu2 %v9195_v30  ;;  %v9207_v30 = vld [vmem:[%s9526_s21 + $0x88] sm:$0xff] }
 0x762   : > { %v5891_v3 = vpack.c.b16 %v5890_v11, %v5889_v26  ;;  %v5846_v57 = vsel %vm5838_vm3, %v5837_v63, %v8609_v19  ;;  %v6190_v2 = vmul.f32 0.5, %v6189_v32  ;;  %vm6196_vm10 = vcmp.eq.f32.partialorder %v16540_v0, 0.0  ;;  %vm16641_vm4 = vmor %vm6335_vm11, %vm6336_vm12  ;;  %v9205_v32 = vld [vmem:[%s9526_s21 + $0x20] sm:$0xff] }
 0x763   : > { %v5845_v59 = vsel %vm5838_vm3, %v5836_v60, %v8608_v8  ;;  %v5854_v6 = vpack.c.bf16 %v5846_v57, %v5846_v57  ;;  %v6332_v18 = vsub.f32 1.0, %v6331_v38  ;;  %v6323_v37 = vsel %vm6322_vm9, %v18019_v10, %v6319_v62  ;;  %7871 = vmatpush.msrb.mxu2 %v9196_v5  ;;  %v9206_v8 = vld [vmem:[%s9526_s21 + $0xf8] sm:$0xff]  ;;  %vm18035_vm12 = vmmov %vm18023_vm1 }
 0x764   : > { %8375 = vmatmul.msk.bf16.vlgmr.msrb.gmra.mxu0 %vm18023_vm1, %v5891_v3  ;;  %v5853_v29 = vpack.c.bf16 %v5845_v59, %v5845_v59  ;;  %v6339_v14 = vand.u32 2147483647, %v16333_v50  ;;  %v6341_v21 = vand.u32 2147483648, %v16333_v50  ;;  %v6191_v48 = vsub.f32 1.5, %v6190_v2  ;;  %v9200_v50 = vld [vmem:[%s16990_s9] ss:$0 sm:$0xff] }
 0x765   : > { %v6328_v63 = vsel %vm16599_vm13, %v6327_v4, %v6323_v37  ;;  %v6028_v60 = vunpack.c.l.b16 %v5854_v6  ;;  %v6333_v7 = vmul.f32 %v16411_v9, %v6332_v18  ;;  %7811 = vmatpush.msrb.mxu0 %v9197_v46  ;;  %v8633_v33 = vunpack.i.l.bf16 %v16589_v1  ;;  %7872 = vmatpush.msrb.mxu2 %v9199_v49  ;;  %v9203_v4 = vld [vmem:[%s9526_s21 + $0x28] sm:$0xff]  ;;  %v9208_v18 = vld [vmem:[%s9526_s21 + $0x18] sm:$0xff]  ;;  %v9209_v37 = vld [vmem:[%s9526_s21 + $0xf0] sm:$0xff] }
 0x766   : > { %v16634_v53 = vmul.f32 %v9198_v51, %v6328_v63  ;;  %v6027_v58 = vunpack.c.l.b16 %v5853_v29  ;;  %v6342_v12 = vor.u32 1.1754944e-38, %v6341_v21  ;;  %v6192_v10 = vmul.f32 %v9116_v34, %v6191_v48  ;;  %v9210_v21 = vld [vmem:[%s9526_s21 + $0x80] sm:$0xff] }
 0x767   : > { %v6334_v47 = vadd.f32 %v16411_v9, %v6333_v7  ;;  %vm16647_vm0 = vcmp.eq.f32.partialorder %v6339_v14, 8.507059e+37  ;;  %v5696_v44 = vmul.f32 %v9200_v50, %v16237_v23  ;;  %7812 = vmatpush.msrb.mxu0 %v9201_v17  ;;  %v8614_v28 = vunpack.i.h.bf16 %v16604_v27  ;;  %7873 = vmatpush.msrb.mxu2 %v9202_v42  ;;  %v9215_v17 = vld [vmem:[%s9526_s21 + $0xe0] sm:$0xff] }
 0x768   : > { %v6029_v52 = vpack.c.b16 %v6028_v60, %v6027_v58  ;;  %v8613_v34 = vunpack.i.l.bf16 %v16604_v27  ;;  %v6256_v25 = vmul.f32 %v16494_v40, %v16418_v20  ;;  %v6193_v13 = vmul.f32 %v6192_v10, %v16540_v0  ;;  %v9211_v60 = vld [vmem:[%s9526_s21 + $0x10] sm:$0xff] }
 0x769   : > { %v6338_v55 = vsel %vm16641_vm4, %v16411_v9, %v6334_v47  ;;  %v5695_v23 = vmul.f32 %v9200_v50, %v16245_v45  ;;  %vm6260_vm15 = vweird.f32 %v16418_v20  ;;  %7813 = vmatpush.msrb.mxu0 %v9203_v4  ;;  %vm18028_vm2 = vcmask 130048   ;;  %v9204_v45 = vld [vmem:[%s9526_s21 + $0x90] sm:$0xff] }
 0x76a   : > { %v16670_v27 = vsel %vm16647_vm0, %v6342_v12, %v6338_v55  ;;  %v5824_v26 = vsel %vm18028_vm2, %v5696_v44, %v8614_v28  ;;  %8426 = vmatmul.msk.bf16.vlgmr.msrb.gmra.mxu3 %vm18029_vm6, %v6029_v52  ;;  %v6257_v11 = vsub.f32 1.0, %v6256_v25  ;;  %vm6261_vm5 = vweird.f32 %v16494_v40  ;;  %7874 = vmatpush.msrb.mxu2 %v9204_v45  ;;  %vm18030_vm14 = vmmov %vm18028_vm2  ;;  %v18039_v50 = vld [vmem:[#allocation77_spill] sm:$0xff] }
 0x76b   : > { %v6195_v9 = vsel %vm6194_vm7, %v16540_v0, %v6193_v13  ;;  %v5823_v36 = vsel %vm18030_vm14, %v5695_v23, %v8613_v34  ;;  %v6264_v19 = vand.u32 2147483647, %v16418_v20  ;;  %v6266_v31 = vand.u32 2147483648, %v16418_v20  ;;  %7814 = vmatpush.msrb.mxu0 %v9205_v32  ;;  %7898 = vmatpush.msrb.mxu3 %v9206_v8  ;;  %vm16696_vm13 = vmor %vm6260_vm15, %vm6261_vm5  ;;  %v9217_v55 = vld [vmem:[%s9526_s21 + $0xd8] sm:$0xff]  ;;  %v9223_v0 = vld [vmem:[%s9526_s21 + $0x70] sm:$0xff] }
 0x76c   : > { %v6198_v38 = vsel %vm6196_vm10, %v6197_v56, %v6195_v9  ;;  %v6258_v3 = vmul.f32 %v16494_v40, %v6257_v11  ;;  %v8624_v62 = vunpack.i.h.bf16 %v8622_v24  ;;  %v8623_v57 = vunpack.i.l.bf16 %v8622_v24  ;;  %7875 = vmatpush.msrb.mxu2 %v9207_v30  ;;  %v9218_v24 = vld [vmem:[%s9366_s25 + $0x28] sm:$0x3]  ;;  %vm18042_vm0 = vmmov %vm18023_vm1  ;;  %v9220_v32 = vld [vmem:[%s9526_s21 + $0x78] sm:$0xff] }
 0x76d   : > { %v16690_v2 = vmax.f32 %v6198_v38, 1e-12  ;;  %vm16700_vm7 = vcmp.eq.f32.partialorder %v6264_v19, 8.507059e+37  ;;  %v6267_v56 = vor.u32 1.1754944e-38, %v6266_v31  ;;  %v6271_v6 = vmul.f32 %v16595_v16, %v16485_v61  ;;  %7815 = vmatpush.msrb.mxu0 %v9208_v18  ;;  %7899 = vmatpush.msrb.mxu3 %v9209_v37  ;;  %v9219_v19 = vld [vmem:[%s9526_s21 + $0xd0] sm:$0xff]  ;;  %vm18043_vm15 = vmmov %vm18042_vm0 }
 0x76e   : > { %v6259_v29 = vadd.f32 %v16494_v40, %v6258_v3  ;;  %v5832_v20 = vsel %vm5829_vm8, %v5823_v36, %v8623_v57  ;;  %v5833_v14 = vsel %vm5829_vm8, %v5824_v26, %v8624_v62  ;;  %vm6275_vm11 = vweird.f32 %v16485_v61  ;;  %7876 = vmatpush.msrb.mxu2 %v9210_v21  ;;  %v9221_v62 = vld [vmem:[%s9526_s21 + $0xc8] sm:$0xff] }
 0x76f   : > { %9119 = vrcp.f32 %v16690_v2  ;;  %8455 = vmatmul.msk.f32.vlgmr.msra.gmra.mxu2 %vm18035_vm12, %v16634_v53  ;;  %v5841_v5 = vsel %vm5838_vm3, %v5832_v20, %v8633_v33  ;;  %v5842_v48 = vsel %vm5838_vm3, %v5833_v14, %v8634_v22  ;;  %v6272_v63 = vsub.f32 1.0, %v6271_v6  ;;  %7816 = vmatpush.msrb.mxu0 %v9211_v60  ;;  %v9212_v53 = vld [vmem:[%s9526_s21 + $0xe8] sm:$0xff] }
 0x770   : > { %v6263_v7 = vsel %vm16696_vm13, %v16494_v40, %v6259_v29  ;;  %v5849_v46 = vpack.c.bf16 %v5841_v5, %v5841_v5  ;;  %v5850_v51 = vpack.c.bf16 %v5842_v48, %v5842_v48  ;;  %vm6276_vm8 = vweird.f32 %v16595_v16  ;;  %7900 = vmatpush.msrb.mxu3 %v9212_v53  ;;  %v9214_v40 = vld [vmem:[%s9366_s25] sm:$0xff]  ;;  %v9222_v57 = vld [vmem:[%s9366_s25 + $0x8] sm:$0x3] }
 0x771   : > { %v6268_v1 = vsel %vm16700_vm7, %v6267_v56, %v6263_v7  ;;  %v6273_v22 = vmul.f32 %v16595_v16, %v6272_v63  ;;  %v6279_v33 = vand.u32 2147483647, %v16485_v61  ;;  %v6281_v58 = vand.u32 2147483648, %v16485_v61  ;;  %7817 = vmatpush.msrb.mxu0 %v9213_v54  ;;  %vm16737_vm3 = vmor %vm6275_vm11, %vm6276_vm8  ;;  %v9216_v61 = vld [vmem:[%s9526_s21] sm:$0xff]  ;;  %v9225_v48 = vld [vmem:[%s9526_s21 + $0x68] sm:$0xff] }
 0x772   : > { %v6269_v12 = vmul.f32 %v9214_v40, %v6268_v1  ;;  %v5935_v49 = vunpack.c.l.b16 %v5849_v46  ;;  %v5936_v10 = vunpack.c.l.b16 %v5850_v51  ;;  %v6346_v44 = vmul.f32 %v18039_v50, %v18038_v15  ;;  %7901 = vmatpush.msrb.mxu3 %v9215_v17  ;;  %v9224_v29 = vld [vmem:[%s9526_s21 + $0xc0] sm:$0xff]  ;;  %vm18048_vm11 = vmmov %vm18042_vm0  ;;  %v9226_v63 = vld [vmem:[%s9366_s25 + $0x30] sm:$0xff] }
 0x773   : > { %v6274_v52 = vadd.f32 %v16595_v16, %v6273_v22  ;;  %vm16745_vm10 = vcmp.eq.f32.partialorder %v6279_v33, 8.507059e+37  ;;  %v6282_v34 = vor.u32 1.1754944e-38, %v6281_v58  ;;  %vm6350_vm9 = vweird.f32 %v18038_v15  ;;  %7818 = vmatpush.msrb.mxu0 %v9216_v61  ;;  %v9227_v33 = vld [vmem:[%s9526_s21 + $0x60] sm:$0xff]  ;;  %v9228_v40 = vld [vmem:[%s9526_s21 + $0x58] sm:$0xff] }
 0x774   : > { %8435 = vmatmul.msk.f32.vlgmr.msra.gmra.mxu0 %vm18023_vm1, %v6269_v12  ;;  %v5937_v25 = vpack.c.b16 %v5936_v10, %v5935_v49  ;;  %v6347_v42 = vsub.f32 1.0, %v6346_v44  ;;  %vm6351_vm4 = vweird.f32 %v18039_v50  ;;  %v6354_v13 = vand.u32 2147483647, %v18038_v15  ;;  %7902 = vmatpush.msrb.mxu3 %v9217_v55  ;;  %v9231_v44 = vld [vmem:[%s9366_s25 + $0x38] sm:$0x3] }
 0x775   : > { %v16755_v23 = vpop.eup %9119  ;;  %v6344_v4 = vmul.f32 %v9218_v24, %v16670_v27  ;;  %v6278_v26 = vsel %vm16737_vm3, %v16595_v16, %v6274_v52  ;;  %v6356_v11 = vand.u32 2147483648, %v18038_v15  ;;  %v6361_v45 = vmul.f32 %v16255_v41, %v16115_v43  ;;  %vm16775_vm2 = vmor %vm6350_vm9, %vm6351_vm4  ;;  %v9232_v52 = vld [vmem:[%s9366_s25 + $0x10] sm:$0xff] }
 0x776   : > { %v6283_v9 = vsel %vm16745_vm10, %v6282_v34, %v6278_v26  ;;  %v6348_v36 = vmul.f32 %v18039_v50, %v6347_v42  ;;  %8392 = vmatmul.msk.bf16.vlgmr.msrb.gmra.mxu1 %vm18042_vm0, %v5937_v25  ;;  %7903 = vmatpush.msrb.mxu3 %v9219_v19  ;;  %vm6365_vm6 = vweird.f32 %v16115_v43  ;;  %vm16782_vm5 = vcmp.eq.f32.partialorder %v6354_v13, 8.507059e+37  ;;  %vm18053_vm3 = vmmov %vm18042_vm0  ;;  %v9233_v34 = vld [vmem:[%s9526_s21 + $0x40] sm:$0xff]  ;;  %v9234_v13 = vld [vmem:[%s9366_s25 + $0x18] sm:$0x3] }
 0x777   : > { %8456 = vmatmul.msk.f32.gmra.mxu2 %vm18043_vm15, %v6344_v4  ;;  %v6357_v27 = vor.u32 1.1754944e-38, %v6356_v11  ;;  %v6362_v31 = vsub.f32 1.0, %v6361_v45  ;;  %7840 = vmatpush.msrb.mxu1 %v9220_v32  ;;  %vm6366_vm14 = vweird.f32 %v16255_v41  ;;  %v6286_v3 = vmul.f32 %v16428_v35, %v16371_v39  ;;  %vm18054_vm15 = vmmov %vm18053_vm3 }
 0x778   : > { %v6349_v8 = vadd.f32 %v18039_v50, %v6348_v36  ;;  %7904 = vmatpush.msrb.mxu3 %v9221_v62  ;;  %v6284_v30 = vmul.f32 %v9222_v57, %v6283_v9  ;;  %vm6290_vm13 = vweird.f32 %v16371_v39  ;;  %vm6291_vm7 = vweird.f32 %v16428_v35  ;;  %vm16814_vm12 = vmor %vm6365_vm6, %vm6366_vm14 }
 0x779   : > { %v6363_v59 = vmul.f32 %v16255_v41, %v6362_v31  ;;  %7841 = vmatpush.msrb.mxu1 %v9223_v0  ;;  %v6287_v6 = vsub.f32 1.0, %v6286_v3  ;;  %v6294_v18 = vand.u32 2147483647, %v16371_v39  ;;  %v6296_v37 = vand.u32 2147483648, %v16371_v39  ;;  %vm16824_vm8 = vmor %vm6290_vm13, %vm6291_vm7 }
 0x77a   : > { %v6353_v56 = vsel %vm16775_vm2, %v18039_v50, %v6349_v8  ;;  %7905 = vmatpush.msrb.mxu3 %v9224_v29  ;;  %v6371_v21 = vand.u32 2147483648, %v16115_v43  ;;  %v6301_v5 = vmul.f32 %v16755_v23, %v16690_v2  ;;  %v6369_v46 = vand.u32 2147483647, %v16115_v43  ;;  %v9230_v50 = vld [vmem:[%s9526_s21 + $0x48] sm:$0xff]  ;;  %vm18055_vm2 = vmmov %vm18053_vm3 }
 0x77b   : > { %v6358_v20 = vsel %vm16782_vm5, %v6357_v27, %v6353_v56  ;;  %v6364_v14 = vadd.f32 %v16255_v41, %v6363_v59  ;;  %7842 = vmatpush.msrb.mxu1 %v9225_v48  ;;  %v6288_v51 = vmul.f32 %v16428_v35, %v6287_v6  ;;  %v6297_v1 = vor.u32 1.1754944e-38, %v6296_v37  ;;  %vm18056_vm5 = vmmov %vm18055_vm2 }
 0x77c   : > { %8436 = vmatmul.msk.f32.gmra.mxu0 %vm18048_vm11, %v6284_v30  ;;  %v6359_v60 = vmul.f32 %v9226_v63, %v6358_v20  ;;  %v6302_v22 = vsub.f32 1.0, %v6301_v5  ;;  %vm6295_vm10 = vcmp.eq.f32.partialorder %v6294_v18, 8.507059e+37  ;;  %v6372_v39 = vor.u32 1.1754944e-38, %v6371_v21  ;;  %vm18057_vm14 = vmmov %vm18055_vm2 }
 0x77d   : > { %7843 = vmatpush.msrb.mxu1 %v9227_v33  ;;  %v6368_v43 = vsel %vm16814_vm12, %v16255_v41, %v6364_v14  ;;  %v6289_v58 = vadd.f32 %v16428_v35, %v6288_v51  ;;  %vm6370_vm9 = vcmp.eq.f32.partialorder %v6369_v46, 8.507059e+37  ;;  %v9229_v41 = vld [vmem:[%s9526_s21 + $0x50] sm:$0xff]  ;;  %vm6306_vm1 = vweird.f32 %v16755_v23  ;;  %vm18058_vm13 = vmmov %vm18055_vm2 }
 0x77e   : > { %8465 = vmatmul.msk.f32.vlgmr.msra.gmra.mxu3 %vm18053_vm3, %v6359_v60  ;;  %v6303_v54 = vmul.f32 %v16755_v23, %v6302_v22  ;;  %v6373_v49 = vsel %vm6370_vm9, %v6372_v39, %v6368_v43  ;;  %v6311_v15 = vand.u32 2147483648, %v16690_v2  ;;  %vm6305_vm4 = vweird.f32 %v16690_v2  ;;  %vm18059_vm7 = vmmov %vm18055_vm2 }
 0x77f   : > { %7844 = vmatpush.msrb.mxu1 %v9228_v40  ;;  %v6293_v12 = vsel %vm16824_vm8, %v16428_v35, %v6289_v58  ;;  %v6374_v17 = vmul.f32 %v9231_v44, %v6373_v49  ;;  %v6309_v35 = vand.u32 2147483647, %v16690_v2  ;;  %vm6307_vm0 = vmor %vm6305_vm4, %vm6306_vm1  ;;  %vm18060_vm11 = vcmask 517120  }
 0x780   : > { %v6298_v10 = vsel %vm6295_vm10, %v6297_v1, %v6293_v12  ;;  %v6304_v47 = vadd.f32 %v16755_v23, %v6303_v54  ;;  %v6312_v25 = vor.u32 1.1754944e-38, %v6311_v15  ;;  %vm18061_vm12 = vmmov %vm18055_vm2  ;;  %v7635_v18 = vlaneseq }
 0x781   : > { %7845 = vmatpush.msrb.mxu1 %v9229_v41  ;;  %v6299_v28 = vmul.f32 %v9232_v52, %v6298_v10  ;;  %vm6310_vm6 = vcmp.eq.f32.partialorder %v6309_v35, 8.507059e+37  ;;  %vm18062_vm8 = vmmov %vm18060_vm11 }
 0x782   : > { %v6308_v61 = vsel %vm6307_vm0, %v16755_v23, %v6304_v47  ;;  %vm18063_vm3 = vmmov %vm18062_vm8  ;;  %v16878_v37 = vand.u32 127, %v7635_v18 }
 0x783   : > { %7846 = vmatpush.msrb.mxu1 %v9230_v50  ;;  %v6313_v42 = vsel %vm6310_vm6, %v6312_v25, %v6308_v61  ;;  %vm18064_vm10 = vmmov %vm18063_vm3 }
 0x784   : > { %v6314_v55 = vmul.f32 %v9234_v13, %v6313_v42  ;;  %vm18065_vm1 = vmmov %vm18055_vm2 }
 0x785   : > { %7847 = vmatpush.msrb.mxu1 %v9233_v34  ;;  %vm18066_vm0 = vmmov %vm18065_vm1 }
 0x786   : > { %8466 = vmatmul.msk.f32.gmra.mxu3 %vm18054_vm15, %v6374_v17  ;;  %8445 = vmatmul.msk.f32.vlgmr.msra.gmra.mxu1 %vm18055_vm2, %v6299_v28  ;;  %vm18067_vm2 = vmmov %vm18063_vm3 }
 0x78e   : > { %8446 = vmatmul.msk.f32.gmra.mxu1 %vm18056_vm5, %v6314_v55 }
 0x7e1   : > { %v16854_v24 = vpop.f32.mrf.mxu0  ;;  %v16856_v4 = vpop.f32.mrf.mxu2 }
 0x7e9   : > { %v16858_v2 = vpop.f32.mrf.mxu0  ;;  %v16863_v9 = vpop.f32.mrf.mxu2 }
 0x7ed   : > { %v16860_v26 = vpop.f32.mrf.mxu3 }
 0x7f1   : > { %v7446_v11 = vpop.f32.mrf.mxu0 }
 0x7f2   : > { %v7611_v45 = vsel %vm18057_vm14, %v7446_v11, -inf  ;;  %v7552_v16 = vpop.f32.mrf.mxu2  ;;  %vm18068_vm14 = vmmov %vm18066_vm0 }
 0x7f3   : > { %7612 = vmax.xlane.f32.xlu0 %v7611_v45  ;;  %v16865_v23 = vpop.f32.mrf.mxu1  ;;  %v7623_v62 = vsel %vm18061_vm12, %v7552_v16, -inf  ;;  %vm18070_vm12 = vmmov %vm18067_vm2 }
 0x7f5   : > { %v16867_v36 = vpop.f32.mrf.mxu3 }
 0x7f9   : > { %v7449_v57 = vpop.f32.mrf.mxu0 }
 0x7fa   : > { %v7555_v38 = vpop.f32.mrf.mxu2  ;;  %v7614_v59 = vsel %vm18062_vm8, %v7449_v57, -inf  ;;  %vm18071_vm8 = vmmov %vm18067_vm2 }
 0x7fb   : > { %v16869_v19 = vpop.f32.mrf.mxu1  ;;  %v7626_v3 = vsel %vm18060_vm11, %v7555_v38, -inf }
 0x801   : > { %v7605_v27 = vpop.f32.mrf.mxu3 }
 0x802   : > { %v7629_v31 = vsel %vm18058_vm13, %v7605_v27, -inf  ;;  %vm18069_vm13 = vmmov %vm18066_vm0 }
 0x803   : > { %7630 = vmax.xlane.f32.xlu2 %v7629_v31  ;;  %v7499_v32 = vpop.f32.mrf.mxu1 }
 0x804   : > { %v7617_v8 = vsel %vm18059_vm7, %v7499_v32, -inf }
 0x805   : > { %7618 = vmax.xlane.f32.xlu1 %v7617_v8 }
 0x809   : > { %v7608_v30 = vpop.f32.mrf.mxu3 }
 0x80a   : > { %v7632_v0 = vsel %vm18063_vm3, %v7608_v30, -inf }
 0x80b   : > { %7627 = vmax.xlane.f32.xlu2 %v7626_v3  ;;  %v7502_v56 = vpop.f32.mrf.mxu1 }
 0x80c   : > { %v7620_v6 = vsel %vm18064_vm10, %v7502_v56, -inf  ;;  %vm18072_vm10 = vmmov %vm18067_vm2 }
 0x80d   : > { %7624 = vmax.xlane.f32.xlu1 %v7623_v62 }
 0x813   : > { %7615 = vmax.xlane.f32.xlu2 %v7614_v59 }
 0x815   : > { %7633 = vmax.xlane.f32.xlu1 %v7632_v0 }
 0x81d   : > { %7621 = vmax.xlane.f32.xlu1 %v7620_v6 }
 0x866   : > { %v7613_v29 = vpop.xlane.xlu0 %7612 }
 0x867   : > { %vm7637_vm9 = vcmp.eq.f32.partialorder %v7446_v11, %v7613_v29 }
 0x868   : > { %v7645_v20 = vsel %vm7637_vm9, %v16878_v37, 64 }
 0x869   : > { %v7653_v14 = vsel %vm18065_vm1, %v7645_v20, 2147483647 }
 0x86a   : > { %v7655_v21 = vshra.s32 %v7653_v14, 16 }
 0x86c   : > { %v7657_v5 = vcvt.s32.f32 %v7655_v21 }
 0x86e   : > { %7658 = vmin.xlane.f32.xlu1 %v7657_v5 }
 0x876   : > { %v7631_v48 = vpop.xlane.xlu2 %7630 }
 0x877   : > { %vm7643_vm4 = vcmp.eq.f32.partialorder %v7605_v27, %v7631_v48 }
 0x878   : > { %v7651_v63 = vsel %vm7643_vm4, %v16878_v37, 64  ;;  %v7619_v60 = vpop.xlane.xlu1 %7618 }
 0x879   : > { %v7743_v7 = vsel %vm18066_vm0, %v7651_v63, 2147483647  ;;  %vm7639_vm6 = vcmp.eq.f32.partialorder %v7499_v32, %v7619_v60 }
 0x87a   : > { %v7745_v46 = vshra.s32 %v7743_v7, 16  ;;  %v7647_v54 = vsel %vm7639_vm6, %v16878_v37, 64  ;;  %v7744_v8 = vand.u32 65535, %v7743_v7 }
 0x87b   : > { %v7683_v41 = vsel %vm18069_vm13, %v7647_v54, 2147483647  ;;  %v522_v54 = vld [vmem:[%s436_s26 + $0x18] sm:$0x3] }
 0x87c   : > { %v7747_v51 = vcvt.s32.f32 %v7745_v46  ;;  %v7685_v15 = vshra.s32 %v7683_v41, 16  ;;  %v7746_v3 = vcvt.s32.f32 %v7744_v8  ;;  %v7684_v20 = vand.u32 65535, %v7683_v41  ;;  %v524_v41 = vld [vmem:[%s436_s26 + $0x28] sm:$0x3] }
 0x87e   : > { %7748 = vmin.xlane.f32.xlu0 %v7747_v51  ;;  %v7628_v53 = vpop.xlane.xlu2 %7627  ;;  %v7687_v28 = vcvt.s32.f32 %v7685_v15  ;;  %v7686_v48 = vcvt.s32.f32 %v7684_v20 }
 0x87f   : > { %vm7642_vm15 = vcmp.eq.f32.partialorder %v7555_v38, %v7628_v53 }
 0x880   : > { %v7650_v1 = vsel %vm7642_vm15, %v16878_v37, 64  ;;  %v7625_v22 = vpop.xlane.xlu1 %7624 }
 0x881   : > { %v7728_v33 = vsel %vm18067_vm2, %v7650_v1, 2147483647  ;;  %vm7641_vm5 = vcmp.eq.f32.partialorder %v7552_v16, %v7625_v22  ;;  %v7654_v16 = vand.u32 65535, %v7653_v14 }
 0x882   : > { %v7730_v43 = vshra.s32 %v7728_v33, 16  ;;  %v7649_v58 = vsel %vm7641_vm5, %v16878_v37, 64 }
 0x883   : > { %v7713_v39 = vsel %vm18068_vm14, %v7649_v58, 2147483647  ;;  %v7656_v31 = vcvt.s32.f32 %v7654_v16 }
 0x884   : > { %v7732_v40 = vcvt.s32.f32 %v7730_v43  ;;  %v7715_v12 = vshra.s32 %v7713_v39, 16 }
 0x886   : > { %7733 = vmin.xlane.f32.xlu0 %v7732_v40  ;;  %v7616_v49 = vpop.xlane.xlu2 %7615  ;;  %v7717_v10 = vcvt.s32.f32 %v7715_v12  ;;  %v520_v12 = vld [vmem:[%s436_s26 + $0x8] sm:$0x3] }
 0x887   : > { %vm7638_vm7 = vcmp.eq.f32.partialorder %v7449_v57, %v7616_v49  ;;  %v7729_v57 = vand.u32 65535, %v7728_v33  ;;  %v523_v49 = vld [vmem:[%s436_s26 + $0x20] sm:$0xff] }
 0x888   : > { %7718 = vmin.xlane.f32.xlu2 %v7717_v10  ;;  %v7634_v47 = vpop.xlane.xlu1 %7633  ;;  %v7646_v17 = vsel %vm7638_vm7, %v16878_v37, 64 }
 0x889   : > { %vm7644_vm11 = vcmp.eq.f32.partialorder %v7608_v30, %v7634_v47  ;;  %v7668_v34 = vsel %vm18071_vm8, %v7646_v17, 2147483647  ;;  %v7714_v30 = vand.u32 65535, %v7713_v39  ;;  %v7731_v0 = vcvt.s32.f32 %v7729_v57  ;;  %v519_v39 = vld [vmem:[%s436_s26] sm:$0xff]  ;;  %v526_v47 = vld [vmem:[%s436_s26 + $0x38] sm:$0x3] }
 0x88a   : > { %v7652_v50 = vsel %vm7644_vm11, %v16878_v37, 64  ;;  %v7670_v25 = vshra.s32 %v7668_v34, 16  ;;  %v7669_v46 = vand.u32 65535, %v7668_v34  ;;  %vm18073_vm11 = vmmov %vm18069_vm13 }
 0x88b   : > { %v7758_v44 = vsel %vm18070_vm12, %v7652_v50, 2147483647  ;;  %v7716_v18 = vcvt.s32.f32 %v7714_v30  ;;  %vm18074_vm8 = vmmov %vm18073_vm11 }
 0x88c   : > { %v7760_v52 = vshra.s32 %v7758_v44, 16  ;;  %v7672_v11 = vcvt.s32.f32 %v7670_v25  ;;  %v7759_v14 = vand.u32 65535, %v7758_v44  ;;  %v7671_v22 = vcvt.s32.f32 %v7669_v46 }
 0x88e   : > { %v7762_v35 = vcvt.s32.f32 %v7760_v52  ;;  %v7761_v63 = vcvt.s32.f32 %v7759_v14 }
 0x890   : > { %7688 = vmin.xlane.f32.xlu2 %v7687_v28  ;;  %7763 = vmin.xlane.f32.xlu1 %v7762_v35  ;;  %v7622_v61 = vpop.xlane.xlu1 %7621 }
 0x891   : > { %vm7640_vm3 = vcmp.eq.f32.partialorder %v7502_v56, %v7622_v61 }
 0x892   : > { %v7648_v42 = vsel %vm7640_vm3, %v16878_v37, 64 }
 0x893   : > { %v7698_v13 = vsel %vm18072_vm10, %v7648_v42, 2147483647 }
 0x894   : > { %v7700_v55 = vshra.s32 %v7698_v13, 16 }
 0x896   : > { %v7702_v45 = vcvt.s32.f32 %v7700_v55 }
 0x898   : > { %7673 = vmin.xlane.f32.xlu2 %v7672_v11  ;;  %7703 = vmin.xlane.f32.xlu0 %v7702_v45 }
 0x8e1   : > { %v16896_v27 = vpop.xlane.xlu1 %7658 }
 0x8e2   : > { %vm7660_vm9 = vcmp.eq.f32.partialorder %v7657_v5, %v16896_v27  ;;  %v7665_v15 = vcvt.f32.s32 %v16896_v27 }
 0x8e3   : > { %v7661_v32 = vsel %vm7660_vm9, %v7656_v31, inf }
 0x8e4   : > { %7662 = vmin.xlane.f32.xlu0 %v7661_v32  ;;  %v7666_v44 = vshll.u32 %v7665_v15, 16 }
 0x8f1   : > { %v16899_v38 = vpop.xlane.xlu0 %7748 }
 0x8f2   : > { %vm7750_vm1 = vcmp.eq.f32.partialorder %v7747_v51, %v16899_v38  ;;  %v7699_v51 = vand.u32 65535, %v7698_v13  ;;  %v7755_v34 = vcvt.f32.s32 %v16899_v38 }
 0x8f3   : > { %v7751_v62 = vsel %vm7750_vm1, %v7746_v3, inf  ;;  %vm18075_vm1 = vmmov %vm18074_vm8 }
 0x8f4   : > { %7752 = vmin.xlane.f32.xlu2 %v7751_v62  ;;  %v7701_v33 = vcvt.s32.f32 %v7699_v51  ;;  %v7756_v25 = vshll.u32 %v7755_v34, 16 }
 0x8f9   : > { %v16902_v59 = vpop.xlane.xlu0 %7733 }
 0x8fa   : > { %vm7735_vm4 = vcmp.eq.f32.partialorder %v7732_v40, %v16902_v59  ;;  %v521_v40 = vld [vmem:[%s436_s26 + $0x10] sm:$0xff]  ;;  %v7740_v27 = vcvt.f32.s32 %v16902_v59 }
 0x8fb   : > { %v7736_v56 = vsel %vm7735_vm4, %v7731_v0, inf  ;;  %v16905_v6 = vpop.xlane.xlu2 %7718  ;;  %vm18076_vm4 = vmmov %vm18075_vm1 }
 0x8fc   : > { %7737 = vmin.xlane.f32.xlu2 %v7736_v56  ;;  %vm7720_vm0 = vcmp.eq.f32.partialorder %v7717_v10, %v16905_v6  ;;  %v525_v10 = vld [vmem:[%s436_s26 + $0x30] sm:$0xff]  ;;  %v7741_v38 = vshll.u32 %v7740_v27, 16 }
 0x8fd   : > { %v7721_v29 = vsel %vm7720_vm0, %v7716_v18, inf  ;;  %vm18077_vm0 = vmmov %vm18075_vm1 }
 0x8fe   : > { %7722 = vmin.xlane.f32.xlu1 %v7721_v29 }
 0x903   : > { %v16908_v21 = vpop.xlane.xlu2 %7688  ;;  %v16910_v5 = vpop.xlane.xlu1 %7763 }
 0x904   : > { %vm7690_vm15 = vcmp.eq.f32.partialorder %v7687_v28, %v16908_v21  ;;  %vm7765_vm2 = vcmp.eq.f32.partialorder %v7762_v35, %v16910_v5  ;;  %v9253_v28 = vmov 0.0   ;;  %v7695_v62 = vcvt.f32.s32 %v16908_v21 }
 0x905   : > { %v7691_v60 = vsel %vm7690_vm15, %v7686_v48, inf  ;;  %v7766_v7 = vsel %vm7765_vm2, %v7761_v63, inf  ;;  %v7770_v57 = vcvt.f32.s32 %v16910_v5 }
 0x906   : > { %7692 = vmin.xlane.f32.xlu1 %v7691_v60  ;;  %7767 = vmin.xlane.f32.xlu0 %v7766_v7  ;;  %v7696_v18 = vshll.u32 %v7695_v62, 16 }
 0x907   : > { %v7771_v29 = vshll.u32 %v7770_v57, 16 }
 0x90b   : > { %v16914_v53 = vpop.xlane.xlu2 %7673  ;;  %v16916_v1 = vpop.xlane.xlu0 %7703 }
 0x90c   : > { %vm7675_vm6 = vcmp.eq.f32.partialorder %v7672_v11, %v16914_v53  ;;  %vm7705_vm5 = vcmp.eq.f32.partialorder %v7702_v45, %v16916_v1  ;;  %v7725_v11 = vcvt.f32.s32 %v16905_v6  ;;  %v7680_v21 = vcvt.f32.s32 %v16914_v53 }
 0x90d   : > { %v7676_v43 = vsel %vm7675_vm6, %v7671_v22, inf  ;;  %v7706_v58 = vsel %vm7705_vm5, %v7701_v33, inf  ;;  %v7710_v5 = vcvt.f32.s32 %v16916_v1  ;;  %vm18078_vm6 = vmmov %vm18077_vm0 }
 0x90e   : > { %7677 = vmin.xlane.f32.xlu1 %v7676_v43  ;;  %7707 = vmin.xlane.f32.xlu2 %v7706_v58  ;;  %v7726_v31 = vshll.u32 %v7725_v11, 16  ;;  %v7681_v22 = vshll.u32 %v7680_v21, 16  ;;  %vm18079_vm5 = vmmov %vm18077_vm0 }
 0x90f   : > { %v7711_v33 = vshll.u32 %v7710_v5, 16 }
 0x91a   : > { %6073 = vperm.xlu0 %8574, %v519_v39  }
 0x922   : > { %6088 = vperm.xlu0 %8574, %v522_v54  }
 0x926   : > { %6083 = vperm.xlu2 %8636, %v521_v40  }
 0x927   : > { %6078 = vperm.xlu1 %8635, %v520_v12  }
 0x92a   : > { %6093 = vperm.xlu0 %8574, %v523_v49  }
 0x92e   : > { %6103 = vperm.xlu2 %8636, %v525_v10  }
 0x92f   : > { %6098 = vperm.xlu1 %8635, %v524_v41  }
 0x932   : > { %6108 = vperm.xlu0 %8574, %v526_v47  }
 0x957   : > { %v7663_v50 = vpop.xlane.xlu0 %7662 }
 0x958   : > { %v7664_v17 = vcvt.f32.s32 %v7663_v50 }
 0x95a   : > { %v7667_v52 = vadd.s32 %v7666_v44, %v7664_v17 }
 0x95c   : > { %vm7773_vm14 = vcmp.eq.s32.totalorder %v16878_v37, %v7667_v52 }
 0x95d   : > { %v8467_v35 = vsel %vm7773_vm14, 1.0, %v9253_v28  ;;  %vm18080_vm14 = vmmov %vm18077_vm0 }
 0x95e   : > { %8475 = vmatmul.msk.f32.vlgmr.msrb.gmra.mxu0 %vm18069_vm13, %v8467_v35  ;;  %vm18081_vm13 = vmmov %vm18077_vm0 }
 0x967   : > { %v7753_v61 = vpop.xlane.xlu2 %7752 }
 0x968   : > { %v7754_v42 = vcvt.f32.s32 %v7753_v61 }
 0x96a   : > { %v7757_v13 = vadd.s32 %v7756_v25, %v7754_v42 }
 0x96c   : > { %vm7779_vm7 = vcmp.eq.s32.totalorder %v16878_v37, %v7757_v13 }
 0x96d   : > { %v8473_v55 = vsel %vm7779_vm7, 1.0, %v9253_v28  ;;  %vm18082_vm7 = vmmov %vm18077_vm0 }
 0x96e   : > { %8481 = vmatmul.msk.f32.vlgmr.msrb.gmra.mxu3 %vm18073_vm11, %v8473_v55  ;;  %vm18083_vm11 = vmmov %vm18077_vm0 }
 0x96f   : > { %v7738_v45 = vpop.xlane.xlu2 %7737 }
 0x970   : > { %v7739_v8 = vcvt.f32.s32 %v7738_v45 }
 0x971   : > { %v7723_v16 = vpop.xlane.xlu1 %7722 }
 0x972   : > { %v7724_v32 = vcvt.f32.s32 %v7723_v16  ;;  %v7742_v0 = vadd.s32 %v7741_v38, %v7739_v8 }
 0x974   : > { %v7727_v3 = vadd.s32 %v7726_v31, %v7724_v32  ;;  %vm7778_vm3 = vcmp.eq.s32.totalorder %v16878_v37, %v7742_v0 }
 0x975   : > { %v8472_v60 = vsel %vm7778_vm3, 1.0, %v9253_v28  ;;  %vm18086_vm3 = vmmov %vm18077_vm0 }
 0x976   : > { %vm7777_vm12 = vcmp.eq.s32.totalorder %v16878_v37, %v7727_v3 }
 0x977   : > { %v8471_v30 = vsel %vm7777_vm12, 1.0, %v9253_v28  ;;  %vm18084_vm12 = vmmov %vm18077_vm0 }
 0x978   : > { %8479 = vmatmul.msk.f32.vlgmr.msrb.gmra.mxu2 %vm18074_vm8, %v8471_v30  ;;  %vm18085_vm8 = vmmov %vm18077_vm0 }
 0x979   : > { %v7768_v56 = vpop.xlane.xlu0 %7767  ;;  %v7693_v6 = vpop.xlane.xlu1 %7692 }
 0x97a   : > { %v7769_v59 = vcvt.f32.s32 %v7768_v56  ;;  %v7694_v20 = vcvt.f32.s32 %v7693_v6 }
 0x97c   : > { %v7772_v14 = vadd.s32 %v7771_v29, %v7769_v59  ;;  %v7697_v48 = vadd.s32 %v7696_v18, %v7694_v20 }
 0x97e   : > { %vm7775_vm10 = vcmp.eq.s32.totalorder %v16878_v37, %v7697_v48  ;;  %vm7780_vm9 = vcmp.eq.s32.totalorder %v16878_v37, %v7772_v14 }
 0x97f   : > { %v8469_v63 = vsel %vm7775_vm10, 1.0, %v9253_v28  ;;  %v8474_v7 = vsel %vm7780_vm9, 1.0, %v9253_v28  ;;  %vm18087_vm10 = vmmov %vm18077_vm0 }
 0x980   : > { %8477 = vmatmul.msk.f32.vlgmr.msrb.gmra.mxu1 %vm18075_vm1, %v8469_v63  ;;  %8480 = vmatmul.msk.f32.gmra.mxu2 %vm18076_vm4, %v8472_v60 }
 0x981   : > { %8482 = vmatmul.msk.f32.gmra.mxu3 %vm18077_vm0, %v8474_v7  ;;  %v7708_v46 = vpop.xlane.xlu2 %7707  ;;  %v7678_v51 = vpop.xlane.xlu1 %7677 }
 0x982   : > { %v7709_v53 = vcvt.f32.s32 %v7708_v46  ;;  %v7679_v43 = vcvt.f32.s32 %v7678_v51 }
 0x984   : > { %v7712_v1 = vadd.s32 %v7711_v33, %v7709_v53  ;;  %v7682_v58 = vadd.s32 %v7681_v22, %v7679_v43 }
 0x986   : > { %vm7774_vm15 = vcmp.eq.s32.totalorder %v16878_v37, %v7682_v58  ;;  %vm7776_vm2 = vcmp.eq.s32.totalorder %v16878_v37, %v7712_v1 }
 0x987   : > { %v8468_v39 = vsel %vm7774_vm15, 1.0, %v9253_v28  ;;  %v8470_v54 = vsel %vm7776_vm2, 1.0, %v9253_v28 }
 0x988   : > { %8476 = vmatmul.msk.f32.gmra.mxu0 %vm18078_vm6, %v8468_v39  ;;  %8478 = vmatmul.msk.f32.gmra.mxu1 %vm18079_vm5, %v8470_v54 }
 0x989   : > { %v6084_v47 = vpop.permute.xlu2 %6083 }
 0x98a   : > { %v6113_v57 = vmul.f32 %v6084_v47, %v16865_v23 }
 0x98c   : > { %v6074_v40 = vpop.permute.xlu0 %6073 }
 0x98d   : > { %v6111_v31 = vmul.f32 %v6074_v40, %v16854_v24 }
 0x991   : > { %v6104_v13 = vpop.permute.xlu2 %6103 }
 0x992   : > { %v6117_v21 = vmul.f32 %v6104_v13, %v16860_v26 }
 0x994   : > { %v6089_v44 = vpop.permute.xlu0 %6088 }
 0x999   : > { %v6079_v41 = vpop.permute.xlu1 %6078 }
 0x99a   : > { %v6112_v3 = vmul.f32 %v6079_v41, %v16858_v2  ;;  %v6114_v2 = vmul.f32 %v6089_v44, %v16869_v19 }
 0x99c   : > { %v6094_v25 = vpop.permute.xlu0 %6093 }
 0x99d   : > { %v6115_v30 = vmul.f32 %v6094_v25, %v16856_v4 }
 0x9a1   : > { %v6099_v28 = vpop.permute.xlu1 %6098 }
 0x9a2   : > { %v6116_v18 = vmul.f32 %v6099_v28, %v16863_v9 }
 0x9a4   : > { %v6109_v16 = vpop.permute.xlu0 %6108 }
 0x9a5   : > { %v6118_v23 = vmul.f32 %v6109_v16, %v16867_v36 }
 0x9db   : > { %v7820_v12 = vpop.f32.mrf.mxu0 }
 0x9dc   : > { %v7913_v49 = vmul.f32 %v7820_v12, %v6074_v40 }
 0x9de   : > { %7929 = vrot.lane.b32.xlu1 %v7913_v49, %s9254_s29 }
 0x9f1   : > { %v7907_v42 = vpop.f32.mrf.mxu3 }
 0x9f2   : > { %v7919_v55 = vmul.f32 %v7907_v42, %v6104_v13 }
 0x9fb   : > { %v7878_v10 = vpop.f32.mrf.mxu2 }
 0x9fc   : > { %v7917_v11 = vmul.f32 %v7878_v10, %v6094_v25 }
 0x9fd   : > { %v7849_v15 = vpop.f32.mrf.mxu1 }
 0x9fe   : > { %v7915_v50 = vmul.f32 %v7849_v15, %v6084_v47 }
 0xa00   : > { %7933 = vrot.lane.b32.xlu0 %v7915_v50, %s9254_s29 }
 0xa03   : > { %v7881_v17 = vpop.f32.mrf.mxu2 }
 0xa04   : > { %v7918_v61 = vmul.f32 %v7881_v17, %v6099_v28  ;;  %v7910_v45 = vpop.f32.mrf.mxu3 }
 0xa05   : > { %v7823_v37 = vpop.f32.mrf.mxu0  ;;  %v7852_v52 = vpop.f32.mrf.mxu1  ;;  %v7920_v27 = vmul.f32 %v7910_v45, %v6109_v16 }
 0xa06   : > { %v7914_v35 = vmul.f32 %v7823_v37, %v6079_v41  ;;  %v7916_v34 = vmul.f32 %v7852_v52, %v6089_v44 }
 0xa08   : > { %7935 = vrot.lane.b32.xlu1 %v7916_v34, %s9254_s29  ;;  %7931 = vrot.lane.b32.xlu2 %v7914_v35, %s9254_s29 }
 0xa09   : > { %7939 = vrot.lane.b32.xlu0 %v7918_v61, %s9254_s29 }
 0xa10   : > { %7941 = vrot.lane.b32.xlu1 %v7919_v55, %s9254_s29  ;;  %7937 = vrot.lane.b32.xlu2 %v7917_v11, %s9254_s29 }
 0xa18   : > { %7943 = vrot.lane.b32.xlu2 %v7920_v27, %s9254_s29 }
 0xa50   : > { %v7930_v32 = vpop.permute.xlu1 %7929 }
 0xa51   : > { %v7953_v8 = vsel %vm18080_vm14, %v6111_v31, %v7930_v32 }
 0xa52   : > { %7961 = vst [vmem:[%s16953_s30] sm:$0xff] %v7953_v8 }
 0xa62   : > { %v7932_v38 = vpop.permute.xlu2 %7931 }
 0xa63   : > { %v7954_v62 = vsel %vm18081_vm13, %v6112_v3, %v7932_v38 }
 0xa64   : > { %7962 = vst [vmem:[%s16953_s30 + $0x8] sm:$0x3] %v7954_v62 }
 0xa6a   : > { %v7938_v24 = vpop.permute.xlu2 %7937 }
 0xa6b   : > { %v7957_v6 = vsel %vm18083_vm11, %v6115_v30, %v7938_v24 }
 0xa6c   : > { %7965 = vst [vmem:[%s16953_s30 + $0x20] sm:$0xff] %v7957_v6 }
 0xa72   : > { %v7934_v0 = vpop.permute.xlu0 %7933  ;;  %v7944_v29 = vpop.permute.xlu2 %7943 }
 0xa73   : > { %v7955_v56 = vsel %vm18082_vm7, %v6113_v57, %v7934_v0  ;;  %v7960_v48 = vsel %vm18086_vm3, %v6118_v23, %v7944_v29 }
 0xa74   : > { %7963 = vst [vmem:[%s16953_s30 + $0x10] sm:$0xff] %v7955_v56 }
 0xa75   : > { %7968 = vst [vmem:[%s16953_s30 + $0x38] sm:$0x3] %v7960_v48 }
 0xa7a   : > { %v7936_v59 = vpop.permute.xlu1 %7935 }
 0xa7b   : > { %v7940_v20 = vpop.permute.xlu0 %7939  ;;  %v7956_v4 = vsel %vm18084_vm12, %v6114_v2, %v7936_v59 }
 0xa7c   : > { %v7958_v14 = vsel %vm18085_vm8, %v6116_v18, %v7940_v20  ;;  %7964 = vst [vmem:[%s16953_s30 + $0x18] sm:$0x3] %v7956_v4 }
 0xa7d   : > { %7966 = vst [vmem:[%s16953_s30 + $0x28] sm:$0x3] %v7958_v14 }
 0xa82   : > { %v7942_v5 = vpop.permute.xlu1 %7941 }
 0xa83   : > { %v7959_v19 = vsel %vm18087_vm10, %v6117_v21, %v7942_v5 }
 0xa84   : > { %7967 = vst [vmem:[%s16953_s30 + $0x30] sm:$0xff] %v7959_v19 }
 0xa85 PF: > { %s22_s15 = sadd.s32 1, %s9241_s15  }
 0xa86   : > { %p19_p4 = scmp.ge.s32.totalorder %s22_s15, 4  }
 0xa88   :  { %21 = sbr.rel (!%p19_p4) target bundleno = 3 (0x3), region = 99 }

</bundles_post_ra>
